<compile_context>
chip_gen: v6e
topology: v6e:2x2x1
jax: 0.10.0
libtpu: 0.0.40
codegen_flags: <defaults>
</compile_context>

<pallas_src>
import functools

import jax
import jax.numpy as jnp
from jax.experimental import pallas as pl
from jax.experimental.pallas import tpu as pltpu

EXPANSION = 4            # CLIP Bottleneck expansion
ACT_DTYPE = jnp.bfloat16
BN_EPS = 1e-5

# Tile targets / VMEM budget chosen to be safe on v5e (16 MiB default scoped),
# v6e (128 MiB) and v7x (64 MiB physical, 2 TCs).
TILE_M = 512
TILE_N = 256
TILE_K = 512
VMEM_LIMIT = 48 * 1024 * 1024


def _cpad(c):
    return ((c + 127) // 128) * 128


def _pick_tile(dim, target):
    """Largest power-of-two tile <= target that divides dim, else the whole dim."""
    if dim <= target:
        return dim
    t = target
    while t > 8 and dim % t:
        t //= 2
    return t if dim % t == 0 else dim


# -----------------------------------------------------------------------------
# Pallas kernels
# -----------------------------------------------------------------------------
def _matmul_epilogue_kernel(a_ref, w_ref, s_ref, b_ref, o_ref, acc_ref, *, relu):
    """Tiled matmul with K-accumulation + folded-BN scale/shift (+ReLU) epilogue."""
    @pl.when(pl.program_id(2) == 0)
    def _():
        acc_ref[...] = jnp.zeros_like(acc_ref)

    acc_ref[...] += jnp.dot(a_ref[...], w_ref[...], preferred_element_type=jnp.float32)

    @pl.when(pl.program_id(2) == pl.num_programs(2) - 1)
    def _():
        y = acc_ref[...] * s_ref[...] + b_ref[...]
        if relu:
            y = jnp.maximum(y, 0.0)
        o_ref[...] = y.astype(o_ref.dtype)


def _tail_ds_kernel(a_ref, w_ref, s_ref, b_ref, ai_ref, wi_ref, si_ref, bi_ref, o_ref):
    """conv3+bn3, downsample conv+bn, residual add and ReLU, all fused (full K)."""
    y = jnp.dot(a_ref[...], w_ref[...], preferred_element_type=jnp.float32)
    y = y * s_ref[...] + b_ref[...]
    yi = jnp.dot(ai_ref[...], wi_ref[...], preferred_element_type=jnp.float32)
    yi = yi * si_ref[...] + bi_ref[...]
    o_ref[...] = jnp.maximum(y + yi, 0.0).astype(o_ref.dtype)


def _tail_kernel(a_ref, w_ref, s_ref, b_ref, id_ref, o_ref):
    """conv3+bn3 + residual add + ReLU (identity path has no downsample)."""
    y = jnp.dot(a_ref[...], w_ref[...], preferred_element_type=jnp.float32)
    y = y * s_ref[...] + b_ref[...]
    o_ref[...] = jnp.maximum(y + id_ref[...].astype(jnp.float32), 0.0).astype(o_ref.dtype)


def _make_avgpool_kernel(n):
    """2x2 avg-pool of n tensors.  Each input arrives as the FREE contiguous reshape
    (N*Ho, 2, Wo, 2*C): H-pool = leading-dim slices, W-pool = 128-aligned lane slices."""
    def kernel(*refs):
        for i in range(n):
            x_ref, o_ref = refs[i], refs[n + i]
            c = o_ref.shape[-1]
            v = x_ref[...]
            top = v[:, 0].astype(jnp.float32)        # rows with h even   (NHo, Wo, 2C)
            bot = v[:, 1].astype(jnp.float32)        # rows with h odd
            s = top[..., :c] + top[..., c:] + bot[..., :c] + bot[..., c:]
            o_ref[...] = (s * 0.25).astype(o_ref.dtype)
    return kernel


def _mha_kernel(q_ref, k_ref, v_ref, o_ref):
    """Single-query multi-head attention.  q:(NH,hd)  k,v:(NH,L,hd).
    Softmax scale pre-folded into the q projection; broadcast-multiply + reduce
    (VPU/XLU) instead of a batched MXU matmul for the 1-token query."""
    q = q_ref[...].astype(jnp.float32)
    k = k_ref[...].astype(jnp.float32)
    v = v_ref[...].astype(jnp.float32)
    s = jnp.sum(q[:, None, :] * k, axis=-1)                       # (NH, L)
    m = jnp.max(s, axis=-1, keepdims=True)
    e = jnp.exp(s - m)
    p = e * pl.reciprocal(jnp.sum(e, axis=-1, keepdims=True), approx=True)
    o = jnp.sum(p[:, :, None] * v, axis=1)                        # (NH, hd)
    o_ref[...] = o.astype(o_ref.dtype)


def _head_kernel(x_ref, w1_ref, b1_ref, w2_ref, b2_ref, o_ref):
    """c_proj followed by fc, chained in one kernel (no HBM round trip)."""
    h = jnp.dot(x_ref[...], w1_ref[...], preferred_element_type=jnp.float32) + b1_ref[...]
    o = jnp.dot(h.astype(ACT_DTYPE), w2_ref[...],
                preferred_element_type=jnp.float32) + b2_ref[...]
    o_ref[...] = o


# -----------------------------------------------------------------------------
# pallas_call wrappers
# -----------------------------------------------------------------------------
_VMEM_SPEC = pl.BlockSpec(memory_space=pltpu.MemorySpace.VMEM)


def _whole_call(kernel, out_shape, *args):
    """Whole-array VMEM-resident call (used only for small ops: pool / MHA / head)."""
    multi = isinstance(out_shape, (tuple, list))
    out_specs = tuple(_VMEM_SPEC for _ in out_shape) if multi else _VMEM_SPEC
    return pl.pallas_call(
        kernel,
        out_shape=tuple(out_shape) if multi else out_shape,
        in_specs=[_VMEM_SPEC] * len(args),
        out_specs=out_specs,
        compiler_params=pltpu.CompilerParams(vmem_limit_bytes=VMEM_LIMIT),
    )(*args)


def matmul_epilogue(a, w, scale, shift, *, relu, out_dtype=ACT_DTYPE):
    """(M,K)x(K,N) matmul on an (M,N,K) grid with scale/shift(+ReLU) epilogue."""
    M, K = a.shape
    _, N = w.shape
    tm = _pick_tile(M, TILE_M)
    tn = _pick_tile(N, TILE_N)
    tk = _pick_tile(K, TILE_K)
    grid = (M // tm, N // tn, K // tk)
    return pl.pallas_call(
        functools.partial(_matmul_epilogue_kernel, relu=relu),
        out_shape=jax.ShapeDtypeStruct((M, N), out_dtype),
        grid_spec=pltpu.PrefetchScalarGridSpec(
            num_scalar_prefetch=0,
            grid=grid,
            in_specs=[
                pl.BlockSpec((tm, tk), lambda i, j, k: (i, k)),
                pl.BlockSpec((tk, tn), lambda i, j, k: (k, j)),
                pl.BlockSpec((1, tn), lambda i, j, k: (0, j)),
                pl.BlockSpec((1, tn), lambda i, j, k: (0, j)),
            ],
            out_specs=pl.BlockSpec((tm, tn), lambda i, j, k: (i, j)),
            scratch_shapes=[pltpu.VMEM((tm, tn), jnp.float32)],
        ),
        compiler_params=pltpu.CompilerParams(
            dimension_semantics=("parallel", "parallel", "arbitrary"),
            vmem_limit_bytes=VMEM_LIMIT),
    )(a, w, scale, shift)


def tail_ds(a, c3, ai, ds):
    M, K = a.shape
    Ki = ai.shape[1]
    N = c3["w"].shape[1]
    tm = _pick_tile(M, TILE_M)
    tn = _pick_tile(N, TILE_N)
    grid = (M // tm, N // tn)
    return pl.pallas_call(
        _tail_ds_kernel,
        out_shape=jax.ShapeDtypeStruct((M, N), ACT_DTYPE),
        grid_spec=pltpu.PrefetchScalarGridSpec(
            num_scalar_prefetch=0,
            grid=grid,
            in_specs=[
                pl.BlockSpec((tm, K), lambda i, j: (i, 0)),
                pl.BlockSpec((K, tn), lambda i, j: (0, j)),
                pl.BlockSpec((1, tn), lambda i, j: (0, j)),
                pl.BlockSpec((1, tn), lambda i, j: (0, j)),
                pl.BlockSpec((tm, Ki), lambda i, j: (i, 0)),
                pl.BlockSpec((Ki, tn), lambda i, j: (0, j)),
                pl.BlockSpec((1, tn), lambda i, j: (0, j)),
                pl.BlockSpec((1, tn), lambda i, j: (0, j)),
            ],
            out_specs=pl.BlockSpec((tm, tn), lambda i, j: (i, j)),
        ),
        compiler_params=pltpu.CompilerParams(
            dimension_semantics=("parallel", "parallel"),
            vmem_limit_bytes=VMEM_LIMIT),
    )(a, c3["w"], c3["s"], c3["b"], ai, ds["w"], ds["s"], ds["b"])


def tail_res(a, c3, identity):
    M, K = a.shape
    N = c3["w"].shape[1]
    tm = _pick_tile(M, TILE_M)
    tn = _pick_tile(N, TILE_N)
    grid = (M // tm, N // tn)
    return pl.pallas_call(
        _tail_kernel,
        out_shape=jax.ShapeDtypeStruct((M, N), ACT_DTYPE),
        grid_spec=pltpu.PrefetchScalarGridSpec(
            num_scalar_prefetch=0,
            grid=grid,
            in_specs=[
                pl.BlockSpec((tm, K), lambda i, j: (i, 0)),
                pl.BlockSpec((K, tn), lambda i, j: (0, j)),
                pl.BlockSpec((1, tn), lambda i, j: (0, j)),
                pl.BlockSpec((1, tn), lambda i, j: (0, j)),
                pl.BlockSpec((tm, tn), lambda i, j: (i, j)),
            ],
            out_specs=pl.BlockSpec((tm, tn), lambda i, j: (i, j)),
        ),
        compiler_params=pltpu.CompilerParams(
            dimension_semantics=("parallel", "parallel"),
            vmem_limit_bytes=VMEM_LIMIT),
    )(a, c3["w"], c3["s"], c3["b"], identity)


# -----------------------------------------------------------------------------
# Glue: im2col, conv+BN(+ReLU), avg-pool
# -----------------------------------------------------------------------------
def _im2col(x, kh, kw, stride, padding, kpad):
    """Patch-extract at the REAL channel count; pad the concatenated K to kpad
    inside the single concatenation (no second copy)."""
    N, H, W, C = x.shape
    Ho = (H + 2 * padding - kh) // stride + 1
    Wo = (W + 2 * padding - kw) // stride + 1
    if padding:
        x = jnp.pad(x, ((0, 0), (padding, padding), (padding, padding), (0, 0)))
    cols = []
    for dy in range(kh):
        for dx in range(kw):
            cols.append(
                x[:, dy:dy + stride * Ho:stride, dx:dx + stride * Wo:stride, :]
                .reshape(N * Ho * Wo, C))
    k_real = kh * kw * C
    if kpad > k_real:
        cols.append(jnp.zeros((N * Ho * Wo, kpad - k_real), x.dtype))
    return jnp.concatenate(cols, axis=1), Ho, Wo


def conv_bn_act(x, pc, *, stride=1, padding=0, relu=True):
    """Fused conv + folded-BN (+ReLU).  x: (N,H,W,Cpad) bf16 (Cpad multiple of 128)."""
    N, H, W, C = x.shape
    kh, kw, cin = pc["kh"], pc["kw"], pc["cin"]
    if kh == 1 and kw == 1 and stride == 1 and padding == 0:
        a, Ho, Wo = x.reshape(N * H * W, C), H, W            # 1x1 conv == plain matmul
    else:
        xr = x[..., :cin] if cin < C else x                  # drop zero-padded channels
        a, Ho, Wo = _im2col(xr, kh, kw, stride, padding, pc["w"].shape[0])
    cout = pc["w"].shape[1]
    out = matmul_epilogue(a, pc["w"], pc["s"], pc["b"], relu=relu)
    return out.reshape(N, Ho, Wo, cout)


def avgpool2x2(*xs):
    """nn.AvgPool2d(2) for one or more NHWC tensors, pooled in a single Pallas kernel.
    Inputs are presented via a free contiguous reshape (no wrapper relayout)."""
    prepped, out_sds, nhwc = [], [], []
    for x in xs:
        N, H, W, C = x.shape
        Ho, Wo = H // 2, W // 2
        prepped.append(x.reshape(N * Ho, 2, Wo, 2 * C))
        out_sds.append(jax.ShapeDtypeStruct((N * Ho, Wo, C), ACT_DTYPE))
        nhwc.append((N, Ho, Wo, C))
    kernel = _make_avgpool_kernel(len(xs))
    if len(xs) == 1:
        y = _whole_call(kernel, out_sds[0], prepped[0])
        return y.reshape(nhwc[0])
    ys = _whole_call(kernel, tuple(out_sds), *prepped)
    return tuple(y.reshape(s) for y, s in zip(ys, nhwc))


# -----------------------------------------------------------------------------
# Model blocks
# -----------------------------------------------------------------------------
def bottleneck_forward(x, blk):
    stride = blk["stride"]
    out = conv_bn_act(x, blk["conv1"], relu=True)                  # 1x1
    out = conv_bn_act(out, blk["conv2"], padding=1, relu=True)     # 3x3
    identity = x
    if stride > 1:                                                 # anti-aliased stride
        out, identity = avgpool2x2(out, identity)

    N, Ho, Wo, Cp = out.shape
    M = N * Ho * Wo
    c3 = blk["conv3"]
    cout = c3["w"].shape[1]
    a_main = out.reshape(M, Cp)
    if "ds" in blk:
        y = tail_ds(a_main, c3, identity.reshape(M, identity.shape[-1]), blk["ds"])
    else:
        y = tail_res(a_main, c3, identity.reshape(M, cout))
    return y.reshape(N, Ho, Wo, cout)


def attnpool_forward(x, ap):
    N, H, W, C = x.shape                       # C == embed_dim (multiple of 128 here)
    heads = ap["heads"]
    hd = C // heads
    L = H * W + 1
    # NCHW flatten(2).permute(2,0,1)  <=>  NHWC reshape + transpose -> (HW, N, C)
    xs = jnp.transpose(x.reshape(N, H * W, C), (1, 0, 2)).astype(jnp.float32)
    xs = jnp.concatenate([jnp.mean(xs, axis=0, keepdims=True), xs], axis=0)   # (L, N, C)
    xs = xs + ap["pos"][:, None, :]

    # q only for the mean token (query length 1); k/v for all L tokens, bf16 outputs.
    q_in = xs[0].astype(ACT_DTYPE)                       # (N, C)
    kv_in = xs.reshape(L * N, C).astype(ACT_DTYPE)       # (L*N, C)
    q = matmul_epilogue(q_in, ap["wq"], ap["ones_q"], ap["bq"], relu=False)      # (N, C)
    kv = matmul_epilogue(kv_in, ap["wkv"], ap["ones_kv"], ap["bkv"], relu=False)  # (L*N, 2C)

    q = q.reshape(N * heads, hd)
    k = jnp.transpose(kv[:, :C].reshape(L, N, heads, hd), (1, 2, 0, 3)
                      ).reshape(N * heads, L, hd)
    v = jnp.transpose(kv[:, C:].reshape(L, N, heads, hd), (1, 2, 0, 3)
                      ).reshape(N * heads, L, hd)

    o = _whole_call(_mha_kernel, jax.ShapeDtypeStruct((N * heads, hd), ACT_DTYPE), q, k, v)
    return o.reshape(N, C)


def head_forward(feat, ap, fcp):
    N = feat.shape[0]
    out = _whole_call(
        _head_kernel,
        jax.ShapeDtypeStruct((N, fcp["w"].shape[1]), jnp.float32),
        feat, ap["wc"], ap["bc"], fcp["w"], fcp["b"])
    return out[:, :fcp["out_dim"]]


def modified_resnet_forward(x_nchw, P):
    x = jnp.transpose(x_nchw, (0, 2, 3, 1)).astype(ACT_DTYPE)      # NCHW -> NHWC (raw 3 ch)
    # stem (conv1 im2cols the raw 3-channel input: K=27 padded to 128)
    x = conv_bn_act(x, P["stem"][0], stride=2, padding=1)
    x = conv_bn_act(x, P["stem"][1], padding=1)
    x = conv_bn_act(x, P["stem"][2], padding=1)
    x = avgpool2x2(x)
    # residual stages
    for lname in ("layer1", "layer2", "layer3", "layer4"):
        for blk in P[lname]:
            x = bottleneck_forward(x, blk)
    # attention pooling + classifier head (c_proj + fc fused)
    feat = attnpool_forward(x, P["attnpool"])
    return head_forward(feat, P["attnpool"], P["fc"])


# -----------------------------------------------------------------------------
# One-time parameter preparation (fold BN, pad to 128 lanes, transpose, cast bf16)
# -----------------------------------------------------------------------------
def _prep_conv(w_oihw):
    cout, cin, kh, kw = w_oihw.shape
    cout_p = _cpad(cout)
    w = jnp.transpose(w_oihw, (2, 3, 1, 0))                          # (kh, kw, cin, cout)
    w = jnp.pad(w, ((0, 0), (0, 0), (0, 0), (0, cout_p - cout)))
    if kh == 1 and kw == 1:
        cin_p = _cpad(cin)
        w = jnp.pad(w, ((0, 0), (0, 0), (0, cin_p - cin), (0, 0)))
        w = w.reshape(cin_p, cout_p)
    else:
        # real-channel im2col layout: rows ordered (dy, dx, ci), padded to a 128 multiple
        k_real = kh * kw * cin
        w = w.reshape(k_real, cout_p)
        w = jnp.pad(w, ((0, _cpad(k_real) - k_real), (0, 0)))
    return w.astype(ACT_DTYPE), kh, kw, cin


def _fold_bn(bn, cout_p):
    g, b, rm, rv = bn
    c = g.shape[0]
    scale = g / jnp.sqrt(rv + BN_EPS)
    shift = b - rm * scale
    # padded channels get scale=shift=0 so they stay exactly zero through the epilogue
    scale = jnp.pad(scale, (0, cout_p - c)).reshape(1, cout_p).astype(jnp.float32)
    shift = jnp.pad(shift, (0, cout_p - c)).reshape(1, cout_p).astype(jnp.float32)
    return scale, shift


def _prep_conv_bn(w_oihw, bn):
    w, kh, kw, cin = _prep_conv(w_oihw)
    s, b = _fold_bn(bn, w.shape[1])
    return {"w": w, "kh": kh, "kw": kw, "cin": cin, "s": s, "b": b}


def prepare_params(p):
    """Transform PyTorch-layout params into inference-ready padded/folded/bf16 form."""
    P = {"stem": [
        _prep_conv_bn(p["conv1"], p["bn1"]),
        _prep_conv_bn(p["conv2"], p["bn2"]),
        _prep_conv_bn(p["conv3"], p["bn3"]),
    ]}
    for lname in ("layer1", "layer2", "layer3", "layer4"):
        blks = []
        for blk in p[lname]:
            nb = {"stride": blk["stride"],
                  "conv1": _prep_conv_bn(blk["conv1"], blk["bn1"]),
                  "conv2": _prep_conv_bn(blk["conv2"], blk["bn2"]),
                  "conv3": _prep_conv_bn(blk["conv3"], blk["bn3"])}
            if "ds_conv" in blk:
                nb["ds"] = _prep_conv_bn(blk["ds_conv"], blk["ds_bn"])
            blks.append(nb)
        P[lname] = blks

    ap = p["attnpool"]
    heads = ap["heads"]
    C = ap["pos"].shape[1]
    scale = (C // heads) ** -0.5
    (Wq, bq), (Wk, bk), (Wv, bv), (Wc, bc) = ap["q"], ap["k"], ap["v"], ap["c"]
    P["attnpool"] = {
        "heads": heads,
        "pos": ap["pos"].astype(jnp.float32),
        "wq": (Wq.T * scale).astype(ACT_DTYPE),                      # softmax scale folded
        "bq": (bq * scale).reshape(1, -1).astype(jnp.float32),
        "ones_q": jnp.ones((1, C), jnp.float32),
        "wkv": jnp.concatenate([Wk.T, Wv.T], axis=1).astype(ACT_DTYPE),
        "bkv": jnp.concatenate([bk, bv]).reshape(1, -1).astype(jnp.float32),
        "ones_kv": jnp.ones((1, 2 * C), jnp.float32),
        "wc": Wc.T.astype(ACT_DTYPE),
        "bc": bc.reshape(1, -1).astype(jnp.float32),
    }

    Wfc, bfc = p["fc"]
    od = Wfc.shape[0]
    odp = _cpad(od)
    P["fc"] = {
        "w": jnp.pad(Wfc.T, ((0, 0), (0, odp - od))).astype(ACT_DTYPE),
        "b": jnp.pad(bfc, (0, odp - od)).reshape(1, odp).astype(jnp.float32),
        "out_dim": od,
    }
    return P


# -----------------------------------------------------------------------------
# Deterministic parameter initialization (synthetic; mirrors __init__ shapes)
# -----------------------------------------------------------------------------
class KeyGen:
    def __init__(self, key):
        self.key = key

    def __call__(self):
        self.key, k = jax.random.split(self.key)
        return k


def conv_init(kg, cout, cin, kh, kw):
    fan_in = cin * kh * kw
    return jax.random.normal(kg(), (cout, cin, kh, kw), jnp.float32) / jnp.sqrt(float(fan_in))


def linear_init(kg, cout, cin):
    w = jax.random.normal(kg(), (cout, cin), jnp.float32) / jnp.sqrt(float(cin))
    b = 0.01 * jax.random.normal(kg(), (cout,), jnp.float32)
    return w, b


def bn_init(kg, c):
    g = 1.0 + 0.1 * jax.random.normal(kg(), (c,), jnp.float32)
    b = 0.1 * jax.random.normal(kg(), (c,), jnp.float32)
    rm = 0.1 * jax.random.normal(kg(), (c,), jnp.float32)            # running_mean
    rv = 1.0 + 0.1 * jax.random.uniform(kg(), (c,), jnp.float32)     # running_var > 0
    return g, b, rm, rv


def init_params(key, width=8, layers=(1, 1, 1, 1), output_dim=10, input_resolution=32):
    kg = KeyGen(key)
    p = {}
    p["conv1"] = conv_init(kg, width // 2, 3, 3, 3)
    p["bn1"] = bn_init(kg, width // 2)
    p["conv2"] = conv_init(kg, width // 2, width // 2, 3, 3)
    p["bn2"] = bn_init(kg, width // 2)
    p["conv3"] = conv_init(kg, width, width // 2, 3, 3)
    p["bn3"] = bn_init(kg, width)

    inplanes = width

    def make_layer(planes, blocks, stride):
        nonlocal inplanes
        blks = []
        strides = [stride] + [1] * (blocks - 1)
        for s in strides:
            blk = {
                "conv1": conv_init(kg, planes, inplanes, 1, 1),
                "bn1": bn_init(kg, planes),
                "conv2": conv_init(kg, planes, planes, 3, 3),
                "bn2": bn_init(kg, planes),
                "conv3": conv_init(kg, planes * EXPANSION, planes, 1, 1),
                "bn3": bn_init(kg, planes * EXPANSION),
                "stride": s,
            }
            if s > 1 or inplanes != planes * EXPANSION:
                blk["ds_conv"] = conv_init(kg, planes * EXPANSION, inplanes, 1, 1)
                blk["ds_bn"] = bn_init(kg, planes * EXPANSION)
            blks.append(blk)
            inplanes = planes * EXPANSION
        return blks

    p["layer1"] = make_layer(width, layers[0], 1)
    p["layer2"] = make_layer(width * 2, layers[1], 2)
    p["layer3"] = make_layer(width * 4, layers[2], 2)
    p["layer4"] = make_layer(width * 8, layers[3], 2)

    embed_dim = width * 32
    heads = width // 2
    attn_out_dim = 1024
    spacial = input_resolution // 32
    p["attnpool"] = {
        "pos": jax.random.normal(kg(), (spacial * spacial + 1, embed_dim), jnp.float32)
        / embed_dim ** 0.5,
        "q": linear_init(kg, embed_dim, embed_dim),
        "k": linear_init(kg, embed_dim, embed_dim),
        "v": linear_init(kg, embed_dim, embed_dim),
        "c": linear_init(kg, attn_out_dim, embed_dim),
        "heads": heads,
    }
    p["fc"] = linear_init(kg, output_dim, attn_out_dim)
    return p


# -----------------------------------------------------------------------------
if __name__ == "__main__":
    key = jax.random.PRNGKey(0)
    pkey, xkey = jax.random.split(key)
    params = init_params(pkey, width=8, layers=(1, 1, 1, 1), output_dim=10,
                         input_resolution=32)
    P = prepare_params(params)                      # one-time weight transform (BN folded)
    x = jax.random.normal(xkey, (2, 3, 32, 32), jnp.float32)   # NCHW, like PyTorch

    fwd = jax.jit(lambda inp: modified_resnet_forward(inp, P))
    out = jax.block_until_ready(fwd(x))
    assert out.shape == (2, 10), out.shape
    assert bool(jnp.all(jnp.isfinite(out)))
    print("KERNEL_OK")
</pallas_src>

<mosaic_0001>
module attributes {stable_mosaic.version = 11 : i64} {
  func.func @_matmul_epilogue_kernel(%arg0: i32, %arg1: i32, %arg2: i32, %arg3: memref<512x128xbf16, #tpu.memory_space<vmem>>, %arg4: memref<128x128xbf16, #tpu.memory_space<vmem>>, %arg5: memref<1x128xf32, #tpu.memory_space<vmem>>, %arg6: memref<1x128xf32, #tpu.memory_space<vmem>>, %arg7: memref<512x128xbf16, #tpu.memory_space<vmem>>, %arg8: memref<512x128xf32, #tpu.memory_space<vmem>>) attributes {dimension_semantics = [#tpu.dimension_semantics<parallel>, #tpu.dimension_semantics<parallel>, #tpu.dimension_semantics<arbitrary>], iteration_bounds = array<i64: 1, 1, 1>, scalar_prefetch = 0 : i64, scratch_operands = 1 : i64, tpu.core_type = #tpu.core_type<tc>, window_params = [{transform_indices = @transform_0, window_bounds = array<i64: 512, 128>}, {transform_indices = @transform_1, window_bounds = array<i64: 128, 128>}, {transform_indices = @transform_2, window_bounds = array<i64: 1, 128>}, {transform_indices = @transform_3, window_bounds = array<i64: 1, 128>}, {transform_indices = @transform_4, window_bounds = array<i64: 512, 128>}]} {
    %c0_i32 = arith.constant 0 : i32
    %0 = arith.cmpi eq, %arg2, %c0_i32 : i32
    %1 = arith.extui %0 : i1 to i32
    %c0_i32_0 = arith.constant 0 : i32
    %2 = arith.cmpi ne, %1, %c0_i32_0 : i32
    scf.if %2 {
      %cst_10 = arith.constant 0.000000e+00 : f32
      %12 = vector.broadcast %cst_10 : f32 to vector<512x128xf32>
      %c0_11 = arith.constant 0 : index
      %c0_12 = arith.constant 0 : index
      %13 = vector.load %arg8[%c0_11, %c0_12] : memref<512x128xf32, #tpu.memory_space<vmem>>, vector<512x128xf32>
      tpu.vector_store %arg8[%c0_11, %c0_12], %12 {strides = array<i32>} : memref<512x128xf32, #tpu.memory_space<vmem>>, vector<512x128xf32>,
    } else {
    }
    %c0 = arith.constant 0 : index
    %c0_1 = arith.constant 0 : index
    %3 = vector.load %arg8[%c0, %c0_1] : memref<512x128xf32, #tpu.memory_space<vmem>>, vector<512x128xf32>
    %c0_2 = arith.constant 0 : index
    %c0_3 = arith.constant 0 : index
    %4 = vector.load %arg3[%c0_2, %c0_3] : memref<512x128xbf16, #tpu.memory_space<vmem>>, vector<512x128xbf16>
    %c0_4 = arith.constant 0 : index
    %c0_5 = arith.constant 0 : index
    %5 = vector.load %arg4[%c0_4, %c0_5] : memref<128x128xbf16, #tpu.memory_space<vmem>>, vector<128x128xbf16>
    %cst = arith.constant dense<0.000000e+00> : vector<512x128xf32>
    %6 = tpu.matmul %4, %5, %cst {dimension_numbers = #tpu.dot_dimension_numbers<[1], [0], [0], [1], [0, 0, 1, 1], [], []>} : vector<512x128xbf16>, vector<128x128xbf16>, vector<512x128xf32> -> vector<512x128xf32>
    %7 = arith.addf %3, %6 : vector<512x128xf32>
    %c0_6 = arith.constant 0 : index
    %c0_7 = arith.constant 0 : index
    %8 = vector.load %arg8[%c0_6, %c0_7] : memref<512x128xf32, #tpu.memory_space<vmem>>, vector<512x128xf32>
    tpu.vector_store %arg8[%c0_6, %c0_7], %7 {strides = array<i32>} : memref<512x128xf32, #tpu.memory_space<vmem>>, vector<512x128xf32>,
    %c0_i32_8 = arith.constant 0 : i32
    %9 = arith.cmpi eq, %arg2, %c0_i32_8 : i32
    %10 = arith.extui %9 : i1 to i32
    %c0_i32_9 = arith.constant 0 : i32
    %11 = arith.cmpi ne, %10, %c0_i32_9 : i32
    scf.if %11 {
      %c0_10 = arith.constant 0 : index
      %c0_11 = arith.constant 0 : index
      %12 = vector.load %arg8[%c0_10, %c0_11] : memref<512x128xf32, #tpu.memory_space<vmem>>, vector<512x128xf32>
      %c0_12 = arith.constant 0 : index
      %c0_13 = arith.constant 0 : index
      %13 = vector.load %arg5[%c0_12, %c0_13] : memref<1x128xf32, #tpu.memory_space<vmem>>, vector<1x128xf32>
      %14 = vector.broadcast %13 : vector<1x128xf32> to vector<512x128xf32>
      %15 = arith.mulf %12, %14 : vector<512x128xf32>
      %c0_14 = arith.constant 0 : index
      %c0_15 = arith.constant 0 : index
      %16 = vector.load %arg6[%c0_14, %c0_15] : memref<1x128xf32, #tpu.memory_space<vmem>>, vector<1x128xf32>
      %17 = vector.broadcast %16 : vector<1x128xf32> to vector<512x128xf32>
      %18 = arith.addf %15, %17 : vector<512x128xf32>
      %cst_16 = arith.constant 0.000000e+00 : f32
      %19 = vector.broadcast %cst_16 : f32 to vector<512x128xf32>
      %20 = arith.maximumf %18, %19 : vector<512x128xf32>
      %21 = arith.truncf %20 : vector<512x128xf32> to vector<512x128xbf16>
      %c0_17 = arith.constant 0 : index
      %c0_18 = arith.constant 0 : index
      %22 = vector.load %arg7[%c0_17, %c0_18] : memref<512x128xbf16, #tpu.memory_space<vmem>>, vector<512x128xbf16>
      tpu.vector_store %arg7[%c0_17, %c0_18], %21 {strides = array<i32>} : memref<512x128xbf16, #tpu.memory_space<vmem>>, vector<512x128xbf16>,
    } else {
    }
    return
  }
  func.func @transform_0(%arg0: i32, %arg1: i32, %arg2: i32) -> (i32, i32) {
    %c0_i32 = arith.constant 0 : i32
    return %arg0, %arg2 : i32, i32
  }
  func.func @transform_1(%arg0: i32, %arg1: i32, %arg2: i32) -> (i32, i32) {
    %c0_i32 = arith.constant 0 : i32
    return %arg2, %arg1 : i32, i32
  }
  func.func @transform_2(%arg0: i32, %arg1: i32, %arg2: i32) -> (i32, i32) {
    %c0_i32 = arith.constant 0 : i32
    %c0_i32_0 = arith.constant 0 : i32
    return %c0_i32, %arg1 : i32, i32
  }
  func.func @transform_3(%arg0: i32, %arg1: i32, %arg2: i32) -> (i32, i32) {
    %c0_i32 = arith.constant 0 : i32
    %c0_i32_0 = arith.constant 0 : i32
    return %c0_i32, %arg1 : i32, i32
  }
  func.func @transform_4(%arg0: i32, %arg1: i32, %arg2: i32) -> (i32, i32) {
    %c0_i32 = arith.constant 0 : i32
    return %arg0, %arg1 : i32, i32
  }
}

module attributes {stable_mosaic.version = 11 : i64} {
  func.func @kernel(%arg0: memref<16x2x8x256xbf16, #tpu.memory_space<vmem>>, %arg1: memref<16x8x128xbf16, #tpu.memory_space<vmem>>) attributes {dimension_semantics = [], scalar_prefetch = 0 : i64, scratch_operands = 0 : i64, tpu.core_type = #tpu.core_type<tc>} {
    %c0 = arith.constant 0 : index
    %c0_0 = arith.constant 0 : index
    %c0_1 = arith.constant 0 : index
    %c0_2 = arith.constant 0 : index
    %0 = vector.load %arg0[%c0, %c0_0, %c0_1, %c0_2] : memref<16x2x8x256xbf16, #tpu.memory_space<vmem>>, vector<16x2x8x256xbf16>
    %1 = vector.extract_strided_slice %0 {offsets = [0, 0, 0, 0], sizes = [16, 1, 8, 256], strides = [1, 1, 1, 1]} : vector<16x2x8x256xbf16> to vector<16x1x8x256xbf16>
    %2 = vector.shape_cast %1 : vector<16x1x8x256xbf16> to vector<16x8x256xbf16>
    %3 = arith.extf %2 : vector<16x8x256xbf16> to vector<16x8x256xf32>
    %4 = vector.extract_strided_slice %0 {offsets = [0, 1, 0, 0], sizes = [16, 1, 8, 256], strides = [1, 1, 1, 1]} : vector<16x2x8x256xbf16> to vector<16x1x8x256xbf16>
    %5 = vector.shape_cast %4 : vector<16x1x8x256xbf16> to vector<16x8x256xbf16>
    %6 = arith.extf %5 : vector<16x8x256xbf16> to vector<16x8x256xf32>
    %7 = vector.extract_strided_slice %3 {offsets = [0, 0, 0], sizes = [16, 8, 128], strides = [1, 1, 1]} : vector<16x8x256xf32> to vector<16x8x128xf32>
    %8 = vector.extract_strided_slice %3 {offsets = [0, 0, 128], sizes = [16, 8, 128], strides = [1, 1, 1]} : vector<16x8x256xf32> to vector<16x8x128xf32>
    %9 = arith.addf %7, %8 : vector<16x8x128xf32>
    %10 = vector.extract_strided_slice %6 {offsets = [0, 0, 0], sizes = [16, 8, 128], strides = [1, 1, 1]} : vector<16x8x256xf32> to vector<16x8x128xf32>
    %11 = arith.addf %9, %10 : vector<16x8x128xf32>
    %12 = vector.extract_strided_slice %6 {offsets = [0, 0, 128], sizes = [16, 8, 128], strides = [1, 1, 1]} : vector<16x8x256xf32> to vector<16x8x128xf32>
    %13 = arith.addf %11, %12 : vector<16x8x128xf32>
    %cst = arith.constant 2.500000e-01 : f32
    %14 = vector.broadcast %cst : f32 to vector<16x8x128xf32>
    %15 = arith.mulf %13, %14 : vector<16x8x128xf32>
    %16 = arith.truncf %15 : vector<16x8x128xf32> to vector<16x8x128xbf16>
    %c0_3 = arith.constant 0 : index
    %c0_4 = arith.constant 0 : index
    %c0_5 = arith.constant 0 : index
    %17 = vector.load %arg1[%c0_3, %c0_4, %c0_5] : memref<16x8x128xbf16, #tpu.memory_space<vmem>>, vector<16x8x128xbf16>
    tpu.vector_store %arg1[%c0_3, %c0_4, %c0_5], %16 {strides = array<i32>} : memref<16x8x128xbf16, #tpu.memory_space<vmem>>, vector<16x8x128xbf16>,
    return
  }
}

module attributes {stable_mosaic.version = 11 : i64} {
  func.func @_matmul_epilogue_kernel(%arg0: i32, %arg1: i32, %arg2: i32, %arg3: memref<128x128xbf16, #tpu.memory_space<vmem>>, %arg4: memref<128x128xbf16, #tpu.memory_space<vmem>>, %arg5: memref<1x128xf32, #tpu.memory_space<vmem>>, %arg6: memref<1x128xf32, #tpu.memory_space<vmem>>, %arg7: memref<128x128xbf16, #tpu.memory_space<vmem>>, %arg8: memref<128x128xf32, #tpu.memory_space<vmem>>) attributes {dimension_semantics = [#tpu.dimension_semantics<parallel>, #tpu.dimension_semantics<parallel>, #tpu.dimension_semantics<arbitrary>], iteration_bounds = array<i64: 1, 1, 1>, scalar_prefetch = 0 : i64, scratch_operands = 1 : i64, tpu.core_type = #tpu.core_type<tc>, window_params = [{transform_indices = @transform_0, window_bounds = array<i64: 128, 128>}, {transform_indices = @transform_1, window_bounds = array<i64: 128, 128>}, {transform_indices = @transform_2, window_bounds = array<i64: 1, 128>}, {transform_indices = @transform_3, window_bounds = array<i64: 1, 128>}, {transform_indices = @transform_4, window_bounds = array<i64: 128, 128>}]} {
    %c0_i32 = arith.constant 0 : i32
    %0 = arith.cmpi eq, %arg2, %c0_i32 : i32
    %1 = arith.extui %0 : i1 to i32
    %c0_i32_0 = arith.constant 0 : i32
    %2 = arith.cmpi ne, %1, %c0_i32_0 : i32
    scf.if %2 {
      %cst_10 = arith.constant 0.000000e+00 : f32
      %12 = vector.broadcast %cst_10 : f32 to vector<128x128xf32>
      %c0_11 = arith.constant 0 : index
      %c0_12 = arith.constant 0 : index
      %13 = vector.load %arg8[%c0_11, %c0_12] : memref<128x128xf32, #tpu.memory_space<vmem>>, vector<128x128xf32>
      tpu.vector_store %arg8[%c0_11, %c0_12], %12 {strides = array<i32>} : memref<128x128xf32, #tpu.memory_space<vmem>>, vector<128x128xf32>,
    } else {
    }
    %c0 = arith.constant 0 : index
    %c0_1 = arith.constant 0 : index
    %3 = vector.load %arg8[%c0, %c0_1] : memref<128x128xf32, #tpu.memory_space<vmem>>, vector<128x128xf32>
    %c0_2 = arith.constant 0 : index
    %c0_3 = arith.constant 0 : index
    %4 = vector.load %arg3[%c0_2, %c0_3] : memref<128x128xbf16, #tpu.memory_space<vmem>>, vector<128x128xbf16>
    %c0_4 = arith.constant 0 : index
    %c0_5 = arith.constant 0 : index
    %5 = vector.load %arg4[%c0_4, %c0_5] : memref<128x128xbf16, #tpu.memory_space<vmem>>, vector<128x128xbf16>
    %cst = arith.constant dense<0.000000e+00> : vector<128x128xf32>
    %6 = tpu.matmul %4, %5, %cst {dimension_numbers = #tpu.dot_dimension_numbers<[1], [0], [0], [1], [0, 0, 1, 1], [], []>} : vector<128x128xbf16>, vector<128x128xbf16>, vector<128x128xf32> -> vector<128x128xf32>
    %7 = arith.addf %3, %6 : vector<128x128xf32>
    %c0_6 = arith.constant 0 : index
    %c0_7 = arith.constant 0 : index
    %8 = vector.load %arg8[%c0_6, %c0_7] : memref<128x128xf32, #tpu.memory_space<vmem>>, vector<128x128xf32>
    tpu.vector_store %arg8[%c0_6, %c0_7], %7 {strides = array<i32>} : memref<128x128xf32, #tpu.memory_space<vmem>>, vector<128x128xf32>,
    %c0_i32_8 = arith.constant 0 : i32
    %9 = arith.cmpi eq, %arg2, %c0_i32_8 : i32
    %10 = arith.extui %9 : i1 to i32
    %c0_i32_9 = arith.constant 0 : i32
    %11 = arith.cmpi ne, %10, %c0_i32_9 : i32
    scf.if %11 {
      %c0_10 = arith.constant 0 : index
      %c0_11 = arith.constant 0 : index
      %12 = vector.load %arg8[%c0_10, %c0_11] : memref<128x128xf32, #tpu.memory_space<vmem>>, vector<128x128xf32>
      %c0_12 = arith.constant 0 : index
      %c0_13 = arith.constant 0 : index
      %13 = vector.load %arg5[%c0_12, %c0_13] : memref<1x128xf32, #tpu.memory_space<vmem>>, vector<1x128xf32>
      %14 = vector.broadcast %13 : vector<1x128xf32> to vector<128x128xf32>
      %15 = arith.mulf %12, %14 : vector<128x128xf32>
      %c0_14 = arith.constant 0 : index
      %c0_15 = arith.constant 0 : index
      %16 = vector.load %arg6[%c0_14, %c0_15] : memref<1x128xf32, #tpu.memory_space<vmem>>, vector<1x128xf32>
      %17 = vector.broadcast %16 : vector<1x128xf32> to vector<128x128xf32>
      %18 = arith.addf %15, %17 : vector<128x128xf32>
      %cst_16 = arith.constant 0.000000e+00 : f32
      %19 = vector.broadcast %cst_16 : f32 to vector<128x128xf32>
      %20 = arith.maximumf %18, %19 : vector<128x128xf32>
      %21 = arith.truncf %20 : vector<128x128xf32> to vector<128x128xbf16>
      %c0_17 = arith.constant 0 : index
      %c0_18 = arith.constant 0 : index
      %22 = vector.load %arg7[%c0_17, %c0_18] : memref<128x128xbf16, #tpu.memory_space<vmem>>, vector<128x128xbf16>
      tpu.vector_store %arg7[%c0_17, %c0_18], %21 {strides = array<i32>} : memref<128x128xbf16, #tpu.memory_space<vmem>>, vector<128x128xbf16>,
    } else {
    }
    return
  }
  func.func @transform_0(%arg0: i32, %arg1: i32, %arg2: i32) -> (i32, i32) {
    %c0_i32 = arith.constant 0 : i32
    return %arg0, %arg2 : i32, i32
  }
  func.func @transform_1(%arg0: i32, %arg1: i32, %arg2: i32) -> (i32, i32) {
    %c0_i32 = arith.constant 0 : i32
    return %arg2, %arg1 : i32, i32
  }
  func.func @transform_2(%arg0: i32, %arg1: i32, %arg2: i32) -> (i32, i32) {
    %c0_i32 = arith.constant 0 : i32
    %c0_i32_0 = arith.constant 0 : i32
    return %c0_i32, %arg1 : i32, i32
  }
  func.func @transform_3(%arg0: i32, %arg1: i32, %arg2: i32) -> (i32, i32) {
    %c0_i32 = arith.constant 0 : i32
    %c0_i32_0 = arith.constant 0 : i32
    return %c0_i32, %arg1 : i32, i32
  }
  func.func @transform_4(%arg0: i32, %arg1: i32, %arg2: i32) -> (i32, i32) {
    %c0_i32 = arith.constant 0 : i32
    return %arg0, %arg1 : i32, i32
  }
}

module attributes {stable_mosaic.version = 11 : i64} {
  func.func @_tail_ds_kernel(%arg0: i32, %arg1: i32, %arg2: memref<128x128xbf16, #tpu.memory_space<vmem>>, %arg3: memref<128x128xbf16, #tpu.memory_space<vmem>>, %arg4: memref<1x128xf32, #tpu.memory_space<vmem>>, %arg5: memref<1x128xf32, #tpu.memory_space<vmem>>, %arg6: memref<128x128xbf16, #tpu.memory_space<vmem>>, %arg7: memref<128x128xbf16, #tpu.memory_space<vmem>>, %arg8: memref<1x128xf32, #tpu.memory_space<vmem>>, %arg9: memref<1x128xf32, #tpu.memory_space<vmem>>, %arg10: memref<128x128xbf16, #tpu.memory_space<vmem>>) attributes {dimension_semantics = [#tpu.dimension_semantics<parallel>, #tpu.dimension_semantics<parallel>], iteration_bounds = array<i64: 1, 1>, scalar_prefetch = 0 : i64, scratch_operands = 0 : i64, tpu.core_type = #tpu.core_type<tc>, window_params = [{transform_indices = @transform_0, window_bounds = array<i64: 128, 128>}, {transform_indices = @transform_1, window_bounds = array<i64: 128, 128>}, {transform_indices = @transform_2, window_bounds = array<i64: 1, 128>}, {transform_indices = @transform_3, window_bounds = array<i64: 1, 128>}, {transform_indices = @transform_4, window_bounds = array<i64: 128, 128>}, {transform_indices = @transform_5, window_bounds = array<i64: 128, 128>}, {transform_indices = @transform_6, window_bounds = array<i64: 1, 128>}, {transform_indices = @transform_7, window_bounds = array<i64: 1, 128>}, {transform_indices = @transform_8, window_bounds = array<i64: 128, 128>}]} {
    %c0 = arith.constant 0 : index
    %c0_0 = arith.constant 0 : index
    %0 = vector.load %arg2[%c0, %c0_0] : memref<128x128xbf16, #tpu.memory_space<vmem>>, vector<128x128xbf16>
    %c0_1 = arith.constant 0 : index
    %c0_2 = arith.constant 0 : index
    %1 = vector.load %arg3[%c0_1, %c0_2] : memref<128x128xbf16, #tpu.memory_space<vmem>>, vector<128x128xbf16>
    %cst = arith.constant dense<0.000000e+00> : vector<128x128xf32>
    %2 = tpu.matmul %0, %1, %cst {dimension_numbers = #tpu.dot_dimension_numbers<[1], [0], [0], [1], [0, 0, 1, 1], [], []>} : vector<128x128xbf16>, vector<128x128xbf16>, vector<128x128xf32> -> vector<128x128xf32>
    %c0_3 = arith.constant 0 : index
    %c0_4 = arith.constant 0 : index
    %3 = vector.load %arg4[%c0_3, %c0_4] : memref<1x128xf32, #tpu.memory_space<vmem>>, vector<1x128xf32>
    %4 = vector.broadcast %3 : vector<1x128xf32> to vector<128x128xf32>
    %5 = arith.mulf %2, %4 : vector<128x128xf32>
    %c0_5 = arith.constant 0 : index
    %c0_6 = arith.constant 0 : index
    %6 = vector.load %arg5[%c0_5, %c0_6] : memref<1x128xf32, #tpu.memory_space<vmem>>, vector<1x128xf32>
    %7 = vector.broadcast %6 : vector<1x128xf32> to vector<128x128xf32>
    %8 = arith.addf %5, %7 : vector<128x128xf32>
    %c0_7 = arith.constant 0 : index
    %c0_8 = arith.constant 0 : index
    %9 = vector.load %arg6[%c0_7, %c0_8] : memref<128x128xbf16, #tpu.memory_space<vmem>>, vector<128x128xbf16>
    %c0_9 = arith.constant 0 : index
    %c0_10 = arith.constant 0 : index
    %10 = vector.load %arg7[%c0_9, %c0_10] : memref<128x128xbf16, #tpu.memory_space<vmem>>, vector<128x128xbf16>
    %cst_11 = arith.constant dense<0.000000e+00> : vector<128x128xf32>
    %11 = tpu.matmul %9, %10, %cst_11 {dimension_numbers = #tpu.dot_dimension_numbers<[1], [0], [0], [1], [0, 0, 1, 1], [], []>} : vector<128x128xbf16>, vector<128x128xbf16>, vector<128x128xf32> -> vector<128x128xf32>
    %c0_12 = arith.constant 0 : index
    %c0_13 = arith.constant 0 : index
    %12 = vector.load %arg8[%c0_12, %c0_13] : memref<1x128xf32, #tpu.memory_space<vmem>>, vector<1x128xf32>
    %13 = vector.broadcast %12 : vector<1x128xf32> to vector<128x128xf32>
    %14 = arith.mulf %11, %13 : vector<128x128xf32>
    %c0_14 = arith.constant 0 : index
    %c0_15 = arith.constant 0 : index
    %15 = vector.load %arg9[%c0_14, %c0_15] : memref<1x128xf32, #tpu.memory_space<vmem>>, vector<1x128xf32>
    %16 = vector.broadcast %15 : vector<1x128xf32> to vector<128x128xf32>
    %17 = arith.addf %14, %16 : vector<128x128xf32>
    %18 = arith.addf %8, %17 : vector<128x128xf32>
    %cst_16 = arith.constant 0.000000e+00 : f32
    %19 = vector.broadcast %cst_16 : f32 to vector<128x128xf32>
    %20 = arith.maximumf %18, %19 : vector<128x128xf32>
    %21 = arith.truncf %20 : vector<128x128xf32> to vector<128x128xbf16>
    %c0_17 = arith.constant 0 : index
    %c0_18 = arith.constant 0 : index
    %22 = vector.load %arg10[%c0_17, %c0_18] : memref<128x128xbf16, #tpu.memory_space<vmem>>, vector<128x128xbf16>
    tpu.vector_store %arg10[%c0_17, %c0_18], %21 {strides = array<i32>} : memref<128x128xbf16, #tpu.memory_space<vmem>>, vector<128x128xbf16>,
    return
  }
  func.func @transform_0(%arg0: i32, %arg1: i32) -> (i32, i32) {
    %c0_i32 = arith.constant 0 : i32
    %c0_i32_0 = arith.constant 0 : i32
    return %arg0, %c0_i32 : i32, i32
  }
  func.func @transform_1(%arg0: i32, %arg1: i32) -> (i32, i32) {
    %c0_i32 = arith.constant 0 : i32
    %c0_i32_0 = arith.constant 0 : i32
    return %c0_i32, %arg1 : i32, i32
  }
  func.func @transform_2(%arg0: i32, %arg1: i32) -> (i32, i32) {
    %c0_i32 = arith.constant 0 : i32
    %c0_i32_0 = arith.constant 0 : i32
    return %c0_i32, %arg1 : i32, i32
  }
  func.func @transform_3(%arg0: i32, %arg1: i32) -> (i32, i32) {
    %c0_i32 = arith.constant 0 : i32
    %c0_i32_0 = arith.constant 0 : i32
    return %c0_i32, %arg1 : i32, i32
  }
  func.func @transform_4(%arg0: i32, %arg1: i32) -> (i32, i32) {
    %c0_i32 = arith.constant 0 : i32
    %c0_i32_0 = arith.constant 0 : i32
    return %arg0, %c0_i32 : i32, i32
  }
  func.func @transform_5(%arg0: i32, %arg1: i32) -> (i32, i32) {
    %c0_i32 = arith.constant 0 : i32
    %c0_i32_0 = arith.constant 0 : i32
    return %c0_i32, %arg1 : i32, i32
  }
  func.func @transform_6(%arg0: i32, %arg1: i32) -> (i32, i32) {
    %c0_i32 = arith.constant 0 : i32
    %c0_i32_0 = arith.constant 0 : i32
    return %c0_i32, %arg1 : i32, i32
  }
  func.func @transform_7(%arg0: i32, %arg1: i32) -> (i32, i32) {
    %c0_i32 = arith.constant 0 : i32
    %c0_i32_0 = arith.constant 0 : i32
    return %c0_i32, %arg1 : i32, i32
  }
  func.func @transform_8(%arg0: i32, %arg1: i32) -> (i32, i32) {
    %c0_i32 = arith.constant 0 : i32
    return %arg0, %arg1 : i32, i32
  }
}

module attributes {stable_mosaic.version = 11 : i64} {
  func.func @_matmul_epilogue_kernel(%arg0: i32, %arg1: i32, %arg2: i32, %arg3: memref<128x256xbf16, #tpu.memory_space<vmem>>, %arg4: memref<256x128xbf16, #tpu.memory_space<vmem>>, %arg5: memref<1x128xf32, #tpu.memory_space<vmem>>, %arg6: memref<1x128xf32, #tpu.memory_space<vmem>>, %arg7: memref<128x128xbf16, #tpu.memory_space<vmem>>, %arg8: memref<128x128xf32, #tpu.memory_space<vmem>>) attributes {dimension_semantics = [#tpu.dimension_semantics<parallel>, #tpu.dimension_semantics<parallel>, #tpu.dimension_semantics<arbitrary>], iteration_bounds = array<i64: 1, 1, 1>, scalar_prefetch = 0 : i64, scratch_operands = 1 : i64, tpu.core_type = #tpu.core_type<tc>, window_params = [{transform_indices = @transform_0, window_bounds = array<i64: 128, 256>}, {transform_indices = @transform_1, window_bounds = array<i64: 256, 128>}, {transform_indices = @transform_2, window_bounds = array<i64: 1, 128>}, {transform_indices = @transform_3, window_bounds = array<i64: 1, 128>}, {transform_indices = @transform_4, window_bounds = array<i64: 128, 128>}]} {
    %c0_i32 = arith.constant 0 : i32
    %0 = arith.cmpi eq, %arg2, %c0_i32 : i32
    %1 = arith.extui %0 : i1 to i32
    %c0_i32_0 = arith.constant 0 : i32
    %2 = arith.cmpi ne, %1, %c0_i32_0 : i32
    scf.if %2 {
      %cst_10 = arith.constant 0.000000e+00 : f32
      %12 = vector.broadcast %cst_10 : f32 to vector<128x128xf32>
      %c0_11 = arith.constant 0 : index
      %c0_12 = arith.constant 0 : index
      %13 = vector.load %arg8[%c0_11, %c0_12] : memref<128x128xf32, #tpu.memory_space<vmem>>, vector<128x128xf32>
      tpu.vector_store %arg8[%c0_11, %c0_12], %12 {strides = array<i32>} : memref<128x128xf32, #tpu.memory_space<vmem>>, vector<128x128xf32>,
    } else {
    }
    %c0 = arith.constant 0 : index
    %c0_1 = arith.constant 0 : index
    %3 = vector.load %arg8[%c0, %c0_1] : memref<128x128xf32, #tpu.memory_space<vmem>>, vector<128x128xf32>
    %c0_2 = arith.constant 0 : index
    %c0_3 = arith.constant 0 : index
    %4 = vector.load %arg3[%c0_2, %c0_3] : memref<128x256xbf16, #tpu.memory_space<vmem>>, vector<128x256xbf16>
    %c0_4 = arith.constant 0 : index
    %c0_5 = arith.constant 0 : index
    %5 = vector.load %arg4[%c0_4, %c0_5] : memref<256x128xbf16, #tpu.memory_space<vmem>>, vector<256x128xbf16>
    %cst = arith.constant dense<0.000000e+00> : vector<128x128xf32>
    %6 = tpu.matmul %4, %5, %cst {dimension_numbers = #tpu.dot_dimension_numbers<[1], [0], [0], [1], [0, 0, 1, 1], [], []>} : vector<128x256xbf16>, vector<256x128xbf16>, vector<128x128xf32> -> vector<128x128xf32>
    %7 = arith.addf %3, %6 : vector<128x128xf32>
    %c0_6 = arith.constant 0 : index
    %c0_7 = arith.constant 0 : index
    %8 = vector.load %arg8[%c0_6, %c0_7] : memref<128x128xf32, #tpu.memory_space<vmem>>, vector<128x128xf32>
    tpu.vector_store %arg8[%c0_6, %c0_7], %7 {strides = array<i32>} : memref<128x128xf32, #tpu.memory_space<vmem>>, vector<128x128xf32>,
    %c0_i32_8 = arith.constant 0 : i32
    %9 = arith.cmpi eq, %arg2, %c0_i32_8 : i32
    %10 = arith.extui %9 : i1 to i32
    %c0_i32_9 = arith.constant 0 : i32
    %11 = arith.cmpi ne, %10, %c0_i32_9 : i32
    scf.if %11 {
      %c0_10 = arith.constant 0 : index
      %c0_11 = arith.constant 0 : index
      %12 = vector.load %arg8[%c0_10, %c0_11] : memref<128x128xf32, #tpu.memory_space<vmem>>, vector<128x128xf32>
      %c0_12 = arith.constant 0 : index
      %c0_13 = arith.constant 0 : index
      %13 = vector.load %arg5[%c0_12, %c0_13] : memref<1x128xf32, #tpu.memory_space<vmem>>, vector<1x128xf32>
      %14 = vector.broadcast %13 : vector<1x128xf32> to vector<128x128xf32>
      %15 = arith.mulf %12, %14 : vector<128x128xf32>
      %c0_14 = arith.constant 0 : index
      %c0_15 = arith.constant 0 : index
      %16 = vector.load %arg6[%c0_14, %c0_15] : memref<1x128xf32, #tpu.memory_space<vmem>>, vector<1x128xf32>
      %17 = vector.broadcast %16 : vector<1x128xf32> to vector<128x128xf32>
      %18 = arith.addf %15, %17 : vector<128x128xf32>
      %cst_16 = arith.constant 0.000000e+00 : f32
      %19 = vector.broadcast %cst_16 : f32 to vector<128x128xf32>
      %20 = arith.maximumf %18, %19 : vector<128x128xf32>
      %21 = arith.truncf %20 : vector<128x128xf32> to vector<128x128xbf16>
      %c0_17 = arith.constant 0 : index
      %c0_18 = arith.constant 0 : index
      %22 = vector.load %arg7[%c0_17, %c0_18] : memref<128x128xbf16, #tpu.memory_space<vmem>>, vector<128x128xbf16>
      tpu.vector_store %arg7[%c0_17, %c0_18], %21 {strides = array<i32>} : memref<128x128xbf16, #tpu.memory_space<vmem>>, vector<128x128xbf16>,
    } else {
    }
    return
  }
  func.func @transform_0(%arg0: i32, %arg1: i32, %arg2: i32) -> (i32, i32) {
    %c0_i32 = arith.constant 0 : i32
    return %arg0, %arg2 : i32, i32
  }
  func.func @transform_1(%arg0: i32, %arg1: i32, %arg2: i32) -> (i32, i32) {
    %c0_i32 = arith.constant 0 : i32
    return %arg2, %arg1 : i32, i32
  }
  func.func @transform_2(%arg0: i32, %arg1: i32, %arg2: i32) -> (i32, i32) {
    %c0_i32 = arith.constant 0 : i32
    %c0_i32_0 = arith.constant 0 : i32
    return %c0_i32, %arg1 : i32, i32
  }
  func.func @transform_3(%arg0: i32, %arg1: i32, %arg2: i32) -> (i32, i32) {
    %c0_i32 = arith.constant 0 : i32
    %c0_i32_0 = arith.constant 0 : i32
    return %c0_i32, %arg1 : i32, i32
  }
  func.func @transform_4(%arg0: i32, %arg1: i32, %arg2: i32) -> (i32, i32) {
    %c0_i32 = arith.constant 0 : i32
    return %arg0, %arg1 : i32, i32
  }
}

module attributes {stable_mosaic.version = 11 : i64} {
  func.func @_tail_ds_kernel(%arg0: i32, %arg1: i32, %arg2: memref<32x128xbf16, #tpu.memory_space<vmem>>, %arg3: memref<128x128xbf16, #tpu.memory_space<vmem>>, %arg4: memref<1x128xf32, #tpu.memory_space<vmem>>, %arg5: memref<1x128xf32, #tpu.memory_space<vmem>>, %arg6: memref<32x128xbf16, #tpu.memory_space<vmem>>, %arg7: memref<128x128xbf16, #tpu.memory_space<vmem>>, %arg8: memref<1x128xf32, #tpu.memory_space<vmem>>, %arg9: memref<1x128xf32, #tpu.memory_space<vmem>>, %arg10: memref<32x128xbf16, #tpu.memory_space<vmem>>) attributes {dimension_semantics = [#tpu.dimension_semantics<parallel>, #tpu.dimension_semantics<parallel>], iteration_bounds = array<i64: 1, 1>, scalar_prefetch = 0 : i64, scratch_operands = 0 : i64, tpu.core_type = #tpu.core_type<tc>, window_params = [{transform_indices = @transform_0, window_bounds = array<i64: 32, 128>}, {transform_indices = @transform_1, window_bounds = array<i64: 128, 128>}, {transform_indices = @transform_2, window_bounds = array<i64: 1, 128>}, {transform_indices = @transform_3, window_bounds = array<i64: 1, 128>}, {transform_indices = @transform_4, window_bounds = array<i64: 32, 128>}, {transform_indices = @transform_5, window_bounds = array<i64: 128, 128>}, {transform_indices = @transform_6, window_bounds = array<i64: 1, 128>}, {transform_indices = @transform_7, window_bounds = array<i64: 1, 128>}, {transform_indices = @transform_8, window_bounds = array<i64: 32, 128>}]} {
    %c0 = arith.constant 0 : index
    %c0_0 = arith.constant 0 : index
    %0 = vector.load %arg2[%c0, %c0_0] : memref<32x128xbf16, #tpu.memory_space<vmem>>, vector<32x128xbf16>
    %c0_1 = arith.constant 0 : index
    %c0_2 = arith.constant 0 : index
    %1 = vector.load %arg3[%c0_1, %c0_2] : memref<128x128xbf16, #tpu.memory_space<vmem>>, vector<128x128xbf16>
    %cst = arith.constant dense<0.000000e+00> : vector<32x128xf32>
    %2 = tpu.matmul %0, %1, %cst {dimension_numbers = #tpu.dot_dimension_numbers<[1], [0], [0], [1], [0, 0, 1, 1], [], []>} : vector<32x128xbf16>, vector<128x128xbf16>, vector<32x128xf32> -> vector<32x128xf32>
    %c0_3 = arith.constant 0 : index
    %c0_4 = arith.constant 0 : index
    %3 = vector.load %arg4[%c0_3, %c0_4] : memref<1x128xf32, #tpu.memory_space<vmem>>, vector<1x128xf32>
    %4 = vector.broadcast %3 : vector<1x128xf32> to vector<32x128xf32>
    %5 = arith.mulf %2, %4 : vector<32x128xf32>
    %c0_5 = arith.constant 0 : index
    %c0_6 = arith.constant 0 : index
    %6 = vector.load %arg5[%c0_5, %c0_6] : memref<1x128xf32, #tpu.memory_space<vmem>>, vector<1x128xf32>
    %7 = vector.broadcast %6 : vector<1x128xf32> to vector<32x128xf32>
    %8 = arith.addf %5, %7 : vector<32x128xf32>
    %c0_7 = arith.constant 0 : index
    %c0_8 = arith.constant 0 : index
    %9 = vector.load %arg6[%c0_7, %c0_8] : memref<32x128xbf16, #tpu.memory_space<vmem>>, vector<32x128xbf16>
    %c0_9 = arith.constant 0 : index
    %c0_10 = arith.constant 0 : index
    %10 = vector.load %arg7[%c0_9, %c0_10] : memref<128x128xbf16, #tpu.memory_space<vmem>>, vector<128x128xbf16>
    %cst_11 = arith.constant dense<0.000000e+00> : vector<32x128xf32>
    %11 = tpu.matmul %9, %10, %cst_11 {dimension_numbers = #tpu.dot_dimension_numbers<[1], [0], [0], [1], [0, 0, 1, 1], [], []>} : vector<32x128xbf16>, vector<128x128xbf16>, vector<32x128xf32> -> vector<32x128xf32>
    %c0_12 = arith.constant 0 : index
    %c0_13 = arith.constant 0 : index
    %12 = vector.load %arg8[%c0_12, %c0_13] : memref<1x128xf32, #tpu.memory_space<vmem>>, vector<1x128xf32>
    %13 = vector.broadcast %12 : vector<1x128xf32> to vector<32x128xf32>
    %14 = arith.mulf %11, %13 : vector<32x128xf32>
    %c0_14 = arith.constant 0 : index
    %c0_15 = arith.constant 0 : index
    %15 = vector.load %arg9[%c0_14, %c0_15] : memref<1x128xf32, #tpu.memory_space<vmem>>, vector<1x128xf32>
    %16 = vector.broadcast %15 : vector<1x128xf32> to vector<32x128xf32>
    %17 = arith.addf %14, %16 : vector<32x128xf32>
    %18 = arith.addf %8, %17 : vector<32x128xf32>
    %cst_16 = arith.constant 0.000000e+00 : f32
    %19 = vector.broadcast %cst_16 : f32 to vector<32x128xf32>
    %20 = arith.maximumf %18, %19 : vector<32x128xf32>
    %21 = arith.truncf %20 : vector<32x128xf32> to vector<32x128xbf16>
    %c0_17 = arith.constant 0 : index
    %c0_18 = arith.constant 0 : index
    %22 = vector.load %arg10[%c0_17, %c0_18] : memref<32x128xbf16, #tpu.memory_space<vmem>>, vector<32x128xbf16>
    tpu.vector_store %arg10[%c0_17, %c0_18], %21 {strides = array<i32>} : memref<32x128xbf16, #tpu.memory_space<vmem>>, vector<32x128xbf16>,
    return
  }
  func.func @transform_0(%arg0: i32, %arg1: i32) -> (i32, i32) {
    %c0_i32 = arith.constant 0 : i32
    %c0_i32_0 = arith.constant 0 : i32
    return %arg0, %c0_i32 : i32, i32
  }
  func.func @transform_1(%arg0: i32, %arg1: i32) -> (i32, i32) {
    %c0_i32 = arith.constant 0 : i32
    %c0_i32_0 = arith.constant 0 : i32
    return %c0_i32, %arg1 : i32, i32
  }
  func.func @transform_2(%arg0: i32, %arg1: i32) -> (i32, i32) {
    %c0_i32 = arith.constant 0 : i32
    %c0_i32_0 = arith.constant 0 : i32
    return %c0_i32, %arg1 : i32, i32
  }
  func.func @transform_3(%arg0: i32, %arg1: i32) -> (i32, i32) {
    %c0_i32 = arith.constant 0 : i32
    %c0_i32_0 = arith.constant 0 : i32
    return %c0_i32, %arg1 : i32, i32
  }
  func.func @transform_4(%arg0: i32, %arg1: i32) -> (i32, i32) {
    %c0_i32 = arith.constant 0 : i32
    %c0_i32_0 = arith.constant 0 : i32
    return %arg0, %c0_i32 : i32, i32
  }
  func.func @transform_5(%arg0: i32, %arg1: i32) -> (i32, i32) {
    %c0_i32 = arith.constant 0 : i32
    %c0_i32_0 = arith.constant 0 : i32
    return %c0_i32, %arg1 : i32, i32
  }
  func.func @transform_6(%arg0: i32, %arg1: i32) -> (i32, i32) {
    %c0_i32 = arith.constant 0 : i32
    %c0_i32_0 = arith.constant 0 : i32
    return %c0_i32, %arg1 : i32, i32
  }
  func.func @transform_7(%arg0: i32, %arg1: i32) -> (i32, i32) {
    %c0_i32 = arith.constant 0 : i32
    %c0_i32_0 = arith.constant 0 : i32
    return %c0_i32, %arg1 : i32, i32
  }
  func.func @transform_8(%arg0: i32, %arg1: i32) -> (i32, i32) {
    %c0_i32 = arith.constant 0 : i32
    return %arg0, %arg1 : i32, i32
  }
}

module attributes {stable_mosaic.version = 11 : i64} {
  func.func @kernel(%arg0: memref<8x2x4x256xbf16, #tpu.memory_space<vmem>>, %arg1: memref<8x2x4x256xbf16, #tpu.memory_space<vmem>>, %arg2: memref<8x4x128xbf16, #tpu.memory_space<vmem>>, %arg3: memref<8x4x128xbf16, #tpu.memory_space<vmem>>) attributes {dimension_semantics = [], scalar_prefetch = 0 : i64, scratch_operands = 0 : i64, tpu.core_type = #tpu.core_type<tc>} {
    %c0 = arith.constant 0 : index
    %c0_0 = arith.constant 0 : index
    %c0_1 = arith.constant 0 : index
    %c0_2 = arith.constant 0 : index
    %0 = vector.load %arg0[%c0, %c0_0, %c0_1, %c0_2] : memref<8x2x4x256xbf16, #tpu.memory_space<vmem>>, vector<8x2x4x256xbf16>
    %1 = vector.extract_strided_slice %0 {offsets = [0, 0, 0, 0], sizes = [8, 1, 4, 256], strides = [1, 1, 1, 1]} : vector<8x2x4x256xbf16> to vector<8x1x4x256xbf16>
    %2 = vector.shape_cast %1 : vector<8x1x4x256xbf16> to vector<8x4x256xbf16>
    %3 = arith.extf %2 : vector<8x4x256xbf16> to vector<8x4x256xf32>
    %4 = vector.extract_strided_slice %0 {offsets = [0, 1, 0, 0], sizes = [8, 1, 4, 256], strides = [1, 1, 1, 1]} : vector<8x2x4x256xbf16> to vector<8x1x4x256xbf16>
    %5 = vector.shape_cast %4 : vector<8x1x4x256xbf16> to vector<8x4x256xbf16>
    %6 = arith.extf %5 : vector<8x4x256xbf16> to vector<8x4x256xf32>
    %7 = vector.extract_strided_slice %3 {offsets = [0, 0, 0], sizes = [8, 4, 128], strides = [1, 1, 1]} : vector<8x4x256xf32> to vector<8x4x128xf32>
    %8 = vector.extract_strided_slice %3 {offsets = [0, 0, 128], sizes = [8, 4, 128], strides = [1, 1, 1]} : vector<8x4x256xf32> to vector<8x4x128xf32>
    %9 = arith.addf %7, %8 : vector<8x4x128xf32>
    %10 = vector.extract_strided_slice %6 {offsets = [0, 0, 0], sizes = [8, 4, 128], strides = [1, 1, 1]} : vector<8x4x256xf32> to vector<8x4x128xf32>
    %11 = arith.addf %9, %10 : vector<8x4x128xf32>
    %12 = vector.extract_strided_slice %6 {offsets = [0, 0, 128], sizes = [8, 4, 128], strides = [1, 1, 1]} : vector<8x4x256xf32> to vector<8x4x128xf32>
    %13 = arith.addf %11, %12 : vector<8x4x128xf32>
    %cst = arith.constant 2.500000e-01 : f32
    %14 = vector.broadcast %cst : f32 to vector<8x4x128xf32>
    %15 = arith.mulf %13, %14 : vector<8x4x128xf32>
    %16 = arith.truncf %15 : vector<8x4x128xf32> to vector<8x4x128xbf16>
    %c0_3 = arith.constant 0 : index
    %c0_4 = arith.constant 0 : index
    %c0_5 = arith.constant 0 : index
    %17 = vector.load %arg2[%c0_3, %c0_4, %c0_5] : memref<8x4x128xbf16, #tpu.memory_space<vmem>>, vector<8x4x128xbf16>
    tpu.vector_store %arg2[%c0_3, %c0_4, %c0_5], %16 {strides = array<i32>} : memref<8x4x128xbf16, #tpu.memory_space<vmem>>, vector<8x4x128xbf16>,
    %c0_6 = arith.constant 0 : index
    %c0_7 = arith.constant 0 : index
    %c0_8 = arith.constant 0 : index
    %c0_9 = arith.constant 0 : index
    %18 = vector.load %arg1[%c0_6, %c0_7, %c0_8, %c0_9] : memref<8x2x4x256xbf16, #tpu.memory_space<vmem>>, vector<8x2x4x256xbf16>
    %19 = vector.extract_strided_slice %18 {offsets = [0, 0, 0, 0], sizes = [8, 1, 4, 256], strides = [1, 1, 1, 1]} : vector<8x2x4x256xbf16> to vector<8x1x4x256xbf16>
    %20 = vector.shape_cast %19 : vector<8x1x4x256xbf16> to vector<8x4x256xbf16>
    %21 = arith.extf %20 : vector<8x4x256xbf16> to vector<8x4x256xf32>
    %22 = vector.extract_strided_slice %18 {offsets = [0, 1, 0, 0], sizes = [8, 1, 4, 256], strides = [1, 1, 1, 1]} : vector<8x2x4x256xbf16> to vector<8x1x4x256xbf16>
    %23 = vector.shape_cast %22 : vector<8x1x4x256xbf16> to vector<8x4x256xbf16>
    %24 = arith.extf %23 : vector<8x4x256xbf16> to vector<8x4x256xf32>
    %25 = vector.extract_strided_slice %21 {offsets = [0, 0, 0], sizes = [8, 4, 128], strides = [1, 1, 1]} : vector<8x4x256xf32> to vector<8x4x128xf32>
    %26 = vector.extract_strided_slice %21 {offsets = [0, 0, 128], sizes = [8, 4, 128], strides = [1, 1, 1]} : vector<8x4x256xf32> to vector<8x4x128xf32>
    %27 = arith.addf %25, %26 : vector<8x4x128xf32>
    %28 = vector.extract_strided_slice %24 {offsets = [0, 0, 0], sizes = [8, 4, 128], strides = [1, 1, 1]} : vector<8x4x256xf32> to vector<8x4x128xf32>
    %29 = arith.addf %27, %28 : vector<8x4x128xf32>
    %30 = vector.extract_strided_slice %24 {offsets = [0, 0, 128], sizes = [8, 4, 128], strides = [1, 1, 1]} : vector<8x4x256xf32> to vector<8x4x128xf32>
    %31 = arith.addf %29, %30 : vector<8x4x128xf32>
    %cst_10 = arith.constant 2.500000e-01 : f32
    %32 = vector.broadcast %cst_10 : f32 to vector<8x4x128xf32>
    %33 = arith.mulf %31, %32 : vector<8x4x128xf32>
    %34 = arith.truncf %33 : vector<8x4x128xf32> to vector<8x4x128xbf16>
    %c0_11 = arith.constant 0 : index
    %c0_12 = arith.constant 0 : index
    %c0_13 = arith.constant 0 : index
    %35 = vector.load %arg3[%c0_11, %c0_12, %c0_13] : memref<8x4x128xbf16, #tpu.memory_space<vmem>>, vector<8x4x128xbf16>
    tpu.vector_store %arg3[%c0_11, %c0_12, %c0_13], %34 {strides = array<i32>} : memref<8x4x128xbf16, #tpu.memory_space<vmem>>, vector<8x4x128xbf16>,
    return
  }
}

module attributes {stable_mosaic.version = 11 : i64} {
  func.func @_matmul_epilogue_kernel(%arg0: i32, %arg1: i32, %arg2: i32, %arg3: memref<32x128xbf16, #tpu.memory_space<vmem>>, %arg4: memref<128x128xbf16, #tpu.memory_space<vmem>>, %arg5: memref<1x128xf32, #tpu.memory_space<vmem>>, %arg6: memref<1x128xf32, #tpu.memory_space<vmem>>, %arg7: memref<32x128xbf16, #tpu.memory_space<vmem>>, %arg8: memref<32x128xf32, #tpu.memory_space<vmem>>) attributes {dimension_semantics = [#tpu.dimension_semantics<parallel>, #tpu.dimension_semantics<parallel>, #tpu.dimension_semantics<arbitrary>], iteration_bounds = array<i64: 1, 1, 1>, scalar_prefetch = 0 : i64, scratch_operands = 1 : i64, tpu.core_type = #tpu.core_type<tc>, window_params = [{transform_indices = @transform_0, window_bounds = array<i64: 32, 128>}, {transform_indices = @transform_1, window_bounds = array<i64: 128, 128>}, {transform_indices = @transform_2, window_bounds = array<i64: 1, 128>}, {transform_indices = @transform_3, window_bounds = array<i64: 1, 128>}, {transform_indices = @transform_4, window_bounds = array<i64: 32, 128>}]} {
    %c0_i32 = arith.constant 0 : i32
    %0 = arith.cmpi eq, %arg2, %c0_i32 : i32
    %1 = arith.extui %0 : i1 to i32
    %c0_i32_0 = arith.constant 0 : i32
    %2 = arith.cmpi ne, %1, %c0_i32_0 : i32
    scf.if %2 {
      %cst_10 = arith.constant 0.000000e+00 : f32
      %12 = vector.broadcast %cst_10 : f32 to vector<32x128xf32>
      %c0_11 = arith.constant 0 : index
      %c0_12 = arith.constant 0 : index
      %13 = vector.load %arg8[%c0_11, %c0_12] : memref<32x128xf32, #tpu.memory_space<vmem>>, vector<32x128xf32>
      tpu.vector_store %arg8[%c0_11, %c0_12], %12 {strides = array<i32>} : memref<32x128xf32, #tpu.memory_space<vmem>>, vector<32x128xf32>,
    } else {
    }
    %c0 = arith.constant 0 : index
    %c0_1 = arith.constant 0 : index
    %3 = vector.load %arg8[%c0, %c0_1] : memref<32x128xf32, #tpu.memory_space<vmem>>, vector<32x128xf32>
    %c0_2 = arith.constant 0 : index
    %c0_3 = arith.constant 0 : index
    %4 = vector.load %arg3[%c0_2, %c0_3] : memref<32x128xbf16, #tpu.memory_space<vmem>>, vector<32x128xbf16>
    %c0_4 = arith.constant 0 : index
    %c0_5 = arith.constant 0 : index
    %5 = vector.load %arg4[%c0_4, %c0_5] : memref<128x128xbf16, #tpu.memory_space<vmem>>, vector<128x128xbf16>
    %cst = arith.constant dense<0.000000e+00> : vector<32x128xf32>
    %6 = tpu.matmul %4, %5, %cst {dimension_numbers = #tpu.dot_dimension_numbers<[1], [0], [0], [1], [0, 0, 1, 1], [], []>} : vector<32x128xbf16>, vector<128x128xbf16>, vector<32x128xf32> -> vector<32x128xf32>
    %7 = arith.addf %3, %6 : vector<32x128xf32>
    %c0_6 = arith.constant 0 : index
    %c0_7 = arith.constant 0 : index
    %8 = vector.load %arg8[%c0_6, %c0_7] : memref<32x128xf32, #tpu.memory_space<vmem>>, vector<32x128xf32>
    tpu.vector_store %arg8[%c0_6, %c0_7], %7 {strides = array<i32>} : memref<32x128xf32, #tpu.memory_space<vmem>>, vector<32x128xf32>,
    %c0_i32_8 = arith.constant 0 : i32
    %9 = arith.cmpi eq, %arg2, %c0_i32_8 : i32
    %10 = arith.extui %9 : i1 to i32
    %c0_i32_9 = arith.constant 0 : i32
    %11 = arith.cmpi ne, %10, %c0_i32_9 : i32
    scf.if %11 {
      %c0_10 = arith.constant 0 : index
      %c0_11 = arith.constant 0 : index
      %12 = vector.load %arg8[%c0_10, %c0_11] : memref<32x128xf32, #tpu.memory_space<vmem>>, vector<32x128xf32>
      %c0_12 = arith.constant 0 : index
      %c0_13 = arith.constant 0 : index
      %13 = vector.load %arg5[%c0_12, %c0_13] : memref<1x128xf32, #tpu.memory_space<vmem>>, vector<1x128xf32>
      %14 = vector.broadcast %13 : vector<1x128xf32> to vector<32x128xf32>
      %15 = arith.mulf %12, %14 : vector<32x128xf32>
      %c0_14 = arith.constant 0 : index
      %c0_15 = arith.constant 0 : index
      %16 = vector.load %arg6[%c0_14, %c0_15] : memref<1x128xf32, #tpu.memory_space<vmem>>, vector<1x128xf32>
      %17 = vector.broadcast %16 : vector<1x128xf32> to vector<32x128xf32>
      %18 = arith.addf %15, %17 : vector<32x128xf32>
      %cst_16 = arith.constant 0.000000e+00 : f32
      %19 = vector.broadcast %cst_16 : f32 to vector<32x128xf32>
      %20 = arith.maximumf %18, %19 : vector<32x128xf32>
      %21 = arith.truncf %20 : vector<32x128xf32> to vector<32x128xbf16>
      %c0_17 = arith.constant 0 : index
      %c0_18 = arith.constant 0 : index
      %22 = vector.load %arg7[%c0_17, %c0_18] : memref<32x128xbf16, #tpu.memory_space<vmem>>, vector<32x128xbf16>
      tpu.vector_store %arg7[%c0_17, %c0_18], %21 {strides = array<i32>} : memref<32x128xbf16, #tpu.memory_space<vmem>>, vector<32x128xbf16>,
    } else {
    }
    return
  }
  func.func @transform_0(%arg0: i32, %arg1: i32, %arg2: i32) -> (i32, i32) {
    %c0_i32 = arith.constant 0 : i32
    return %arg0, %arg2 : i32, i32
  }
  func.func @transform_1(%arg0: i32, %arg1: i32, %arg2: i32) -> (i32, i32) {
    %c0_i32 = arith.constant 0 : i32
    return %arg2, %arg1 : i32, i32
  }
  func.func @transform_2(%arg0: i32, %arg1: i32, %arg2: i32) -> (i32, i32) {
    %c0_i32 = arith.constant 0 : i32
    %c0_i32_0 = arith.constant 0 : i32
    return %c0_i32, %arg1 : i32, i32
  }
  func.func @transform_3(%arg0: i32, %arg1: i32, %arg2: i32) -> (i32, i32) {
    %c0_i32 = arith.constant 0 : i32
    %c0_i32_0 = arith.constant 0 : i32
    return %c0_i32, %arg1 : i32, i32
  }
  func.func @transform_4(%arg0: i32, %arg1: i32, %arg2: i32) -> (i32, i32) {
    %c0_i32 = arith.constant 0 : i32
    return %arg0, %arg1 : i32, i32
  }
}

module attributes {stable_mosaic.version = 11 : i64} {
  func.func @_matmul_epilogue_kernel(%arg0: i32, %arg1: i32, %arg2: i32, %arg3: memref<32x384xbf16, #tpu.memory_space<vmem>>, %arg4: memref<384x128xbf16, #tpu.memory_space<vmem>>, %arg5: memref<1x128xf32, #tpu.memory_space<vmem>>, %arg6: memref<1x128xf32, #tpu.memory_space<vmem>>, %arg7: memref<32x128xbf16, #tpu.memory_space<vmem>>, %arg8: memref<32x128xf32, #tpu.memory_space<vmem>>) attributes {dimension_semantics = [#tpu.dimension_semantics<parallel>, #tpu.dimension_semantics<parallel>, #tpu.dimension_semantics<arbitrary>], iteration_bounds = array<i64: 1, 1, 1>, scalar_prefetch = 0 : i64, scratch_operands = 1 : i64, tpu.core_type = #tpu.core_type<tc>, window_params = [{transform_indices = @transform_0, window_bounds = array<i64: 32, 384>}, {transform_indices = @transform_1, window_bounds = array<i64: 384, 128>}, {transform_indices = @transform_2, window_bounds = array<i64: 1, 128>}, {transform_indices = @transform_3, window_bounds = array<i64: 1, 128>}, {transform_indices = @transform_4, window_bounds = array<i64: 32, 128>}]} {
    %c0_i32 = arith.constant 0 : i32
    %0 = arith.cmpi eq, %arg2, %c0_i32 : i32
    %1 = arith.extui %0 : i1 to i32
    %c0_i32_0 = arith.constant 0 : i32
    %2 = arith.cmpi ne, %1, %c0_i32_0 : i32
    scf.if %2 {
      %cst_10 = arith.constant 0.000000e+00 : f32
      %12 = vector.broadcast %cst_10 : f32 to vector<32x128xf32>
      %c0_11 = arith.constant 0 : index
      %c0_12 = arith.constant 0 : index
      %13 = vector.load %arg8[%c0_11, %c0_12] : memref<32x128xf32, #tpu.memory_space<vmem>>, vector<32x128xf32>
      tpu.vector_store %arg8[%c0_11, %c0_12], %12 {strides = array<i32>} : memref<32x128xf32, #tpu.memory_space<vmem>>, vector<32x128xf32>,
    } else {
    }
    %c0 = arith.constant 0 : index
    %c0_1 = arith.constant 0 : index
    %3 = vector.load %arg8[%c0, %c0_1] : memref<32x128xf32, #tpu.memory_space<vmem>>, vector<32x128xf32>
    %c0_2 = arith.constant 0 : index
    %c0_3 = arith.constant 0 : index
    %4 = vector.load %arg3[%c0_2, %c0_3] : memref<32x384xbf16, #tpu.memory_space<vmem>>, vector<32x384xbf16>
    %c0_4 = arith.constant 0 : index
    %c0_5 = arith.constant 0 : index
    %5 = vector.load %arg4[%c0_4, %c0_5] : memref<384x128xbf16, #tpu.memory_space<vmem>>, vector<384x128xbf16>
    %cst = arith.constant dense<0.000000e+00> : vector<32x128xf32>
    %6 = tpu.matmul %4, %5, %cst {dimension_numbers = #tpu.dot_dimension_numbers<[1], [0], [0], [1], [0, 0, 1, 1], [], []>} : vector<32x384xbf16>, vector<384x128xbf16>, vector<32x128xf32> -> vector<32x128xf32>
    %7 = arith.addf %3, %6 : vector<32x128xf32>
    %c0_6 = arith.constant 0 : index
    %c0_7 = arith.constant 0 : index
    %8 = vector.load %arg8[%c0_6, %c0_7] : memref<32x128xf32, #tpu.memory_space<vmem>>, vector<32x128xf32>
    tpu.vector_store %arg8[%c0_6, %c0_7], %7 {strides = array<i32>} : memref<32x128xf32, #tpu.memory_space<vmem>>, vector<32x128xf32>,
    %c0_i32_8 = arith.constant 0 : i32
    %9 = arith.cmpi eq, %arg2, %c0_i32_8 : i32
    %10 = arith.extui %9 : i1 to i32
    %c0_i32_9 = arith.constant 0 : i32
    %11 = arith.cmpi ne, %10, %c0_i32_9 : i32
    scf.if %11 {
      %c0_10 = arith.constant 0 : index
      %c0_11 = arith.constant 0 : index
      %12 = vector.load %arg8[%c0_10, %c0_11] : memref<32x128xf32, #tpu.memory_space<vmem>>, vector<32x128xf32>
      %c0_12 = arith.constant 0 : index
      %c0_13 = arith.constant 0 : index
      %13 = vector.load %arg5[%c0_12, %c0_13] : memref<1x128xf32, #tpu.memory_space<vmem>>, vector<1x128xf32>
      %14 = vector.broadcast %13 : vector<1x128xf32> to vector<32x128xf32>
      %15 = arith.mulf %12, %14 : vector<32x128xf32>
      %c0_14 = arith.constant 0 : index
      %c0_15 = arith.constant 0 : index
      %16 = vector.load %arg6[%c0_14, %c0_15] : memref<1x128xf32, #tpu.memory_space<vmem>>, vector<1x128xf32>
      %17 = vector.broadcast %16 : vector<1x128xf32> to vector<32x128xf32>
      %18 = arith.addf %15, %17 : vector<32x128xf32>
      %cst_16 = arith.constant 0.000000e+00 : f32
      %19 = vector.broadcast %cst_16 : f32 to vector<32x128xf32>
      %20 = arith.maximumf %18, %19 : vector<32x128xf32>
      %21 = arith.truncf %20 : vector<32x128xf32> to vector<32x128xbf16>
      %c0_17 = arith.constant 0 : index
      %c0_18 = arith.constant 0 : index
      %22 = vector.load %arg7[%c0_17, %c0_18] : memref<32x128xbf16, #tpu.memory_space<vmem>>, vector<32x128xbf16>
      tpu.vector_store %arg7[%c0_17, %c0_18], %21 {strides = array<i32>} : memref<32x128xbf16, #tpu.memory_space<vmem>>, vector<32x128xbf16>,
    } else {
    }
    return
  }
  func.func @transform_0(%arg0: i32, %arg1: i32, %arg2: i32) -> (i32, i32) {
    %c0_i32 = arith.constant 0 : i32
    return %arg0, %arg2 : i32, i32
  }
  func.func @transform_1(%arg0: i32, %arg1: i32, %arg2: i32) -> (i32, i32) {
    %c0_i32 = arith.constant 0 : i32
    return %arg2, %arg1 : i32, i32
  }
  func.func @transform_2(%arg0: i32, %arg1: i32, %arg2: i32) -> (i32, i32) {
    %c0_i32 = arith.constant 0 : i32
    %c0_i32_0 = arith.constant 0 : i32
    return %c0_i32, %arg1 : i32, i32
  }
  func.func @transform_3(%arg0: i32, %arg1: i32, %arg2: i32) -> (i32, i32) {
    %c0_i32 = arith.constant 0 : i32
    %c0_i32_0 = arith.constant 0 : i32
    return %c0_i32, %arg1 : i32, i32
  }
  func.func @transform_4(%arg0: i32, %arg1: i32, %arg2: i32) -> (i32, i32) {
    %c0_i32 = arith.constant 0 : i32
    return %arg0, %arg1 : i32, i32
  }
}

module attributes {stable_mosaic.version = 11 : i64} {
  func.func @_matmul_epilogue_kernel(%arg0: i32, %arg1: i32, %arg2: i32, %arg3: memref<8x128xbf16, #tpu.memory_space<vmem>>, %arg4: memref<128x128xbf16, #tpu.memory_space<vmem>>, %arg5: memref<1x128xf32, #tpu.memory_space<vmem>>, %arg6: memref<1x128xf32, #tpu.memory_space<vmem>>, %arg7: memref<8x128xbf16, #tpu.memory_space<vmem>>, %arg8: memref<8x128xf32, #tpu.memory_space<vmem>>) attributes {dimension_semantics = [#tpu.dimension_semantics<parallel>, #tpu.dimension_semantics<parallel>, #tpu.dimension_semantics<arbitrary>], iteration_bounds = array<i64: 1, 1, 1>, scalar_prefetch = 0 : i64, scratch_operands = 1 : i64, tpu.core_type = #tpu.core_type<tc>, window_params = [{transform_indices = @transform_0, window_bounds = array<i64: 8, 128>}, {transform_indices = @transform_1, window_bounds = array<i64: 128, 128>}, {transform_indices = @transform_2, window_bounds = array<i64: 1, 128>}, {transform_indices = @transform_3, window_bounds = array<i64: 1, 128>}, {transform_indices = @transform_4, window_bounds = array<i64: 8, 128>}]} {
    %c0_i32 = arith.constant 0 : i32
    %0 = arith.cmpi eq, %arg2, %c0_i32 : i32
    %1 = arith.extui %0 : i1 to i32
    %c0_i32_0 = arith.constant 0 : i32
    %2 = arith.cmpi ne, %1, %c0_i32_0 : i32
    scf.if %2 {
      %cst_10 = arith.constant 0.000000e+00 : f32
      %12 = vector.broadcast %cst_10 : f32 to vector<8x128xf32>
      %c0_11 = arith.constant 0 : index
      %c0_12 = arith.constant 0 : index
      %13 = vector.load %arg8[%c0_11, %c0_12] : memref<8x128xf32, #tpu.memory_space<vmem>>, vector<8x128xf32>
      tpu.vector_store %arg8[%c0_11, %c0_12], %12 {strides = array<i32>} : memref<8x128xf32, #tpu.memory_space<vmem>>, vector<8x128xf32>,
    } else {
    }
    %c0 = arith.constant 0 : index
    %c0_1 = arith.constant 0 : index
    %3 = vector.load %arg8[%c0, %c0_1] : memref<8x128xf32, #tpu.memory_space<vmem>>, vector<8x128xf32>
    %c0_2 = arith.constant 0 : index
    %c0_3 = arith.constant 0 : index
    %4 = vector.load %arg3[%c0_2, %c0_3] : memref<8x128xbf16, #tpu.memory_space<vmem>>, vector<8x128xbf16>
    %c0_4 = arith.constant 0 : index
    %c0_5 = arith.constant 0 : index
    %5 = vector.load %arg4[%c0_4, %c0_5] : memref<128x128xbf16, #tpu.memory_space<vmem>>, vector<128x128xbf16>
    %cst = arith.constant dense<0.000000e+00> : vector<8x128xf32>
    %6 = tpu.matmul %4, %5, %cst {dimension_numbers = #tpu.dot_dimension_numbers<[1], [0], [0], [1], [0, 0, 1, 1], [], []>} : vector<8x128xbf16>, vector<128x128xbf16>, vector<8x128xf32> -> vector<8x128xf32>
    %7 = arith.addf %3, %6 : vector<8x128xf32>
    %c0_6 = arith.constant 0 : index
    %c0_7 = arith.constant 0 : index
    %8 = vector.load %arg8[%c0_6, %c0_7] : memref<8x128xf32, #tpu.memory_space<vmem>>, vector<8x128xf32>
    tpu.vector_store %arg8[%c0_6, %c0_7], %7 {strides = array<i32>} : memref<8x128xf32, #tpu.memory_space<vmem>>, vector<8x128xf32>,
    %c0_i32_8 = arith.constant 0 : i32
    %9 = arith.cmpi eq, %arg2, %c0_i32_8 : i32
    %10 = arith.extui %9 : i1 to i32
    %c0_i32_9 = arith.constant 0 : i32
    %11 = arith.cmpi ne, %10, %c0_i32_9 : i32
    scf.if %11 {
      %c0_10 = arith.constant 0 : index
      %c0_11 = arith.constant 0 : index
      %12 = vector.load %arg8[%c0_10, %c0_11] : memref<8x128xf32, #tpu.memory_space<vmem>>, vector<8x128xf32>
      %c0_12 = arith.constant 0 : index
      %c0_13 = arith.constant 0 : index
      %13 = vector.load %arg5[%c0_12, %c0_13] : memref<1x128xf32, #tpu.memory_space<vmem>>, vector<1x128xf32>
      %14 = vector.broadcast %13 : vector<1x128xf32> to vector<8x128xf32>
      %15 = arith.mulf %12, %14 : vector<8x128xf32>
      %c0_14 = arith.constant 0 : index
      %c0_15 = arith.constant 0 : index
      %16 = vector.load %arg6[%c0_14, %c0_15] : memref<1x128xf32, #tpu.memory_space<vmem>>, vector<1x128xf32>
      %17 = vector.broadcast %16 : vector<1x128xf32> to vector<8x128xf32>
      %18 = arith.addf %15, %17 : vector<8x128xf32>
      %cst_16 = arith.constant 0.000000e+00 : f32
      %19 = vector.broadcast %cst_16 : f32 to vector<8x128xf32>
      %20 = arith.maximumf %18, %19 : vector<8x128xf32>
      %21 = arith.truncf %20 : vector<8x128xf32> to vector<8x128xbf16>
      %c0_17 = arith.constant 0 : index
      %c0_18 = arith.constant 0 : index
      %22 = vector.load %arg7[%c0_17, %c0_18] : memref<8x128xbf16, #tpu.memory_space<vmem>>, vector<8x128xbf16>
      tpu.vector_store %arg7[%c0_17, %c0_18], %21 {strides = array<i32>} : memref<8x128xbf16, #tpu.memory_space<vmem>>, vector<8x128xbf16>,
    } else {
    }
    return
  }
  func.func @transform_0(%arg0: i32, %arg1: i32, %arg2: i32) -> (i32, i32) {
    %c0_i32 = arith.constant 0 : i32
    return %arg0, %arg2 : i32, i32
  }
  func.func @transform_1(%arg0: i32, %arg1: i32, %arg2: i32) -> (i32, i32) {
    %c0_i32 = arith.constant 0 : i32
    return %arg2, %arg1 : i32, i32
  }
  func.func @transform_2(%arg0: i32, %arg1: i32, %arg2: i32) -> (i32, i32) {
    %c0_i32 = arith.constant 0 : i32
    %c0_i32_0 = arith.constant 0 : i32
    return %c0_i32, %arg1 : i32, i32
  }
  func.func @transform_3(%arg0: i32, %arg1: i32, %arg2: i32) -> (i32, i32) {
    %c0_i32 = arith.constant 0 : i32
    %c0_i32_0 = arith.constant 0 : i32
    return %c0_i32, %arg1 : i32, i32
  }
  func.func @transform_4(%arg0: i32, %arg1: i32, %arg2: i32) -> (i32, i32) {
    %c0_i32 = arith.constant 0 : i32
    return %arg0, %arg1 : i32, i32
  }
}

module attributes {stable_mosaic.version = 11 : i64} {
  func.func @_tail_ds_kernel(%arg0: i32, %arg1: i32, %arg2: memref<8x128xbf16, #tpu.memory_space<vmem>>, %arg3: memref<128x128xbf16, #tpu.memory_space<vmem>>, %arg4: memref<1x128xf32, #tpu.memory_space<vmem>>, %arg5: memref<1x128xf32, #tpu.memory_space<vmem>>, %arg6: memref<8x128xbf16, #tpu.memory_space<vmem>>, %arg7: memref<128x128xbf16, #tpu.memory_space<vmem>>, %arg8: memref<1x128xf32, #tpu.memory_space<vmem>>, %arg9: memref<1x128xf32, #tpu.memory_space<vmem>>, %arg10: memref<8x128xbf16, #tpu.memory_space<vmem>>) attributes {dimension_semantics = [#tpu.dimension_semantics<parallel>, #tpu.dimension_semantics<parallel>], iteration_bounds = array<i64: 1, 1>, scalar_prefetch = 0 : i64, scratch_operands = 0 : i64, tpu.core_type = #tpu.core_type<tc>, window_params = [{transform_indices = @transform_0, window_bounds = array<i64: 8, 128>}, {transform_indices = @transform_1, window_bounds = array<i64: 128, 128>}, {transform_indices = @transform_2, window_bounds = array<i64: 1, 128>}, {transform_indices = @transform_3, window_bounds = array<i64: 1, 128>}, {transform_indices = @transform_4, window_bounds = array<i64: 8, 128>}, {transform_indices = @transform_5, window_bounds = array<i64: 128, 128>}, {transform_indices = @transform_6, window_bounds = array<i64: 1, 128>}, {transform_indices = @transform_7, window_bounds = array<i64: 1, 128>}, {transform_indices = @transform_8, window_bounds = array<i64: 8, 128>}]} {
    %c0 = arith.constant 0 : index
    %c0_0 = arith.constant 0 : index
    %0 = vector.load %arg2[%c0, %c0_0] : memref<8x128xbf16, #tpu.memory_space<vmem>>, vector<8x128xbf16>
    %c0_1 = arith.constant 0 : index
    %c0_2 = arith.constant 0 : index
    %1 = vector.load %arg3[%c0_1, %c0_2] : memref<128x128xbf16, #tpu.memory_space<vmem>>, vector<128x128xbf16>
    %cst = arith.constant dense<0.000000e+00> : vector<8x128xf32>
    %2 = tpu.matmul %0, %1, %cst {dimension_numbers = #tpu.dot_dimension_numbers<[1], [0], [0], [1], [0, 0, 1, 1], [], []>} : vector<8x128xbf16>, vector<128x128xbf16>, vector<8x128xf32> -> vector<8x128xf32>
    %c0_3 = arith.constant 0 : index
    %c0_4 = arith.constant 0 : index
    %3 = vector.load %arg4[%c0_3, %c0_4] : memref<1x128xf32, #tpu.memory_space<vmem>>, vector<1x128xf32>
    %4 = vector.broadcast %3 : vector<1x128xf32> to vector<8x128xf32>
    %5 = arith.mulf %2, %4 : vector<8x128xf32>
    %c0_5 = arith.constant 0 : index
    %c0_6 = arith.constant 0 : index
    %6 = vector.load %arg5[%c0_5, %c0_6] : memref<1x128xf32, #tpu.memory_space<vmem>>, vector<1x128xf32>
    %7 = vector.broadcast %6 : vector<1x128xf32> to vector<8x128xf32>
    %8 = arith.addf %5, %7 : vector<8x128xf32>
    %c0_7 = arith.constant 0 : index
    %c0_8 = arith.constant 0 : index
    %9 = vector.load %arg6[%c0_7, %c0_8] : memref<8x128xbf16, #tpu.memory_space<vmem>>, vector<8x128xbf16>
    %c0_9 = arith.constant 0 : index
    %c0_10 = arith.constant 0 : index
    %10 = vector.load %arg7[%c0_9, %c0_10] : memref<128x128xbf16, #tpu.memory_space<vmem>>, vector<128x128xbf16>
    %cst_11 = arith.constant dense<0.000000e+00> : vector<8x128xf32>
    %11 = tpu.matmul %9, %10, %cst_11 {dimension_numbers = #tpu.dot_dimension_numbers<[1], [0], [0], [1], [0, 0, 1, 1], [], []>} : vector<8x128xbf16>, vector<128x128xbf16>, vector<8x128xf32> -> vector<8x128xf32>
    %c0_12 = arith.constant 0 : index
    %c0_13 = arith.constant 0 : index
    %12 = vector.load %arg8[%c0_12, %c0_13] : memref<1x128xf32, #tpu.memory_space<vmem>>, vector<1x128xf32>
    %13 = vector.broadcast %12 : vector<1x128xf32> to vector<8x128xf32>
    %14 = arith.mulf %11, %13 : vector<8x128xf32>
    %c0_14 = arith.constant 0 : index
    %c0_15 = arith.constant 0 : index
    %15 = vector.load %arg9[%c0_14, %c0_15] : memref<1x128xf32, #tpu.memory_space<vmem>>, vector<1x128xf32>
    %16 = vector.broadcast %15 : vector<1x128xf32> to vector<8x128xf32>
    %17 = arith.addf %14, %16 : vector<8x128xf32>
    %18 = arith.addf %8, %17 : vector<8x128xf32>
    %cst_16 = arith.constant 0.000000e+00 : f32
    %19 = vector.broadcast %cst_16 : f32 to vector<8x128xf32>
    %20 = arith.maximumf %18, %19 : vector<8x128xf32>
    %21 = arith.truncf %20 : vector<8x128xf32> to vector<8x128xbf16>
    %c0_17 = arith.constant 0 : index
    %c0_18 = arith.constant 0 : index
    %22 = vector.load %arg10[%c0_17, %c0_18] : memref<8x128xbf16, #tpu.memory_space<vmem>>, vector<8x128xbf16>
    tpu.vector_store %arg10[%c0_17, %c0_18], %21 {strides = array<i32>} : memref<8x128xbf16, #tpu.memory_space<vmem>>, vector<8x128xbf16>,
    return
  }
  func.func @transform_0(%arg0: i32, %arg1: i32) -> (i32, i32) {
    %c0_i32 = arith.constant 0 : i32
    %c0_i32_0 = arith.constant 0 : i32
    return %arg0, %c0_i32 : i32, i32
  }
  func.func @transform_1(%arg0: i32, %arg1: i32) -> (i32, i32) {
    %c0_i32 = arith.constant 0 : i32
    %c0_i32_0 = arith.constant 0 : i32
    return %c0_i32, %arg1 : i32, i32
  }
  func.func @transform_2(%arg0: i32, %arg1: i32) -> (i32, i32) {
    %c0_i32 = arith.constant 0 : i32
    %c0_i32_0 = arith.constant 0 : i32
    return %c0_i32, %arg1 : i32, i32
  }
  func.func @transform_3(%arg0: i32, %arg1: i32) -> (i32, i32) {
    %c0_i32 = arith.constant 0 : i32
    %c0_i32_0 = arith.constant 0 : i32
    return %c0_i32, %arg1 : i32, i32
  }
  func.func @transform_4(%arg0: i32, %arg1: i32) -> (i32, i32) {
    %c0_i32 = arith.constant 0 : i32
    %c0_i32_0 = arith.constant 0 : i32
    return %arg0, %c0_i32 : i32, i32
  }
  func.func @transform_5(%arg0: i32, %arg1: i32) -> (i32, i32) {
    %c0_i32 = arith.constant 0 : i32
    %c0_i32_0 = arith.constant 0 : i32
    return %c0_i32, %arg1 : i32, i32
  }
  func.func @transform_6(%arg0: i32, %arg1: i32) -> (i32, i32) {
    %c0_i32 = arith.constant 0 : i32
    %c0_i32_0 = arith.constant 0 : i32
    return %c0_i32, %arg1 : i32, i32
  }
  func.func @transform_7(%arg0: i32, %arg1: i32) -> (i32, i32) {
    %c0_i32 = arith.constant 0 : i32
    %c0_i32_0 = arith.constant 0 : i32
    return %c0_i32, %arg1 : i32, i32
  }
  func.func @transform_8(%arg0: i32, %arg1: i32) -> (i32, i32) {
    %c0_i32 = arith.constant 0 : i32
    return %arg0, %arg1 : i32, i32
  }
}

module attributes {stable_mosaic.version = 11 : i64} {
  func.func @kernel(%arg0: memref<4x2x2x256xbf16, #tpu.memory_space<vmem>>, %arg1: memref<4x2x2x256xbf16, #tpu.memory_space<vmem>>, %arg2: memref<4x2x128xbf16, #tpu.memory_space<vmem>>, %arg3: memref<4x2x128xbf16, #tpu.memory_space<vmem>>) attributes {dimension_semantics = [], scalar_prefetch = 0 : i64, scratch_operands = 0 : i64, tpu.core_type = #tpu.core_type<tc>} {
    %c0 = arith.constant 0 : index
    %c0_0 = arith.constant 0 : index
    %c0_1 = arith.constant 0 : index
    %c0_2 = arith.constant 0 : index
    %0 = vector.load %arg0[%c0, %c0_0, %c0_1, %c0_2] : memref<4x2x2x256xbf16, #tpu.memory_space<vmem>>, vector<4x2x2x256xbf16>
    %1 = vector.extract_strided_slice %0 {offsets = [0, 0, 0, 0], sizes = [4, 1, 2, 256], strides = [1, 1, 1, 1]} : vector<4x2x2x256xbf16> to vector<4x1x2x256xbf16>
    %2 = vector.shape_cast %1 : vector<4x1x2x256xbf16> to vector<4x2x256xbf16>
    %3 = arith.extf %2 : vector<4x2x256xbf16> to vector<4x2x256xf32>
    %4 = vector.extract_strided_slice %0 {offsets = [0, 1, 0, 0], sizes = [4, 1, 2, 256], strides = [1, 1, 1, 1]} : vector<4x2x2x256xbf16> to vector<4x1x2x256xbf16>
    %5 = vector.shape_cast %4 : vector<4x1x2x256xbf16> to vector<4x2x256xbf16>
    %6 = arith.extf %5 : vector<4x2x256xbf16> to vector<4x2x256xf32>
    %7 = vector.extract_strided_slice %3 {offsets = [0, 0, 0], sizes = [4, 2, 128], strides = [1, 1, 1]} : vector<4x2x256xf32> to vector<4x2x128xf32>
    %8 = vector.extract_strided_slice %3 {offsets = [0, 0, 128], sizes = [4, 2, 128], strides = [1, 1, 1]} : vector<4x2x256xf32> to vector<4x2x128xf32>
    %9 = arith.addf %7, %8 : vector<4x2x128xf32>
    %10 = vector.extract_strided_slice %6 {offsets = [0, 0, 0], sizes = [4, 2, 128], strides = [1, 1, 1]} : vector<4x2x256xf32> to vector<4x2x128xf32>
    %11 = arith.addf %9, %10 : vector<4x2x128xf32>
    %12 = vector.extract_strided_slice %6 {offsets = [0, 0, 128], sizes = [4, 2, 128], strides = [1, 1, 1]} : vector<4x2x256xf32> to vector<4x2x128xf32>
    %13 = arith.addf %11, %12 : vector<4x2x128xf32>
    %cst = arith.constant 2.500000e-01 : f32
    %14 = vector.broadcast %cst : f32 to vector<4x2x128xf32>
    %15 = arith.mulf %13, %14 : vector<4x2x128xf32>
    %16 = arith.truncf %15 : vector<4x2x128xf32> to vector<4x2x128xbf16>
    %c0_3 = arith.constant 0 : index
    %c0_4 = arith.constant 0 : index
    %c0_5 = arith.constant 0 : index
    %17 = vector.load %arg2[%c0_3, %c0_4, %c0_5] : memref<4x2x128xbf16, #tpu.memory_space<vmem>>, vector<4x2x128xbf16>
    tpu.vector_store %arg2[%c0_3, %c0_4, %c0_5], %16 {strides = array<i32>} : memref<4x2x128xbf16, #tpu.memory_space<vmem>>, vector<4x2x128xbf16>,
    %c0_6 = arith.constant 0 : index
    %c0_7 = arith.constant 0 : index
    %c0_8 = arith.constant 0 : index
    %c0_9 = arith.constant 0 : index
    %18 = vector.load %arg1[%c0_6, %c0_7, %c0_8, %c0_9] : memref<4x2x2x256xbf16, #tpu.memory_space<vmem>>, vector<4x2x2x256xbf16>
    %19 = vector.extract_strided_slice %18 {offsets = [0, 0, 0, 0], sizes = [4, 1, 2, 256], strides = [1, 1, 1, 1]} : vector<4x2x2x256xbf16> to vector<4x1x2x256xbf16>
    %20 = vector.shape_cast %19 : vector<4x1x2x256xbf16> to vector<4x2x256xbf16>
    %21 = arith.extf %20 : vector<4x2x256xbf16> to vector<4x2x256xf32>
    %22 = vector.extract_strided_slice %18 {offsets = [0, 1, 0, 0], sizes = [4, 1, 2, 256], strides = [1, 1, 1, 1]} : vector<4x2x2x256xbf16> to vector<4x1x2x256xbf16>
    %23 = vector.shape_cast %22 : vector<4x1x2x256xbf16> to vector<4x2x256xbf16>
    %24 = arith.extf %23 : vector<4x2x256xbf16> to vector<4x2x256xf32>
    %25 = vector.extract_strided_slice %21 {offsets = [0, 0, 0], sizes = [4, 2, 128], strides = [1, 1, 1]} : vector<4x2x256xf32> to vector<4x2x128xf32>
    %26 = vector.extract_strided_slice %21 {offsets = [0, 0, 128], sizes = [4, 2, 128], strides = [1, 1, 1]} : vector<4x2x256xf32> to vector<4x2x128xf32>
    %27 = arith.addf %25, %26 : vector<4x2x128xf32>
    %28 = vector.extract_strided_slice %24 {offsets = [0, 0, 0], sizes = [4, 2, 128], strides = [1, 1, 1]} : vector<4x2x256xf32> to vector<4x2x128xf32>
    %29 = arith.addf %27, %28 : vector<4x2x128xf32>
    %30 = vector.extract_strided_slice %24 {offsets = [0, 0, 128], sizes = [4, 2, 128], strides = [1, 1, 1]} : vector<4x2x256xf32> to vector<4x2x128xf32>
    %31 = arith.addf %29, %30 : vector<4x2x128xf32>
    %cst_10 = arith.constant 2.500000e-01 : f32
    %32 = vector.broadcast %cst_10 : f32 to vector<4x2x128xf32>
    %33 = arith.mulf %31, %32 : vector<4x2x128xf32>
    %34 = arith.truncf %33 : vector<4x2x128xf32> to vector<4x2x128xbf16>
    %c0_11 = arith.constant 0 : index
    %c0_12 = arith.constant 0 : index
    %c0_13 = arith.constant 0 : index
    %35 = vector.load %arg3[%c0_11, %c0_12, %c0_13] : memref<4x2x128xbf16, #tpu.memory_space<vmem>>, vector<4x2x128xbf16>
    tpu.vector_store %arg3[%c0_11, %c0_12, %c0_13], %34 {strides = array<i32>} : memref<4x2x128xbf16, #tpu.memory_space<vmem>>, vector<4x2x128xbf16>,
    return
  }
}

module attributes {stable_mosaic.version = 11 : i64} {
  func.func @_matmul_epilogue_kernel(%arg0: i32, %arg1: i32, %arg2: i32, %arg3: memref<8x128xbf16, #tpu.memory_space<vmem>>, %arg4: memref<128x128xbf16, #tpu.memory_space<vmem>>, %arg5: memref<1x128xf32, #tpu.memory_space<vmem>>, %arg6: memref<1x128xf32, #tpu.memory_space<vmem>>, %arg7: memref<8x128xbf16, #tpu.memory_space<vmem>>, %arg8: memref<8x128xf32, #tpu.memory_space<vmem>>) attributes {dimension_semantics = [#tpu.dimension_semantics<parallel>, #tpu.dimension_semantics<parallel>, #tpu.dimension_semantics<arbitrary>], iteration_bounds = array<i64: 1, 1, 5>, scalar_prefetch = 0 : i64, scratch_operands = 1 : i64, tpu.core_type = #tpu.core_type<tc>, window_params = [{transform_indices = @transform_0, window_bounds = array<i64: 8, 128>}, {transform_indices = @transform_1, window_bounds = array<i64: 128, 128>}, {transform_indices = @transform_2, window_bounds = array<i64: 1, 128>}, {transform_indices = @transform_3, window_bounds = array<i64: 1, 128>}, {transform_indices = @transform_4, window_bounds = array<i64: 8, 128>}]} {
    %c0_i32 = arith.constant 0 : i32
    %0 = arith.cmpi eq, %arg2, %c0_i32 : i32
    %1 = arith.extui %0 : i1 to i32
    %c0_i32_0 = arith.constant 0 : i32
    %2 = arith.cmpi ne, %1, %c0_i32_0 : i32
    scf.if %2 {
      %cst_9 = arith.constant 0.000000e+00 : f32
      %12 = vector.broadcast %cst_9 : f32 to vector<8x128xf32>
      %c0_10 = arith.constant 0 : index
      %c0_11 = arith.constant 0 : index
      %13 = vector.load %arg8[%c0_10, %c0_11] : memref<8x128xf32, #tpu.memory_space<vmem>>, vector<8x128xf32>
      tpu.vector_store %arg8[%c0_10, %c0_11], %12 {strides = array<i32>} : memref<8x128xf32, #tpu.memory_space<vmem>>, vector<8x128xf32>,
    } else {
    }
    %c0 = arith.constant 0 : index
    %c0_1 = arith.constant 0 : index
    %3 = vector.load %arg8[%c0, %c0_1] : memref<8x128xf32, #tpu.memory_space<vmem>>, vector<8x128xf32>
    %c0_2 = arith.constant 0 : index
    %c0_3 = arith.constant 0 : index
    %4 = vector.load %arg3[%c0_2, %c0_3] : memref<8x128xbf16, #tpu.memory_space<vmem>>, vector<8x128xbf16>
    %c0_4 = arith.constant 0 : index
    %c0_5 = arith.constant 0 : index
    %5 = vector.load %arg4[%c0_4, %c0_5] : memref<128x128xbf16, #tpu.memory_space<vmem>>, vector<128x128xbf16>
    %cst = arith.constant dense<0.000000e+00> : vector<8x128xf32>
    %6 = tpu.matmul %4, %5, %cst {dimension_numbers = #tpu.dot_dimension_numbers<[1], [0], [0], [1], [0, 0, 1, 1], [], []>} : vector<8x128xbf16>, vector<128x128xbf16>, vector<8x128xf32> -> vector<8x128xf32>
    %7 = arith.addf %3, %6 : vector<8x128xf32>
    %c0_6 = arith.constant 0 : index
    %c0_7 = arith.constant 0 : index
    %8 = vector.load %arg8[%c0_6, %c0_7] : memref<8x128xf32, #tpu.memory_space<vmem>>, vector<8x128xf32>
    tpu.vector_store %arg8[%c0_6, %c0_7], %7 {strides = array<i32>} : memref<8x128xf32, #tpu.memory_space<vmem>>, vector<8x128xf32>,
    %c4_i32 = arith.constant 4 : i32
    %9 = arith.cmpi eq, %arg2, %c4_i32 : i32
    %10 = arith.extui %9 : i1 to i32
    %c0_i32_8 = arith.constant 0 : i32
    %11 = arith.cmpi ne, %10, %c0_i32_8 : i32
    scf.if %11 {
      %c0_9 = arith.constant 0 : index
      %c0_10 = arith.constant 0 : index
      %12 = vector.load %arg8[%c0_9, %c0_10] : memref<8x128xf32, #tpu.memory_space<vmem>>, vector<8x128xf32>
      %c0_11 = arith.constant 0 : index
      %c0_12 = arith.constant 0 : index
      %13 = vector.load %arg5[%c0_11, %c0_12] : memref<1x128xf32, #tpu.memory_space<vmem>>, vector<1x128xf32>
      %14 = vector.broadcast %13 : vector<1x128xf32> to vector<8x128xf32>
      %15 = arith.mulf %12, %14 : vector<8x128xf32>
      %c0_13 = arith.constant 0 : index
      %c0_14 = arith.constant 0 : index
      %16 = vector.load %arg6[%c0_13, %c0_14] : memref<1x128xf32, #tpu.memory_space<vmem>>, vector<1x128xf32>
      %17 = vector.broadcast %16 : vector<1x128xf32> to vector<8x128xf32>
      %18 = arith.addf %15, %17 : vector<8x128xf32>
      %cst_15 = arith.constant 0.000000e+00 : f32
      %19 = vector.broadcast %cst_15 : f32 to vector<8x128xf32>
      %20 = arith.maximumf %18, %19 : vector<8x128xf32>
      %21 = arith.truncf %20 : vector<8x128xf32> to vector<8x128xbf16>
      %c0_16 = arith.constant 0 : index
      %c0_17 = arith.constant 0 : index
      %22 = vector.load %arg7[%c0_16, %c0_17] : memref<8x128xbf16, #tpu.memory_space<vmem>>, vector<8x128xbf16>
      tpu.vector_store %arg7[%c0_16, %c0_17], %21 {strides = array<i32>} : memref<8x128xbf16, #tpu.memory_space<vmem>>, vector<8x128xbf16>,
    } else {
    }
    return
  }
  func.func @transform_0(%arg0: i32, %arg1: i32, %arg2: i32) -> (i32, i32) {
    %c0_i32 = arith.constant 0 : i32
    return %arg0, %arg2 : i32, i32
  }
  func.func @transform_1(%arg0: i32, %arg1: i32, %arg2: i32) -> (i32, i32) {
    %c0_i32 = arith.constant 0 : i32
    return %arg2, %arg1 : i32, i32
  }
  func.func @transform_2(%arg0: i32, %arg1: i32, %arg2: i32) -> (i32, i32) {
    %c0_i32 = arith.constant 0 : i32
    %c0_i32_0 = arith.constant 0 : i32
    return %c0_i32, %arg1 : i32, i32
  }
  func.func @transform_3(%arg0: i32, %arg1: i32, %arg2: i32) -> (i32, i32) {
    %c0_i32 = arith.constant 0 : i32
    %c0_i32_0 = arith.constant 0 : i32
    return %c0_i32, %arg1 : i32, i32
  }
  func.func @transform_4(%arg0: i32, %arg1: i32, %arg2: i32) -> (i32, i32) {
    %c0_i32 = arith.constant 0 : i32
    return %arg0, %arg1 : i32, i32
  }
}

module attributes {stable_mosaic.version = 11 : i64} {
  func.func @_tail_ds_kernel(%arg0: i32, %arg1: i32, %arg2: memref<2x128xbf16, #tpu.memory_space<vmem>>, %arg3: memref<128x256xbf16, #tpu.memory_space<vmem>>, %arg4: memref<1x256xf32, #tpu.memory_space<vmem>>, %arg5: memref<1x256xf32, #tpu.memory_space<vmem>>, %arg6: memref<2x128xbf16, #tpu.memory_space<vmem>>, %arg7: memref<128x256xbf16, #tpu.memory_space<vmem>>, %arg8: memref<1x256xf32, #tpu.memory_space<vmem>>, %arg9: memref<1x256xf32, #tpu.memory_space<vmem>>, %arg10: memref<2x256xbf16, #tpu.memory_space<vmem>>) attributes {dimension_semantics = [#tpu.dimension_semantics<parallel>, #tpu.dimension_semantics<parallel>], iteration_bounds = array<i64: 1, 1>, scalar_prefetch = 0 : i64, scratch_operands = 0 : i64, tpu.core_type = #tpu.core_type<tc>, window_params = [{transform_indices = @transform_0, window_bounds = array<i64: 2, 128>}, {transform_indices = @transform_1, window_bounds = array<i64: 128, 256>}, {transform_indices = @transform_2, window_bounds = array<i64: 1, 256>}, {transform_indices = @transform_3, window_bounds = array<i64: 1, 256>}, {transform_indices = @transform_4, window_bounds = array<i64: 2, 128>}, {transform_indices = @transform_5, window_bounds = array<i64: 128, 256>}, {transform_indices = @transform_6, window_bounds = array<i64: 1, 256>}, {transform_indices = @transform_7, window_bounds = array<i64: 1, 256>}, {transform_indices = @transform_8, window_bounds = array<i64: 2, 256>}]} {
    %c0 = arith.constant 0 : index
    %c0_0 = arith.constant 0 : index
    %0 = vector.load %arg2[%c0, %c0_0] : memref<2x128xbf16, #tpu.memory_space<vmem>>, vector<2x128xbf16>
    %c0_1 = arith.constant 0 : index
    %c0_2 = arith.constant 0 : index
    %1 = vector.load %arg3[%c0_1, %c0_2] : memref<128x256xbf16, #tpu.memory_space<vmem>>, vector<128x256xbf16>
    %cst = arith.constant dense<0.000000e+00> : vector<2x256xf32>
    %2 = tpu.matmul %0, %1, %cst {dimension_numbers = #tpu.dot_dimension_numbers<[1], [0], [0], [1], [0, 0, 1, 1], [], []>} : vector<2x128xbf16>, vector<128x256xbf16>, vector<2x256xf32> -> vector<2x256xf32>
    %c0_3 = arith.constant 0 : index
    %c0_4 = arith.constant 0 : index
    %3 = vector.load %arg4[%c0_3, %c0_4] : memref<1x256xf32, #tpu.memory_space<vmem>>, vector<1x256xf32>
    %4 = vector.broadcast %3 : vector<1x256xf32> to vector<2x256xf32>
    %5 = arith.mulf %2, %4 : vector<2x256xf32>
    %c0_5 = arith.constant 0 : index
    %c0_6 = arith.constant 0 : index
    %6 = vector.load %arg5[%c0_5, %c0_6] : memref<1x256xf32, #tpu.memory_space<vmem>>, vector<1x256xf32>
    %7 = vector.broadcast %6 : vector<1x256xf32> to vector<2x256xf32>
    %8 = arith.addf %5, %7 : vector<2x256xf32>
    %c0_7 = arith.constant 0 : index
    %c0_8 = arith.constant 0 : index
    %9 = vector.load %arg6[%c0_7, %c0_8] : memref<2x128xbf16, #tpu.memory_space<vmem>>, vector<2x128xbf16>
    %c0_9 = arith.constant 0 : index
    %c0_10 = arith.constant 0 : index
    %10 = vector.load %arg7[%c0_9, %c0_10] : memref<128x256xbf16, #tpu.memory_space<vmem>>, vector<128x256xbf16>
    %cst_11 = arith.constant dense<0.000000e+00> : vector<2x256xf32>
    %11 = tpu.matmul %9, %10, %cst_11 {dimension_numbers = #tpu.dot_dimension_numbers<[1], [0], [0], [1], [0, 0, 1, 1], [], []>} : vector<2x128xbf16>, vector<128x256xbf16>, vector<2x256xf32> -> vector<2x256xf32>
    %c0_12 = arith.constant 0 : index
    %c0_13 = arith.constant 0 : index
    %12 = vector.load %arg8[%c0_12, %c0_13] : memref<1x256xf32, #tpu.memory_space<vmem>>, vector<1x256xf32>
    %13 = vector.broadcast %12 : vector<1x256xf32> to vector<2x256xf32>
    %14 = arith.mulf %11, %13 : vector<2x256xf32>
    %c0_14 = arith.constant 0 : index
    %c0_15 = arith.constant 0 : index
    %15 = vector.load %arg9[%c0_14, %c0_15] : memref<1x256xf32, #tpu.memory_space<vmem>>, vector<1x256xf32>
    %16 = vector.broadcast %15 : vector<1x256xf32> to vector<2x256xf32>
    %17 = arith.addf %14, %16 : vector<2x256xf32>
    %18 = arith.addf %8, %17 : vector<2x256xf32>
    %cst_16 = arith.constant 0.000000e+00 : f32
    %19 = vector.broadcast %cst_16 : f32 to vector<2x256xf32>
    %20 = arith.maximumf %18, %19 : vector<2x256xf32>
    %21 = arith.truncf %20 : vector<2x256xf32> to vector<2x256xbf16>
    %c0_17 = arith.constant 0 : index
    %c0_18 = arith.constant 0 : index
    %22 = vector.load %arg10[%c0_17, %c0_18] : memref<2x256xbf16, #tpu.memory_space<vmem>>, vector<2x256xbf16>
    tpu.vector_store %arg10[%c0_17, %c0_18], %21 {strides = array<i32>} : memref<2x256xbf16, #tpu.memory_space<vmem>>, vector<2x256xbf16>,
    return
  }
  func.func @transform_0(%arg0: i32, %arg1: i32) -> (i32, i32) {
    %c0_i32 = arith.constant 0 : i32
    %c0_i32_0 = arith.constant 0 : i32
    return %arg0, %c0_i32 : i32, i32
  }
  func.func @transform_1(%arg0: i32, %arg1: i32) -> (i32, i32) {
    %c0_i32 = arith.constant 0 : i32
    %c0_i32_0 = arith.constant 0 : i32
    return %c0_i32, %arg1 : i32, i32
  }
  func.func @transform_2(%arg0: i32, %arg1: i32) -> (i32, i32) {
    %c0_i32 = arith.constant 0 : i32
    %c0_i32_0 = arith.constant 0 : i32
    return %c0_i32, %arg1 : i32, i32
  }
  func.func @transform_3(%arg0: i32, %arg1: i32) -> (i32, i32) {
    %c0_i32 = arith.constant 0 : i32
    %c0_i32_0 = arith.constant 0 : i32
    return %c0_i32, %arg1 : i32, i32
  }
  func.func @transform_4(%arg0: i32, %arg1: i32) -> (i32, i32) {
    %c0_i32 = arith.constant 0 : i32
    %c0_i32_0 = arith.constant 0 : i32
    return %arg0, %c0_i32 : i32, i32
  }
  func.func @transform_5(%arg0: i32, %arg1: i32) -> (i32, i32) {
    %c0_i32 = arith.constant 0 : i32
    %c0_i32_0 = arith.constant 0 : i32
    return %c0_i32, %arg1 : i32, i32
  }
  func.func @transform_6(%arg0: i32, %arg1: i32) -> (i32, i32) {
    %c0_i32 = arith.constant 0 : i32
    %c0_i32_0 = arith.constant 0 : i32
    return %c0_i32, %arg1 : i32, i32
  }
  func.func @transform_7(%arg0: i32, %arg1: i32) -> (i32, i32) {
    %c0_i32 = arith.constant 0 : i32
    %c0_i32_0 = arith.constant 0 : i32
    return %c0_i32, %arg1 : i32, i32
  }
  func.func @transform_8(%arg0: i32, %arg1: i32) -> (i32, i32) {
    %c0_i32 = arith.constant 0 : i32
    return %arg0, %arg1 : i32, i32
  }
}

module attributes {stable_mosaic.version = 11 : i64} {
  func.func @kernel(%arg0: memref<2x2x1x256xbf16, #tpu.memory_space<vmem>>, %arg1: memref<2x2x1x256xbf16, #tpu.memory_space<vmem>>, %arg2: memref<2x1x128xbf16, #tpu.memory_space<vmem>>, %arg3: memref<2x1x128xbf16, #tpu.memory_space<vmem>>) attributes {dimension_semantics = [], scalar_prefetch = 0 : i64, scratch_operands = 0 : i64, tpu.core_type = #tpu.core_type<tc>} {
    %c0 = arith.constant 0 : index
    %c0_0 = arith.constant 0 : index
    %c0_1 = arith.constant 0 : index
    %c0_2 = arith.constant 0 : index
    %0 = vector.load %arg0[%c0, %c0_0, %c0_1, %c0_2] : memref<2x2x1x256xbf16, #tpu.memory_space<vmem>>, vector<2x2x1x256xbf16>
    %1 = vector.extract_strided_slice %0 {offsets = [0, 0, 0, 0], sizes = [2, 1, 1, 256], strides = [1, 1, 1, 1]} : vector<2x2x1x256xbf16> to vector<2x1x1x256xbf16>
    %2 = vector.shape_cast %1 : vector<2x1x1x256xbf16> to vector<2x1x256xbf16>
    %3 = arith.extf %2 : vector<2x1x256xbf16> to vector<2x1x256xf32>
    %4 = vector.extract_strided_slice %0 {offsets = [0, 1, 0, 0], sizes = [2, 1, 1, 256], strides = [1, 1, 1, 1]} : vector<2x2x1x256xbf16> to vector<2x1x1x256xbf16>
    %5 = vector.shape_cast %4 : vector<2x1x1x256xbf16> to vector<2x1x256xbf16>
    %6 = arith.extf %5 : vector<2x1x256xbf16> to vector<2x1x256xf32>
    %7 = vector.extract_strided_slice %3 {offsets = [0, 0, 0], sizes = [2, 1, 128], strides = [1, 1, 1]} : vector<2x1x256xf32> to vector<2x1x128xf32>
    %8 = vector.extract_strided_slice %3 {offsets = [0, 0, 128], sizes = [2, 1, 128], strides = [1, 1, 1]} : vector<2x1x256xf32> to vector<2x1x128xf32>
    %9 = arith.addf %7, %8 : vector<2x1x128xf32>
    %10 = vector.extract_strided_slice %6 {offsets = [0, 0, 0], sizes = [2, 1, 128], strides = [1, 1, 1]} : vector<2x1x256xf32> to vector<2x1x128xf32>
    %11 = arith.addf %9, %10 : vector<2x1x128xf32>
    %12 = vector.extract_strided_slice %6 {offsets = [0, 0, 128], sizes = [2, 1, 128], strides = [1, 1, 1]} : vector<2x1x256xf32> to vector<2x1x128xf32>
    %13 = arith.addf %11, %12 : vector<2x1x128xf32>
    %cst = arith.constant 2.500000e-01 : f32
    %14 = vector.broadcast %cst : f32 to vector<2x1x128xf32>
    %15 = arith.mulf %13, %14 : vector<2x1x128xf32>
    %16 = arith.truncf %15 : vector<2x1x128xf32> to vector<2x1x128xbf16>
    %c0_3 = arith.constant 0 : index
    %c0_4 = arith.constant 0 : index
    %c0_5 = arith.constant 0 : index
    %17 = vector.load %arg2[%c0_3, %c0_4, %c0_5] : memref<2x1x128xbf16, #tpu.memory_space<vmem>>, vector<2x1x128xbf16>
    tpu.vector_store %arg2[%c0_3, %c0_4, %c0_5], %16 {strides = array<i32>} : memref<2x1x128xbf16, #tpu.memory_space<vmem>>, vector<2x1x128xbf16>,
    %c0_6 = arith.constant 0 : index
    %c0_7 = arith.constant 0 : index
    %c0_8 = arith.constant 0 : index
    %c0_9 = arith.constant 0 : index
    %18 = vector.load %arg1[%c0_6, %c0_7, %c0_8, %c0_9] : memref<2x2x1x256xbf16, #tpu.memory_space<vmem>>, vector<2x2x1x256xbf16>
    %19 = vector.extract_strided_slice %18 {offsets = [0, 0, 0, 0], sizes = [2, 1, 1, 256], strides = [1, 1, 1, 1]} : vector<2x2x1x256xbf16> to vector<2x1x1x256xbf16>
    %20 = vector.shape_cast %19 : vector<2x1x1x256xbf16> to vector<2x1x256xbf16>
    %21 = arith.extf %20 : vector<2x1x256xbf16> to vector<2x1x256xf32>
    %22 = vector.extract_strided_slice %18 {offsets = [0, 1, 0, 0], sizes = [2, 1, 1, 256], strides = [1, 1, 1, 1]} : vector<2x2x1x256xbf16> to vector<2x1x1x256xbf16>
    %23 = vector.shape_cast %22 : vector<2x1x1x256xbf16> to vector<2x1x256xbf16>
    %24 = arith.extf %23 : vector<2x1x256xbf16> to vector<2x1x256xf32>
    %25 = vector.extract_strided_slice %21 {offsets = [0, 0, 0], sizes = [2, 1, 128], strides = [1, 1, 1]} : vector<2x1x256xf32> to vector<2x1x128xf32>
    %26 = vector.extract_strided_slice %21 {offsets = [0, 0, 128], sizes = [2, 1, 128], strides = [1, 1, 1]} : vector<2x1x256xf32> to vector<2x1x128xf32>
    %27 = arith.addf %25, %26 : vector<2x1x128xf32>
    %28 = vector.extract_strided_slice %24 {offsets = [0, 0, 0], sizes = [2, 1, 128], strides = [1, 1, 1]} : vector<2x1x256xf32> to vector<2x1x128xf32>
    %29 = arith.addf %27, %28 : vector<2x1x128xf32>
    %30 = vector.extract_strided_slice %24 {offsets = [0, 0, 128], sizes = [2, 1, 128], strides = [1, 1, 1]} : vector<2x1x256xf32> to vector<2x1x128xf32>
    %31 = arith.addf %29, %30 : vector<2x1x128xf32>
    %cst_10 = arith.constant 2.500000e-01 : f32
    %32 = vector.broadcast %cst_10 : f32 to vector<2x1x128xf32>
    %33 = arith.mulf %31, %32 : vector<2x1x128xf32>
    %34 = arith.truncf %33 : vector<2x1x128xf32> to vector<2x1x128xbf16>
    %c0_11 = arith.constant 0 : index
    %c0_12 = arith.constant 0 : index
    %c0_13 = arith.constant 0 : index
    %35 = vector.load %arg3[%c0_11, %c0_12, %c0_13] : memref<2x1x128xbf16, #tpu.memory_space<vmem>>, vector<2x1x128xbf16>
    tpu.vector_store %arg3[%c0_11, %c0_12, %c0_13], %34 {strides = array<i32>} : memref<2x1x128xbf16, #tpu.memory_space<vmem>>, vector<2x1x128xbf16>,
    return
  }
}

module attributes {stable_mosaic.version = 11 : i64} {
  func.func @_matmul_epilogue_kernel(%arg0: i32, %arg1: i32, %arg2: i32, %arg3: memref<4x256xbf16, #tpu.memory_space<vmem>>, %arg4: memref<256x256xbf16, #tpu.memory_space<vmem>>, %arg5: memref<1x256xf32, #tpu.memory_space<vmem>>, %arg6: memref<1x256xf32, #tpu.memory_space<vmem>>, %arg7: memref<4x256xbf16, #tpu.memory_space<vmem>>, %arg8: memref<4x256xf32, #tpu.memory_space<vmem>>) attributes {dimension_semantics = [#tpu.dimension_semantics<parallel>, #tpu.dimension_semantics<parallel>, #tpu.dimension_semantics<arbitrary>], iteration_bounds = array<i64: 1, 2, 1>, scalar_prefetch = 0 : i64, scratch_operands = 1 : i64, tpu.core_type = #tpu.core_type<tc>, window_params = [{transform_indices = @transform_0, window_bounds = array<i64: 4, 256>}, {transform_indices = @transform_1, window_bounds = array<i64: 256, 256>}, {transform_indices = @transform_2, window_bounds = array<i64: 1, 256>}, {transform_indices = @transform_3, window_bounds = array<i64: 1, 256>}, {transform_indices = @transform_4, window_bounds = array<i64: 4, 256>}]} {
    %c0_i32 = arith.constant 0 : i32
    %0 = arith.cmpi eq, %arg2, %c0_i32 : i32
    %1 = arith.extui %0 : i1 to i32
    %c0_i32_0 = arith.constant 0 : i32
    %2 = arith.cmpi ne, %1, %c0_i32_0 : i32
    scf.if %2 {
      %cst_10 = arith.constant 0.000000e+00 : f32
      %12 = vector.broadcast %cst_10 : f32 to vector<4x256xf32>
      %c0_11 = arith.constant 0 : index
      %c0_12 = arith.constant 0 : index
      %13 = vector.load %arg8[%c0_11, %c0_12] : memref<4x256xf32, #tpu.memory_space<vmem>>, vector<4x256xf32>
      tpu.vector_store %arg8[%c0_11, %c0_12], %12 {strides = array<i32>} : memref<4x256xf32, #tpu.memory_space<vmem>>, vector<4x256xf32>,
    } else {
    }
    %c0 = arith.constant 0 : index
    %c0_1 = arith.constant 0 : index
    %3 = vector.load %arg8[%c0, %c0_1] : memref<4x256xf32, #tpu.memory_space<vmem>>, vector<4x256xf32>
    %c0_2 = arith.constant 0 : index
    %c0_3 = arith.constant 0 : index
    %4 = vector.load %arg3[%c0_2, %c0_3] : memref<4x256xbf16, #tpu.memory_space<vmem>>, vector<4x256xbf16>
    %c0_4 = arith.constant 0 : index
    %c0_5 = arith.constant 0 : index
    %5 = vector.load %arg4[%c0_4, %c0_5] : memref<256x256xbf16, #tpu.memory_space<vmem>>, vector<256x256xbf16>
    %cst = arith.constant dense<0.000000e+00> : vector<4x256xf32>
    %6 = tpu.matmul %4, %5, %cst {dimension_numbers = #tpu.dot_dimension_numbers<[1], [0], [0], [1], [0, 0, 1, 1], [], []>} : vector<4x256xbf16>, vector<256x256xbf16>, vector<4x256xf32> -> vector<4x256xf32>
    %7 = arith.addf %3, %6 : vector<4x256xf32>
    %c0_6 = arith.constant 0 : index
    %c0_7 = arith.constant 0 : index
    %8 = vector.load %arg8[%c0_6, %c0_7] : memref<4x256xf32, #tpu.memory_space<vmem>>, vector<4x256xf32>
    tpu.vector_store %arg8[%c0_6, %c0_7], %7 {strides = array<i32>} : memref<4x256xf32, #tpu.memory_space<vmem>>, vector<4x256xf32>,
    %c0_i32_8 = arith.constant 0 : i32
    %9 = arith.cmpi eq, %arg2, %c0_i32_8 : i32
    %10 = arith.extui %9 : i1 to i32
    %c0_i32_9 = arith.constant 0 : i32
    %11 = arith.cmpi ne, %10, %c0_i32_9 : i32
    scf.if %11 {
      %c0_10 = arith.constant 0 : index
      %c0_11 = arith.constant 0 : index
      %12 = vector.load %arg8[%c0_10, %c0_11] : memref<4x256xf32, #tpu.memory_space<vmem>>, vector<4x256xf32>
      %c0_12 = arith.constant 0 : index
      %c0_13 = arith.constant 0 : index
      %13 = vector.load %arg5[%c0_12, %c0_13] : memref<1x256xf32, #tpu.memory_space<vmem>>, vector<1x256xf32>
      %14 = vector.broadcast %13 : vector<1x256xf32> to vector<4x256xf32>
      %15 = arith.mulf %12, %14 : vector<4x256xf32>
      %c0_14 = arith.constant 0 : index
      %c0_15 = arith.constant 0 : index
      %16 = vector.load %arg6[%c0_14, %c0_15] : memref<1x256xf32, #tpu.memory_space<vmem>>, vector<1x256xf32>
      %17 = vector.broadcast %16 : vector<1x256xf32> to vector<4x256xf32>
      %18 = arith.addf %15, %17 : vector<4x256xf32>
      %19 = arith.truncf %18 : vector<4x256xf32> to vector<4x256xbf16>
      %c0_16 = arith.constant 0 : index
      %c0_17 = arith.constant 0 : index
      %20 = vector.load %arg7[%c0_16, %c0_17] : memref<4x256xbf16, #tpu.memory_space<vmem>>, vector<4x256xbf16>
      tpu.vector_store %arg7[%c0_16, %c0_17], %19 {strides = array<i32>} : memref<4x256xbf16, #tpu.memory_space<vmem>>, vector<4x256xbf16>,
    } else {
    }
    return
  }
  func.func @transform_0(%arg0: i32, %arg1: i32, %arg2: i32) -> (i32, i32) {
    %c0_i32 = arith.constant 0 : i32
    return %arg0, %arg2 : i32, i32
  }
  func.func @transform_1(%arg0: i32, %arg1: i32, %arg2: i32) -> (i32, i32) {
    %c0_i32 = arith.constant 0 : i32
    return %arg2, %arg1 : i32, i32
  }
  func.func @transform_2(%arg0: i32, %arg1: i32, %arg2: i32) -> (i32, i32) {
    %c0_i32 = arith.constant 0 : i32
    %c0_i32_0 = arith.constant 0 : i32
    return %c0_i32, %arg1 : i32, i32
  }
  func.func @transform_3(%arg0: i32, %arg1: i32, %arg2: i32) -> (i32, i32) {
    %c0_i32 = arith.constant 0 : i32
    %c0_i32_0 = arith.constant 0 : i32
    return %c0_i32, %arg1 : i32, i32
  }
  func.func @transform_4(%arg0: i32, %arg1: i32, %arg2: i32) -> (i32, i32) {
    %c0_i32 = arith.constant 0 : i32
    return %arg0, %arg1 : i32, i32
  }
}

module attributes {stable_mosaic.version = 11 : i64} {
  func.func @_matmul_epilogue_kernel(%arg0: i32, %arg1: i32, %arg2: i32, %arg3: memref<2x256xbf16, #tpu.memory_space<vmem>>, %arg4: memref<256x256xbf16, #tpu.memory_space<vmem>>, %arg5: memref<1x256xf32, #tpu.memory_space<vmem>>, %arg6: memref<1x256xf32, #tpu.memory_space<vmem>>, %arg7: memref<2x256xbf16, #tpu.memory_space<vmem>>, %arg8: memref<2x256xf32, #tpu.memory_space<vmem>>) attributes {dimension_semantics = [#tpu.dimension_semantics<parallel>, #tpu.dimension_semantics<parallel>, #tpu.dimension_semantics<arbitrary>], iteration_bounds = array<i64: 1, 1, 1>, scalar_prefetch = 0 : i64, scratch_operands = 1 : i64, tpu.core_type = #tpu.core_type<tc>, window_params = [{transform_indices = @transform_0, window_bounds = array<i64: 2, 256>}, {transform_indices = @transform_1, window_bounds = array<i64: 256, 256>}, {transform_indices = @transform_2, window_bounds = array<i64: 1, 256>}, {transform_indices = @transform_3, window_bounds = array<i64: 1, 256>}, {transform_indices = @transform_4, window_bounds = array<i64: 2, 256>}]} {
    %c0_i32 = arith.constant 0 : i32
    %0 = arith.cmpi eq, %arg2, %c0_i32 : i32
    %1 = arith.extui %0 : i1 to i32
    %c0_i32_0 = arith.constant 0 : i32
    %2 = arith.cmpi ne, %1, %c0_i32_0 : i32
    scf.if %2 {
      %cst_10 = arith.constant 0.000000e+00 : f32
      %12 = vector.broadcast %cst_10 : f32 to vector<2x256xf32>
      %c0_11 = arith.constant 0 : index
      %c0_12 = arith.constant 0 : index
      %13 = vector.load %arg8[%c0_11, %c0_12] : memref<2x256xf32, #tpu.memory_space<vmem>>, vector<2x256xf32>
      tpu.vector_store %arg8[%c0_11, %c0_12], %12 {strides = array<i32>} : memref<2x256xf32, #tpu.memory_space<vmem>>, vector<2x256xf32>,
    } else {
    }
    %c0 = arith.constant 0 : index
    %c0_1 = arith.constant 0 : index
    %3 = vector.load %arg8[%c0, %c0_1] : memref<2x256xf32, #tpu.memory_space<vmem>>, vector<2x256xf32>
    %c0_2 = arith.constant 0 : index
    %c0_3 = arith.constant 0 : index
    %4 = vector.load %arg3[%c0_2, %c0_3] : memref<2x256xbf16, #tpu.memory_space<vmem>>, vector<2x256xbf16>
    %c0_4 = arith.constant 0 : index
    %c0_5 = arith.constant 0 : index
    %5 = vector.load %arg4[%c0_4, %c0_5] : memref<256x256xbf16, #tpu.memory_space<vmem>>, vector<256x256xbf16>
    %cst = arith.constant dense<0.000000e+00> : vector<2x256xf32>
    %6 = tpu.matmul %4, %5, %cst {dimension_numbers = #tpu.dot_dimension_numbers<[1], [0], [0], [1], [0, 0, 1, 1], [], []>} : vector<2x256xbf16>, vector<256x256xbf16>, vector<2x256xf32> -> vector<2x256xf32>
    %7 = arith.addf %3, %6 : vector<2x256xf32>
    %c0_6 = arith.constant 0 : index
    %c0_7 = arith.constant 0 : index
    %8 = vector.load %arg8[%c0_6, %c0_7] : memref<2x256xf32, #tpu.memory_space<vmem>>, vector<2x256xf32>
    tpu.vector_store %arg8[%c0_6, %c0_7], %7 {strides = array<i32>} : memref<2x256xf32, #tpu.memory_space<vmem>>, vector<2x256xf32>,
    %c0_i32_8 = arith.constant 0 : i32
    %9 = arith.cmpi eq, %arg2, %c0_i32_8 : i32
    %10 = arith.extui %9 : i1 to i32
    %c0_i32_9 = arith.constant 0 : i32
    %11 = arith.cmpi ne, %10, %c0_i32_9 : i32
    scf.if %11 {
      %c0_10 = arith.constant 0 : index
      %c0_11 = arith.constant 0 : index
      %12 = vector.load %arg8[%c0_10, %c0_11] : memref<2x256xf32, #tpu.memory_space<vmem>>, vector<2x256xf32>
      %c0_12 = arith.constant 0 : index
      %c0_13 = arith.constant 0 : index
      %13 = vector.load %arg5[%c0_12, %c0_13] : memref<1x256xf32, #tpu.memory_space<vmem>>, vector<1x256xf32>
      %14 = vector.broadcast %13 : vector<1x256xf32> to vector<2x256xf32>
      %15 = arith.mulf %12, %14 : vector<2x256xf32>
      %c0_14 = arith.constant 0 : index
      %c0_15 = arith.constant 0 : index
      %16 = vector.load %arg6[%c0_14, %c0_15] : memref<1x256xf32, #tpu.memory_space<vmem>>, vector<1x256xf32>
      %17 = vector.broadcast %16 : vector<1x256xf32> to vector<2x256xf32>
      %18 = arith.addf %15, %17 : vector<2x256xf32>
      %19 = arith.truncf %18 : vector<2x256xf32> to vector<2x256xbf16>
      %c0_16 = arith.constant 0 : index
      %c0_17 = arith.constant 0 : index
      %20 = vector.load %arg7[%c0_16, %c0_17] : memref<2x256xbf16, #tpu.memory_space<vmem>>, vector<2x256xbf16>
      tpu.vector_store %arg7[%c0_16, %c0_17], %19 {strides = array<i32>} : memref<2x256xbf16, #tpu.memory_space<vmem>>, vector<2x256xbf16>,
    } else {
    }
    return
  }
  func.func @transform_0(%arg0: i32, %arg1: i32, %arg2: i32) -> (i32, i32) {
    %c0_i32 = arith.constant 0 : i32
    return %arg0, %arg2 : i32, i32
  }
  func.func @transform_1(%arg0: i32, %arg1: i32, %arg2: i32) -> (i32, i32) {
    %c0_i32 = arith.constant 0 : i32
    return %arg2, %arg1 : i32, i32
  }
  func.func @transform_2(%arg0: i32, %arg1: i32, %arg2: i32) -> (i32, i32) {
    %c0_i32 = arith.constant 0 : i32
    %c0_i32_0 = arith.constant 0 : i32
    return %c0_i32, %arg1 : i32, i32
  }
  func.func @transform_3(%arg0: i32, %arg1: i32, %arg2: i32) -> (i32, i32) {
    %c0_i32 = arith.constant 0 : i32
    %c0_i32_0 = arith.constant 0 : i32
    return %c0_i32, %arg1 : i32, i32
  }
  func.func @transform_4(%arg0: i32, %arg1: i32, %arg2: i32) -> (i32, i32) {
    %c0_i32 = arith.constant 0 : i32
    return %arg0, %arg1 : i32, i32
  }
}

module attributes {stable_mosaic.version = 11 : i64} {
  func.func @_mha_kernel(%arg0: memref<8x64xbf16, #tpu.memory_space<vmem>>, %arg1: memref<8x2x64xbf16, #tpu.memory_space<vmem>>, %arg2: memref<8x2x64xbf16, #tpu.memory_space<vmem>>, %arg3: memref<8x64xbf16, #tpu.memory_space<vmem>>) attributes {dimension_semantics = [], scalar_prefetch = 0 : i64, scratch_operands = 0 : i64, tpu.core_type = #tpu.core_type<tc>} {
    %c0 = arith.constant 0 : index
    %c0_0 = arith.constant 0 : index
    %0 = vector.load %arg0[%c0, %c0_0] : memref<8x64xbf16, #tpu.memory_space<vmem>>, vector<8x64xbf16>
    %1 = arith.extf %0 : vector<8x64xbf16> to vector<8x64xf32>
    %c0_1 = arith.constant 0 : index
    %c0_2 = arith.constant 0 : index
    %c0_3 = arith.constant 0 : index
    %2 = vector.load %arg1[%c0_1, %c0_2, %c0_3] : memref<8x2x64xbf16, #tpu.memory_space<vmem>>, vector<8x2x64xbf16>
    %3 = arith.extf %2 : vector<8x2x64xbf16> to vector<8x2x64xf32>
    %c0_4 = arith.constant 0 : index
    %c0_5 = arith.constant 0 : index
    %c0_6 = arith.constant 0 : index
    %4 = vector.load %arg2[%c0_4, %c0_5, %c0_6] : memref<8x2x64xbf16, #tpu.memory_space<vmem>>, vector<8x2x64xbf16>
    %5 = arith.extf %4 : vector<8x2x64xbf16> to vector<8x2x64xf32>
    %6 = vector.shape_cast %1 : vector<8x64xf32> to vector<8x1x64xf32>
    %7 = vector.broadcast %6 : vector<8x1x64xf32> to vector<8x2x64xf32>
    %8 = arith.mulf %7, %3 : vector<8x2x64xf32>
    %cst = arith.constant dense<0.000000e+00> : vector<8x2xf32>
    %9 = vector.multi_reduction <add>, %8, %cst [2] : vector<8x2x64xf32> to vector<8x2xf32>
    %cst_7 = arith.constant dense<0xFF800000> : vector<8xf32>
    %10 = vector.multi_reduction <maximumf>, %9, %cst_7 [1] : vector<8x2xf32> to vector<8xf32>
    %11 = vector.shape_cast %10 : vector<8xf32> to vector<8x1xf32>
    %12 = vector.broadcast %11 : vector<8x1xf32> to vector<8x2xf32>
    %13 = arith.subf %9, %12 : vector<8x2xf32>
    %14 = math.exp %13 : vector<8x2xf32>
    %cst_8 = arith.constant dense<0.000000e+00> : vector<8xf32>
    %15 = vector.multi_reduction <add>, %14, %cst_8 [1] : vector<8x2xf32> to vector<8xf32>
    %16 = vector.shape_cast %15 : vector<8xf32> to vector<8x1xf32>
    %17 = tpu.reciprocal %16 {approx = true} : vector<8x1xf32> -> vector<8x1xf32>
    %18 = vector.broadcast %17 : vector<8x1xf32> to vector<8x2xf32>
    %19 = arith.mulf %14, %18 : vector<8x2xf32>
    %20 = vector.shape_cast %19 : vector<8x2xf32> to vector<8x2x1xf32>
    %21 = vector.broadcast %20 : vector<8x2x1xf32> to vector<8x2x64xf32>
    %22 = arith.mulf %21, %5 : vector<8x2x64xf32>
    %cst_9 = arith.constant dense<0.000000e+00> : vector<8x64xf32>
    %23 = vector.multi_reduction <add>, %22, %cst_9 [1] : vector<8x2x64xf32> to vector<8x64xf32>
    %24 = arith.truncf %23 : vector<8x64xf32> to vector<8x64xbf16>
    %c0_10 = arith.constant 0 : index
    %c0_11 = arith.constant 0 : index
    %25 = vector.load %arg3[%c0_10, %c0_11] : memref<8x64xbf16, #tpu.memory_space<vmem>>, vector<8x64xbf16>
    tpu.vector_store %arg3[%c0_10, %c0_11], %24 {strides = array<i32>} : memref<8x64xbf16, #tpu.memory_space<vmem>>, vector<8x64xbf16>,
    return
  }
}

module attributes {stable_mosaic.version = 11 : i64} {
  func.func @_head_kernel(%arg0: memref<2x256xbf16, #tpu.memory_space<vmem>>, %arg1: memref<256x1024xbf16, #tpu.memory_space<vmem>>, %arg2: memref<1x1024xf32, #tpu.memory_space<vmem>>, %arg3: memref<1024x128xbf16, #tpu.memory_space<vmem>>, %arg4: memref<1x128xf32, #tpu.memory_space<vmem>>, %arg5: memref<2x128xf32, #tpu.memory_space<vmem>>) attributes {dimension_semantics = [], scalar_prefetch = 0 : i64, scratch_operands = 0 : i64, tpu.core_type = #tpu.core_type<tc>} {
    %c0 = arith.constant 0 : index
    %c0_0 = arith.constant 0 : index
    %0 = vector.load %arg0[%c0, %c0_0] : memref<2x256xbf16, #tpu.memory_space<vmem>>, vector<2x256xbf16>
    %c0_1 = arith.constant 0 : index
    %c0_2 = arith.constant 0 : index
    %1 = vector.load %arg1[%c0_1, %c0_2] : memref<256x1024xbf16, #tpu.memory_space<vmem>>, vector<256x1024xbf16>
    %cst = arith.constant dense<0.000000e+00> : vector<2x1024xf32>
    %2 = tpu.matmul %0, %1, %cst {dimension_numbers = #tpu.dot_dimension_numbers<[1], [0], [0], [1], [0, 0, 1, 1], [], []>} : vector<2x256xbf16>, vector<256x1024xbf16>, vector<2x1024xf32> -> vector<2x1024xf32>
    %c0_3 = arith.constant 0 : index
    %c0_4 = arith.constant 0 : index
    %3 = vector.load %arg2[%c0_3, %c0_4] : memref<1x1024xf32, #tpu.memory_space<vmem>>, vector<1x1024xf32>
    %4 = vector.broadcast %3 : vector<1x1024xf32> to vector<2x1024xf32>
    %5 = arith.addf %2, %4 : vector<2x1024xf32>
    %6 = arith.truncf %5 : vector<2x1024xf32> to vector<2x1024xbf16>
    %c0_5 = arith.constant 0 : index
    %c0_6 = arith.constant 0 : index
    %7 = vector.load %arg3[%c0_5, %c0_6] : memref<1024x128xbf16, #tpu.memory_space<vmem>>, vector<1024x128xbf16>
    %cst_7 = arith.constant dense<0.000000e+00> : vector<2x128xf32>
    %8 = tpu.matmul %6, %7, %cst_7 {dimension_numbers = #tpu.dot_dimension_numbers<[1], [0], [0], [1], [0, 0, 1, 1], [], []>} : vector<2x1024xbf16>, vector<1024x128xbf16>, vector<2x128xf32> -> vector<2x128xf32>
    %c0_8 = arith.constant 0 : index
    %c0_9 = arith.constant 0 : index
    %9 = vector.load %arg4[%c0_8, %c0_9] : memref<1x128xf32, #tpu.memory_space<vmem>>, vector<1x128xf32>
    %10 = vector.broadcast %9 : vector<1x128xf32> to vector<2x128xf32>
    %11 = arith.addf %8, %10 : vector<2x128xf32>
    %c0_10 = arith.constant 0 : index
    %c0_11 = arith.constant 0 : index
    %12 = vector.load %arg5[%c0_10, %c0_11] : memref<2x128xf32, #tpu.memory_space<vmem>>, vector<2x128xf32>
    tpu.vector_store %arg5[%c0_10, %c0_11], %11 {strides = array<i32>} : memref<2x128xf32, #tpu.memory_space<vmem>>, vector<2x128xf32>,
    return
  }
}

</mosaic_0001>

<bundles_post_ra>
// kernel: _lambda_.23
= control target key start
LH: loop header
LB: loop body
LE: loop exit
PB: predicated region body
PF: predicated region fallthrough
CT: control target
= control target key end

     0   :  { %s2400_s1 = inlined_call_operand.vmem [shape: bf16[128,128], index: 1, kind: input, shape index: {}]   ;;  %s2401_s0 = inlined_call_operand.vmem [shape: bf16[512,128], index: 0, kind: input, shape index: {}]   ;;  %s2402_s2 = inlined_call_operand.vmem [shape: f32[1,128], index: 2, kind: input, shape index: {}]   ;;  %s2403_s3 = inlined_call_operand.vmem [shape: f32[1,128], index: 3, kind: input, shape index: {}]   ;;  %s2404_s4 = inlined_call_operand.vmem [shape: bf16[512,128], index: 4, kind: output, shape index: {}]  }
   0x1   :  { %v1981_v0 = vld [vmem:[%s2400_s1 + $0x38] sm:$0xff]   ;;  %v1982_v1 = vld [vmem:[%s2400_s1 + $0x30] sm:$0xff]   ;;  %v1983_v2 = vld [vmem:[%s2400_s1 + $0x28] sm:$0xff]  }
   0x2   :  { %1885 = vmatprep.subr.bf16.mxu0 %v1981_v0  ;;  %1965 = vmatprep.subr.bf16.mxu1 %v1981_v0  ;;  %v1984_v3 = vld [vmem:[%s2400_s1 + $0x20] sm:$0xff]   ;;  %v1985_v6 = vld [vmem:[%s2400_s1 + $0x18] sm:$0xff]   ;;  %v1986_v7 = vld [vmem:[%s2400_s1 + $0x10] sm:$0xff]  }
   0x3   :  { %1886 = vmatpush3.bf16.msra.mxu0 %v1981_v0  ;;  %1973 = vmatpush3.bf16.msra.mxu1 %v1981_v0  ;;  %v1989_v4 = vld [vmem:[%s2401_s0] sm:$0xff]   ;;  %v1987_v8 = vld [vmem:[%s2400_s1 + $0x8] sm:$0xff]   ;;  %v1993_v12 = vld [vmem:[%s2401_s0 + $0x10] sm:$0xff]  }
   0x4   :  { %1887 = vmatprep.subr.bf16.mxu0 %v1982_v1  ;;  %1966 = vmatprep.subr.bf16.mxu1 %v1982_v1  ;;  %v1990_v5 = vld [vmem:[%s2401_s0 + $0x80] sm:$0xff]   ;;  %v1991_v10 = vld [vmem:[%s2401_s0 + $0x8] sm:$0xff]   ;;  %v1994_v13 = vld [vmem:[%s2401_s0 + $0x90] sm:$0xff]  }
   0x5   :  { %1901 = vmatprep.mubr.bf16.mxu0 %v1989_v4  ;;  %1933 = vmatprep.mubr.bf16.mxu1 %v1990_v5  ;;  %v1988_v9 = vld [vmem:[%s2400_s1] sm:$0xff]   ;;  %v1992_v11 = vld [vmem:[%s2401_s0 + $0x88] sm:$0xff]   ;;  %v1995_v14 = vld [vmem:[%s2401_s0 + $0x18] sm:$0xff]  }
   0x6   :  { %v1996_v15 = vld [vmem:[%s2401_s0 + $0x98] sm:$0xff]   ;;  %v1997_v16 = vld [vmem:[%s2401_s0 + $0x20] sm:$0xff]   ;;  %v1999_v18 = vld [vmem:[%s2401_s0 + $0x28] sm:$0xff]  }
   0x7   :  { %1888 = vmatpush3.bf16.msra.mxu0 %v1982_v1  ;;  %1974 = vmatpush3.bf16.msra.mxu1 %v1982_v1  ;;  %v1998_v17 = vld [vmem:[%s2401_s0 + $0xa0] sm:$0xff]   ;;  %v2000_v19 = vld [vmem:[%s2401_s0 + $0xa8] sm:$0xff]   ;;  %v2001_v20 = vld [vmem:[%s2401_s0 + $0x30] sm:$0xff]  }
   0x8   :  { %1889 = vmatprep.subr.bf16.mxu0 %v1983_v2  ;;  %1967 = vmatprep.subr.bf16.mxu1 %v1983_v2  ;;  %v2002_v21 = vld [vmem:[%s2401_s0 + $0xb0] sm:$0xff]   ;;  %v2003_v22 = vld [vmem:[%s2401_s0 + $0x38] sm:$0xff]   ;;  %v2005_v24 = vld [vmem:[%s2401_s0 + $0x40] sm:$0xff]  }
   0x9   :  { %v2004_v23 = vld [vmem:[%s2401_s0 + $0xb8] sm:$0xff]   ;;  %v2006_v25 = vld [vmem:[%s2401_s0 + $0xc0] sm:$0xff]   ;;  %v2007_v26 = vld [vmem:[%s2401_s0 + $0x48] sm:$0xff]  }
   0xa   :  { %v2008_v27 = vld [vmem:[%s2401_s0 + $0xc8] sm:$0xff]   ;;  %v2009_v28 = vld [vmem:[%s2401_s0 + $0x50] sm:$0xff]   ;;  %v2011_v30 = vld [vmem:[%s2401_s0 + $0x58] sm:$0xff]  }
   0xb   :  { %1890 = vmatpush3.bf16.msra.mxu0 %v1983_v2  ;;  %1975 = vmatpush3.bf16.msra.mxu1 %v1983_v2  ;;  %v2010_v29 = vld [vmem:[%s2401_s0 + $0xd0] sm:$0xff]   ;;  %v2012_v31 = vld [vmem:[%s2401_s0 + $0xd8] sm:$0xff]   ;;  %v2013_v32 = vld [vmem:[%s2401_s0 + $0x60] sm:$0xff]  }
   0xc   :  { %1891 = vmatprep.subr.bf16.mxu0 %v1984_v3  ;;  %1968 = vmatprep.subr.bf16.mxu1 %v1984_v3  ;;  %v2014_v33 = vld [vmem:[%s2401_s0 + $0xe0] sm:$0xff]   ;;  %v2015_v34 = vld [vmem:[%s2401_s0 + $0x68] sm:$0xff]   ;;  %v2017_v36 = vld [vmem:[%s2401_s0 + $0x70] sm:$0xff]  }
   0xd   :  { %v2016_v35 = vld [vmem:[%s2401_s0 + $0xe8] sm:$0xff]   ;;  %v2018_v37 = vld [vmem:[%s2401_s0 + $0xf0] sm:$0xff]   ;;  %v2019_v38 = vld [vmem:[%s2401_s0 + $0x78] sm:$0xff]  }
   0xe   :  { %v2020_v39 = vld [vmem:[%s2401_s0 + $0xf8] sm:$0xff]   ;;  %v2169_v40 = vld [vmem:[%s2402_s2] ss:$0 sm:$0xff] }
   0xf   :  { %1892 = vmatpush3.bf16.msra.mxu0 %v1984_v3  ;;  %1976 = vmatpush3.bf16.msra.mxu1 %v1984_v3  ;;  %v2176_v45 = vld [vmem:[%s2403_s3] ss:$0 sm:$0xff] }
  0x10   :  { %1893 = vmatprep.subr.bf16.mxu0 %v1985_v6  ;;  %1969 = vmatprep.subr.bf16.mxu1 %v1985_v6 }
  0x13   :  { %1894 = vmatpush3.bf16.msra.mxu0 %v1985_v6  ;;  %1977 = vmatpush3.bf16.msra.mxu1 %v1985_v6 }
  0x14   :  { %1895 = vmatprep.subr.bf16.mxu0 %v1986_v7  ;;  %1970 = vmatprep.subr.bf16.mxu1 %v1986_v7 }
  0x17   :  { %1896 = vmatpush3.bf16.msra.mxu0 %v1986_v7  ;;  %1978 = vmatpush3.bf16.msra.mxu1 %v1986_v7 }
  0x18   :  { %1897 = vmatprep.subr.bf16.mxu0 %v1987_v8  ;;  %1971 = vmatprep.subr.bf16.mxu1 %v1987_v8 }
  0x1b   :  { %1898 = vmatpush3.bf16.msra.mxu0 %v1987_v8  ;;  %1979 = vmatpush3.bf16.msra.mxu1 %v1987_v8 }
  0x1c   :  { %1899 = vmatprep.subr.bf16.mxu0 %v1988_v9  ;;  %1972 = vmatprep.subr.bf16.mxu1 %v1988_v9 }
  0x1f   :  { %1900 = vmatpush3.bf16.msra.mxu0 %v1988_v9  ;;  %1980 = vmatpush3.bf16.msra.mxu1 %v1988_v9 }
  0x22   :  { %1902 = vmatmul.mubr.bf16.vlgmr.msra.gmra.mxu0 %v1991_v10  ;;  %1934 = vmatmul.mubr.bf16.vlgmr.msra.gmra.mxu1 %v1992_v11 }
  0x23   :  { %1905 = vmatprep.mubr.bf16.mxu0 %v1993_v12  ;;  %1937 = vmatprep.mubr.bf16.mxu1 %v1994_v13 }
  0x2a   :  { %1906 = vmatmul.mubr.bf16.gmra.mxu0 %v1995_v14  ;;  %1938 = vmatmul.mubr.bf16.gmra.mxu1 %v1996_v15 }
  0x2b   :  { %1909 = vmatprep.mubr.bf16.mxu0 %v1997_v16  ;;  %1941 = vmatprep.mubr.bf16.mxu1 %v1998_v17 }
  0x32   :  { %1910 = vmatmul.mubr.bf16.gmra.mxu0 %v1999_v18  ;;  %1942 = vmatmul.mubr.bf16.gmra.mxu1 %v2000_v19 }
  0x33   :  { %1913 = vmatprep.mubr.bf16.mxu0 %v2001_v20  ;;  %1945 = vmatprep.mubr.bf16.mxu1 %v2002_v21 }
  0x3a   :  { %1914 = vmatmul.mubr.bf16.gmra.mxu0 %v2003_v22  ;;  %1946 = vmatmul.mubr.bf16.gmra.mxu1 %v2004_v23 }
  0x3b   :  { %1917 = vmatprep.mubr.bf16.mxu0 %v2005_v24  ;;  %1949 = vmatprep.mubr.bf16.mxu1 %v2006_v25 }
  0x42   :  { %1918 = vmatmul.mubr.bf16.gmra.mxu0 %v2007_v26  ;;  %1950 = vmatmul.mubr.bf16.gmra.mxu1 %v2008_v27 }
  0x43   :  { %1921 = vmatprep.mubr.bf16.mxu0 %v2009_v28  ;;  %1953 = vmatprep.mubr.bf16.mxu1 %v2010_v29 }
  0x4a   :  { %1922 = vmatmul.mubr.bf16.gmra.mxu0 %v2011_v30  ;;  %1954 = vmatmul.mubr.bf16.gmra.mxu1 %v2012_v31 }
  0x4b   :  { %1925 = vmatprep.mubr.bf16.mxu0 %v2013_v32  ;;  %1957 = vmatprep.mubr.bf16.mxu1 %v2014_v33 }
  0x52   :  { %1926 = vmatmul.mubr.bf16.gmra.mxu0 %v2015_v34  ;;  %1958 = vmatmul.mubr.bf16.gmra.mxu1 %v2016_v35 }
  0x53   :  { %1929 = vmatprep.mubr.bf16.mxu0 %v2017_v36  ;;  %1961 = vmatprep.mubr.bf16.mxu1 %v2018_v37 }
  0x5a   :  { %1930 = vmatmul.mubr.bf16.gmra.mxu0 %v2019_v38  ;;  %1962 = vmatmul.mubr.bf16.gmra.mxu1 %v2020_v39 }
  0xe2   :  { %v1903_v41 = vpop.f32.mrf.mxu0  ;;  %v1935_v42 = vpop.f32.mrf.mxu1 }
  0xe3   :  { %v963_v43 = vmul.f32 %v1903_v41, %v2169_v40  ;;  %v995_v44 = vmul.f32 %v1935_v42, %v2169_v40 }
  0xe4   :  { %v504_v46 = vpop.f32.mrf.mxu0  ;;  %v632_v47 = vpop.f32.mrf.mxu1 }
  0xe5   :  { %v961_v48 = vmul.f32 %v2169_v40, %v504_v46  ;;  %v993_v49 = vmul.f32 %v2169_v40, %v632_v47  ;;  %v1034_v52 = vadd.f32 %v2176_v45, %v963_v43  ;;  %v1066_v53 = vadd.f32 %v2176_v45, %v995_v44 }
  0xe6   :  { %v1904_v50 = vpop.f32.mrf.mxu0  ;;  %v1936_v51 = vpop.f32.mrf.mxu1 }
  0xe7   :  { %v964_v54 = vmul.f32 %v1904_v50, %v2169_v40  ;;  %v996_v55 = vmul.f32 %v1936_v51, %v2169_v40  ;;  %v1032_v58 = vadd.f32 %v2176_v45, %v961_v48  ;;  %v1064_v59 = vadd.f32 %v2176_v45, %v993_v49 }
  0xe8   :  { %v507_v56 = vpop.f32.mrf.mxu0  ;;  %v635_v57 = vpop.f32.mrf.mxu1  ;;  %v1098_v2 = vmax.f32 %v1034_v52, 0.0  ;;  %v1130_v3 = vmax.f32 %v1066_v53, 0.0 }
  0xe9   :  { %v962_v60 = vmul.f32 %v2169_v40, %v507_v56  ;;  %v994_v61 = vmul.f32 %v2169_v40, %v635_v57  ;;  %v1035_v62 = vadd.f32 %v2176_v45, %v964_v54  ;;  %v1067_v63 = vadd.f32 %v2176_v45, %v996_v55 }
  0xea   :  { %v1907_v0 = vpop.f32.mrf.mxu0  ;;  %v1939_v1 = vpop.f32.mrf.mxu1  ;;  %v1096_v12 = vmax.f32 %v1032_v58, 0.0  ;;  %v1128_v13 = vmax.f32 %v1064_v59, 0.0 }
  0xeb   :  { %v1033_v4 = vadd.f32 %v2176_v45, %v962_v60  ;;  %v1065_v5 = vadd.f32 %v2176_v45, %v994_v61  ;;  %v1099_v6 = vmax.f32 %v1035_v62, 0.0  ;;  %v1131_v7 = vmax.f32 %v1067_v63, 0.0 }
  0xec   :  { %v967_v8 = vmul.f32 %v1907_v0, %v2169_v40  ;;  %v999_v9 = vmul.f32 %v1939_v1, %v2169_v40  ;;  %v520_v10 = vpop.f32.mrf.mxu0  ;;  %v648_v11 = vpop.f32.mrf.mxu1 }
  0xed   :  { %v1097_v14 = vmax.f32 %v1033_v4, 0.0  ;;  %v1129_v15 = vmax.f32 %v1065_v5, 0.0  ;;  %v1662_v16 = vpack.c.bf16 %v1099_v6, %v1098_v2  ;;  %v1742_v17 = vpack.c.bf16 %v1131_v7, %v1130_v3 }
  0xee   :  { %v965_v18 = vmul.f32 %v2169_v40, %v520_v10  ;;  %v997_v19 = vmul.f32 %v2169_v40, %v648_v11  ;;  %v1908_v20 = vpop.f32.mrf.mxu0  ;;  %v1940_v21 = vpop.f32.mrf.mxu1  ;;  %v1038_v24 = vadd.f32 %v2176_v45, %v967_v8  ;;  %v1070_v25 = vadd.f32 %v2176_v45, %v999_v9 }
  0xef   :  { %v1657_v22 = vpack.c.bf16 %v1097_v14, %v1096_v12  ;;  %v1737_v23 = vpack.c.bf16 %v1129_v15, %v1128_v13  ;;  %1814 = vst [vmem:[%s2404_s4 + $0x8] sm:$0xff] %v1662_v16   ;;  %1830 = vst [vmem:[%s2404_s4 + $0x88] sm:$0xff] %v1742_v17   ;;  %v968_v26 = vmul.f32 %v1908_v20, %v2169_v40 }
  0xf0   :  { %v1000_v27 = vmul.f32 %v1940_v21, %v2169_v40  ;;  %v523_v28 = vpop.f32.mrf.mxu0  ;;  %v651_v29 = vpop.f32.mrf.mxu1  ;;  %v1036_v30 = vadd.f32 %v2176_v45, %v965_v18  ;;  %v1068_v31 = vadd.f32 %v2176_v45, %v997_v19  ;;  %v1102_v43 = vmax.f32 %v1038_v24, 0.0 }
  0xf1   :  { %1658 = vst [vmem:[%s2404_s4] sm:$0xff] %v1657_v22   ;;  %1829 = vst [vmem:[%s2404_s4 + $0x80] sm:$0xff] %v1737_v23   ;;  %v966_v32 = vmul.f32 %v2169_v40, %v523_v28  ;;  %v998_v33 = vmul.f32 %v2169_v40, %v651_v29  ;;  %v1039_v34 = vadd.f32 %v2176_v45, %v968_v26  ;;  %v1134_v44 = vmax.f32 %v1070_v25, 0.0 }
  0xf2   :  { %v1071_v35 = vadd.f32 %v2176_v45, %v1000_v27  ;;  %v1911_v36 = vpop.f32.mrf.mxu0  ;;  %v1943_v37 = vpop.f32.mrf.mxu1  ;;  %v1100_v50 = vmax.f32 %v1036_v30, 0.0  ;;  %v1132_v51 = vmax.f32 %v1068_v31, 0.0 }
  0xf3   :  { %v1037_v38 = vadd.f32 %v2176_v45, %v966_v32  ;;  %v1069_v39 = vadd.f32 %v2176_v45, %v998_v33  ;;  %v971_v41 = vmul.f32 %v1911_v36, %v2169_v40  ;;  %v1003_v42 = vmul.f32 %v1943_v37, %v2169_v40 }
  0xf4   :  { %v1103_v46 = vmax.f32 %v1039_v34, 0.0  ;;  %v1135_v47 = vmax.f32 %v1071_v35, 0.0  ;;  %v536_v48 = vpop.f32.mrf.mxu0  ;;  %v664_v49 = vpop.f32.mrf.mxu1 }
  0xf5   :  { %v1101_v52 = vmax.f32 %v1037_v38, 0.0  ;;  %v1133_v53 = vmax.f32 %v1069_v39, 0.0  ;;  %v969_v56 = vmul.f32 %v2169_v40, %v536_v48  ;;  %v1001_v57 = vmul.f32 %v2169_v40, %v664_v49 }
  0xf6   :  { %v1672_v54 = vpack.c.bf16 %v1103_v46, %v1102_v43  ;;  %v1752_v55 = vpack.c.bf16 %v1135_v47, %v1134_v44  ;;  %v1912_v58 = vpop.f32.mrf.mxu0  ;;  %v1944_v59 = vpop.f32.mrf.mxu1  ;;  %v1042_v62 = vadd.f32 %v2176_v45, %v971_v41  ;;  %v1074_v63 = vadd.f32 %v2176_v45, %v1003_v42 }
  0xf7   :  { %v1667_v60 = vpack.c.bf16 %v1101_v52, %v1100_v50  ;;  %v1747_v61 = vpack.c.bf16 %v1133_v53, %v1132_v51  ;;  %v972_v0 = vmul.f32 %v1912_v58, %v2169_v40  ;;  %v1004_v1 = vmul.f32 %v1944_v59, %v2169_v40 }
  0xf8   :  { %1816 = vst [vmem:[%s2404_s4 + $0x18] sm:$0xff] %v1672_v54   ;;  %1832 = vst [vmem:[%s2404_s4 + $0x98] sm:$0xff] %v1752_v55   ;;  %v539_v2 = vpop.f32.mrf.mxu0  ;;  %v667_v3 = vpop.f32.mrf.mxu1  ;;  %v1040_v4 = vadd.f32 %v2176_v45, %v969_v56  ;;  %v1072_v5 = vadd.f32 %v2176_v45, %v1001_v57  ;;  %v1106_v12 = vmax.f32 %v1042_v62, 0.0  ;;  %v1138_v13 = vmax.f32 %v1074_v63, 0.0 }
  0xf9   :  { %1815 = vst [vmem:[%s2404_s4 + $0x10] sm:$0xff] %v1667_v60   ;;  %1831 = vst [vmem:[%s2404_s4 + $0x90] sm:$0xff] %v1747_v61   ;;  %v970_v6 = vmul.f32 %v2169_v40, %v539_v2  ;;  %v1002_v7 = vmul.f32 %v2169_v40, %v667_v3  ;;  %v1043_v8 = vadd.f32 %v2176_v45, %v972_v0 }
  0xfa   :  { %v1075_v9 = vadd.f32 %v2176_v45, %v1004_v1  ;;  %v1915_v10 = vpop.f32.mrf.mxu0  ;;  %v1947_v11 = vpop.f32.mrf.mxu1  ;;  %v1104_v22 = vmax.f32 %v1040_v4, 0.0  ;;  %v1136_v23 = vmax.f32 %v1072_v5, 0.0 }
  0xfb   :  { %v1041_v14 = vadd.f32 %v2176_v45, %v970_v6  ;;  %v1073_v15 = vadd.f32 %v2176_v45, %v1002_v7  ;;  %v1107_v16 = vmax.f32 %v1043_v8, 0.0  ;;  %v975_v18 = vmul.f32 %v1915_v10, %v2169_v40 }
  0xfc   :  { %v1139_v17 = vmax.f32 %v1075_v9, 0.0  ;;  %v1007_v19 = vmul.f32 %v1947_v11, %v2169_v40  ;;  %v552_v20 = vpop.f32.mrf.mxu0  ;;  %v680_v21 = vpop.f32.mrf.mxu1 }
  0xfd   :  { %v1105_v24 = vmax.f32 %v1041_v14, 0.0  ;;  %v1137_v25 = vmax.f32 %v1073_v15, 0.0  ;;  %v1682_v26 = vpack.c.bf16 %v1107_v16, %v1106_v12  ;;  %v973_v28 = vmul.f32 %v2169_v40, %v552_v20 }
  0xfe   :  { %v1762_v27 = vpack.c.bf16 %v1139_v17, %v1138_v13  ;;  %v1005_v29 = vmul.f32 %v2169_v40, %v680_v21  ;;  %v1916_v30 = vpop.f32.mrf.mxu0  ;;  %v1948_v31 = vpop.f32.mrf.mxu1  ;;  %v1046_v34 = vadd.f32 %v2176_v45, %v975_v18  ;;  %v1078_v35 = vadd.f32 %v2176_v45, %v1007_v19 }
  0xff   :  { %v1677_v32 = vpack.c.bf16 %v1105_v24, %v1104_v22  ;;  %v1757_v33 = vpack.c.bf16 %v1137_v25, %v1136_v23  ;;  %1818 = vst [vmem:[%s2404_s4 + $0x28] sm:$0xff] %v1682_v26   ;;  %v976_v36 = vmul.f32 %v1916_v30, %v2169_v40  ;;  %v1008_v37 = vmul.f32 %v1948_v31, %v2169_v40 }
 0x100   :  { %1834 = vst [vmem:[%s2404_s4 + $0xa8] sm:$0xff] %v1762_v27   ;;  %v555_v38 = vpop.f32.mrf.mxu0  ;;  %v683_v39 = vpop.f32.mrf.mxu1  ;;  %v1044_v41 = vadd.f32 %v2176_v45, %v973_v28  ;;  %v1076_v42 = vadd.f32 %v2176_v45, %v1005_v29  ;;  %v1110_v54 = vmax.f32 %v1046_v34, 0.0  ;;  %v1142_v55 = vmax.f32 %v1078_v35, 0.0 }
 0x101   :  { %1817 = vst [vmem:[%s2404_s4 + $0x20] sm:$0xff] %v1677_v32   ;;  %1833 = vst [vmem:[%s2404_s4 + $0xa0] sm:$0xff] %v1757_v33   ;;  %v974_v43 = vmul.f32 %v2169_v40, %v555_v38  ;;  %v1006_v44 = vmul.f32 %v2169_v40, %v683_v39  ;;  %v1047_v46 = vadd.f32 %v2176_v45, %v976_v36 }
 0x102   :  { %v1079_v47 = vadd.f32 %v2176_v45, %v1008_v37  ;;  %v1919_v48 = vpop.f32.mrf.mxu0  ;;  %v1951_v49 = vpop.f32.mrf.mxu1  ;;  %v1108_v60 = vmax.f32 %v1044_v41, 0.0  ;;  %v1140_v61 = vmax.f32 %v1076_v42, 0.0 }
 0x103   :  { %v1045_v50 = vadd.f32 %v2176_v45, %v974_v43  ;;  %v1077_v51 = vadd.f32 %v2176_v45, %v1006_v44  ;;  %v979_v52 = vmul.f32 %v1919_v48, %v2169_v40  ;;  %v1011_v53 = vmul.f32 %v1951_v49, %v2169_v40 }
 0x104   :  { %v1111_v56 = vmax.f32 %v1047_v46, 0.0  ;;  %v1143_v57 = vmax.f32 %v1079_v47, 0.0  ;;  %v568_v58 = vpop.f32.mrf.mxu0  ;;  %v696_v59 = vpop.f32.mrf.mxu1 }
 0x105   :  { %v1109_v62 = vmax.f32 %v1045_v50, 0.0  ;;  %v1141_v63 = vmax.f32 %v1077_v51, 0.0  ;;  %v977_v2 = vmul.f32 %v2169_v40, %v568_v58  ;;  %v1009_v3 = vmul.f32 %v2169_v40, %v696_v59 }
 0x106   :  { %v1692_v0 = vpack.c.bf16 %v1111_v56, %v1110_v54  ;;  %v1772_v1 = vpack.c.bf16 %v1143_v57, %v1142_v55  ;;  %v1920_v4 = vpop.f32.mrf.mxu0  ;;  %v1952_v5 = vpop.f32.mrf.mxu1  ;;  %v1050_v8 = vadd.f32 %v2176_v45, %v979_v52  ;;  %v1082_v9 = vadd.f32 %v2176_v45, %v1011_v53 }
 0x107   :  { %v1687_v6 = vpack.c.bf16 %v1109_v62, %v1108_v60  ;;  %v1767_v7 = vpack.c.bf16 %v1141_v63, %v1140_v61  ;;  %v980_v10 = vmul.f32 %v1920_v4, %v2169_v40  ;;  %v1012_v11 = vmul.f32 %v1952_v5, %v2169_v40 }
 0x108   :  { %1820 = vst [vmem:[%s2404_s4 + $0x38] sm:$0xff] %v1692_v0   ;;  %1836 = vst [vmem:[%s2404_s4 + $0xb8] sm:$0xff] %v1772_v1   ;;  %v571_v12 = vpop.f32.mrf.mxu0  ;;  %v699_v13 = vpop.f32.mrf.mxu1  ;;  %v1048_v14 = vadd.f32 %v2176_v45, %v977_v2  ;;  %v1080_v15 = vadd.f32 %v2176_v45, %v1009_v3  ;;  %v1114_v22 = vmax.f32 %v1050_v8, 0.0  ;;  %v1146_v23 = vmax.f32 %v1082_v9, 0.0 }
 0x109   :  { %1819 = vst [vmem:[%s2404_s4 + $0x30] sm:$0xff] %v1687_v6   ;;  %1835 = vst [vmem:[%s2404_s4 + $0xb0] sm:$0xff] %v1767_v7   ;;  %v978_v16 = vmul.f32 %v2169_v40, %v571_v12  ;;  %v1010_v17 = vmul.f32 %v2169_v40, %v699_v13  ;;  %v1051_v18 = vadd.f32 %v2176_v45, %v980_v10 }
 0x10a   :  { %v1083_v19 = vadd.f32 %v2176_v45, %v1012_v11  ;;  %v1923_v20 = vpop.f32.mrf.mxu0  ;;  %v1955_v21 = vpop.f32.mrf.mxu1  ;;  %v1112_v32 = vmax.f32 %v1048_v14, 0.0  ;;  %v1144_v33 = vmax.f32 %v1080_v15, 0.0 }
 0x10b   :  { %v1049_v24 = vadd.f32 %v2176_v45, %v978_v16  ;;  %v1081_v25 = vadd.f32 %v2176_v45, %v1010_v17  ;;  %v1115_v26 = vmax.f32 %v1051_v18, 0.0  ;;  %v983_v28 = vmul.f32 %v1923_v20, %v2169_v40 }
 0x10c   :  { %v1147_v27 = vmax.f32 %v1083_v19, 0.0  ;;  %v1015_v29 = vmul.f32 %v1955_v21, %v2169_v40  ;;  %v584_v30 = vpop.f32.mrf.mxu0  ;;  %v712_v31 = vpop.f32.mrf.mxu1 }
 0x10d   :  { %v1113_v34 = vmax.f32 %v1049_v24, 0.0  ;;  %v1145_v35 = vmax.f32 %v1081_v25, 0.0  ;;  %v1702_v36 = vpack.c.bf16 %v1115_v26, %v1114_v22  ;;  %v981_v38 = vmul.f32 %v2169_v40, %v584_v30 }
 0x10e   :  { %v1782_v37 = vpack.c.bf16 %v1147_v27, %v1146_v23  ;;  %v1013_v39 = vmul.f32 %v2169_v40, %v712_v31  ;;  %v1924_v41 = vpop.f32.mrf.mxu0  ;;  %v1956_v42 = vpop.f32.mrf.mxu1  ;;  %v1054_v46 = vadd.f32 %v2176_v45, %v983_v28  ;;  %v1086_v47 = vadd.f32 %v2176_v45, %v1015_v29 }
 0x10f   :  { %v1697_v43 = vpack.c.bf16 %v1113_v34, %v1112_v32  ;;  %v1777_v44 = vpack.c.bf16 %v1145_v35, %v1144_v33  ;;  %1822 = vst [vmem:[%s2404_s4 + $0x48] sm:$0xff] %v1702_v36   ;;  %v984_v48 = vmul.f32 %v1924_v41, %v2169_v40  ;;  %v1016_v49 = vmul.f32 %v1956_v42, %v2169_v40 }
 0x110   :  { %1838 = vst [vmem:[%s2404_s4 + $0xc8] sm:$0xff] %v1782_v37   ;;  %v587_v50 = vpop.f32.mrf.mxu0  ;;  %v715_v51 = vpop.f32.mrf.mxu1  ;;  %v1052_v52 = vadd.f32 %v2176_v45, %v981_v38  ;;  %v1084_v53 = vadd.f32 %v2176_v45, %v1013_v39  ;;  %v1118_v0 = vmax.f32 %v1054_v46, 0.0  ;;  %v1150_v1 = vmax.f32 %v1086_v47, 0.0 }
 0x111   :  { %1821 = vst [vmem:[%s2404_s4 + $0x40] sm:$0xff] %v1697_v43   ;;  %1837 = vst [vmem:[%s2404_s4 + $0xc0] sm:$0xff] %v1777_v44   ;;  %v982_v54 = vmul.f32 %v2169_v40, %v587_v50  ;;  %v1014_v55 = vmul.f32 %v2169_v40, %v715_v51  ;;  %v1055_v56 = vadd.f32 %v2176_v45, %v984_v48 }
 0x112   :  { %v1087_v57 = vadd.f32 %v2176_v45, %v1016_v49  ;;  %v1927_v58 = vpop.f32.mrf.mxu0  ;;  %v1959_v59 = vpop.f32.mrf.mxu1  ;;  %v1116_v6 = vmax.f32 %v1052_v52, 0.0  ;;  %v1148_v7 = vmax.f32 %v1084_v53, 0.0 }
 0x113   :  { %v1053_v60 = vadd.f32 %v2176_v45, %v982_v54  ;;  %v1085_v61 = vadd.f32 %v2176_v45, %v1014_v55  ;;  %v987_v62 = vmul.f32 %v1927_v58, %v2169_v40  ;;  %v1019_v63 = vmul.f32 %v1959_v59, %v2169_v40 }
 0x114   :  { %v1119_v2 = vmax.f32 %v1055_v56, 0.0  ;;  %v1151_v3 = vmax.f32 %v1087_v57, 0.0  ;;  %v600_v4 = vpop.f32.mrf.mxu0  ;;  %v728_v5 = vpop.f32.mrf.mxu1 }
 0x115   :  { %v1117_v8 = vmax.f32 %v1053_v60, 0.0  ;;  %v1149_v9 = vmax.f32 %v1085_v61, 0.0  ;;  %v985_v12 = vmul.f32 %v2169_v40, %v600_v4  ;;  %v1017_v13 = vmul.f32 %v2169_v40, %v728_v5 }
 0x116   :  { %v1712_v10 = vpack.c.bf16 %v1119_v2, %v1118_v0  ;;  %v1792_v11 = vpack.c.bf16 %v1151_v3, %v1150_v1  ;;  %v1928_v14 = vpop.f32.mrf.mxu0  ;;  %v1960_v15 = vpop.f32.mrf.mxu1  ;;  %v1058_v18 = vadd.f32 %v2176_v45, %v987_v62  ;;  %v1090_v19 = vadd.f32 %v2176_v45, %v1019_v63 }
 0x117   :  { %v1707_v16 = vpack.c.bf16 %v1117_v8, %v1116_v6  ;;  %v1787_v17 = vpack.c.bf16 %v1149_v9, %v1148_v7  ;;  %v988_v20 = vmul.f32 %v1928_v14, %v2169_v40  ;;  %v1020_v21 = vmul.f32 %v1960_v15, %v2169_v40 }
 0x118   :  { %1824 = vst [vmem:[%s2404_s4 + $0x58] sm:$0xff] %v1712_v10   ;;  %1840 = vst [vmem:[%s2404_s4 + $0xd8] sm:$0xff] %v1792_v11   ;;  %v603_v22 = vpop.f32.mrf.mxu0  ;;  %v731_v23 = vpop.f32.mrf.mxu1  ;;  %v1056_v24 = vadd.f32 %v2176_v45, %v985_v12  ;;  %v1088_v25 = vadd.f32 %v2176_v45, %v1017_v13  ;;  %v1122_v32 = vmax.f32 %v1058_v18, 0.0  ;;  %v1154_v33 = vmax.f32 %v1090_v19, 0.0 }
 0x119   :  { %1823 = vst [vmem:[%s2404_s4 + $0x50] sm:$0xff] %v1707_v16   ;;  %1839 = vst [vmem:[%s2404_s4 + $0xd0] sm:$0xff] %v1787_v17   ;;  %v986_v26 = vmul.f32 %v2169_v40, %v603_v22  ;;  %v1018_v27 = vmul.f32 %v2169_v40, %v731_v23  ;;  %v1059_v28 = vadd.f32 %v2176_v45, %v988_v20 }
 0x11a   :  { %v1091_v29 = vadd.f32 %v2176_v45, %v1020_v21  ;;  %v1931_v30 = vpop.f32.mrf.mxu0  ;;  %v1963_v31 = vpop.f32.mrf.mxu1  ;;  %v1120_v43 = vmax.f32 %v1056_v24, 0.0  ;;  %v1152_v44 = vmax.f32 %v1088_v25, 0.0 }
 0x11b   :  { %v1057_v34 = vadd.f32 %v2176_v45, %v986_v26  ;;  %v1089_v35 = vadd.f32 %v2176_v45, %v1018_v27  ;;  %v1123_v36 = vmax.f32 %v1059_v28, 0.0  ;;  %v991_v38 = vmul.f32 %v1931_v30, %v2169_v40 }
 0x11c   :  { %v1155_v37 = vmax.f32 %v1091_v29, 0.0  ;;  %v1023_v39 = vmul.f32 %v1963_v31, %v2169_v40  ;;  %v616_v41 = vpop.f32.mrf.mxu0  ;;  %v744_v42 = vpop.f32.mrf.mxu1 }
 0x11d   :  { %v1121_v46 = vmax.f32 %v1057_v34, 0.0  ;;  %v1153_v47 = vmax.f32 %v1089_v35, 0.0  ;;  %v1722_v48 = vpack.c.bf16 %v1123_v36, %v1122_v32  ;;  %v989_v50 = vmul.f32 %v2169_v40, %v616_v41 }
 0x11e   :  { %v1802_v49 = vpack.c.bf16 %v1155_v37, %v1154_v33  ;;  %v1021_v51 = vmul.f32 %v2169_v40, %v744_v42  ;;  %v1932_v52 = vpop.f32.mrf.mxu0  ;;  %v1964_v53 = vpop.f32.mrf.mxu1  ;;  %v1062_v56 = vadd.f32 %v2176_v45, %v991_v38  ;;  %v1094_v57 = vadd.f32 %v2176_v45, %v1023_v39 }
 0x11f   :  { %v1717_v54 = vpack.c.bf16 %v1121_v46, %v1120_v43  ;;  %v1797_v55 = vpack.c.bf16 %v1153_v47, %v1152_v44  ;;  %1826 = vst [vmem:[%s2404_s4 + $0x68] sm:$0xff] %v1722_v48   ;;  %v992_v58 = vmul.f32 %v1932_v52, %v2169_v40  ;;  %v1024_v59 = vmul.f32 %v1964_v53, %v2169_v40 }
 0x120   :  { %1842 = vst [vmem:[%s2404_s4 + $0xe8] sm:$0xff] %v1802_v49   ;;  %v619_v60 = vpop.f32.mrf.mxu0  ;;  %v747_v61 = vpop.f32.mrf.mxu1  ;;  %v1060_v62 = vadd.f32 %v2176_v45, %v989_v50  ;;  %v1092_v63 = vadd.f32 %v2176_v45, %v1021_v51  ;;  %v1126_v6 = vmax.f32 %v1062_v56, 0.0  ;;  %v1158_v7 = vmax.f32 %v1094_v57, 0.0 }
 0x121   :  { %1825 = vst [vmem:[%s2404_s4 + $0x60] sm:$0xff] %v1717_v54   ;;  %1841 = vst [vmem:[%s2404_s4 + $0xe0] sm:$0xff] %v1797_v55   ;;  %v990_v0 = vmul.f32 %v2169_v40, %v619_v60  ;;  %v1022_v1 = vmul.f32 %v2169_v40, %v747_v61  ;;  %v1063_v2 = vadd.f32 %v2176_v45, %v992_v58 }
 0x122   :  { %v1095_v3 = vadd.f32 %v2176_v45, %v1024_v59  ;;  %v1124_v10 = vmax.f32 %v1060_v62, 0.0  ;;  %v1156_v11 = vmax.f32 %v1092_v63, 0.0 }
 0x123   :  { %v1061_v4 = vadd.f32 %v2176_v45, %v990_v0  ;;  %v1093_v5 = vadd.f32 %v2176_v45, %v1022_v1  ;;  %v1127_v8 = vmax.f32 %v1063_v2, 0.0 }
 0x124   :  { %v1159_v9 = vmax.f32 %v1095_v3, 0.0 }
 0x125   :  { %v1125_v12 = vmax.f32 %v1061_v4, 0.0  ;;  %v1157_v13 = vmax.f32 %v1093_v5, 0.0  ;;  %v1732_v14 = vpack.c.bf16 %v1127_v8, %v1126_v6 }
 0x126   :  { %v1812_v15 = vpack.c.bf16 %v1159_v9, %v1158_v7 }
 0x127   :  { %v1727_v16 = vpack.c.bf16 %v1125_v12, %v1124_v10  ;;  %v1807_v40 = vpack.c.bf16 %v1157_v13, %v1156_v11  ;;  %1828 = vst [vmem:[%s2404_s4 + $0x78] sm:$0xff] %v1732_v14  }
 0x128   :  { %1844 = vst [vmem:[%s2404_s4 + $0xf8] sm:$0xff] %v1812_v15  }
 0x129   :  { %1827 = vst [vmem:[%s2404_s4 + $0x70] sm:$0xff] %v1727_v16   ;;  %1843 = vst [vmem:[%s2404_s4 + $0xf0] sm:$0xff] %v1807_v40  }

// kernel: _lambda_.26
= control target key start
LH: loop header
LB: loop body
LE: loop exit
PB: predicated region body
PF: predicated region fallthrough
CT: control target
= control target key end

     0   :  { %s381_s0 = inlined_call_operand.vmem [shape: bf16[16,2,8,256], index: 0, kind: input, shape index: {}]   ;;  %s382_s1 = inlined_call_operand.vmem [shape: bf16[16,8,128], index: 1, kind: output, shape index: {}]  }
   0x1   :  { %v8_v0 = vld [vmem:[%s381_s0] sm:$0xff]  ;;  %v9_v1 = vld [vmem:[%s381_s0 + $0x8] sm:$0xff]  ;;  %v10_v2 = vld [vmem:[%s381_s0 + $0x10] sm:$0xff] }
   0x2   :  { %v11_v3 = vld [vmem:[%s381_s0 + $0x18] sm:$0xff]  ;;  %v40_v4 = vunpack.c.l.bf16 %v8_v0  ;;  %v41_v5 = vunpack.c.h.bf16 %v8_v0  ;;  %v42_v6 = vunpack.c.l.bf16 %v10_v2  ;;  %v43_v7 = vunpack.c.h.bf16 %v10_v2  ;;  %v12_v8 = vld [vmem:[%s381_s0 + $0x20] sm:$0xff]  ;;  %v13_v9 = vld [vmem:[%s381_s0 + $0x28] sm:$0xff] }
   0x3   :  { %v72_v10 = vunpack.c.l.bf16 %v9_v1  ;;  %v73_v11 = vunpack.c.h.bf16 %v9_v1  ;;  %v74_v12 = vunpack.c.l.bf16 %v11_v3  ;;  %v75_v13 = vunpack.c.h.bf16 %v11_v3  ;;  %v14_v14 = vld [vmem:[%s381_s0 + $0x30] sm:$0xff]  ;;  %v15_v15 = vld [vmem:[%s381_s0 + $0x38] sm:$0xff]  ;;  %v16_v20 = vld [vmem:[%s381_s0 + $0x40] sm:$0xff] }
   0x4   :  { %v104_v16 = vadd.f32 %v41_v5, %v40_v4  ;;  %v105_v17 = vadd.f32 %v43_v7, %v42_v6  ;;  %v44_v18 = vunpack.c.l.bf16 %v12_v8  ;;  %v45_v19 = vunpack.c.h.bf16 %v12_v8  ;;  %v18_v25 = vld [vmem:[%s381_s0 + $0x50] sm:$0xff]  ;;  %v17_v30 = vld [vmem:[%s381_s0 + $0x48] sm:$0xff]  ;;  %v19_v33 = vld [vmem:[%s381_s0 + $0x58] sm:$0xff] }
   0x5   :  { %v46_v21 = vunpack.c.l.bf16 %v14_v14  ;;  %v47_v22 = vunpack.c.h.bf16 %v14_v14  ;;  %v76_v23 = vunpack.c.l.bf16 %v13_v9  ;;  %v77_v24 = vunpack.c.h.bf16 %v13_v9  ;;  %v20_v44 = vld [vmem:[%s381_s0 + $0x60] sm:$0xff]  ;;  %v22_v45 = vld [vmem:[%s381_s0 + $0x70] sm:$0xff]  ;;  %v21_v54 = vld [vmem:[%s381_s0 + $0x68] sm:$0xff] }
   0x6   :  { %v120_v26 = vadd.f32 %v104_v16, %v72_v10  ;;  %v121_v27 = vadd.f32 %v105_v17, %v74_v12  ;;  %v78_v28 = vunpack.c.l.bf16 %v15_v15  ;;  %v79_v29 = vunpack.c.h.bf16 %v15_v15  ;;  %v23_v55 = vld [vmem:[%s381_s0 + $0x78] sm:$0xff]  ;;  %v24_v0 = vld [vmem:[%s381_s0 + $0x80] sm:$0xff]  ;;  %v26_v5 = vld [vmem:[%s381_s0 + $0x90] sm:$0xff] }
   0x7   :  { %v106_v31 = vadd.f32 %v45_v19, %v44_v18  ;;  %v107_v32 = vadd.f32 %v47_v22, %v46_v21  ;;  %v48_v34 = vunpack.c.l.bf16 %v16_v20  ;;  %v49_v35 = vunpack.c.h.bf16 %v16_v20  ;;  %v25_v10 = vld [vmem:[%s381_s0 + $0x88] sm:$0xff]  ;;  %v28_v20 = vld [vmem:[%s381_s0 + $0xa0] sm:$0xff] }
   0x8   :  { %v136_v36 = vadd.f32 %v120_v26, %v73_v11  ;;  %v137_v37 = vadd.f32 %v121_v27, %v75_v13  ;;  %v50_v38 = vunpack.c.l.bf16 %v18_v25  ;;  %v51_v39 = vunpack.c.h.bf16 %v18_v25  ;;  %v27_v13 = vld [vmem:[%s381_s0 + $0x98] sm:$0xff]  ;;  %v30_v25 = vld [vmem:[%s381_s0 + $0xb0] sm:$0xff] }
   0x9   :  { %v122_v40 = vadd.f32 %v106_v31, %v76_v23  ;;  %v123_v41 = vadd.f32 %v107_v32, %v78_v28  ;;  %v80_v42 = vunpack.c.l.bf16 %v17_v30  ;;  %v81_v43 = vunpack.c.h.bf16 %v17_v30  ;;  %v29_v30 = vld [vmem:[%s381_s0 + $0xa8] sm:$0xff] }
   0xa   :  { %v152_v46 = vmul.f32 0.25, %v136_v36  ;;  %v153_v47 = vmul.f32 0.25, %v137_v37  ;;  %v82_v48 = vunpack.c.l.bf16 %v19_v33  ;;  %v83_v49 = vunpack.c.h.bf16 %v19_v33 }
   0xb   :  { %v138_v50 = vadd.f32 %v122_v40, %v77_v24  ;;  %v139_v51 = vadd.f32 %v123_v41, %v79_v29  ;;  %v108_v52 = vadd.f32 %v49_v35, %v48_v34  ;;  %v109_v53 = vadd.f32 %v51_v39, %v50_v38  ;;  %v31_v34 = vld [vmem:[%s381_s0 + $0xb8] sm:$0xff] }
   0xc   :  { %v207_v56 = vpack.c.bf16 %v153_v47, %v152_v46  ;;  %v52_v57 = vunpack.c.l.bf16 %v20_v44  ;;  %v53_v58 = vunpack.c.h.bf16 %v20_v44  ;;  %v54_v59 = vunpack.c.l.bf16 %v22_v45  ;;  %v32_v44 = vld [vmem:[%s381_s0 + $0xc0] sm:$0xff] }
   0xd   :  { %v154_v60 = vmul.f32 0.25, %v138_v50  ;;  %v155_v61 = vmul.f32 0.25, %v139_v51  ;;  %v124_v62 = vadd.f32 %v108_v52, %v80_v42  ;;  %v125_v63 = vadd.f32 %v109_v53, %v82_v48 }
   0xe   :  { %208 = vst [vmem:[%s382_s1] sm:$0xff] %v207_v56   ;;  %v55_v1 = vunpack.c.h.bf16 %v22_v45  ;;  %v84_v2 = vunpack.c.l.bf16 %v21_v54  ;;  %v85_v3 = vunpack.c.h.bf16 %v21_v54  ;;  %v86_v4 = vunpack.c.l.bf16 %v23_v55  ;;  %v34_v45 = vld [vmem:[%s381_s0 + $0xd0] sm:$0xff]  ;;  %v33_v54 = vld [vmem:[%s381_s0 + $0xc8] sm:$0xff] }
   0xf   :  { %v212_v6 = vpack.c.bf16 %v155_v61, %v154_v60  ;;  %v140_v7 = vadd.f32 %v124_v62, %v81_v43  ;;  %v141_v8 = vadd.f32 %v125_v63, %v83_v49  ;;  %v87_v9 = vunpack.c.h.bf16 %v23_v55  ;;  %v35_v55 = vld [vmem:[%s381_s0 + $0xd8] sm:$0xff] }
  0x10   :  { %v110_v11 = vadd.f32 %v53_v58, %v52_v57  ;;  %v111_v12 = vadd.f32 %v55_v1, %v54_v59  ;;  %v56_v14 = vunpack.c.l.bf16 %v24_v0  ;;  %v57_v15 = vunpack.c.h.bf16 %v24_v0  ;;  %v36_v0 = vld [vmem:[%s381_s0 + $0xe0] sm:$0xff]  ;;  %v38_v1 = vld [vmem:[%s381_s0 + $0xf0] sm:$0xff] }
  0x11   :  { %244 = vst [vmem:[%s382_s1 + $0x8] sm:$0xff] %v212_v6   ;;  %v156_v16 = vmul.f32 0.25, %v140_v7  ;;  %v157_v17 = vmul.f32 0.25, %v141_v8  ;;  %v58_v18 = vunpack.c.l.bf16 %v26_v5  ;;  %v59_v19 = vunpack.c.h.bf16 %v26_v5 }
  0x12   :  { %v126_v21 = vadd.f32 %v110_v11, %v84_v2  ;;  %v127_v22 = vadd.f32 %v111_v12, %v86_v4  ;;  %v88_v23 = vunpack.c.l.bf16 %v25_v10  ;;  %v89_v24 = vunpack.c.h.bf16 %v25_v10  ;;  %v37_v10 = vld [vmem:[%s381_s0 + $0xe8] sm:$0xff]  ;;  %v39_v11 = vld [vmem:[%s381_s0 + $0xf8] sm:$0xff] }
  0x13   :  { %v217_v26 = vpack.c.bf16 %v157_v17, %v156_v16  ;;  %v90_v27 = vunpack.c.l.bf16 %v27_v13  ;;  %v91_v28 = vunpack.c.h.bf16 %v27_v13  ;;  %v112_v29 = vadd.f32 %v57_v15, %v56_v14 }
  0x14   :  { %v142_v31 = vadd.f32 %v126_v21, %v85_v3  ;;  %v143_v32 = vadd.f32 %v127_v22, %v87_v9  ;;  %v113_v33 = vadd.f32 %v59_v19, %v58_v18  ;;  %v60_v35 = vunpack.c.l.bf16 %v28_v20 }
  0x15   :  { %245 = vst [vmem:[%s382_s1 + $0x10] sm:$0xff] %v217_v26   ;;  %v128_v36 = vadd.f32 %v112_v29, %v88_v23  ;;  %v61_v37 = vunpack.c.h.bf16 %v28_v20  ;;  %v62_v38 = vunpack.c.l.bf16 %v30_v25  ;;  %v63_v39 = vunpack.c.h.bf16 %v30_v25 }
  0x16   :  { %v158_v40 = vmul.f32 0.25, %v142_v31  ;;  %v159_v41 = vmul.f32 0.25, %v143_v32  ;;  %v129_v42 = vadd.f32 %v113_v33, %v90_v27  ;;  %v92_v43 = vunpack.c.l.bf16 %v29_v30 }
  0x17   :  { %v144_v46 = vadd.f32 %v128_v36, %v89_v24  ;;  %v93_v47 = vunpack.c.h.bf16 %v29_v30  ;;  %v94_v48 = vunpack.c.l.bf16 %v31_v34  ;;  %v95_v49 = vunpack.c.h.bf16 %v31_v34 }
  0x18   :  { %v222_v50 = vpack.c.bf16 %v159_v41, %v158_v40  ;;  %v145_v51 = vadd.f32 %v129_v42, %v91_v28  ;;  %v114_v52 = vadd.f32 %v61_v37, %v60_v35  ;;  %v115_v53 = vadd.f32 %v63_v39, %v62_v38 }
  0x19   :  { %v160_v56 = vmul.f32 0.25, %v144_v46  ;;  %v64_v57 = vunpack.c.l.bf16 %v32_v44  ;;  %v65_v58 = vunpack.c.h.bf16 %v32_v44  ;;  %v66_v59 = vunpack.c.l.bf16 %v34_v45 }
  0x1a   :  { %246 = vst [vmem:[%s382_s1 + $0x18] sm:$0xff] %v222_v50   ;;  %v161_v60 = vmul.f32 0.25, %v145_v51  ;;  %v130_v61 = vadd.f32 %v114_v52, %v92_v43  ;;  %v131_v62 = vadd.f32 %v115_v53, %v94_v48  ;;  %v67_v63 = vunpack.c.h.bf16 %v34_v45 }
  0x1b   :  { %v96_v2 = vunpack.c.l.bf16 %v33_v54  ;;  %v97_v3 = vunpack.c.h.bf16 %v33_v54  ;;  %v98_v4 = vunpack.c.l.bf16 %v35_v55  ;;  %v99_v5 = vunpack.c.h.bf16 %v35_v55 }
  0x1c   :  { %v227_v6 = vpack.c.bf16 %v161_v60, %v160_v56  ;;  %v146_v7 = vadd.f32 %v130_v61, %v93_v47  ;;  %v147_v8 = vadd.f32 %v131_v62, %v95_v49  ;;  %v116_v9 = vadd.f32 %v65_v58, %v64_v57 }
  0x1d   :  { %v117_v12 = vadd.f32 %v67_v63, %v66_v59  ;;  %v68_v13 = vunpack.c.l.bf16 %v36_v0  ;;  %v69_v14 = vunpack.c.h.bf16 %v36_v0  ;;  %v70_v15 = vunpack.c.l.bf16 %v38_v1 }
  0x1e   :  { %247 = vst [vmem:[%s382_s1 + $0x20] sm:$0xff] %v227_v6   ;;  %v162_v16 = vmul.f32 0.25, %v146_v7  ;;  %v163_v17 = vmul.f32 0.25, %v147_v8  ;;  %v132_v18 = vadd.f32 %v116_v9, %v96_v2  ;;  %v71_v19 = vunpack.c.h.bf16 %v38_v1 }
  0x1f   :  { %v133_v20 = vadd.f32 %v117_v12, %v98_v4  ;;  %v100_v21 = vunpack.c.l.bf16 %v37_v10  ;;  %v102_v22 = vunpack.c.l.bf16 %v39_v11  ;;  %v101_v25 = vunpack.c.h.bf16 %v37_v10 }
  0x20   :  { %v232_v23 = vpack.c.bf16 %v163_v17, %v162_v16  ;;  %v148_v24 = vadd.f32 %v132_v18, %v97_v3  ;;  %v118_v26 = vadd.f32 %v69_v14, %v68_v13  ;;  %v103_v28 = vunpack.c.h.bf16 %v39_v11 }
  0x21   :  { %v149_v27 = vadd.f32 %v133_v20, %v99_v5  ;;  %v119_v29 = vadd.f32 %v71_v19, %v70_v15 }
  0x22   :  { %248 = vst [vmem:[%s382_s1 + $0x28] sm:$0xff] %v232_v23   ;;  %v164_v30 = vmul.f32 0.25, %v148_v24  ;;  %v134_v31 = vadd.f32 %v118_v26, %v100_v21 }
  0x23   :  { %v165_v32 = vmul.f32 0.25, %v149_v27  ;;  %v135_v33 = vadd.f32 %v119_v29, %v102_v22 }
  0x24   :  { %v150_v34 = vadd.f32 %v134_v31, %v101_v25 }
  0x25   :  { %v237_v35 = vpack.c.bf16 %v165_v32, %v164_v30  ;;  %v151_v36 = vadd.f32 %v135_v33, %v103_v28 }
  0x26   :  { %v166_v37 = vmul.f32 0.25, %v150_v34 }
  0x27   :  { %249 = vst [vmem:[%s382_s1 + $0x30] sm:$0xff] %v237_v35   ;;  %v167_v38 = vmul.f32 0.25, %v151_v36 }
  0x29   :  { %v242_v39 = vpack.c.bf16 %v167_v38, %v166_v37 }
  0x2b   :  { %250 = vst [vmem:[%s382_s1 + $0x38] sm:$0xff] %v242_v39  }

// kernel: _lambda_.27
= control target key start
LH: loop header
LB: loop body
LE: loop exit
PB: predicated region body
PF: predicated region fallthrough
CT: control target
= control target key end

     0   :  { %s774_s1 = inlined_call_operand.vmem [shape: bf16[128,128], index: 1, kind: input, shape index: {}]   ;;  %s775_s0 = inlined_call_operand.vmem [shape: bf16[128,128], index: 0, kind: input, shape index: {}]   ;;  %s776_s2 = inlined_call_operand.vmem [shape: f32[1,128], index: 2, kind: input, shape index: {}]   ;;  %s777_s3 = inlined_call_operand.vmem [shape: f32[1,128], index: 3, kind: input, shape index: {}]   ;;  %s778_s4 = inlined_call_operand.vmem [shape: bf16[128,128], index: 4, kind: output, shape index: {}]  }
   0x1   :  { %v637_v0 = vld [vmem:[%s774_s1 + $0x38] sm:$0xff]   ;;  %v638_v1 = vld [vmem:[%s774_s1 + $0x30] sm:$0xff]   ;;  %v639_v2 = vld [vmem:[%s774_s1 + $0x28] sm:$0xff]  }
   0x2   :  { %589 = vmatprep.subr.bf16.mxu0 %v637_v0  ;;  %621 = vmatprep.subr.bf16.mxu1 %v637_v0  ;;  %v640_v3 = vld [vmem:[%s774_s1 + $0x20] sm:$0xff]   ;;  %v641_v6 = vld [vmem:[%s774_s1 + $0x18] sm:$0xff]   ;;  %v642_v7 = vld [vmem:[%s774_s1 + $0x10] sm:$0xff]  }
   0x3   :  { %590 = vmatpush3.bf16.msra.mxu0 %v637_v0  ;;  %629 = vmatpush3.bf16.msra.mxu1 %v637_v0  ;;  %v645_v4 = vld [vmem:[%s775_s0] sm:$0xff]   ;;  %v643_v8 = vld [vmem:[%s774_s1 + $0x8] sm:$0xff]   ;;  %v649_v12 = vld [vmem:[%s775_s0 + $0x10] sm:$0xff]  }
   0x4   :  { %591 = vmatprep.subr.bf16.mxu0 %v638_v1  ;;  %622 = vmatprep.subr.bf16.mxu1 %v638_v1  ;;  %v646_v5 = vld [vmem:[%s775_s0 + $0x20] sm:$0xff]   ;;  %v647_v10 = vld [vmem:[%s775_s0 + $0x8] sm:$0xff]   ;;  %v650_v13 = vld [vmem:[%s775_s0 + $0x30] sm:$0xff]  }
   0x5   :  { %605 = vmatprep.mubr.bf16.mxu0 %v645_v4  ;;  %613 = vmatprep.mubr.bf16.mxu1 %v646_v5  ;;  %v644_v9 = vld [vmem:[%s774_s1] sm:$0xff]   ;;  %v648_v11 = vld [vmem:[%s775_s0 + $0x28] sm:$0xff]   ;;  %v651_v14 = vld [vmem:[%s775_s0 + $0x18] sm:$0xff]  }
   0x6   :  { %v652_v15 = vld [vmem:[%s775_s0 + $0x38] sm:$0xff]   ;;  %v729_v16 = vld [vmem:[%s776_s2] ss:$0 sm:$0xff] }
   0x7   :  { %592 = vmatpush3.bf16.msra.mxu0 %v638_v1  ;;  %630 = vmatpush3.bf16.msra.mxu1 %v638_v1  ;;  %v493_v21 = vld [vmem:[%s777_s3] ss:$0 sm:$0xff] }
   0x8   :  { %593 = vmatprep.subr.bf16.mxu0 %v639_v2  ;;  %623 = vmatprep.subr.bf16.mxu1 %v639_v2 }
   0xb   :  { %594 = vmatpush3.bf16.msra.mxu0 %v639_v2  ;;  %631 = vmatpush3.bf16.msra.mxu1 %v639_v2 }
   0xc   :  { %595 = vmatprep.subr.bf16.mxu0 %v640_v3  ;;  %624 = vmatprep.subr.bf16.mxu1 %v640_v3 }
   0xf   :  { %596 = vmatpush3.bf16.msra.mxu0 %v640_v3  ;;  %632 = vmatpush3.bf16.msra.mxu1 %v640_v3 }
  0x10   :  { %597 = vmatprep.subr.bf16.mxu0 %v641_v6  ;;  %625 = vmatprep.subr.bf16.mxu1 %v641_v6 }
  0x13   :  { %598 = vmatpush3.bf16.msra.mxu0 %v641_v6  ;;  %633 = vmatpush3.bf16.msra.mxu1 %v641_v6 }
  0x14   :  { %599 = vmatprep.subr.bf16.mxu0 %v642_v7  ;;  %626 = vmatprep.subr.bf16.mxu1 %v642_v7 }
  0x17   :  { %600 = vmatpush3.bf16.msra.mxu0 %v642_v7  ;;  %634 = vmatpush3.bf16.msra.mxu1 %v642_v7 }
  0x18   :  { %601 = vmatprep.subr.bf16.mxu0 %v643_v8  ;;  %627 = vmatprep.subr.bf16.mxu1 %v643_v8 }
  0x1b   :  { %602 = vmatpush3.bf16.msra.mxu0 %v643_v8  ;;  %635 = vmatpush3.bf16.msra.mxu1 %v643_v8 }
  0x1c   :  { %603 = vmatprep.subr.bf16.mxu0 %v644_v9  ;;  %628 = vmatprep.subr.bf16.mxu1 %v644_v9 }
  0x1f   :  { %604 = vmatpush3.bf16.msra.mxu0 %v644_v9  ;;  %636 = vmatpush3.bf16.msra.mxu1 %v644_v9 }
  0x22   :  { %606 = vmatmul.mubr.bf16.vlgmr.msra.gmra.mxu0 %v647_v10  ;;  %614 = vmatmul.mubr.bf16.vlgmr.msra.gmra.mxu1 %v648_v11 }
  0x23   :  { %609 = vmatprep.mubr.bf16.mxu0 %v649_v12  ;;  %617 = vmatprep.mubr.bf16.mxu1 %v650_v13 }
  0x2a   :  { %610 = vmatmul.mubr.bf16.gmra.mxu0 %v651_v14  ;;  %618 = vmatmul.mubr.bf16.gmra.mxu1 %v652_v15 }
  0xe2   :  { %v607_v17 = vpop.f32.mrf.mxu0  ;;  %v615_v18 = vpop.f32.mrf.mxu1 }
  0xe3   :  { %v339_v19 = vmul.f32 %v607_v17, %v729_v16  ;;  %v347_v20 = vmul.f32 %v615_v18, %v729_v16 }
  0xe4   :  { %v216_v22 = vpop.f32.mrf.mxu0  ;;  %v248_v23 = vpop.f32.mrf.mxu1 }
  0xe5   :  { %v337_v24 = vmul.f32 %v729_v16, %v216_v22  ;;  %v345_v25 = vmul.f32 %v729_v16, %v248_v23  ;;  %v362_v28 = vadd.f32 %v493_v21, %v339_v19  ;;  %v370_v29 = vadd.f32 %v493_v21, %v347_v20 }
  0xe6   :  { %v608_v26 = vpop.f32.mrf.mxu0  ;;  %v616_v27 = vpop.f32.mrf.mxu1 }
  0xe7   :  { %v340_v30 = vmul.f32 %v608_v26, %v729_v16  ;;  %v348_v31 = vmul.f32 %v616_v27, %v729_v16  ;;  %v360_v34 = vadd.f32 %v493_v21, %v337_v24  ;;  %v368_v35 = vadd.f32 %v493_v21, %v345_v25 }
  0xe8   :  { %v219_v32 = vpop.f32.mrf.mxu0  ;;  %v251_v33 = vpop.f32.mrf.mxu1  ;;  %v378_v42 = vmax.f32 %v362_v28, 0.0  ;;  %v386_v43 = vmax.f32 %v370_v29, 0.0 }
  0xe9   :  { %v338_v36 = vmul.f32 %v729_v16, %v219_v32  ;;  %v346_v37 = vmul.f32 %v729_v16, %v251_v33  ;;  %v363_v38 = vadd.f32 %v493_v21, %v340_v30  ;;  %v371_v39 = vadd.f32 %v493_v21, %v348_v31 }
  0xea   :  { %v611_v40 = vpop.f32.mrf.mxu0  ;;  %v619_v41 = vpop.f32.mrf.mxu1  ;;  %v376_v52 = vmax.f32 %v360_v34, 0.0  ;;  %v384_v53 = vmax.f32 %v368_v35, 0.0 }
  0xeb   :  { %v361_v44 = vadd.f32 %v493_v21, %v338_v36  ;;  %v369_v45 = vadd.f32 %v493_v21, %v346_v37  ;;  %v379_v46 = vmax.f32 %v363_v38, 0.0  ;;  %v387_v47 = vmax.f32 %v371_v39, 0.0 }
  0xec   :  { %v343_v48 = vmul.f32 %v611_v40, %v729_v16  ;;  %v351_v49 = vmul.f32 %v619_v41, %v729_v16  ;;  %v232_v50 = vpop.f32.mrf.mxu0  ;;  %v264_v51 = vpop.f32.mrf.mxu1 }
  0xed   :  { %v377_v54 = vmax.f32 %v361_v44, 0.0  ;;  %v385_v55 = vmax.f32 %v369_v45, 0.0  ;;  %v534_v56 = vpack.c.bf16 %v379_v46, %v378_v42  ;;  %v554_v57 = vpack.c.bf16 %v387_v47, %v386_v43 }
  0xee   :  { %v341_v58 = vmul.f32 %v729_v16, %v232_v50  ;;  %v349_v59 = vmul.f32 %v729_v16, %v264_v51  ;;  %v612_v60 = vpop.f32.mrf.mxu0  ;;  %v620_v61 = vpop.f32.mrf.mxu1  ;;  %v366_v0 = vadd.f32 %v493_v21, %v343_v48  ;;  %v374_v1 = vadd.f32 %v493_v21, %v351_v49 }
  0xef   :  { %v529_v62 = vpack.c.bf16 %v377_v54, %v376_v52  ;;  %v549_v63 = vpack.c.bf16 %v385_v55, %v384_v53  ;;  %566 = vst [vmem:[%s778_s4 + $0x8] sm:$0xff] %v534_v56   ;;  %570 = vst [vmem:[%s778_s4 + $0x28] sm:$0xff] %v554_v57   ;;  %v344_v2 = vmul.f32 %v612_v60, %v729_v16 }
  0xf0   :  { %v352_v3 = vmul.f32 %v620_v61, %v729_v16  ;;  %v235_v4 = vpop.f32.mrf.mxu0  ;;  %v267_v5 = vpop.f32.mrf.mxu1  ;;  %v364_v6 = vadd.f32 %v493_v21, %v341_v58  ;;  %v372_v7 = vadd.f32 %v493_v21, %v349_v59  ;;  %v382_v14 = vmax.f32 %v366_v0, 0.0 }
  0xf1   :  { %530 = vst [vmem:[%s778_s4] sm:$0xff] %v529_v62   ;;  %569 = vst [vmem:[%s778_s4 + $0x20] sm:$0xff] %v549_v63   ;;  %v342_v8 = vmul.f32 %v729_v16, %v235_v4  ;;  %v350_v9 = vmul.f32 %v729_v16, %v267_v5  ;;  %v367_v10 = vadd.f32 %v493_v21, %v344_v2  ;;  %v390_v15 = vmax.f32 %v374_v1, 0.0 }
  0xf2   :  { %v375_v11 = vadd.f32 %v493_v21, %v352_v3  ;;  %v380_v19 = vmax.f32 %v364_v6, 0.0  ;;  %v388_v20 = vmax.f32 %v372_v7, 0.0 }
  0xf3   :  { %v365_v12 = vadd.f32 %v493_v21, %v342_v8  ;;  %v373_v13 = vadd.f32 %v493_v21, %v350_v9  ;;  %v383_v17 = vmax.f32 %v367_v10, 0.0 }
  0xf4   :  { %v391_v18 = vmax.f32 %v375_v11, 0.0 }
  0xf5   :  { %v381_v22 = vmax.f32 %v365_v12, 0.0  ;;  %v389_v23 = vmax.f32 %v373_v13, 0.0  ;;  %v544_v24 = vpack.c.bf16 %v383_v17, %v382_v14 }
  0xf6   :  { %v564_v25 = vpack.c.bf16 %v391_v18, %v390_v15 }
  0xf7   :  { %v539_v26 = vpack.c.bf16 %v381_v22, %v380_v19  ;;  %v559_v27 = vpack.c.bf16 %v389_v23, %v388_v20  ;;  %568 = vst [vmem:[%s778_s4 + $0x18] sm:$0xff] %v544_v24  }
  0xf8   :  { %572 = vst [vmem:[%s778_s4 + $0x38] sm:$0xff] %v564_v25  }
  0xf9   :  { %567 = vst [vmem:[%s778_s4 + $0x10] sm:$0xff] %v539_v26   ;;  %571 = vst [vmem:[%s778_s4 + $0x30] sm:$0xff] %v559_v27  }

// kernel: _lambda_.29
= control target key start
LH: loop header
LB: loop body
LE: loop exit
PB: predicated region body
PF: predicated region fallthrough
CT: control target
= control target key end

     0   :  { %s1180_s1 = inlined_call_operand.vmem [shape: bf16[128,128], index: 1, kind: input, shape index: {}]   ;;  %s1181_s5 = inlined_call_operand.vmem [shape: bf16[128,128], index: 5, kind: input, shape index: {}]   ;;  %s1182_s0 = inlined_call_operand.vmem [shape: bf16[128,128], index: 0, kind: input, shape index: {}]   ;;  %s1183_s4 = inlined_call_operand.vmem [shape: bf16[128,128], index: 4, kind: input, shape index: {}]   ;;  %s1184_s2 = inlined_call_operand.vmem [shape: f32[1,128], index: 2, kind: input, shape index: {}]   ;;  %s1185_s6 = inlined_call_operand.vmem [shape: f32[1,128], index: 6, kind: input, shape index: {}]   ;;  %s1186_s3 = inlined_call_operand.vmem [shape: f32[1,128], index: 3, kind: input, shape index: {}]   ;;  %s1187_s7 = inlined_call_operand.vmem [shape: f32[1,128], index: 7, kind: input, shape index: {}]   ;;  %s1188_s8 = inlined_call_operand.vmem [shape: bf16[128,128], index: 8, kind: output, shape index: {}]  }
   0x1   :  { %v899_v0 = vld [vmem:[%s1180_s1 + $0x38] sm:$0xff]   ;;  %v901_v2 = vld [vmem:[%s1180_s1 + $0x30] sm:$0xff]   ;;  %v903_v4 = vld [vmem:[%s1180_s1 + $0x28] sm:$0xff]  }
   0x2   :  { %v900_v1 = vld [vmem:[%s1181_s5 + $0x38] sm:$0xff]   ;;  %835 = vmatprep.subr.bf16.mxu0 %v899_v0  ;;  %v902_v3 = vld [vmem:[%s1181_s5 + $0x30] sm:$0xff]   ;;  %v904_v5 = vld [vmem:[%s1181_s5 + $0x28] sm:$0xff]  }
   0x3   :  { %867 = vmatprep.subr.bf16.mxu1 %v900_v1  ;;  %836 = vmatpush3.bf16.msra.mxu0 %v899_v0  ;;  %v905_v6 = vld [vmem:[%s1180_s1 + $0x20] sm:$0xff]   ;;  %v907_v8 = vld [vmem:[%s1180_s1 + $0x18] sm:$0xff]   ;;  %v909_v10 = vld [vmem:[%s1180_s1 + $0x10] sm:$0xff]  }
   0x4   :  { %868 = vmatpush3.bf16.msra.mxu1 %v900_v1  ;;  %837 = vmatprep.subr.bf16.mxu0 %v901_v2  ;;  %v906_v7 = vld [vmem:[%s1181_s5 + $0x20] sm:$0xff]   ;;  %v908_v9 = vld [vmem:[%s1181_s5 + $0x18] sm:$0xff]   ;;  %v910_v11 = vld [vmem:[%s1181_s5 + $0x10] sm:$0xff]  }
   0x5   :  { %869 = vmatprep.subr.bf16.mxu1 %v902_v3  ;;  %v915_v12 = vld [vmem:[%s1182_s0] sm:$0xff]   ;;  %v911_v14 = vld [vmem:[%s1180_s1 + $0x8] sm:$0xff]   ;;  %v919_v20 = vld [vmem:[%s1182_s0 + $0x10] sm:$0xff]  }
   0x6   :  { %v916_v13 = vld [vmem:[%s1183_s4] sm:$0xff]   ;;  %851 = vmatprep.mubr.bf16.mxu0 %v915_v12  ;;  %v912_v15 = vld [vmem:[%s1181_s5 + $0x8] sm:$0xff]   ;;  %v920_v21 = vld [vmem:[%s1183_s4 + $0x10] sm:$0xff]  }
   0x7   :  { %838 = vmatpush3.bf16.msra.mxu0 %v901_v2  ;;  %883 = vmatprep.mubr.bf16.mxu1 %v916_v13  ;;  %v913_v16 = vld [vmem:[%s1180_s1] sm:$0xff]   ;;  %v917_v18 = vld [vmem:[%s1182_s0 + $0x8] sm:$0xff]   ;;  %v921_v22 = vld [vmem:[%s1182_s0 + $0x18] sm:$0xff]  }
   0x8   :  { %870 = vmatpush3.bf16.msra.mxu1 %v902_v3  ;;  %839 = vmatprep.subr.bf16.mxu0 %v903_v4  ;;  %v914_v17 = vld [vmem:[%s1181_s5] sm:$0xff]   ;;  %v918_v19 = vld [vmem:[%s1183_s4 + $0x8] sm:$0xff]   ;;  %v922_v23 = vld [vmem:[%s1183_s4 + $0x18] sm:$0xff]  }
   0x9   :  { %871 = vmatprep.subr.bf16.mxu1 %v904_v5  ;;  %v923_v24 = vld [vmem:[%s1182_s0 + $0x20] sm:$0xff]   ;;  %v925_v26 = vld [vmem:[%s1182_s0 + $0x28] sm:$0xff]   ;;  %v927_v28 = vld [vmem:[%s1182_s0 + $0x30] sm:$0xff]  }
   0xa   :  { %v924_v25 = vld [vmem:[%s1183_s4 + $0x20] sm:$0xff]   ;;  %v926_v27 = vld [vmem:[%s1183_s4 + $0x28] sm:$0xff]   ;;  %v928_v29 = vld [vmem:[%s1183_s4 + $0x30] sm:$0xff]  }
   0xb   :  { %840 = vmatpush3.bf16.msra.mxu0 %v903_v4  ;;  %v929_v30 = vld [vmem:[%s1182_s0 + $0x38] sm:$0xff]   ;;  %v1075_v32 = vld [vmem:[%s1184_s2] ss:$0 sm:$0xff] }
   0xc   :  { %872 = vmatpush3.bf16.msra.mxu1 %v904_v5  ;;  %841 = vmatprep.subr.bf16.mxu0 %v905_v6  ;;  %v930_v31 = vld [vmem:[%s1183_s4 + $0x38] sm:$0xff]   ;;  %v1080_v33 = vld [vmem:[%s1185_s6] ss:$0 sm:$0xff] }
   0xd   :  { %873 = vmatprep.subr.bf16.mxu1 %v906_v7  ;;  %v1085_v35 = vld [vmem:[%s1186_s3] ss:$0 sm:$0xff] }
   0xe   :  { %v1091_v38 = vld [vmem:[%s1187_s7] ss:$0 sm:$0xff] }
   0xf   :  { %842 = vmatpush3.bf16.msra.mxu0 %v905_v6 }
  0x10   :  { %874 = vmatpush3.bf16.msra.mxu1 %v906_v7  ;;  %843 = vmatprep.subr.bf16.mxu0 %v907_v8 }
  0x11   :  { %875 = vmatprep.subr.bf16.mxu1 %v908_v9 }
  0x13   :  { %844 = vmatpush3.bf16.msra.mxu0 %v907_v8 }
  0x14   :  { %876 = vmatpush3.bf16.msra.mxu1 %v908_v9  ;;  %845 = vmatprep.subr.bf16.mxu0 %v909_v10 }
  0x15   :  { %877 = vmatprep.subr.bf16.mxu1 %v910_v11 }
  0x17   :  { %846 = vmatpush3.bf16.msra.mxu0 %v909_v10 }
  0x18   :  { %878 = vmatpush3.bf16.msra.mxu1 %v910_v11  ;;  %847 = vmatprep.subr.bf16.mxu0 %v911_v14 }
  0x19   :  { %879 = vmatprep.subr.bf16.mxu1 %v912_v15 }
  0x1b   :  { %848 = vmatpush3.bf16.msra.mxu0 %v911_v14 }
  0x1c   :  { %880 = vmatpush3.bf16.msra.mxu1 %v912_v15  ;;  %849 = vmatprep.subr.bf16.mxu0 %v913_v16 }
  0x1d   :  { %881 = vmatprep.subr.bf16.mxu1 %v914_v17 }
  0x1f   :  { %850 = vmatpush3.bf16.msra.mxu0 %v913_v16 }
  0x20   :  { %882 = vmatpush3.bf16.msra.mxu1 %v914_v17 }
  0x22   :  { %852 = vmatmul.mubr.bf16.vlgmr.msra.gmra.mxu0 %v917_v18 }
  0x23   :  { %884 = vmatmul.mubr.bf16.vlgmr.msra.gmra.mxu1 %v918_v19  ;;  %855 = vmatprep.mubr.bf16.mxu0 %v919_v20 }
  0x24   :  { %887 = vmatprep.mubr.bf16.mxu1 %v920_v21 }
  0x2a   :  { %856 = vmatmul.mubr.bf16.gmra.mxu0 %v921_v22 }
  0x2b   :  { %888 = vmatmul.mubr.bf16.gmra.mxu1 %v922_v23  ;;  %859 = vmatprep.mubr.bf16.mxu0 %v923_v24 }
  0x2c   :  { %891 = vmatprep.mubr.bf16.mxu1 %v924_v25 }
  0x32   :  { %860 = vmatmul.mubr.bf16.gmra.mxu0 %v925_v26 }
  0x33   :  { %892 = vmatmul.mubr.bf16.gmra.mxu1 %v926_v27  ;;  %863 = vmatprep.mubr.bf16.mxu0 %v927_v28 }
  0x34   :  { %895 = vmatprep.mubr.bf16.mxu1 %v928_v29 }
  0x3a   :  { %864 = vmatmul.mubr.bf16.gmra.mxu0 %v929_v30 }
  0x3b   :  { %896 = vmatmul.mubr.bf16.gmra.mxu1 %v930_v31 }
  0xe2   :  { %v853_v34 = vpop.f32.mrf.mxu0 }
  0xe3   :  { %v264_v36 = vmul.f32 %v853_v34, %v1075_v32  ;;  %v885_v37 = vpop.f32.mrf.mxu1 }
  0xe4   :  { %v535_v39 = vmul.f32 %v885_v37, %v1080_v33  ;;  %v192_v40 = vpop.f32.mrf.mxu0 }
  0xe5   :  { %v287_v41 = vadd.f32 %v1085_v35, %v264_v36  ;;  %v262_v42 = vmul.f32 %v1075_v32, %v192_v40  ;;  %v463_v43 = vpop.f32.mrf.mxu1 }
  0xe6   :  { %v558_v44 = vadd.f32 %v1091_v38, %v535_v39  ;;  %v533_v45 = vmul.f32 %v1080_v33, %v463_v43  ;;  %v854_v46 = vpop.f32.mrf.mxu0 }
  0xe7   :  { %v265_v47 = vmul.f32 %v854_v46, %v1075_v32  ;;  %v886_v48 = vpop.f32.mrf.mxu1  ;;  %v285_v49 = vadd.f32 %v1085_v35, %v262_v42 }
  0xe8   :  { %v556_v50 = vadd.f32 %v1091_v38, %v533_v45  ;;  %v536_v51 = vmul.f32 %v886_v48, %v1080_v33  ;;  %v195_v52 = vpop.f32.mrf.mxu0  ;;  %v574_v53 = vadd.f32 %v558_v44, %v287_v41 }
  0xe9   :  { %v288_v54 = vadd.f32 %v1085_v35, %v265_v47  ;;  %v263_v55 = vmul.f32 %v1075_v32, %v195_v52  ;;  %v466_v56 = vpop.f32.mrf.mxu1 }
  0xea   :  { %v559_v57 = vadd.f32 %v1091_v38, %v536_v51  ;;  %v534_v58 = vmul.f32 %v1080_v33, %v466_v56  ;;  %v857_v59 = vpop.f32.mrf.mxu0  ;;  %v572_v63 = vadd.f32 %v556_v50, %v285_v49  ;;  %v590_v4 = vmax.f32 %v574_v53, 0.0 }
  0xeb   :  { %v286_v60 = vadd.f32 %v1085_v35, %v263_v55  ;;  %v268_v61 = vmul.f32 %v857_v59, %v1075_v32  ;;  %v889_v62 = vpop.f32.mrf.mxu1 }
  0xec   :  { %v575_v0 = vadd.f32 %v559_v57, %v288_v54  ;;  %v557_v1 = vadd.f32 %v1091_v38, %v534_v58  ;;  %v539_v2 = vmul.f32 %v889_v62, %v1080_v33  ;;  %v208_v3 = vpop.f32.mrf.mxu0  ;;  %v588_v16 = vmax.f32 %v572_v63, 0.0 }
  0xed   :  { %v291_v5 = vadd.f32 %v1085_v35, %v268_v61  ;;  %v266_v6 = vmul.f32 %v1075_v32, %v208_v3  ;;  %v479_v7 = vpop.f32.mrf.mxu1 }
  0xee   :  { %v591_v8 = vmax.f32 %v575_v0, 0.0  ;;  %v573_v9 = vadd.f32 %v557_v1, %v286_v60  ;;  %v562_v10 = vadd.f32 %v1091_v38, %v539_v2  ;;  %v537_v11 = vmul.f32 %v1080_v33, %v479_v7  ;;  %v858_v12 = vpop.f32.mrf.mxu0 }
  0xef   :  { %v289_v13 = vadd.f32 %v1085_v35, %v266_v6  ;;  %v269_v14 = vmul.f32 %v858_v12, %v1075_v32  ;;  %v890_v15 = vpop.f32.mrf.mxu1 }
  0xf0   :  { %v764_v17 = vpack.c.bf16 %v591_v8, %v590_v4  ;;  %v589_v18 = vmax.f32 %v573_v9, 0.0  ;;  %v560_v19 = vadd.f32 %v1091_v38, %v537_v11  ;;  %v211_v20 = vpop.f32.mrf.mxu0  ;;  %v540_v22 = vmul.f32 %v890_v15, %v1080_v33 }
  0xf1   :  { %v292_v21 = vadd.f32 %v1085_v35, %v269_v14  ;;  %v267_v23 = vmul.f32 %v1075_v32, %v211_v20  ;;  %v482_v24 = vpop.f32.mrf.mxu1  ;;  %v578_v26 = vadd.f32 %v562_v10, %v291_v5 }
  0xf2   :  { %796 = vst [vmem:[%s1188_s8 + $0x8] sm:$0xff] %v764_v17   ;;  %v759_v25 = vpack.c.bf16 %v589_v18, %v588_v16  ;;  %v538_v27 = vmul.f32 %v1080_v33, %v482_v24  ;;  %v861_v28 = vpop.f32.mrf.mxu0  ;;  %v576_v29 = vadd.f32 %v560_v19, %v289_v13  ;;  %v563_v30 = vadd.f32 %v1091_v38, %v540_v22 }
  0xf3   :  { %v290_v31 = vadd.f32 %v1085_v35, %v267_v23  ;;  %v272_v34 = vmul.f32 %v861_v28, %v1075_v32  ;;  %v893_v36 = vpop.f32.mrf.mxu1  ;;  %v594_v49 = vmax.f32 %v578_v26, 0.0 }
  0xf4   :  { %760 = vst [vmem:[%s1188_s8] sm:$0xff] %v759_v25   ;;  %v561_v37 = vadd.f32 %v1091_v38, %v538_v27  ;;  %v543_v39 = vmul.f32 %v893_v36, %v1080_v33  ;;  %v224_v40 = vpop.f32.mrf.mxu0  ;;  %v579_v41 = vadd.f32 %v563_v30, %v292_v21  ;;  %v592_v50 = vmax.f32 %v576_v29, 0.0 }
  0xf5   :  { %v295_v42 = vadd.f32 %v1085_v35, %v272_v34  ;;  %v270_v43 = vmul.f32 %v1075_v32, %v224_v40  ;;  %v495_v44 = vpop.f32.mrf.mxu1 }
  0xf6   :  { %v577_v45 = vadd.f32 %v561_v37, %v290_v31  ;;  %v566_v46 = vadd.f32 %v1091_v38, %v543_v39  ;;  %v541_v47 = vmul.f32 %v1080_v33, %v495_v44  ;;  %v862_v48 = vpop.f32.mrf.mxu0  ;;  %v595_v51 = vmax.f32 %v579_v41, 0.0 }
  0xf7   :  { %v273_v52 = vmul.f32 %v862_v48, %v1075_v32  ;;  %v894_v53 = vpop.f32.mrf.mxu1  ;;  %v293_v56 = vadd.f32 %v1085_v35, %v270_v43 }
  0xf8   :  { %v593_v54 = vmax.f32 %v577_v45, 0.0  ;;  %v582_v55 = vadd.f32 %v566_v46, %v295_v42  ;;  %v544_v57 = vmul.f32 %v894_v53, %v1080_v33  ;;  %v227_v58 = vpop.f32.mrf.mxu0  ;;  %v774_v59 = vpack.c.bf16 %v595_v51, %v594_v49 }
  0xf9   :  { %v564_v60 = vadd.f32 %v1091_v38, %v541_v47  ;;  %v296_v61 = vadd.f32 %v1085_v35, %v273_v52  ;;  %v271_v62 = vmul.f32 %v1075_v32, %v227_v58  ;;  %v498_v63 = vpop.f32.mrf.mxu1 }
  0xfa   :  { %v769_v0 = vpack.c.bf16 %v593_v54, %v592_v50  ;;  %v567_v1 = vadd.f32 %v1091_v38, %v544_v57  ;;  %v865_v2 = vpop.f32.mrf.mxu0  ;;  %798 = vst [vmem:[%s1188_s8 + $0x18] sm:$0xff] %v774_v59   ;;  %v542_v4 = vmul.f32 %v1080_v33, %v498_v63  ;;  %v598_v10 = vmax.f32 %v582_v55, 0.0 }
  0xfb   :  { %v294_v3 = vadd.f32 %v1085_v35, %v271_v62  ;;  %v276_v5 = vmul.f32 %v865_v2, %v1075_v32  ;;  %v897_v6 = vpop.f32.mrf.mxu1  ;;  %v580_v11 = vadd.f32 %v564_v60, %v293_v56 }
  0xfc   :  { %797 = vst [vmem:[%s1188_s8 + $0x10] sm:$0xff] %v769_v0   ;;  %v583_v7 = vadd.f32 %v567_v1, %v296_v61  ;;  %v547_v8 = vmul.f32 %v897_v6, %v1080_v33  ;;  %v240_v9 = vpop.f32.mrf.mxu0  ;;  %v565_v12 = vadd.f32 %v1091_v38, %v542_v4 }
  0xfd   :  { %v274_v13 = vmul.f32 %v1075_v32, %v240_v9  ;;  %v511_v14 = vpop.f32.mrf.mxu1  ;;  %v299_v16 = vadd.f32 %v1085_v35, %v276_v5  ;;  %v596_v28 = vmax.f32 %v580_v11, 0.0 }
  0xfe   :  { %v599_v15 = vmax.f32 %v583_v7, 0.0  ;;  %v570_v17 = vadd.f32 %v1091_v38, %v547_v8  ;;  %v545_v18 = vmul.f32 %v1080_v33, %v511_v14  ;;  %v866_v19 = vpop.f32.mrf.mxu0  ;;  %v581_v20 = vadd.f32 %v565_v12, %v294_v3 }
  0xff   :  { %v277_v21 = vmul.f32 %v866_v19, %v1075_v32  ;;  %v898_v22 = vpop.f32.mrf.mxu1  ;;  %v297_v24 = vadd.f32 %v1085_v35, %v274_v13 }
 0x100   :  { %v784_v23 = vpack.c.bf16 %v599_v15, %v598_v10  ;;  %v568_v25 = vadd.f32 %v1091_v38, %v545_v18  ;;  %v548_v26 = vmul.f32 %v898_v22, %v1080_v33  ;;  %v243_v27 = vpop.f32.mrf.mxu0  ;;  %v597_v29 = vmax.f32 %v581_v20, 0.0 }
 0x101   :  { %v300_v30 = vadd.f32 %v1085_v35, %v277_v21  ;;  %v275_v31 = vmul.f32 %v1075_v32, %v243_v27  ;;  %v514_v34 = vpop.f32.mrf.mxu1  ;;  %v586_v36 = vadd.f32 %v570_v17, %v299_v16 }
 0x102   :  { %800 = vst [vmem:[%s1188_s8 + $0x28] sm:$0xff] %v784_v23   ;;  %v571_v37 = vadd.f32 %v1091_v38, %v548_v26  ;;  %v546_v39 = vmul.f32 %v1080_v33, %v514_v34  ;;  %v779_v40 = vpack.c.bf16 %v597_v29, %v596_v28  ;;  %v584_v42 = vadd.f32 %v568_v25, %v297_v24 }
 0x103   :  { %v298_v41 = vadd.f32 %v1085_v35, %v275_v31  ;;  %v602_v32 = vmax.f32 %v586_v36, 0.0 }
 0x104   :  { %v587_v43 = vadd.f32 %v571_v37, %v300_v30  ;;  %v569_v44 = vadd.f32 %v1091_v38, %v546_v39  ;;  %799 = vst [vmem:[%s1188_s8 + $0x20] sm:$0xff] %v779_v40   ;;  %v600_v47 = vmax.f32 %v584_v42, 0.0 }
 0x106   :  { %v603_v45 = vmax.f32 %v587_v43, 0.0  ;;  %v585_v46 = vadd.f32 %v569_v44, %v298_v41 }
 0x108   :  { %v794_v48 = vpack.c.bf16 %v603_v45, %v602_v32  ;;  %v601_v49 = vmax.f32 %v585_v46, 0.0 }
 0x10a   :  { %802 = vst [vmem:[%s1188_s8 + $0x38] sm:$0xff] %v794_v48   ;;  %v789_v33 = vpack.c.bf16 %v601_v49, %v600_v47 }
 0x10c   :  { %801 = vst [vmem:[%s1188_s8 + $0x30] sm:$0xff] %v789_v33  }

// kernel: _lambda_.31
= control target key start
LH: loop header
LB: loop body
LE: loop exit
PB: predicated region body
PF: predicated region fallthrough
CT: control target
= control target key end

     0   :  { %s992_s1 = inlined_call_operand.vmem [shape: bf16[256,128], index: 1, kind: input, shape index: {}]   ;;  %s993_s0 = inlined_call_operand.vmem [shape: bf16[128,256], index: 0, kind: input, shape index: {}]   ;;  %s994_s2 = inlined_call_operand.vmem [shape: f32[1,128], index: 2, kind: input, shape index: {}]   ;;  %s995_s3 = inlined_call_operand.vmem [shape: f32[1,128], index: 3, kind: input, shape index: {}]   ;;  %s996_s4 = inlined_call_operand.vmem [shape: bf16[128,128], index: 4, kind: output, shape index: {}]  }
   0x1   :  { %v765_v0 = vld [vmem:[%s992_s1 + $0x78] sm:$0xff]   ;;  %v767_v2 = vld [vmem:[%s992_s1 + $0x70] sm:$0xff]   ;;  %v769_v4 = vld [vmem:[%s992_s1 + $0x68] sm:$0xff]  }
   0x2   :  { %v766_v1 = vld [vmem:[%s992_s1 + $0x38] sm:$0xff]   ;;  %685 = vmatprep.subr.bf16.mxu0 %v765_v0  ;;  %749 = vmatprep.subr.bf16.mxu1 %v765_v0  ;;  %v768_v3 = vld [vmem:[%s992_s1 + $0x30] sm:$0xff]   ;;  %v770_v5 = vld [vmem:[%s992_s1 + $0x28] sm:$0xff]  }
   0x3   :  { %686 = vmatpush3.bf16.msra.mxu0 %v766_v1  ;;  %757 = vmatpush3.bf16.msra.mxu1 %v766_v1  ;;  %v771_v6 = vld [vmem:[%s992_s1 + $0x60] sm:$0xff]   ;;  %v773_v8 = vld [vmem:[%s992_s1 + $0x58] sm:$0xff]   ;;  %v775_v10 = vld [vmem:[%s992_s1 + $0x50] sm:$0xff]  }
   0x4   :  { %687 = vmatprep.subr.bf16.mxu0 %v767_v2  ;;  %750 = vmatprep.subr.bf16.mxu1 %v767_v2  ;;  %v772_v7 = vld [vmem:[%s992_s1 + $0x20] sm:$0xff]   ;;  %v774_v9 = vld [vmem:[%s992_s1 + $0x18] sm:$0xff]   ;;  %v776_v13 = vld [vmem:[%s992_s1 + $0x10] sm:$0xff]  }
   0x5   :  { %v783_v11 = vld [vmem:[%s993_s0 + $0x4] ss:$8 sps:$4 sm:$0xff]   ;;  %v781_v18 = vld [vmem:[%s993_s0] ss:$8 sps:$4 sm:$0xff]   ;;  %v787_v20 = vld [vmem:[%s993_s0 + $0x14] ss:$8 sps:$4 sm:$0xff]  }
   0x6   :  { %v786_v12 = vld [vmem:[%s993_s0 + $0x44] ss:$8 sps:$4 sm:$0xff]   ;;  %310 = vmatprep.mubr.bf16.mxu0 %v783_v11  ;;  %v784_v19 = vld [vmem:[%s993_s0 + $0x40] ss:$8 sps:$4 sm:$0xff]   ;;  %v789_v21 = vld [vmem:[%s993_s0 + $0x54] ss:$8 sps:$4 sm:$0xff]  }
   0x7   :  { %688 = vmatpush3.bf16.msra.mxu0 %v768_v3  ;;  %758 = vmatpush3.bf16.msra.mxu1 %v768_v3  ;;  %v777_v14 = vld [vmem:[%s992_s1 + $0x48] sm:$0xff]   ;;  %v779_v16 = vld [vmem:[%s992_s1 + $0x40] sm:$0xff]   ;;  %v791_v22 = vld [vmem:[%s993_s0 + $0x10] ss:$8 sps:$4 sm:$0xff]  }
   0x8   :  { %689 = vmatprep.subr.bf16.mxu0 %v769_v4  ;;  %751 = vmatprep.subr.bf16.mxu1 %v769_v4  ;;  %v778_v15 = vld [vmem:[%s992_s1 + $0x8] sm:$0xff]   ;;  %v780_v17 = vld [vmem:[%s992_s1] sm:$0xff]   ;;  %v792_v23 = vld [vmem:[%s993_s0 + $0x50] ss:$8 sps:$4 sm:$0xff]  }
   0x9   :  { %342 = vmatprep.mubr.bf16.mxu1 %v786_v12  ;;  %v793_v24 = vld [vmem:[%s993_s0 + $0x24] ss:$8 sps:$4 sm:$0xff]   ;;  %v797_v26 = vld [vmem:[%s993_s0 + $0x20] ss:$8 sps:$4 sm:$0xff]   ;;  %v799_v28 = vld [vmem:[%s993_s0 + $0x34] ss:$8 sps:$4 sm:$0xff]  }
   0xa   :  { %v795_v25 = vld [vmem:[%s993_s0 + $0x64] ss:$8 sps:$4 sm:$0xff]   ;;  %v798_v27 = vld [vmem:[%s993_s0 + $0x60] ss:$8 sps:$4 sm:$0xff]   ;;  %v801_v29 = vld [vmem:[%s993_s0 + $0x74] ss:$8 sps:$4 sm:$0xff]  }
   0xb   :  { %690 = vmatpush3.bf16.msra.mxu0 %v770_v5  ;;  %759 = vmatpush3.bf16.msra.mxu1 %v770_v5  ;;  %v803_v30 = vld [vmem:[%s993_s0 + $0x30] ss:$8 sps:$4 sm:$0xff]   ;;  %v929_v35 = vld [vmem:[%s994_s2] ss:$0 sm:$0xff] }
   0xc   :  { %691 = vmatprep.subr.bf16.mxu0 %v771_v6  ;;  %752 = vmatprep.subr.bf16.mxu1 %v771_v6  ;;  %v804_v31 = vld [vmem:[%s993_s0 + $0x70] ss:$8 sps:$4 sm:$0xff]   ;;  %v936_v43 = vld [vmem:[%s995_s3] ss:$0 sm:$0xff] }
   0xf   :  { %692 = vmatpush3.bf16.msra.mxu0 %v772_v7  ;;  %760 = vmatpush3.bf16.msra.mxu1 %v772_v7 }
  0x10   :  { %693 = vmatprep.subr.bf16.mxu0 %v773_v8  ;;  %753 = vmatprep.subr.bf16.mxu1 %v773_v8 }
  0x13   :  { %694 = vmatpush3.bf16.msra.mxu0 %v774_v9  ;;  %761 = vmatpush3.bf16.msra.mxu1 %v774_v9 }
  0x14   :  { %695 = vmatprep.subr.bf16.mxu0 %v775_v10  ;;  %754 = vmatprep.subr.bf16.mxu1 %v775_v10 }
  0x17   :  { %696 = vmatpush3.bf16.msra.mxu0 %v776_v13  ;;  %762 = vmatpush3.bf16.msra.mxu1 %v776_v13 }
  0x18   :  { %697 = vmatprep.subr.bf16.mxu0 %v777_v14  ;;  %755 = vmatprep.subr.bf16.mxu1 %v777_v14 }
  0x1b   :  { %698 = vmatpush3.bf16.msra.mxu0 %v778_v15  ;;  %763 = vmatpush3.bf16.msra.mxu1 %v778_v15 }
  0x1c   :  { %699 = vmatprep.subr.bf16.mxu0 %v779_v16  ;;  %756 = vmatprep.subr.bf16.mxu1 %v779_v16 }
  0x1f   :  { %700 = vmatpush3.bf16.msra.mxu0 %v780_v17  ;;  %764 = vmatpush3.bf16.msra.mxu1 %v780_v17 }
  0x22   :  { %311 = vmatmul.mubr.bf16.vlgmr.msra.gmra.mxu0 %v781_v18  ;;  %343 = vmatmul.mubr.bf16.vlgmr.msra.gmra.mxu1 %v784_v19 }
  0x23   :  { %318 = vmatprep.mubr.bf16.mxu0 %v787_v20  ;;  %350 = vmatprep.mubr.bf16.mxu1 %v789_v21 }
  0x2a   :  { %319 = vmatmul.mubr.bf16.gmra.mxu0 %v791_v22  ;;  %351 = vmatmul.mubr.bf16.gmra.mxu1 %v792_v23 }
  0x2b   :  { %326 = vmatprep.mubr.bf16.mxu0 %v793_v24  ;;  %358 = vmatprep.mubr.bf16.mxu1 %v795_v25 }
  0x32   :  { %327 = vmatmul.mubr.bf16.gmra.mxu0 %v797_v26  ;;  %359 = vmatmul.mubr.bf16.gmra.mxu1 %v798_v27 }
  0x33   :  { %334 = vmatprep.mubr.bf16.mxu0 %v799_v28  ;;  %366 = vmatprep.mubr.bf16.mxu1 %v801_v29 }
  0x3a   :  { %335 = vmatmul.mubr.bf16.gmra.mxu0 %v803_v30  ;;  %367 = vmatmul.mubr.bf16.gmra.mxu1 %v804_v31 }
  0xe2   :  { %v701_v32 = vpop.f32.mrf.mxu0  ;;  %v725_v33 = vpop.f32.mrf.mxu1 }
  0xe4   :  { %v702_v34 = vpop.f32.mrf.mxu0  ;;  %v726_v36 = vpop.f32.mrf.mxu1 }
  0xe5   :  { %v703_v37 = vadd.f32 %v702_v34, %v701_v32  ;;  %v727_v38 = vadd.f32 %v726_v36, %v725_v33 }
  0xe6   :  { %v704_v39 = vpop.f32.mrf.mxu0  ;;  %v728_v40 = vpop.f32.mrf.mxu1 }
  0xe7   :  { %v433_v41 = vmul.f32 %v703_v37, %v929_v35  ;;  %v441_v42 = vmul.f32 %v727_v38, %v929_v35 }
  0xe8   :  { %v705_v44 = vpop.f32.mrf.mxu0  ;;  %v729_v45 = vpop.f32.mrf.mxu1 }
  0xe9   :  { %v706_v46 = vadd.f32 %v705_v44, %v704_v39  ;;  %v730_v47 = vadd.f32 %v729_v45, %v728_v40  ;;  %v456_v50 = vadd.f32 %v936_v43, %v433_v41  ;;  %v464_v51 = vadd.f32 %v936_v43, %v441_v42 }
  0xea   :  { %v707_v48 = vpop.f32.mrf.mxu0  ;;  %v731_v49 = vpop.f32.mrf.mxu1 }
  0xeb   :  { %v434_v52 = vmul.f32 %v706_v46, %v929_v35  ;;  %v442_v53 = vmul.f32 %v730_v47, %v929_v35  ;;  %v472_v62 = vmax.f32 %v456_v50, 0.0  ;;  %v480_v63 = vmax.f32 %v464_v51, 0.0 }
  0xec   :  { %v708_v54 = vpop.f32.mrf.mxu0  ;;  %v732_v55 = vpop.f32.mrf.mxu1 }
  0xed   :  { %v457_v56 = vadd.f32 %v936_v43, %v434_v52  ;;  %v465_v57 = vadd.f32 %v936_v43, %v442_v53  ;;  %v709_v58 = vadd.f32 %v708_v54, %v707_v48  ;;  %v733_v59 = vadd.f32 %v732_v55, %v731_v49 }
  0xee   :  { %v710_v60 = vpop.f32.mrf.mxu0  ;;  %v734_v61 = vpop.f32.mrf.mxu1 }
  0xef   :  { %v473_v0 = vmax.f32 %v457_v56, 0.0  ;;  %v481_v1 = vmax.f32 %v465_v57, 0.0  ;;  %v435_v2 = vmul.f32 %v709_v58, %v929_v35  ;;  %v443_v3 = vmul.f32 %v733_v59, %v929_v35 }
  0xf0   :  { %v711_v4 = vpop.f32.mrf.mxu0  ;;  %v735_v5 = vpop.f32.mrf.mxu1 }
  0xf1   :  { %v641_v6 = vpack.c.bf16 %v473_v0, %v472_v62  ;;  %v661_v7 = vpack.c.bf16 %v481_v1, %v480_v63  ;;  %v712_v8 = vadd.f32 %v711_v4, %v710_v60  ;;  %v736_v9 = vadd.f32 %v735_v5, %v734_v61 }
  0xf2   :  { %v713_v10 = vpop.f32.mrf.mxu0  ;;  %v737_v11 = vpop.f32.mrf.mxu1  ;;  %v458_v12 = vadd.f32 %v936_v43, %v435_v2  ;;  %v466_v13 = vadd.f32 %v936_v43, %v443_v3 }
  0xf3   :  { %642 = vst [vmem:[%s996_s4] sm:$0xff] %v641_v6   ;;  %681 = vst [vmem:[%s996_s4 + $0x20] sm:$0xff] %v661_v7   ;;  %v436_v14 = vmul.f32 %v712_v8, %v929_v35  ;;  %v444_v15 = vmul.f32 %v736_v9, %v929_v35 }
  0xf4   :  { %v714_v16 = vpop.f32.mrf.mxu0  ;;  %v738_v17 = vpop.f32.mrf.mxu1  ;;  %v474_v26 = vmax.f32 %v458_v12, 0.0  ;;  %v482_v27 = vmax.f32 %v466_v13, 0.0 }
  0xf5   :  { %v715_v18 = vadd.f32 %v714_v16, %v713_v10  ;;  %v739_v19 = vadd.f32 %v738_v17, %v737_v11  ;;  %v459_v20 = vadd.f32 %v936_v43, %v436_v14  ;;  %v467_v21 = vadd.f32 %v936_v43, %v444_v15 }
  0xf6   :  { %v716_v22 = vpop.f32.mrf.mxu0  ;;  %v740_v23 = vpop.f32.mrf.mxu1 }
  0xf7   :  { %v437_v24 = vmul.f32 %v715_v18, %v929_v35  ;;  %v445_v25 = vmul.f32 %v739_v19, %v929_v35  ;;  %v475_v28 = vmax.f32 %v459_v20, 0.0  ;;  %v483_v29 = vmax.f32 %v467_v21, 0.0 }
  0xf8   :  { %v717_v30 = vpop.f32.mrf.mxu0  ;;  %v741_v31 = vpop.f32.mrf.mxu1 }
  0xf9   :  { %v718_v32 = vadd.f32 %v717_v30, %v716_v22  ;;  %v742_v33 = vadd.f32 %v741_v31, %v740_v23  ;;  %v646_v34 = vpack.c.bf16 %v475_v28, %v474_v26  ;;  %v666_v36 = vpack.c.bf16 %v483_v29, %v482_v27 }
  0xfa   :  { %v719_v37 = vpop.f32.mrf.mxu0  ;;  %v743_v38 = vpop.f32.mrf.mxu1  ;;  %v460_v39 = vadd.f32 %v936_v43, %v437_v24  ;;  %v468_v40 = vadd.f32 %v936_v43, %v445_v25 }
  0xfb   :  { %v438_v41 = vmul.f32 %v718_v32, %v929_v35  ;;  %v446_v42 = vmul.f32 %v742_v33, %v929_v35  ;;  %678 = vst [vmem:[%s996_s4 + $0x8] sm:$0xff] %v646_v34   ;;  %682 = vst [vmem:[%s996_s4 + $0x28] sm:$0xff] %v666_v36  }
  0xfc   :  { %v720_v44 = vpop.f32.mrf.mxu0  ;;  %v744_v45 = vpop.f32.mrf.mxu1  ;;  %v476_v52 = vmax.f32 %v460_v39, 0.0  ;;  %v484_v53 = vmax.f32 %v468_v40, 0.0 }
  0xfd   :  { %v461_v46 = vadd.f32 %v936_v43, %v438_v41  ;;  %v469_v47 = vadd.f32 %v936_v43, %v446_v42  ;;  %v721_v48 = vadd.f32 %v720_v44, %v719_v37  ;;  %v745_v49 = vadd.f32 %v744_v45, %v743_v38 }
  0xfe   :  { %v722_v50 = vpop.f32.mrf.mxu0  ;;  %v746_v51 = vpop.f32.mrf.mxu1 }
  0xff   :  { %v477_v54 = vmax.f32 %v461_v46, 0.0  ;;  %v485_v55 = vmax.f32 %v469_v47, 0.0  ;;  %v439_v56 = vmul.f32 %v721_v48, %v929_v35  ;;  %v447_v57 = vmul.f32 %v745_v49, %v929_v35 }
 0x100   :  { %v723_v58 = vpop.f32.mrf.mxu0  ;;  %v747_v59 = vpop.f32.mrf.mxu1 }
 0x101   :  { %v651_v60 = vpack.c.bf16 %v477_v54, %v476_v52  ;;  %v671_v61 = vpack.c.bf16 %v485_v55, %v484_v53  ;;  %v724_v62 = vadd.f32 %v723_v58, %v722_v50  ;;  %v748_v63 = vadd.f32 %v747_v59, %v746_v51 }
 0x102   :  { %v462_v0 = vadd.f32 %v936_v43, %v439_v56  ;;  %v470_v1 = vadd.f32 %v936_v43, %v447_v57 }
 0x103   :  { %679 = vst [vmem:[%s996_s4 + $0x10] sm:$0xff] %v651_v60   ;;  %683 = vst [vmem:[%s996_s4 + $0x30] sm:$0xff] %v671_v61   ;;  %v440_v2 = vmul.f32 %v724_v62, %v929_v35  ;;  %v448_v3 = vmul.f32 %v748_v63, %v929_v35 }
 0x104   :  { %v478_v6 = vmax.f32 %v462_v0, 0.0  ;;  %v486_v7 = vmax.f32 %v470_v1, 0.0 }
 0x105   :  { %v463_v4 = vadd.f32 %v936_v43, %v440_v2  ;;  %v471_v5 = vadd.f32 %v936_v43, %v448_v3 }
 0x107   :  { %v479_v8 = vmax.f32 %v463_v4, 0.0  ;;  %v487_v9 = vmax.f32 %v471_v5, 0.0 }
 0x109   :  { %v656_v10 = vpack.c.bf16 %v479_v8, %v478_v6  ;;  %v676_v11 = vpack.c.bf16 %v487_v9, %v486_v7 }
 0x10b   :  { %680 = vst [vmem:[%s996_s4 + $0x18] sm:$0xff] %v656_v10   ;;  %684 = vst [vmem:[%s996_s4 + $0x38] sm:$0xff] %v676_v11  }

// kernel: _lambda_.32
= control target key start
LH: loop header
LB: loop body
LE: loop exit
PB: predicated region body
PF: predicated region fallthrough
CT: control target
= control target key end

     0   :  { %s471_s0 = inlined_call_operand.vmem [shape: bf16[8,2,4,256], index: 0, kind: input, shape index: {}]   ;;  %s472_s1 = inlined_call_operand.vmem [shape: bf16[8,2,4,256], index: 1, kind: input, shape index: {}]   ;;  %s473_s2 = inlined_call_operand.vmem [shape: bf16[8,4,128], index: 2, kind: output, shape index: {0}]   ;;  %s474_s3 = inlined_call_operand.vmem [shape: bf16[8,4,128], index: 3, kind: output, shape index: {1}]  }
   0x1   :  { %v278_v0 = vld [vmem:[%s471_s0] sm:$0xff]   ;;  %v341_v1 = vld [vmem:[%s471_s0 + $0x8] sm:$0xff]   ;;  %v342_v2 = vld [vmem:[%s471_s0 + $0x10] sm:$0xff]  }
   0x2   :  { %v279_v3 = vunpack.c.l.bf16 %v278_v0  ;;  %v280_v4 = vunpack.c.h.bf16 %v278_v0  ;;  %v283_v5 = vunpack.c.l.bf16 %v341_v1  ;;  %v284_v6 = vunpack.c.h.bf16 %v341_v1  ;;  %v343_v7 = vld [vmem:[%s471_s0 + $0x18] sm:$0xff]   ;;  %v344_v12 = vld [vmem:[%s471_s0 + $0x20] sm:$0xff]   ;;  %v345_v17 = vld [vmem:[%s471_s0 + $0x28] sm:$0xff]  }
   0x3   :  { %v287_v8 = vunpack.c.l.bf16 %v342_v2  ;;  %v288_v9 = vunpack.c.h.bf16 %v342_v2  ;;  %v291_v10 = vunpack.c.l.bf16 %v343_v7  ;;  %v292_v11 = vunpack.c.h.bf16 %v343_v7  ;;  %v346_v30 = vld [vmem:[%s471_s0 + $0x30] sm:$0xff]   ;;  %v347_v51 = vld [vmem:[%s471_s0 + $0x38] sm:$0xff]   ;;  %v310_v56 = vld [vmem:[%s472_s1] sm:$0xff]  }
   0x4   :  { %v53_v13 = vrot.slane %v279_v3, 4  ;;  %v93_v14 = vrot.slane %v280_v4, 4  ;;  %v54_v15 = vrot.slane %v283_v5, 4  ;;  %v94_v16 = vrot.slane %v284_v6, 4  ;;  %v348_v61 = vld [vmem:[%s472_s1 + $0x8] sm:$0xff]  }
   0x5   :  { %v55_v18 = vrot.slane %v287_v8, 4  ;;  %v95_v19 = vrot.slane %v288_v9, 4  ;;  %v56_v20 = vrot.slane %v291_v10, 4  ;;  %v96_v21 = vrot.slane %v292_v11, 4 }
   0x6   :  { %v69_v22 = vadd.f32 %v279_v3, %v53_v13  ;;  %v70_v23 = vadd.f32 %v283_v5, %v54_v15  ;;  %v295_v24 = vunpack.c.l.bf16 %v344_v12  ;;  %v296_v25 = vunpack.c.h.bf16 %v344_v12  ;;  %v350_v15 = vld [vmem:[%s472_s1 + $0x18] sm:$0xff]  }
   0x7   :  { %v71_v26 = vadd.f32 %v287_v8, %v55_v18  ;;  %v72_v27 = vadd.f32 %v291_v10, %v56_v20  ;;  %v299_v28 = vunpack.c.l.bf16 %v345_v17  ;;  %v300_v29 = vunpack.c.h.bf16 %v345_v17  ;;  %v349_v10 = vld [vmem:[%s472_s1 + $0x10] sm:$0xff]  }
   0x8   :  { %v77_v31 = vadd.f32 %v280_v4, %v69_v22  ;;  %v78_v32 = vadd.f32 %v284_v6, %v70_v23  ;;  %v57_v33 = vrot.slane %v295_v24, 4  ;;  %v97_v34 = vrot.slane %v296_v25, 4 }
   0x9   :  { %v79_v35 = vadd.f32 %v288_v9, %v71_v26  ;;  %v80_v36 = vadd.f32 %v292_v11, %v72_v27  ;;  %v58_v37 = vrot.slane %v299_v28, 4  ;;  %v98_v38 = vrot.slane %v300_v29, 4 }
   0xa   :  { %v109_v39 = vadd.f32 %v93_v14, %v77_v31  ;;  %v110_v40 = vadd.f32 %v94_v16, %v78_v32  ;;  %v73_v41 = vadd.f32 %v295_v24, %v57_v33  ;;  %v303_v42 = vunpack.c.l.bf16 %v346_v30 }
   0xb   :  { %v111_v43 = vadd.f32 %v95_v19, %v79_v35  ;;  %v112_v44 = vadd.f32 %v96_v21, %v80_v36  ;;  %v74_v45 = vadd.f32 %v299_v28, %v58_v37  ;;  %v304_v46 = vunpack.c.h.bf16 %v346_v30  ;;  %v351_v28 = vld [vmem:[%s472_s1 + $0x20] sm:$0xff]  }
   0xc   :  { %v117_v47 = vmul.f32 0.25, %v109_v39  ;;  %v118_v48 = vmul.f32 0.25, %v110_v40  ;;  %v81_v49 = vadd.f32 %v296_v25, %v73_v41  ;;  %v59_v50 = vrot.slane %v303_v42, 4  ;;  %v352_v41 = vld [vmem:[%s472_s1 + $0x28] sm:$0xff]  }
   0xd   :  { %v119_v52 = vmul.f32 0.25, %v111_v43  ;;  %v120_v53 = vmul.f32 0.25, %v112_v44  ;;  %v82_v54 = vadd.f32 %v300_v29, %v74_v45  ;;  %v99_v55 = vrot.slane %v304_v46, 4 }
   0xe   :  { %v125_v57 = vpack.c.bf16 %v117_v47, %v117_v47  ;;  %v126_v58 = vpack.c.bf16 %v118_v48, %v118_v48  ;;  %v113_v59 = vadd.f32 %v97_v34, %v81_v49  ;;  %v75_v60 = vadd.f32 %v303_v42, %v59_v50  ;;  %v353_v50 = vld [vmem:[%s472_s1 + $0x30] sm:$0xff]  }
   0xf   :  { %v127_v62 = vpack.c.bf16 %v119_v52, %v119_v52  ;;  %v128_v63 = vpack.c.bf16 %v120_v53, %v120_v53  ;;  %v114_v0 = vadd.f32 %v98_v38, %v82_v54  ;;  %v307_v1 = vunpack.c.l.bf16 %v347_v51 }
  0x10   :  { %133 = vst [vmem:[%s473_s2] sm:$0x3] %v125_v57  ;;  %134 = vst [vmem:[%s473_s2 + $0x2] sm:$0x3] %v126_v58  ;;  %v121_v2 = vmul.f32 0.25, %v113_v59  ;;  %v83_v3 = vadd.f32 %v304_v46, %v75_v60  ;;  %v308_v4 = vunpack.c.h.bf16 %v347_v51  ;;  %v311_v5 = vunpack.c.l.bf16 %v310_v56 }
  0x11   :  { %135 = vst [vmem:[%s473_s2 + $0x4] sm:$0x3] %v127_v62  ;;  %136 = vst [vmem:[%s473_s2 + $0x6] sm:$0x3] %v128_v63  ;;  %v122_v6 = vmul.f32 0.25, %v114_v0  ;;  %v60_v7 = vrot.slane %v307_v1, 4  ;;  %v312_v8 = vunpack.c.h.bf16 %v310_v56  ;;  %v315_v9 = vunpack.c.l.bf16 %v348_v61 }
  0x12   :  { %v129_v11 = vpack.c.bf16 %v121_v2, %v121_v2  ;;  %v115_v12 = vadd.f32 %v99_v55, %v83_v3  ;;  %v100_v13 = vrot.slane %v308_v4, 4  ;;  %v181_v14 = vrot.slane %v311_v5, 4  ;;  %v354_v63 = vld [vmem:[%s472_s1 + $0x38] sm:$0xff]  }
  0x13   :  { %v130_v16 = vpack.c.bf16 %v122_v6, %v122_v6  ;;  %v76_v17 = vadd.f32 %v307_v1, %v60_v7  ;;  %v221_v18 = vrot.slane %v312_v8, 4  ;;  %v316_v19 = vunpack.c.h.bf16 %v348_v61 }
  0x14   :  { %137 = vst [vmem:[%s473_s2 + $0x8] sm:$0x3] %v129_v11  ;;  %v123_v20 = vmul.f32 0.25, %v115_v12  ;;  %v197_v21 = vadd.f32 %v311_v5, %v181_v14  ;;  %v182_v22 = vrot.slane %v315_v9, 4  ;;  %v319_v23 = vunpack.c.l.bf16 %v349_v10 }
  0x15   :  { %138 = vst [vmem:[%s473_s2 + $0xa] sm:$0x3] %v130_v16  ;;  %v84_v24 = vadd.f32 %v308_v4, %v76_v17  ;;  %v222_v25 = vrot.slane %v316_v19, 4  ;;  %v320_v26 = vunpack.c.h.bf16 %v349_v10  ;;  %v323_v27 = vunpack.c.l.bf16 %v350_v15 }
  0x16   :  { %v131_v29 = vpack.c.bf16 %v123_v20, %v123_v20  ;;  %v205_v30 = vadd.f32 %v312_v8, %v197_v21  ;;  %v198_v31 = vadd.f32 %v315_v9, %v182_v22  ;;  %v183_v32 = vrot.slane %v319_v23, 4 }
  0x17   :  { %v116_v33 = vadd.f32 %v100_v13, %v84_v24  ;;  %v223_v34 = vrot.slane %v320_v26, 4  ;;  %v324_v35 = vunpack.c.h.bf16 %v350_v15  ;;  %v184_v36 = vrot.slane %v323_v27, 4 }
  0x18   :  { %139 = vst [vmem:[%s473_s2 + $0xc] sm:$0x3] %v131_v29  ;;  %v237_v37 = vadd.f32 %v221_v18, %v205_v30  ;;  %v206_v38 = vadd.f32 %v316_v19, %v198_v31  ;;  %v199_v39 = vadd.f32 %v319_v23, %v183_v32  ;;  %v327_v40 = vunpack.c.l.bf16 %v351_v28 }
  0x19   :  { %v124_v42 = vmul.f32 0.25, %v116_v33  ;;  %v200_v43 = vadd.f32 %v323_v27, %v184_v36  ;;  %v224_v44 = vrot.slane %v324_v35, 4  ;;  %v328_v45 = vunpack.c.h.bf16 %v351_v28 }
  0x1a   :  { %v245_v46 = vmul.f32 0.25, %v237_v37  ;;  %v238_v47 = vadd.f32 %v222_v25, %v206_v38  ;;  %v207_v48 = vadd.f32 %v320_v26, %v199_v39  ;;  %v185_v49 = vrot.slane %v327_v40, 4 }
  0x1b   :  { %v132_v51 = vpack.c.bf16 %v124_v42, %v124_v42  ;;  %v208_v52 = vadd.f32 %v324_v35, %v200_v43  ;;  %v225_v53 = vrot.slane %v328_v45, 4  ;;  %v331_v54 = vunpack.c.l.bf16 %v352_v41 }
  0x1c   :  { %v253_v55 = vpack.c.bf16 %v245_v46, %v245_v46  ;;  %v246_v56 = vmul.f32 0.25, %v238_v47  ;;  %v239_v57 = vadd.f32 %v223_v34, %v207_v48  ;;  %v201_v58 = vadd.f32 %v327_v40, %v185_v49 }
  0x1d   :  { %140 = vst [vmem:[%s473_s2 + $0xe] sm:$0x3] %v132_v51  ;;  %v240_v59 = vadd.f32 %v224_v44, %v208_v52  ;;  %v332_v60 = vunpack.c.h.bf16 %v352_v41  ;;  %v186_v61 = vrot.slane %v331_v54, 4  ;;  %v335_v62 = vunpack.c.l.bf16 %v353_v50 }
  0x1e   :  { %261 = vst [vmem:[%s474_s3] sm:$0x3] %v253_v55  ;;  %v254_v0 = vpack.c.bf16 %v246_v56, %v246_v56  ;;  %v247_v1 = vmul.f32 0.25, %v239_v57  ;;  %v209_v2 = vadd.f32 %v328_v45, %v201_v58  ;;  %v336_v3 = vunpack.c.h.bf16 %v353_v50 }
  0x1f   :  { %v248_v4 = vmul.f32 0.25, %v240_v59  ;;  %v202_v5 = vadd.f32 %v331_v54, %v186_v61  ;;  %v226_v6 = vrot.slane %v332_v60, 4  ;;  %v187_v7 = vrot.slane %v335_v62, 4 }
  0x20   :  { %262 = vst [vmem:[%s474_s3 + $0x2] sm:$0x3] %v254_v0  ;;  %v255_v8 = vpack.c.bf16 %v247_v1, %v247_v1  ;;  %v241_v9 = vadd.f32 %v225_v53, %v209_v2  ;;  %v227_v10 = vrot.slane %v336_v3, 4  ;;  %v339_v11 = vunpack.c.l.bf16 %v354_v63 }
  0x21   :  { %v256_v12 = vpack.c.bf16 %v248_v4, %v248_v4  ;;  %v210_v13 = vadd.f32 %v332_v60, %v202_v5  ;;  %v203_v14 = vadd.f32 %v335_v62, %v187_v7  ;;  %v340_v15 = vunpack.c.h.bf16 %v354_v63 }
  0x22   :  { %263 = vst [vmem:[%s474_s3 + $0x4] sm:$0x3] %v255_v8  ;;  %v249_v16 = vmul.f32 0.25, %v241_v9  ;;  %v188_v17 = vrot.slane %v339_v11, 4 }
  0x23   :  { %264 = vst [vmem:[%s474_s3 + $0x6] sm:$0x3] %v256_v12  ;;  %v242_v18 = vadd.f32 %v226_v6, %v210_v13  ;;  %v211_v19 = vadd.f32 %v336_v3, %v203_v14  ;;  %v228_v22 = vrot.slane %v340_v15, 4 }
  0x24   :  { %v257_v20 = vpack.c.bf16 %v249_v16, %v249_v16  ;;  %v204_v21 = vadd.f32 %v339_v11, %v188_v17 }
  0x25   :  { %v250_v23 = vmul.f32 0.25, %v242_v18  ;;  %v243_v24 = vadd.f32 %v227_v10, %v211_v19 }
  0x26   :  { %265 = vst [vmem:[%s474_s3 + $0x8] sm:$0x3] %v257_v20  ;;  %v212_v25 = vadd.f32 %v340_v15, %v204_v21 }
  0x27   :  { %v258_v26 = vpack.c.bf16 %v250_v23, %v250_v23  ;;  %v251_v27 = vmul.f32 0.25, %v243_v24 }
  0x28   :  { %v244_v28 = vadd.f32 %v228_v22, %v212_v25 }
  0x29   :  { %266 = vst [vmem:[%s474_s3 + $0xa] sm:$0x3] %v258_v26  ;;  %v259_v29 = vpack.c.bf16 %v251_v27, %v251_v27 }
  0x2a   :  { %v252_v30 = vmul.f32 0.25, %v244_v28 }
  0x2b   :  { %267 = vst [vmem:[%s474_s3 + $0xc] sm:$0x3] %v259_v29 }
  0x2c   :  { %v260_v31 = vpack.c.bf16 %v252_v30, %v252_v30 }
  0x2e   :  { %268 = vst [vmem:[%s474_s3 + $0xe] sm:$0x3] %v260_v31 }

// kernel: _lambda_.33
= control target key start
LH: loop header
LB: loop body
LE: loop exit
PB: predicated region body
PF: predicated region fallthrough
CT: control target
= control target key end

     0   :  { %s610_s1 = inlined_call_operand.vmem [shape: bf16[128,128], index: 1, kind: input, shape index: {}]   ;;  %s611_s5 = inlined_call_operand.vmem [shape: bf16[128,128], index: 5, kind: input, shape index: {}]   ;;  %s612_s0 = inlined_call_operand.vmem [shape: bf16[32,128], index: 0, kind: input, shape index: {}]   ;;  %s613_s4 = inlined_call_operand.vmem [shape: bf16[32,128], index: 4, kind: input, shape index: {}]   ;;  %s614_s2 = inlined_call_operand.vmem [shape: f32[1,128], index: 2, kind: input, shape index: {}]   ;;  %s615_s6 = inlined_call_operand.vmem [shape: f32[1,128], index: 6, kind: input, shape index: {}]   ;;  %s616_s3 = inlined_call_operand.vmem [shape: f32[1,128], index: 3, kind: input, shape index: {}]   ;;  %s617_s7 = inlined_call_operand.vmem [shape: f32[1,128], index: 7, kind: input, shape index: {}]   ;;  %s618_s8 = inlined_call_operand.vmem [shape: bf16[32,128], index: 8, kind: output, shape index: {}]  }
   0x1   :  { %v467_v0 = vld [vmem:[%s610_s1 + $0x38] sm:$0xff]   ;;  %v469_v2 = vld [vmem:[%s610_s1 + $0x30] sm:$0xff]   ;;  %v471_v4 = vld [vmem:[%s610_s1 + $0x28] sm:$0xff]  }
   0x2   :  { %v468_v1 = vld [vmem:[%s611_s5 + $0x38] sm:$0xff]   ;;  %427 = vmatprep.subr.bf16.mxu0 %v467_v0  ;;  %v470_v3 = vld [vmem:[%s611_s5 + $0x30] sm:$0xff]   ;;  %v472_v5 = vld [vmem:[%s611_s5 + $0x28] sm:$0xff]  }
   0x3   :  { %447 = vmatprep.subr.bf16.mxu1 %v468_v1  ;;  %428 = vmatpush3.bf16.msra.mxu0 %v467_v0  ;;  %v473_v6 = vld [vmem:[%s610_s1 + $0x20] sm:$0xff]   ;;  %v475_v8 = vld [vmem:[%s610_s1 + $0x18] sm:$0xff]   ;;  %v477_v10 = vld [vmem:[%s610_s1 + $0x10] sm:$0xff]  }
   0x4   :  { %448 = vmatpush3.bf16.msra.mxu1 %v468_v1  ;;  %429 = vmatprep.subr.bf16.mxu0 %v469_v2  ;;  %v474_v7 = vld [vmem:[%s611_s5 + $0x20] sm:$0xff]   ;;  %v476_v9 = vld [vmem:[%s611_s5 + $0x18] sm:$0xff]   ;;  %v478_v11 = vld [vmem:[%s611_s5 + $0x10] sm:$0xff]  }
   0x5   :  { %449 = vmatprep.subr.bf16.mxu1 %v470_v3  ;;  %v483_v12 = vld [vmem:[%s612_s0] sm:$0xff]   ;;  %v479_v14 = vld [vmem:[%s610_s1 + $0x8] sm:$0xff]  }
   0x6   :  { %v484_v13 = vld [vmem:[%s613_s4] sm:$0xff]   ;;  %443 = vmatprep.mubr.bf16.mxu0 %v483_v12  ;;  %v480_v15 = vld [vmem:[%s611_s5 + $0x8] sm:$0xff]  }
   0x7   :  { %430 = vmatpush3.bf16.msra.mxu0 %v469_v2  ;;  %463 = vmatprep.mubr.bf16.mxu1 %v484_v13  ;;  %v481_v16 = vld [vmem:[%s610_s1] sm:$0xff]   ;;  %v485_v18 = vld [vmem:[%s612_s0 + $0x8] sm:$0xff]  }
   0x8   :  { %450 = vmatpush3.bf16.msra.mxu1 %v470_v3  ;;  %431 = vmatprep.subr.bf16.mxu0 %v471_v4  ;;  %v482_v17 = vld [vmem:[%s611_s5] sm:$0xff]   ;;  %v486_v19 = vld [vmem:[%s613_s4 + $0x8] sm:$0xff]  }
   0x9   :  { %451 = vmatprep.subr.bf16.mxu1 %v472_v5  ;;  %v374_v20 = vld [vmem:[%s614_s2] ss:$0 sm:$0xff] }
   0xa   :  { %v386_v21 = vld [vmem:[%s615_s6] ss:$0 sm:$0xff] }
   0xb   :  { %432 = vmatpush3.bf16.msra.mxu0 %v471_v4  ;;  %v375_v24 = vld [vmem:[%s616_s3] ss:$0 sm:$0xff] }
   0xc   :  { %452 = vmatpush3.bf16.msra.mxu1 %v472_v5  ;;  %433 = vmatprep.subr.bf16.mxu0 %v473_v6  ;;  %v387_v26 = vld [vmem:[%s617_s7] ss:$0 sm:$0xff] }
   0xd   :  { %453 = vmatprep.subr.bf16.mxu1 %v474_v7 }
   0xf   :  { %434 = vmatpush3.bf16.msra.mxu0 %v473_v6 }
  0x10   :  { %454 = vmatpush3.bf16.msra.mxu1 %v474_v7  ;;  %435 = vmatprep.subr.bf16.mxu0 %v475_v8 }
  0x11   :  { %455 = vmatprep.subr.bf16.mxu1 %v476_v9 }
  0x13   :  { %436 = vmatpush3.bf16.msra.mxu0 %v475_v8 }
  0x14   :  { %456 = vmatpush3.bf16.msra.mxu1 %v476_v9  ;;  %437 = vmatprep.subr.bf16.mxu0 %v477_v10 }
  0x15   :  { %457 = vmatprep.subr.bf16.mxu1 %v478_v11 }
  0x17   :  { %438 = vmatpush3.bf16.msra.mxu0 %v477_v10 }
  0x18   :  { %458 = vmatpush3.bf16.msra.mxu1 %v478_v11  ;;  %439 = vmatprep.subr.bf16.mxu0 %v479_v14 }
  0x19   :  { %459 = vmatprep.subr.bf16.mxu1 %v480_v15 }
  0x1b   :  { %440 = vmatpush3.bf16.msra.mxu0 %v479_v14 }
  0x1c   :  { %460 = vmatpush3.bf16.msra.mxu1 %v480_v15  ;;  %441 = vmatprep.subr.bf16.mxu0 %v481_v16 }
  0x1d   :  { %461 = vmatprep.subr.bf16.mxu1 %v482_v17 }
  0x1f   :  { %442 = vmatpush3.bf16.msra.mxu0 %v481_v16 }
  0x20   :  { %462 = vmatpush3.bf16.msra.mxu1 %v482_v17 }
  0x22   :  { %444 = vmatmul.mubr.bf16.vlgmr.msra.gmra.mxu0 %v485_v18 }
  0x23   :  { %464 = vmatmul.mubr.bf16.vlgmr.msra.gmra.mxu1 %v486_v19 }
  0xe2   :  { %v445_v22 = vpop.f32.mrf.mxu0 }
  0xe3   :  { %v168_v23 = vmul.f32 %v445_v22, %v374_v20  ;;  %v465_v25 = vpop.f32.mrf.mxu1 }
  0xe4   :  { %v319_v27 = vmul.f32 %v465_v25, %v386_v21  ;;  %v144_v28 = vpop.f32.mrf.mxu0 }
  0xe5   :  { %v166_v29 = vmul.f32 %v374_v20, %v144_v28  ;;  %v295_v30 = vpop.f32.mrf.mxu1  ;;  %v179_v31 = vadd.f32 %v375_v24, %v168_v23 }
  0xe6   :  { %v330_v32 = vadd.f32 %v387_v26, %v319_v27  ;;  %v317_v33 = vmul.f32 %v386_v21, %v295_v30  ;;  %v446_v34 = vpop.f32.mrf.mxu0 }
  0xe7   :  { %v169_v35 = vmul.f32 %v446_v34, %v374_v20  ;;  %v466_v36 = vpop.f32.mrf.mxu1  ;;  %v177_v37 = vadd.f32 %v375_v24, %v166_v29 }
  0xe8   :  { %v328_v38 = vadd.f32 %v387_v26, %v317_v33  ;;  %v320_v39 = vmul.f32 %v466_v36, %v386_v21  ;;  %v147_v40 = vpop.f32.mrf.mxu0  ;;  %v334_v44 = vadd.f32 %v330_v32, %v179_v31 }
  0xe9   :  { %v180_v41 = vadd.f32 %v375_v24, %v169_v35  ;;  %v167_v42 = vmul.f32 %v374_v20, %v147_v40  ;;  %v298_v43 = vpop.f32.mrf.mxu1 }
  0xea   :  { %v331_v45 = vadd.f32 %v387_v26, %v320_v39  ;;  %v318_v46 = vmul.f32 %v386_v21, %v298_v43  ;;  %v332_v48 = vadd.f32 %v328_v38, %v177_v37  ;;  %v338_v51 = vmax.f32 %v334_v44, 0.0 }
  0xeb   :  { %v178_v47 = vadd.f32 %v375_v24, %v167_v42 }
  0xec   :  { %v335_v49 = vadd.f32 %v331_v45, %v180_v41  ;;  %v329_v50 = vadd.f32 %v387_v26, %v318_v46  ;;  %v336_v54 = vmax.f32 %v332_v48, 0.0 }
  0xee   :  { %v339_v52 = vmax.f32 %v335_v49, 0.0  ;;  %v333_v53 = vadd.f32 %v329_v50, %v178_v47 }
  0xf0   :  { %v404_v55 = vpack.c.bf16 %v339_v52, %v338_v51  ;;  %v337_v56 = vmax.f32 %v333_v53, 0.0 }
  0xf2   :  { %406 = vst [vmem:[%s618_s8 + $0x8] sm:$0xff] %v404_v55   ;;  %v399_v57 = vpack.c.bf16 %v337_v56, %v336_v54 }
  0xf4   :  { %400 = vst [vmem:[%s618_s8] sm:$0xff] %v399_v57  }

// kernel: _lambda_.34
= control target key start
LH: loop header
LB: loop body
LE: loop exit
PB: predicated region body
PF: predicated region fallthrough
CT: control target
= control target key end

     0   :  { %s362_s1 = inlined_call_operand.vmem [shape: bf16[128,128], index: 1, kind: input, shape index: {}]   ;;  %s363_s0 = inlined_call_operand.vmem [shape: bf16[32,128], index: 0, kind: input, shape index: {}]   ;;  %s364_s2 = inlined_call_operand.vmem [shape: f32[1,128], index: 2, kind: input, shape index: {}]   ;;  %s365_s3 = inlined_call_operand.vmem [shape: f32[1,128], index: 3, kind: input, shape index: {}]   ;;  %s366_s4 = inlined_call_operand.vmem [shape: bf16[32,128], index: 4, kind: output, shape index: {}]  }
   0x1   :  { %v285_v0 = vld [vmem:[%s362_s1 + $0x38] sm:$0xff]   ;;  %v286_v1 = vld [vmem:[%s362_s1 + $0x30] sm:$0xff]   ;;  %v287_v2 = vld [vmem:[%s362_s1 + $0x28] sm:$0xff]  }
   0x2   :  { %265 = vmatprep.subr.bf16.mxu0 %v285_v0  ;;  %v288_v3 = vld [vmem:[%s362_s1 + $0x20] sm:$0xff]   ;;  %v289_v5 = vld [vmem:[%s362_s1 + $0x18] sm:$0xff]   ;;  %v290_v6 = vld [vmem:[%s362_s1 + $0x10] sm:$0xff]  }
   0x3   :  { %266 = vmatpush3.bf16.msra.mxu0 %v285_v0  ;;  %v293_v4 = vld [vmem:[%s363_s0] sm:$0xff]   ;;  %v291_v7 = vld [vmem:[%s362_s1 + $0x8] sm:$0xff]  }
   0x4   :  { %267 = vmatprep.subr.bf16.mxu0 %v286_v1  ;;  %281 = vmatprep.mubr.bf16.mxu0 %v293_v4  ;;  %v292_v8 = vld [vmem:[%s362_s1] sm:$0xff]   ;;  %v294_v9 = vld [vmem:[%s363_s0 + $0x8] sm:$0xff]  }
   0x5   :  { %v234_v10 = vld [vmem:[%s364_s2] ss:$0 sm:$0xff] }
   0x6   :  { %v235_v13 = vld [vmem:[%s365_s3] ss:$0 sm:$0xff] }
   0x7   :  { %268 = vmatpush3.bf16.msra.mxu0 %v286_v1 }
   0x8   :  { %269 = vmatprep.subr.bf16.mxu0 %v287_v2 }
   0xb   :  { %270 = vmatpush3.bf16.msra.mxu0 %v287_v2 }
   0xc   :  { %271 = vmatprep.subr.bf16.mxu0 %v288_v3 }
   0xf   :  { %272 = vmatpush3.bf16.msra.mxu0 %v288_v3 }
  0x10   :  { %273 = vmatprep.subr.bf16.mxu0 %v289_v5 }
  0x13   :  { %274 = vmatpush3.bf16.msra.mxu0 %v289_v5 }
  0x14   :  { %275 = vmatprep.subr.bf16.mxu0 %v290_v6 }
  0x17   :  { %276 = vmatpush3.bf16.msra.mxu0 %v290_v6 }
  0x18   :  { %277 = vmatprep.subr.bf16.mxu0 %v291_v7 }
  0x1b   :  { %278 = vmatpush3.bf16.msra.mxu0 %v291_v7 }
  0x1c   :  { %279 = vmatprep.subr.bf16.mxu0 %v292_v8 }
  0x1f   :  { %280 = vmatpush3.bf16.msra.mxu0 %v292_v8 }
  0x22   :  { %282 = vmatmul.mubr.bf16.vlgmr.msra.gmra.mxu0 %v294_v9 }
  0xe2   :  { %v283_v11 = vpop.f32.mrf.mxu0 }
  0xe3   :  { %v183_v12 = vmul.f32 %v283_v11, %v234_v10 }
  0xe4   :  { %v144_v14 = vpop.f32.mrf.mxu0 }
  0xe5   :  { %v181_v15 = vmul.f32 %v234_v10, %v144_v14  ;;  %v194_v17 = vadd.f32 %v235_v13, %v183_v12 }
  0xe6   :  { %v284_v16 = vpop.f32.mrf.mxu0 }
  0xe7   :  { %v184_v18 = vmul.f32 %v284_v16, %v234_v10  ;;  %v192_v20 = vadd.f32 %v235_v13, %v181_v15  ;;  %v198_v23 = vmax.f32 %v194_v17, 0.0 }
  0xe8   :  { %v147_v19 = vpop.f32.mrf.mxu0 }
  0xe9   :  { %v195_v21 = vadd.f32 %v235_v13, %v184_v18  ;;  %v182_v22 = vmul.f32 %v234_v10, %v147_v19  ;;  %v196_v26 = vmax.f32 %v192_v20, 0.0 }
  0xeb   :  { %v199_v24 = vmax.f32 %v195_v21, 0.0  ;;  %v193_v25 = vadd.f32 %v235_v13, %v182_v22 }
  0xed   :  { %v252_v27 = vpack.c.bf16 %v199_v24, %v198_v23  ;;  %v197_v28 = vmax.f32 %v193_v25, 0.0 }
  0xef   :  { %254 = vst [vmem:[%s366_s4 + $0x8] sm:$0xff] %v252_v27   ;;  %v247_v29 = vpack.c.bf16 %v197_v28, %v196_v26 }
  0xf1   :  { %248 = vst [vmem:[%s366_s4] sm:$0xff] %v247_v29  }

// kernel: _lambda_.35
= control target key start
LH: loop header
LB: loop body
LE: loop exit
PB: predicated region body
PF: predicated region fallthrough
CT: control target
= control target key end

     0   :  { %s693_s1 = inlined_call_operand.vmem [shape: bf16[384,128], index: 1, kind: input, shape index: {}]   ;;  %s694_s0 = inlined_call_operand.vmem [shape: bf16[32,384], index: 0, kind: input, shape index: {}]   ;;  %s695_s2 = inlined_call_operand.vmem [shape: f32[1,128], index: 2, kind: input, shape index: {}]   ;;  %s696_s3 = inlined_call_operand.vmem [shape: f32[1,128], index: 3, kind: input, shape index: {}]   ;;  %s697_s4 = inlined_call_operand.vmem [shape: bf16[32,128], index: 4, kind: output, shape index: {}]  }
   0x1   :  { %v534_v0 = vld [vmem:[%s693_s1 + $0x78] sm:$0xff]   ;;  %v537_v3 = vld [vmem:[%s693_s1 + $0x70] sm:$0xff]   ;;  %v540_v6 = vld [vmem:[%s693_s1 + $0x68] sm:$0xff]  }
   0x2   :  { %v535_v1 = vld [vmem:[%s693_s1 + $0x38] sm:$0xff]   ;;  %476 = vmatprep.subr.bf16.mxu0 %v534_v0  ;;  %v538_v4 = vld [vmem:[%s693_s1 + $0x30] sm:$0xff]   ;;  %v541_v7 = vld [vmem:[%s693_s1 + $0x28] sm:$0xff]  }
   0x3   :  { %v536_v2 = vld [vmem:[%s693_s1 + $0xb8] sm:$0xff]   ;;  %477 = vmatpush3.bf16.msra.mxu0 %v535_v1  ;;  %v539_v5 = vld [vmem:[%s693_s1 + $0xb0] sm:$0xff]   ;;  %v542_v8 = vld [vmem:[%s693_s1 + $0xa8] sm:$0xff]  }
   0x4   :  { %514 = vmatprep.subr.bf16.mxu1 %v536_v2  ;;  %478 = vmatprep.subr.bf16.mxu0 %v537_v3  ;;  %v543_v9 = vld [vmem:[%s693_s1 + $0x60] sm:$0xff]   ;;  %v546_v12 = vld [vmem:[%s693_s1 + $0x58] sm:$0xff]   ;;  %v549_v15 = vld [vmem:[%s693_s1 + $0x50] sm:$0xff]  }
   0x5   :  { %515 = vmatpush3.bf16.msra.mxu1 %v536_v2  ;;  %v544_v10 = vld [vmem:[%s693_s1 + $0x20] sm:$0xff]   ;;  %v548_v13 = vld [vmem:[%s693_s1 + $0x98] sm:$0xff]   ;;  %v551_v16 = vld [vmem:[%s693_s1 + $0x90] sm:$0xff]  }
   0x6   :  { %516 = vmatprep.subr.bf16.mxu1 %v539_v5  ;;  %v545_v11 = vld [vmem:[%s693_s1 + $0xa0] sm:$0xff]   ;;  %v547_v14 = vld [vmem:[%s693_s1 + $0x18] sm:$0xff]   ;;  %v550_v17 = vld [vmem:[%s693_s1 + $0x10] sm:$0xff]  }
   0x7   :  { %479 = vmatpush3.bf16.msra.mxu0 %v538_v4  ;;  %v552_v18 = vld [vmem:[%s693_s1 + $0x48] sm:$0xff]   ;;  %v555_v21 = vld [vmem:[%s693_s1 + $0x40] sm:$0xff]  }
   0x8   :  { %480 = vmatprep.subr.bf16.mxu0 %v540_v6  ;;  %v553_v19 = vld [vmem:[%s693_s1 + $0x8] sm:$0xff]   ;;  %v557_v22 = vld [vmem:[%s693_s1 + $0x80] sm:$0xff]  }
   0x9   :  { %517 = vmatpush3.bf16.msra.mxu1 %v539_v5  ;;  %v554_v20 = vld [vmem:[%s693_s1 + $0x88] sm:$0xff]   ;;  %v560_v23 = vld [vmem:[%s694_s0 + $0x4] ss:$12 sps:$4 sm:$0xff]   ;;  %v455_v36 = vld [vmem:[%s695_s2] ss:$0 sm:$0xff] }
   0xa   :  { %518 = vmatprep.subr.bf16.mxu1 %v542_v8  ;;  %v561_v24 = vld [vmem:[%s694_s0 + $0x8] ss:$12 sps:$4 sm:$0xff]   ;;  %v556_v25 = vld [vmem:[%s693_s1] sm:$0xff]   ;;  %294 = vmatprep.mubr.bf16.mxu0 %v560_v23 }
   0xb   :  { %481 = vmatpush3.bf16.msra.mxu0 %v541_v7  ;;  %530 = vmatprep.mubr.bf16.mxu1 %v561_v24  ;;  %v558_v26 = vld [vmem:[%s694_s0] ss:$12 sps:$4 sm:$0xff]   ;;  %v563_v27 = vld [vmem:[%s694_s0 + $0x1c] ss:$12 sps:$4 sm:$0xff]   ;;  %v565_v29 = vld [vmem:[%s694_s0 + $0x18] ss:$12 sps:$4 sm:$0xff]  }
   0xc   :  { %482 = vmatprep.subr.bf16.mxu0 %v543_v9  ;;  %v562_v28 = vld [vmem:[%s694_s0 + $0x20] ss:$12 sps:$4 sm:$0xff]  }
   0xd   :  { %519 = vmatpush3.bf16.msra.mxu1 %v542_v8  ;;  %v456_v42 = vld [vmem:[%s696_s3] ss:$0 sm:$0xff] }
   0xe   :  { %520 = vmatprep.subr.bf16.mxu1 %v545_v11 }
   0xf   :  { %483 = vmatpush3.bf16.msra.mxu0 %v544_v10 }
  0x10   :  { %484 = vmatprep.subr.bf16.mxu0 %v546_v12 }
  0x11   :  { %521 = vmatpush3.bf16.msra.mxu1 %v545_v11 }
  0x12   :  { %522 = vmatprep.subr.bf16.mxu1 %v548_v13 }
  0x13   :  { %485 = vmatpush3.bf16.msra.mxu0 %v547_v14 }
  0x14   :  { %486 = vmatprep.subr.bf16.mxu0 %v549_v15 }
  0x15   :  { %523 = vmatpush3.bf16.msra.mxu1 %v548_v13 }
  0x16   :  { %524 = vmatprep.subr.bf16.mxu1 %v551_v16 }
  0x17   :  { %487 = vmatpush3.bf16.msra.mxu0 %v550_v17 }
  0x18   :  { %488 = vmatprep.subr.bf16.mxu0 %v552_v18 }
  0x19   :  { %525 = vmatpush3.bf16.msra.mxu1 %v551_v16 }
  0x1a   :  { %526 = vmatprep.subr.bf16.mxu1 %v554_v20 }
  0x1b   :  { %489 = vmatpush3.bf16.msra.mxu0 %v553_v19 }
  0x1c   :  { %490 = vmatprep.subr.bf16.mxu0 %v555_v21 }
  0x1d   :  { %527 = vmatpush3.bf16.msra.mxu1 %v554_v20 }
  0x1e   :  { %528 = vmatprep.subr.bf16.mxu1 %v557_v22 }
  0x1f   :  { %491 = vmatpush3.bf16.msra.mxu0 %v556_v25 }
  0x21   :  { %529 = vmatpush3.bf16.msra.mxu1 %v557_v22 }
  0x22   :  { %295 = vmatmul.mubr.bf16.vlgmr.msra.gmra.mxu0 %v558_v26 }
  0x23   :  { %302 = vmatprep.mubr.bf16.mxu0 %v563_v27 }
  0x24   :  { %531 = vmatmul.mubr.bf16.vlgmr.msra.gmra.mxu1 %v562_v28 }
  0x2a   :  { %303 = vmatmul.mubr.bf16.gmra.mxu0 %v565_v29 }
  0xe2   :  { %v492_v30 = vpop.f32.mrf.mxu0 }
  0xe4   :  { %v493_v31 = vpop.f32.mrf.mxu0  ;;  %v532_v32 = vpop.f32.mrf.mxu1 }
  0xe5   :  { %v494_v33 = vadd.f32 %v493_v31, %v492_v30 }
  0xe6   :  { %v495_v34 = vpop.f32.mrf.mxu0  ;;  %v345_v35 = vpop.f32.mrf.mxu1 }
  0xe7   :  { %v346_v37 = vadd.f32 %v494_v33, %v345_v35 }
  0xe8   :  { %v496_v38 = vpop.f32.mrf.mxu0  ;;  %v533_v39 = vpop.f32.mrf.mxu1 }
  0xe9   :  { %v382_v40 = vmul.f32 %v455_v36, %v346_v37  ;;  %v497_v41 = vadd.f32 %v496_v38, %v495_v34 }
  0xea   :  { %v498_v43 = vpop.f32.mrf.mxu0  ;;  %v348_v44 = vpop.f32.mrf.mxu1 }
  0xeb   :  { %v349_v45 = vadd.f32 %v497_v41, %v348_v44  ;;  %v393_v47 = vadd.f32 %v456_v42, %v382_v40 }
  0xec   :  { %v499_v46 = vpop.f32.mrf.mxu0 }
  0xed   :  { %v383_v48 = vmul.f32 %v455_v36, %v349_v45  ;;  %v500_v49 = vadd.f32 %v499_v46, %v498_v43  ;;  %v397_v54 = vmax.f32 %v393_v47, 0.0 }
  0xee   :  { %v501_v50 = vpop.f32.mrf.mxu0 }
  0xef   :  { %v394_v51 = vadd.f32 %v456_v42, %v383_v48  ;;  %v354_v52 = vadd.f32 %v532_v32, %v500_v49 }
  0xf0   :  { %v502_v53 = vpop.f32.mrf.mxu0 }
  0xf1   :  { %v398_v55 = vmax.f32 %v394_v51, 0.0  ;;  %v384_v56 = vmul.f32 %v455_v36, %v354_v52  ;;  %v503_v57 = vadd.f32 %v502_v53, %v501_v50 }
  0xf3   :  { %v468_v58 = vpack.c.bf16 %v398_v55, %v397_v54  ;;  %v357_v59 = vadd.f32 %v533_v39, %v503_v57  ;;  %v395_v60 = vadd.f32 %v456_v42, %v384_v56 }
  0xf5   :  { %469 = vst [vmem:[%s697_s4] sm:$0xff] %v468_v58   ;;  %v385_v61 = vmul.f32 %v455_v36, %v357_v59  ;;  %v399_v63 = vmax.f32 %v395_v60, 0.0 }
  0xf7   :  { %v396_v62 = vadd.f32 %v456_v42, %v385_v61 }
  0xf9   :  { %v400_v0 = vmax.f32 %v396_v62, 0.0 }
  0xfb   :  { %v473_v1 = vpack.c.bf16 %v400_v0, %v399_v63 }
  0xfd   :  { %475 = vst [vmem:[%s697_s4 + $0x8] sm:$0xff] %v473_v1  }

// kernel: _lambda_.38
= control target key start
LH: loop header
LB: loop body
LE: loop exit
PB: predicated region body
PF: predicated region fallthrough
CT: control target
= control target key end

     0   :  { %v207_v0 = vmov 0.0   ;;  %vm208_vm0 = vmmov 0   ;;  %s270_s1 = inlined_call_operand.vmem [shape: bf16[128,128], index: 1, kind: input, shape index: {}]   ;;  %s271_s0 = inlined_call_operand.vmem [shape: bf16[8,128], index: 0, kind: input, shape index: {}]   ;;  %s272_s2 = inlined_call_operand.vmem [shape: f32[1,128], index: 2, kind: input, shape index: {}]   ;;  %s273_s3 = inlined_call_operand.vmem [shape: f32[1,128], index: 3, kind: input, shape index: {}]   ;;  %s274_s4 = inlined_call_operand.vmem [shape: bf16[8,128], index: 4, kind: output, shape index: {}]  }
   0x1   :  { %177 = vmatprep.subr.bf16.mxu0 %v207_v0  ;;  %v199_v1 = vld [vmem:[%s270_s1 + $0x38] sm:$0xff]   ;;  %193 = vmatprep.mubr.msk.bf16.mxu0 %vm208_vm0, %v207_v0  ;;  %v200_v2 = vld [vmem:[%s270_s1 + $0x30] sm:$0xff]   ;;  %v201_v3 = vld [vmem:[%s270_s1 + $0x28] sm:$0xff]  }
   0x2   :  { %178 = vmatpush3.bf16.msra.mxu0 %v199_v1  ;;  %v202_v4 = vld [vmem:[%s270_s1 + $0x20] sm:$0xff]   ;;  %v203_v5 = vld [vmem:[%s270_s1 + $0x18] sm:$0xff]   ;;  %v204_v6 = vld [vmem:[%s270_s1 + $0x10] sm:$0xff]  }
   0x3   :  { %179 = vmatprep.subr.bf16.mxu0 %v207_v0  ;;  %v205_v7 = vld [vmem:[%s270_s1 + $0x8] sm:$0xff]   ;;  %v206_v8 = vld [vmem:[%s270_s1] sm:$0xff]  }
   0x4   :  { %v24_v9 = vld [vmem:[%s271_s0] sm:$0xf] }
   0x5   :  { %v166_v10 = vld [vmem:[%s272_s2] ss:$0 sm:$0xff] }
   0x6   :  { %180 = vmatpush3.bf16.msra.mxu0 %v200_v2  ;;  %v167_v12 = vld [vmem:[%s273_s3] ss:$0 sm:$0xff] }
   0x7   :  { %181 = vmatprep.subr.bf16.mxu0 %v207_v0 }
   0xa   :  { %182 = vmatpush3.bf16.msra.mxu0 %v201_v3 }
   0xb   :  { %183 = vmatprep.subr.bf16.mxu0 %v207_v0 }
   0xe   :  { %184 = vmatpush3.bf16.msra.mxu0 %v202_v4 }
   0xf   :  { %185 = vmatprep.subr.bf16.mxu0 %v207_v0 }
  0x12   :  { %186 = vmatpush3.bf16.msra.mxu0 %v203_v5 }
  0x13   :  { %187 = vmatprep.subr.bf16.mxu0 %v207_v0 }
  0x16   :  { %188 = vmatpush3.bf16.msra.mxu0 %v204_v6 }
  0x17   :  { %189 = vmatprep.subr.bf16.mxu0 %v207_v0 }
  0x1a   :  { %190 = vmatpush3.bf16.msra.mxu0 %v205_v7 }
  0x1b   :  { %191 = vmatprep.subr.bf16.mxu0 %v207_v0 }
  0x1e   :  { %192 = vmatpush3.bf16.msra.mxu0 %v206_v8 }
  0x21   :  { %194 = vmatmul.mubr.bf16.vlgmr.msra.gmra.mxu0 %v24_v9 }
  0xe1   :  { %v123_v11 = vpop.f32.mrf.mxu0 }
  0xe2   :  { %v142_v13 = vmul.f32 %v166_v10, %v123_v11 }
  0xe3   :  { %v195_v14 = vpop.f32.mrf.mxu0 }
  0xe4   :  { %v150_v15 = vadd.f32 %v167_v12, %v142_v13 }
  0xe5   :  { %v126_v16 = vpop.f32.mrf.mxu0 }
  0xe6   :  { %v151_v17 = vmax.f32 %v150_v15, 0.0 }
  0xe7   :  { %v196_v18 = vpop.f32.mrf.mxu0 }
  0xe8   :  { %v152_v19 = vpack.c.bf16 %v151_v17, %v151_v17 }
  0xea   :  { %153 = vst [vmem:[%s274_s4] sm:$0xf] %v152_v19 }

// kernel: _lambda_.36
= control target key start
LH: loop header
LB: loop body
LE: loop exit
PB: predicated region body
PF: predicated region fallthrough
CT: control target
= control target key end

     0   :  { %s241_s0 = inlined_call_operand.vmem [shape: bf16[4,2,2,256], index: 0, kind: input, shape index: {}]   ;;  %s242_s1 = inlined_call_operand.vmem [shape: bf16[4,2,2,256], index: 1, kind: input, shape index: {}]   ;;  %s243_s2 = inlined_call_operand.vmem [shape: bf16[4,2,128], index: 2, kind: output, shape index: {0}]   ;;  %s244_s3 = inlined_call_operand.vmem [shape: bf16[4,2,128], index: 3, kind: output, shape index: {1}]  }
   0x1   :  { %v13_v0 = vld [vmem:[%s241_s0] sm:$0x3]  ;;  %v14_v1 = vld [vmem:[%s241_s0 + $0x2] sm:$0x3]  ;;  %v15_v2 = vld [vmem:[%s241_s0 + $0x4] sm:$0x3] }
   0x2   :  { %v21_v3 = vunpack.c.l.bf16 %v13_v0  ;;  %v25_v4 = vunpack.c.l.bf16 %v14_v1  ;;  %v16_v5 = vld [vmem:[%s241_s0 + $0x6] sm:$0x3]  ;;  %v22_v6 = vunpack.c.l.bf16 %v15_v2  ;;  %v17_v7 = vld [vmem:[%s241_s0 + $0x8] sm:$0x3]  ;;  %v18_v8 = vld [vmem:[%s241_s0 + $0xa] sm:$0x3] }
   0x3   :  { %v26_v9 = vunpack.c.l.bf16 %v16_v5  ;;  %v23_v10 = vunpack.c.l.bf16 %v17_v7  ;;  %v27_v11 = vunpack.c.l.bf16 %v18_v8  ;;  %v19_v12 = vld [vmem:[%s241_s0 + $0xc] sm:$0x3]  ;;  %v20_v13 = vld [vmem:[%s241_s0 + $0xe] sm:$0x3]  ;;  %v77_v14 = vld [vmem:[%s242_s1] sm:$0x3] }
   0x4   :  { %v33_v15 = vrot.slane %v21_v3, 2  ;;  %v53_v16 = vrot.slane %v25_v4, 2  ;;  %v34_v17 = vrot.slane %v22_v6, 2  ;;  %v24_v18 = vunpack.c.l.bf16 %v19_v12  ;;  %v78_v19 = vld [vmem:[%s242_s1 + $0x2] sm:$0x3] }
   0x5   :  { %v54_v20 = vrot.slane %v26_v9, 2  ;;  %v35_v21 = vrot.slane %v23_v10, 2  ;;  %v55_v22 = vrot.slane %v27_v11, 2  ;;  %v28_v23 = vunpack.c.l.bf16 %v20_v13  ;;  %v79_v24 = vld [vmem:[%s242_s1 + $0x4] sm:$0x3] }
   0x6   :  { %v41_v25 = vadd.f32 %v33_v15, %v21_v3  ;;  %v42_v26 = vadd.f32 %v34_v17, %v22_v6  ;;  %v36_v27 = vrot.slane %v24_v18, 2  ;;  %v85_v28 = vunpack.c.l.bf16 %v77_v14  ;;  %v80_v29 = vld [vmem:[%s242_s1 + $0x6] sm:$0x3]  ;;  %v81_v38 = vld [vmem:[%s242_s1 + $0x8] sm:$0x3] }
   0x7   :  { %v43_v30 = vadd.f32 %v35_v21, %v23_v10  ;;  %v56_v31 = vrot.slane %v28_v23, 2  ;;  %v89_v32 = vunpack.c.l.bf16 %v78_v19  ;;  %v86_v33 = vunpack.c.l.bf16 %v79_v24  ;;  %v82_v47 = vld [vmem:[%s242_s1 + $0xa] sm:$0x3]  ;;  %v83_v60 = vld [vmem:[%s242_s1 + $0xc] sm:$0x3] }
   0x8   :  { %v45_v34 = vadd.f32 %v41_v25, %v25_v4  ;;  %v46_v35 = vadd.f32 %v42_v26, %v26_v9  ;;  %v44_v36 = vadd.f32 %v36_v27, %v24_v18  ;;  %v97_v37 = vrot.slane %v85_v28, 2  ;;  %v84_v61 = vld [vmem:[%s242_s1 + $0xe] sm:$0x3] }
   0x9   :  { %v47_v39 = vadd.f32 %v43_v30, %v27_v11  ;;  %v117_v40 = vrot.slane %v89_v32, 2  ;;  %v90_v41 = vunpack.c.l.bf16 %v80_v29  ;;  %v98_v42 = vrot.slane %v86_v33, 2 }
   0xa   :  { %v61_v43 = vadd.f32 %v53_v16, %v45_v34  ;;  %v62_v44 = vadd.f32 %v54_v20, %v46_v35  ;;  %v48_v45 = vadd.f32 %v44_v36, %v28_v23  ;;  %v105_v46 = vadd.f32 %v97_v37, %v85_v28 }
   0xb   :  { %v63_v48 = vadd.f32 %v55_v22, %v47_v39  ;;  %v106_v49 = vadd.f32 %v98_v42, %v86_v33  ;;  %v118_v50 = vrot.slane %v90_v41, 2  ;;  %v87_v51 = vunpack.c.l.bf16 %v81_v38 }
   0xc   :  { %v65_v52 = vmul.f32 0.25, %v61_v43  ;;  %v66_v53 = vmul.f32 0.25, %v62_v44  ;;  %v64_v54 = vadd.f32 %v56_v31, %v48_v45  ;;  %v109_v55 = vadd.f32 %v105_v46, %v89_v32 }
   0xd   :  { %v67_v56 = vmul.f32 0.25, %v63_v48  ;;  %v110_v57 = vadd.f32 %v106_v49, %v90_v41  ;;  %v91_v58 = vunpack.c.l.bf16 %v82_v47  ;;  %v99_v59 = vrot.slane %v87_v51, 2 }
   0xe   :  { %v69_v62 = vpack.c.bf16 %v65_v52, %v65_v52  ;;  %v70_v63 = vpack.c.bf16 %v66_v53, %v66_v53  ;;  %v68_v0 = vmul.f32 0.25, %v64_v54  ;;  %v125_v1 = vadd.f32 %v117_v40, %v109_v55 }
   0xf   :  { %v71_v2 = vpack.c.bf16 %v67_v56, %v67_v56  ;;  %v126_v3 = vadd.f32 %v118_v50, %v110_v57  ;;  %v107_v4 = vadd.f32 %v99_v59, %v87_v51  ;;  %v119_v5 = vrot.slane %v91_v58, 2 }
  0x10   :  { %73 = vst [vmem:[%s243_s2] sm:$0x1] %v69_v62  ;;  %74 = vst [vmem:[%s243_s2 + $0x1] sm:$0x1] %v70_v63  ;;  %v72_v6 = vpack.c.bf16 %v68_v0, %v68_v0  ;;  %v129_v7 = vmul.f32 0.25, %v125_v1  ;;  %v88_v8 = vunpack.c.l.bf16 %v83_v60  ;;  %v92_v9 = vunpack.c.l.bf16 %v84_v61 }
  0x11   :  { %75 = vst [vmem:[%s243_s2 + $0x2] sm:$0x1] %v71_v2  ;;  %v130_v10 = vmul.f32 0.25, %v126_v3  ;;  %v111_v11 = vadd.f32 %v107_v4, %v91_v58 }
  0x12   :  { %76 = vst [vmem:[%s243_s2 + $0x3] sm:$0x1] %v72_v6  ;;  %v133_v12 = vpack.c.bf16 %v129_v7, %v129_v7  ;;  %v100_v13 = vrot.slane %v88_v8, 2  ;;  %v120_v17 = vrot.slane %v92_v9, 2 }
  0x13   :  { %v134_v14 = vpack.c.bf16 %v130_v10, %v130_v10  ;;  %v127_v15 = vadd.f32 %v119_v5, %v111_v11 }
  0x14   :  { %137 = vst [vmem:[%s244_s3] sm:$0x1] %v133_v12  ;;  %v108_v16 = vadd.f32 %v100_v13, %v88_v8 }
  0x15   :  { %138 = vst [vmem:[%s244_s3 + $0x1] sm:$0x1] %v134_v14  ;;  %v131_v18 = vmul.f32 0.25, %v127_v15 }
  0x16   :  { %v112_v19 = vadd.f32 %v108_v16, %v92_v9 }
  0x17   :  { %v135_v20 = vpack.c.bf16 %v131_v18, %v131_v18 }
  0x18   :  { %v128_v21 = vadd.f32 %v120_v17, %v112_v19 }
  0x19   :  { %139 = vst [vmem:[%s244_s3 + $0x2] sm:$0x1] %v135_v20 }
  0x1a   :  { %v132_v22 = vmul.f32 0.25, %v128_v21 }
  0x1c   :  { %v136_v23 = vpack.c.bf16 %v132_v22, %v132_v22 }
  0x1e   :  { %140 = vst [vmem:[%s244_s3 + $0x3] sm:$0x1] %v136_v23 }

// kernel: _lambda_.37
= control target key start
LH: loop header
LB: loop body
LE: loop exit
PB: predicated region body
PF: predicated region fallthrough
CT: control target
= control target key end

     0   :  { %v376_v0 = vmov 0.0   ;;  %vm377_vm0 = vmmov 0   ;;  %s492_s1 = inlined_call_operand.vmem [shape: bf16[128,128], index: 1, kind: input, shape index: {}]   ;;  %s493_s5 = inlined_call_operand.vmem [shape: bf16[128,128], index: 5, kind: input, shape index: {}]   ;;  %s494_s0 = inlined_call_operand.vmem [shape: bf16[8,128], index: 0, kind: input, shape index: {}]   ;;  %s495_s4 = inlined_call_operand.vmem [shape: bf16[8,128], index: 4, kind: input, shape index: {}]   ;;  %s496_s2 = inlined_call_operand.vmem [shape: f32[1,128], index: 2, kind: input, shape index: {}]   ;;  %s497_s6 = inlined_call_operand.vmem [shape: f32[1,128], index: 6, kind: input, shape index: {}]   ;;  %s498_s3 = inlined_call_operand.vmem [shape: f32[1,128], index: 3, kind: input, shape index: {}]   ;;  %s499_s7 = inlined_call_operand.vmem [shape: f32[1,128], index: 7, kind: input, shape index: {}]   ;;  %s500_s8 = inlined_call_operand.vmem [shape: bf16[8,128], index: 8, kind: output, shape index: {}]  }
   0x1   :  { %318 = vmatprep.subr.bf16.mxu0 %v376_v0  ;;  %338 = vmatprep.subr.bf16.mxu1 %v376_v0  ;;  %v360_v1 = vld [vmem:[%s492_s1 + $0x38] sm:$0xff]   ;;  %v362_v3 = vld [vmem:[%s492_s1 + $0x30] sm:$0xff]   ;;  %v364_v5 = vld [vmem:[%s492_s1 + $0x28] sm:$0xff]  }
   0x2   :  { %v361_v2 = vld [vmem:[%s493_s5 + $0x38] sm:$0xff]   ;;  %334 = vmatprep.mubr.msk.bf16.mxu0 %vm377_vm0, %v376_v0  ;;  %354 = vmatprep.mubr.msk.bf16.mxu1 %vm377_vm0, %v376_v0  ;;  %v363_v4 = vld [vmem:[%s493_s5 + $0x30] sm:$0xff]   ;;  %v365_v6 = vld [vmem:[%s493_s5 + $0x28] sm:$0xff]  }
   0x3   :  { %319 = vmatpush3.bf16.msra.mxu0 %v360_v1  ;;  %339 = vmatpush3.bf16.msra.mxu1 %v361_v2  ;;  %v366_v7 = vld [vmem:[%s492_s1 + $0x20] sm:$0xff]   ;;  %v368_v9 = vld [vmem:[%s492_s1 + $0x18] sm:$0xff]   ;;  %v370_v11 = vld [vmem:[%s492_s1 + $0x10] sm:$0xff]  }
   0x4   :  { %320 = vmatprep.subr.bf16.mxu0 %v376_v0  ;;  %340 = vmatprep.subr.bf16.mxu1 %v376_v0  ;;  %v367_v8 = vld [vmem:[%s493_s5 + $0x20] sm:$0xff]   ;;  %v369_v10 = vld [vmem:[%s493_s5 + $0x18] sm:$0xff]   ;;  %v371_v12 = vld [vmem:[%s493_s5 + $0x10] sm:$0xff]  }
   0x5   :  { %v372_v13 = vld [vmem:[%s492_s1 + $0x8] sm:$0xff]   ;;  %v374_v15 = vld [vmem:[%s492_s1] sm:$0xff]  }
   0x6   :  { %v373_v14 = vld [vmem:[%s493_s5 + $0x8] sm:$0xff]   ;;  %v375_v16 = vld [vmem:[%s493_s5] sm:$0xff]  }
   0x7   :  { %321 = vmatpush3.bf16.msra.mxu0 %v362_v3  ;;  %341 = vmatpush3.bf16.msra.mxu1 %v363_v4  ;;  %v30_v17 = vld [vmem:[%s494_s0] sm:$0xf] }
   0x8   :  { %322 = vmatprep.subr.bf16.mxu0 %v376_v0  ;;  %342 = vmatprep.subr.bf16.mxu1 %v376_v0  ;;  %v151_v18 = vld [vmem:[%s495_s4] sm:$0xf] }
   0x9   :  { %v288_v19 = vld [vmem:[%s496_s2] ss:$0 sm:$0xff] }
   0xa   :  { %v298_v20 = vld [vmem:[%s497_s6] ss:$0 sm:$0xff] }
   0xb   :  { %323 = vmatpush3.bf16.msra.mxu0 %v364_v5  ;;  %343 = vmatpush3.bf16.msra.mxu1 %v365_v6  ;;  %v289_v22 = vld [vmem:[%s498_s3] ss:$0 sm:$0xff] }
   0xc   :  { %324 = vmatprep.subr.bf16.mxu0 %v376_v0  ;;  %344 = vmatprep.subr.bf16.mxu1 %v376_v0  ;;  %v299_v25 = vld [vmem:[%s499_s7] ss:$0 sm:$0xff] }
   0xf   :  { %325 = vmatpush3.bf16.msra.mxu0 %v366_v7  ;;  %345 = vmatpush3.bf16.msra.mxu1 %v367_v8 }
  0x10   :  { %326 = vmatprep.subr.bf16.mxu0 %v376_v0  ;;  %346 = vmatprep.subr.bf16.mxu1 %v376_v0 }
  0x13   :  { %327 = vmatpush3.bf16.msra.mxu0 %v368_v9  ;;  %347 = vmatpush3.bf16.msra.mxu1 %v369_v10 }
  0x14   :  { %328 = vmatprep.subr.bf16.mxu0 %v376_v0  ;;  %348 = vmatprep.subr.bf16.mxu1 %v376_v0 }
  0x17   :  { %329 = vmatpush3.bf16.msra.mxu0 %v370_v11  ;;  %349 = vmatpush3.bf16.msra.mxu1 %v371_v12 }
  0x18   :  { %330 = vmatprep.subr.bf16.mxu0 %v376_v0  ;;  %350 = vmatprep.subr.bf16.mxu1 %v376_v0 }
  0x1b   :  { %331 = vmatpush3.bf16.msra.mxu0 %v372_v13  ;;  %351 = vmatpush3.bf16.msra.mxu1 %v373_v14 }
  0x1c   :  { %332 = vmatprep.subr.bf16.mxu0 %v376_v0  ;;  %352 = vmatprep.subr.bf16.mxu1 %v376_v0 }
  0x1f   :  { %333 = vmatpush3.bf16.msra.mxu0 %v374_v15  ;;  %353 = vmatpush3.bf16.msra.mxu1 %v375_v16 }
  0x22   :  { %335 = vmatmul.mubr.bf16.vlgmr.msra.gmra.mxu0 %v30_v17  ;;  %355 = vmatmul.mubr.bf16.vlgmr.msra.gmra.mxu1 %v151_v18 }
  0xe2   :  { %v129_v21 = vpop.f32.mrf.mxu0  ;;  %v250_v24 = vpop.f32.mrf.mxu1 }
  0xe3   :  { %v142_v23 = vmul.f32 %v288_v19, %v129_v21  ;;  %v263_v26 = vmul.f32 %v298_v20, %v250_v24 }
  0xe4   :  { %v336_v27 = vpop.f32.mrf.mxu0  ;;  %v356_v29 = vpop.f32.mrf.mxu1 }
  0xe5   :  { %v150_v28 = vadd.f32 %v289_v22, %v142_v23  ;;  %v271_v30 = vadd.f32 %v299_v25, %v263_v26 }
  0xe6   :  { %v132_v31 = vpop.f32.mrf.mxu0  ;;  %v253_v32 = vpop.f32.mrf.mxu1 }
  0xe7   :  { %v272_v33 = vadd.f32 %v271_v30, %v150_v28 }
  0xe8   :  { %v337_v34 = vpop.f32.mrf.mxu0  ;;  %v357_v35 = vpop.f32.mrf.mxu1 }
  0xe9   :  { %v273_v36 = vmax.f32 %v272_v33, 0.0 }
  0xeb   :  { %v274_v37 = vpack.c.bf16 %v273_v36, %v273_v36 }
  0xed   :  { %275 = vst [vmem:[%s500_s8] sm:$0xf] %v274_v37 }

// kernel: _lambda_.39
= control target key start
LH: loop header
LB: loop body
LE: loop exit
PB: predicated region body
PF: predicated region fallthrough
CT: control target
= control target key end

     0   :  { %s690_s15 = smov 0   ;;  %s692_s16 = smov 0   ;;  %s742_s0 = inlined_call_operand.vmem [shape: bf16[8,640], index: 0, kind: input, shape index: {}]   ;;  %s743_s1 = inlined_call_operand.vmem [shape: bf16[640,128], index: 1, kind: input, shape index: {}]   ;;  %s744_s2 = inlined_call_operand.vmem [shape: f32[1,128], index: 2, kind: input, shape index: {}]   ;;  %s745_s3 = inlined_call_operand.vmem [shape: f32[1,128], index: 3, kind: input, shape index: {}]   ;;  %s746_s4 = inlined_call_operand.vmem [shape: bf16[8,128], index: 4, kind: output, shape index: {}]  }
   0x1   :  { %s694_s17 = smov 0  }
   0x2 LB: > { %s26_s18 = sadd.s32 1, %s656_s16  ;;  %p555_p0 = scmp.ge.s32.totalorder %s660_s17, 1  ;;  %s660_s17 = sphi %s694_s17, %s14_s17   ;;  %s656_s16 = sphi %s692_s16, %s748_s16   ;;  %s652_s15 = sphi %s690_s15, %s747_s15  }
   0x3   : > { %p27_p1 = scmp.ge.s32.totalorder %s26_s18, 5  ;;  %p220_p2 = scmp.lt.s32.totalorder %s660_s17, 6 }
   0x5   : > { %s750_s18 = smov (%p27_p1, %s26_s18), 0  ;;  %p221_p3 = pnand %p555_p0, %p220_p2 }
   0x6   : > { %p267_p4 = scmp.lt.s32.totalorder (!%p221_p3), %s652_s15, 4  ;;  %s557_s19 = sshll.u32 (!%p221_p3), %s652_s15, 4 }
   0x7   : > { %224 = sbr.rel (%p221_p3) target bundleno = 265 (0x109), region = 36  ;;  %p274_p5 = scmp.lt.s32.totalorder (!%p221_p3), %s557_s19, 79 }
   0x8   : > { %p559_p6 = scmp.ne.s32.totalorder (!%p221_p3), %s652_s15, 0 }
   0xc   : > { %s268_s20 = scalar_select %p267_p4, %s652_s15, 4 }
   0xd   : > { %s752_s19 = smov (!%p274_p5, %s557_s19), 79  ;;  %299 = sbr.rel (%p559_p6) target bundleno = 20 (0x14), region = 40 }
   0xe   : > { %s556_s21 = sshll.u32 %s268_s20, 2  ;;  %s558_s25 = sshll.u32 %s752_s19, 2 }
   0xf   : > { %s716_s24 = scalar_lea.vmem %s742_s0, %s556_s21  ;;  %s280_s28 = scalar_lea.vmem %s743_s1, %s558_s25 }
  0x12   : > { %v662_v0 = vmov 0.0  }
  0x13   : > { %300 = vst [vmem:[#allocation2] sm:$0xff] %v662_v0 }
  0x14 PF: > { %v630_v1 = vld [vmem:[%s280_s28 + $0x38] sm:$0xff]   ;;  %v663_v2 = vmov 0.0   ;;  %v631_v3 = vld [vmem:[%s280_s28 + $0x30] sm:$0xff]   ;;  %vm664_vm0 = vmmov 0   ;;  %v632_v4 = vld [vmem:[%s280_s28 + $0x28] sm:$0xff]   ;;  %p568_p7 = scmp.ne.s32.totalorder %s652_s15, 4 }
  0x15   : > { %583 = vmatprep.subr.bf16.mxu0 %v663_v2  ;;  %599 = vmatprep.mubr.msk.bf16.mxu0 %vm664_vm0, %v663_v2  ;;  %v633_v5 = vld [vmem:[%s280_s28 + $0x20] sm:$0xff]   ;;  %v634_v6 = vld [vmem:[%s280_s28 + $0x18] sm:$0xff]   ;;  %v635_v7 = vld [vmem:[%s280_s28 + $0x10] sm:$0xff]  }
  0x16   : > { %584 = vmatpush3.bf16.msra.mxu0 %v630_v1  ;;  %v636_v8 = vld [vmem:[%s280_s28 + $0x8] sm:$0xff]   ;;  %v637_v9 = vld [vmem:[%s280_s28] sm:$0xff]  }
  0x17   : > { %585 = vmatprep.subr.bf16.mxu0 %v663_v2  ;;  %v302_v10 = vld [vmem:[%s716_s24] sm:$0xf] }
  0x1a   : > { %586 = vmatpush3.bf16.msra.mxu0 %v631_v3  ;;  %v301_v11 = vld [vmem:[#allocation2] sm:$0xff] }
  0x1b   : > { %587 = vmatprep.subr.bf16.mxu0 %v663_v2 }
  0x1e   : > { %588 = vmatpush3.bf16.msra.mxu0 %v632_v4 }
  0x1f   : > { %589 = vmatprep.subr.bf16.mxu0 %v663_v2 }
  0x22   : > { %590 = vmatpush3.bf16.msra.mxu0 %v633_v5 }
  0x23   : > { %591 = vmatprep.subr.bf16.mxu0 %v663_v2 }
  0x26   : > { %592 = vmatpush3.bf16.msra.mxu0 %v634_v6 }
  0x27   : > { %593 = vmatprep.subr.bf16.mxu0 %v663_v2 }
  0x2a   : > { %594 = vmatpush3.bf16.msra.mxu0 %v635_v7 }
  0x2b   : > { %595 = vmatprep.subr.bf16.mxu0 %v663_v2 }
  0x2e   : > { %596 = vmatpush3.bf16.msra.mxu0 %v636_v8 }
  0x2f   : > { %597 = vmatprep.subr.bf16.mxu0 %v663_v2 }
  0x32   : > { %598 = vmatpush3.bf16.msra.mxu0 %v637_v9 }
  0x35   : > { %600 = vmatmul.mubr.bf16.vlgmr.msra.gmra.mxu0 %v302_v10 }
  0xf5   : > { %v401_v12 = vpop.f32.mrf.mxu0 }
  0xf6   : > { %v407_v13 = vadd.f32 %v401_v12, %v301_v11 }
  0xf7   : > { %v601_v14 = vpop.f32.mrf.mxu0  ;;  %412 = sbr.rel (%p568_p7) target bundleno = 265 (0x109), region = 44 }
  0xf8   : > { %408 = vst [vmem:[#allocation2] sm:$0xff] %v407_v13 }
  0xf9   : > { %v404_v15 = vpop.f32.mrf.mxu0 }
  0xfb   : > { %v602_v16 = vpop.f32.mrf.mxu0 }
  0xfc   : > { %v569_v18 = vld [vmem:[%s744_s2] ss:$0 sm:$0xff] }
  0xfd   : > { %v570_v19 = vld [vmem:[%s745_s3] ss:$0 sm:$0xff] }
  0xff   : > { %v413_v17 = vld [vmem:[#allocation2] sm:$0xff] }
 0x100   : > { %v421_v20 = vmul.f32 %v569_v18, %v413_v17 }
 0x102   : > { %v429_v21 = vadd.f32 %v570_v19, %v421_v20 }
 0x104   : > { %v430_v22 = vmax.f32 %v429_v21, 0.0 }
 0x106   : > { %v431_v23 = vpack.c.bf16 %v430_v22, %v430_v22 }
 0x108   : > { %432 = vst [vmem:[%s746_s4] sm:$0xf] %v431_v23 }
 0x109 PF: > { %s14_s17 = sadd.s32 1, %s660_s17   ;;  %s747_s15 = smov %s656_s16 }
 0x10a   : > { %p11_p8 = scmp.ge.s32.totalorder %s14_s17, 7   ;;  %s748_s16 = smov %s750_s18 }
 0x10c   :  { %13 = sbr.rel (!%p11_p8) target bundleno = 2 (0x2), region = 83 }

// kernel: _lambda_.40
= control target key start
LH: loop header
LB: loop body
LE: loop exit
PB: predicated region body
PF: predicated region fallthrough
CT: control target
= control target key end

     0   :  { %vm43_vm0 = vcmask 1040384   ;;  %vm44_vm1 = vsmask.f32 256  ;;  %s176_s0 = inlined_call_operand.vmem [shape: bf16[2,2,1,256], index: 0, kind: input, shape index: {}]   ;;  %s177_s1 = inlined_call_operand.vmem [shape: bf16[2,2,1,256], index: 1, kind: input, shape index: {}]   ;;  %s178_s2 = inlined_call_operand.vmem [shape: bf16[2,1,128], index: 2, kind: output, shape index: {0}]   ;;  %s179_s3 = inlined_call_operand.vmem [shape: bf16[2,1,128], index: 3, kind: output, shape index: {1}]  }
   0x1   :  { %v13_v0 = vld [vmem:[%s176_s0] sm:$0x3]  ;;  %v14_v1 = vld [vmem:[%s176_s0 + $0x2] sm:$0x3]  ;;  %v15_v4 = vld [vmem:[%s176_s0 + $0x4] sm:$0x3] }
   0x2   :  { %v17_v2 = vunpack.c.l.bf16 %v13_v0  ;;  %v19_v3 = vunpack.c.l.bf16 %v14_v1  ;;  %v16_v5 = vld [vmem:[%s176_s0 + $0x6] sm:$0x3]  ;;  %v18_v6 = vunpack.c.l.bf16 %v15_v4  ;;  %v52_v8 = vld [vmem:[%s177_s1] sm:$0x3]  ;;  %v53_v9 = vld [vmem:[%s177_s1 + $0x2] sm:$0x3] }
   0x3   :  { %v20_v7 = vunpack.c.l.bf16 %v16_v5  ;;  %v56_v11 = vunpack.c.l.bf16 %v52_v8  ;;  %v58_v12 = vunpack.c.l.bf16 %v53_v9  ;;  %v54_v13 = vld [vmem:[%s177_s1 + $0x4] sm:$0x3]  ;;  %v55_v15 = vld [vmem:[%s177_s1 + $0x6] sm:$0x3]  ;;  %vm140_vm2 = vmand %vm43_vm0, %vm44_vm1 }
   0x4   :  { %v23_v10 = vrot.slane %v17_v2, 2  ;;  %v24_v14 = vrot.slane %v18_v6, 2  ;;  %v57_v16 = vunpack.c.l.bf16 %v54_v13  ;;  %v33_v18 = vrot.slane %v19_v3, 2  ;;  %v46_v37 = vld [vmem:[%s178_s2] sm:$0x1] }
   0x5   :  { %v62_v19 = vrot.slane %v56_v11, 2  ;;  %v59_v20 = vunpack.c.l.bf16 %v55_v15  ;;  %v34_v22 = vrot.slane %v20_v7, 2  ;;  %v72_v26 = vrot.slane %v58_v12, 2  ;;  %v49_v41 = vld [vmem:[%s178_s2 + $0x1] sm:$0x1] }
   0x6   :  { %v27_v17 = vadd.f32 %v23_v10, %v17_v2  ;;  %v28_v21 = vadd.f32 %v24_v14, %v18_v6  ;;  %v63_v23 = vrot.slane %v57_v16, 2  ;;  %v82_v44 = vld [vmem:[%s179_s3] sm:$0x1]  ;;  %v85_v48 = vld [vmem:[%s179_s3 + $0x1] sm:$0x1] }
   0x7   :  { %v66_v25 = vadd.f32 %v62_v19, %v56_v11  ;;  %v73_v29 = vrot.slane %v59_v20, 2 }
   0x8   :  { %v29_v24 = vadd.f32 %v27_v17, %v19_v3  ;;  %v30_v27 = vadd.f32 %v28_v21, %v20_v7  ;;  %v67_v28 = vadd.f32 %v63_v23, %v57_v16 }
   0x9   :  { %v68_v31 = vadd.f32 %v66_v25, %v58_v12 }
   0xa   :  { %v37_v30 = vadd.f32 %v33_v18, %v29_v24  ;;  %v38_v32 = vadd.f32 %v34_v22, %v30_v27  ;;  %v69_v33 = vadd.f32 %v67_v28, %v59_v20 }
   0xb   :  { %v76_v35 = vadd.f32 %v72_v26, %v68_v31 }
   0xc   :  { %v39_v34 = vmul.f32 0.25, %v37_v30  ;;  %v40_v38 = vmul.f32 0.25, %v38_v32  ;;  %v77_v39 = vadd.f32 %v73_v29, %v69_v33 }
   0xd   :  { %v78_v42 = vmul.f32 0.25, %v76_v35 }
   0xe   :  { %v41_v40 = vpack.c.bf16 %v39_v34, %v39_v34  ;;  %v42_v43 = vpack.c.bf16 %v40_v38, %v40_v38  ;;  %v79_v45 = vmul.f32 0.25, %v77_v39 }
   0xf   :  { %v80_v47 = vpack.c.bf16 %v78_v42, %v78_v42 }
  0x10   :  { %v47_v46 = vsel %vm140_vm2, %v41_v40, %v46_v37  ;;  %v50_v49 = vsel %vm140_vm2, %v42_v43, %v49_v41  ;;  %v81_v50 = vpack.c.bf16 %v79_v45, %v79_v45 }
  0x11   :  { %48 = vst [vmem:[%s178_s2] sm:$0x1] %v47_v46  ;;  %51 = vst [vmem:[%s178_s2 + $0x1] sm:$0x1] %v50_v49  ;;  %v83_v51 = vsel %vm140_vm2, %v80_v47, %v82_v44 }
  0x12   :  { %84 = vst [vmem:[%s179_s3] sm:$0x1] %v83_v51  ;;  %v86_v52 = vsel %vm140_vm2, %v81_v50, %v85_v48 }
  0x13   :  { %87 = vst [vmem:[%s179_s3 + $0x1] sm:$0x1] %v86_v52 }

// kernel: _lambda_.41
= control target key start
LH: loop header
LB: loop body
LE: loop exit
PB: predicated region body
PF: predicated region fallthrough
CT: control target
= control target key end

     0   :  { %v475_v1 = vmov 0   ;;  %v170_v35 = vlaneseq  ;;  %v476_v55 = vmov 1966171168   ;;  %s639_s1 = inlined_call_operand.vmem [shape: bf16[128,256], index: 1, kind: input, shape index: {}]   ;;  %s640_s5 = inlined_call_operand.vmem [shape: bf16[128,256], index: 5, kind: input, shape index: {}]   ;;  %s641_s0 = inlined_call_operand.vmem [shape: bf16[2,128], index: 0, kind: input, shape index: {}]   ;;  %s642_s4 = inlined_call_operand.vmem [shape: bf16[2,128], index: 4, kind: input, shape index: {}]   ;;  %s643_s2 = inlined_call_operand.vmem [shape: f32[1,256], index: 2, kind: input, shape index: {}]   ;;  %s644_s6 = inlined_call_operand.vmem [shape: f32[1,256], index: 6, kind: input, shape index: {}]   ;;  %s645_s3 = inlined_call_operand.vmem [shape: f32[1,256], index: 3, kind: input, shape index: {}]   ;;  %s646_s7 = inlined_call_operand.vmem [shape: f32[1,256], index: 7, kind: input, shape index: {}]   ;;  %s647_s8 = inlined_call_operand.vmem [shape: bf16[2,256], index: 8, kind: output, shape index: {}]  }
   0x1   :  { %v427_v0 = vld [vmem:[%s639_s1 + $0x74] ss:$8 sps:$4 sm:$0xff]   ;;  %159 = vmatprep.mubr.bf16.mxu0 %v475_v1  ;;  %325 = vmatprep.mubr.bf16.mxu1 %v475_v1  ;;  %v431_v3 = vld [vmem:[%s639_s1 + $0x70] ss:$8 sps:$4 sm:$0xff]   ;;  %v433_v5 = vld [vmem:[%s639_s1 + $0x64] ss:$8 sps:$4 sm:$0xff]   ;;  %v372_v56 = vunpack.c.l.s4 %v476_v55 }
   0x2   :  { %v429_v2 = vld [vmem:[%s640_s5 + $0x74] ss:$8 sps:$4 sm:$0xff]   ;;  %127 = vmatprep.subr.bf16.mxu0 %v427_v0  ;;  %v432_v4 = vld [vmem:[%s640_s5 + $0x70] ss:$8 sps:$4 sm:$0xff]   ;;  %v435_v6 = vld [vmem:[%s640_s5 + $0x64] ss:$8 sps:$4 sm:$0xff]  }
   0x3   :  { %293 = vmatprep.subr.bf16.mxu1 %v429_v2  ;;  %128 = vmatpush1.bf16.msra.mxu0 %v431_v3  ;;  %v437_v7 = vld [vmem:[%s639_s1 + $0x60] ss:$8 sps:$4 sm:$0xff]   ;;  %v439_v9 = vld [vmem:[%s639_s1 + $0x54] ss:$8 sps:$4 sm:$0xff]   ;;  %v443_v11 = vld [vmem:[%s639_s1 + $0x50] ss:$8 sps:$4 sm:$0xff]  }
   0x4   :  { %294 = vmatpush1.bf16.msra.mxu1 %v432_v4  ;;  %129 = vmatprep.subr.bf16.mxu0 %v433_v5  ;;  %v438_v8 = vld [vmem:[%s640_s5 + $0x60] ss:$8 sps:$4 sm:$0xff]   ;;  %v441_v10 = vld [vmem:[%s640_s5 + $0x54] ss:$8 sps:$4 sm:$0xff]   ;;  %v444_v12 = vld [vmem:[%s640_s5 + $0x50] ss:$8 sps:$4 sm:$0xff]   ;;  %v373_v4 = vunpack.c.0.s8 %v372_v56 }
   0x5   :  { %295 = vmatprep.subr.bf16.mxu1 %v435_v6  ;;  %v445_v13 = vld [vmem:[%s639_s1 + $0x44] ss:$8 sps:$4 sm:$0xff]   ;;  %v449_v15 = vld [vmem:[%s639_s1 + $0x40] ss:$8 sps:$4 sm:$0xff]   ;;  %v451_v17 = vld [vmem:[%s639_s1 + $0x34] ss:$8 sps:$4 sm:$0xff]  }
   0x6   :  { %v447_v14 = vld [vmem:[%s640_s5 + $0x44] ss:$8 sps:$4 sm:$0xff]   ;;  %v450_v16 = vld [vmem:[%s640_s5 + $0x40] ss:$8 sps:$4 sm:$0xff]   ;;  %v453_v18 = vld [vmem:[%s640_s5 + $0x34] ss:$8 sps:$4 sm:$0xff]  }
   0x7   :  { %130 = vmatpush1.bf16.msra.mxu0 %v437_v7  ;;  %v455_v19 = vld [vmem:[%s639_s1 + $0x30] ss:$8 sps:$4 sm:$0xff]   ;;  %v457_v21 = vld [vmem:[%s639_s1 + $0x24] ss:$8 sps:$4 sm:$0xff]   ;;  %v461_v23 = vld [vmem:[%s639_s1 + $0x20] ss:$8 sps:$4 sm:$0xff]  }
   0x8   :  { %296 = vmatpush1.bf16.msra.mxu1 %v438_v8  ;;  %131 = vmatprep.subr.bf16.mxu0 %v439_v9  ;;  %v456_v20 = vld [vmem:[%s640_s5 + $0x30] ss:$8 sps:$4 sm:$0xff]   ;;  %v459_v22 = vld [vmem:[%s640_s5 + $0x24] ss:$8 sps:$4 sm:$0xff]   ;;  %v462_v24 = vld [vmem:[%s640_s5 + $0x20] ss:$8 sps:$4 sm:$0xff]  }
   0x9   :  { %297 = vmatprep.subr.bf16.mxu1 %v441_v10  ;;  %v463_v25 = vld [vmem:[%s639_s1 + $0x14] ss:$8 sps:$4 sm:$0xff]   ;;  %v467_v27 = vld [vmem:[%s639_s1 + $0x10] ss:$8 sps:$4 sm:$0xff]   ;;  %v469_v29 = vld [vmem:[%s639_s1 + $0x4] ss:$8 sps:$4 sm:$0xff]  }
   0xa   :  { %v465_v26 = vld [vmem:[%s640_s5 + $0x14] ss:$8 sps:$4 sm:$0xff]   ;;  %v468_v28 = vld [vmem:[%s640_s5 + $0x10] ss:$8 sps:$4 sm:$0xff]   ;;  %v471_v30 = vld [vmem:[%s640_s5 + $0x4] ss:$8 sps:$4 sm:$0xff]  }
   0xb   :  { %132 = vmatpush1.bf16.msra.mxu0 %v443_v11  ;;  %v473_v31 = vld [vmem:[%s639_s1] ss:$8 sps:$4 sm:$0xff]   ;;  %v171_v36 = vshrl.u32 %v170_v35, 7 }
   0xc   :  { %298 = vmatpush1.bf16.msra.mxu1 %v444_v12  ;;  %133 = vmatprep.subr.bf16.mxu0 %v445_v13  ;;  %v474_v32 = vld [vmem:[%s640_s5] ss:$8 sps:$4 sm:$0xff]  }
   0xd   :  { %299 = vmatprep.subr.bf16.mxu1 %v447_v14  ;;  %v30_v33 = vld [vmem:[%s641_s0] sm:$0x1]  ;;  %v172_v37 = vsub.s32 0, %v171_v36  ;;  %v176_v40 = vsub.s32 1, %v171_v36  ;;  %v376_v10 = vsub.s32 %v373_v4, %v171_v36 }
   0xe   :  { %v196_v34 = vld [vmem:[%s642_s4] sm:$0x1] }
   0xf   :  { %134 = vmatpush1.bf16.msra.mxu0 %v449_v15  ;;  %v168_v38 = vld [vmem:[%s643_s2] sm:$0x3] }
  0x10   :  { %300 = vmatpush1.bf16.msra.mxu1 %v450_v16  ;;  %135 = vmatprep.subr.bf16.mxu0 %v451_v17  ;;  %v334_v39 = vld [vmem:[%s644_s6] sm:$0x3]  ;;  %v173_v43 = vrot.slane %v168_v38, %v172_v37  ;;  %v177_v47 = vrot.slane %v168_v38, %v176_v40 }
  0x11   :  { %301 = vmatprep.subr.bf16.mxu1 %v453_v18  ;;  %v182_v41 = vld [vmem:[%s645_s3] sm:$0x3]  ;;  %v339_v44 = vrot.slane %v334_v39, %v172_v37  ;;  %v343_v48 = vrot.slane %v334_v39, %v176_v40 }
  0x12   :  { %v348_v42 = vld [vmem:[%s646_s7] sm:$0x3]  ;;  %v187_v45 = vrot.slane %v182_v41, %v172_v37  ;;  %v191_v51 = vrot.slane %v182_v41, %v176_v40 }
  0x13   :  { %136 = vmatpush1.bf16.msra.mxu0 %v455_v19  ;;  %v353_v46 = vrot.slane %v348_v42, %v172_v37  ;;  %v357_v54 = vrot.slane %v348_v42, %v176_v40 }
  0x14   :  { %302 = vmatpush1.bf16.msra.mxu1 %v456_v20  ;;  %137 = vmatprep.subr.bf16.mxu0 %v457_v21 }
  0x15   :  { %303 = vmatprep.subr.bf16.mxu1 %v459_v22 }
  0x17   :  { %138 = vmatpush1.bf16.msra.mxu0 %v461_v23 }
  0x18   :  { %304 = vmatpush1.bf16.msra.mxu1 %v462_v24  ;;  %139 = vmatprep.subr.bf16.mxu0 %v463_v25 }
  0x19   :  { %305 = vmatprep.subr.bf16.mxu1 %v465_v26 }
  0x1b   :  { %140 = vmatpush1.bf16.msra.mxu0 %v467_v27 }
  0x1c   :  { %306 = vmatpush1.bf16.msra.mxu1 %v468_v28  ;;  %141 = vmatprep.subr.bf16.mxu0 %v469_v29 }
  0x1d   :  { %307 = vmatprep.subr.bf16.mxu1 %v471_v30 }
  0x1f   :  { %142 = vmatpush1.bf16.msra.mxu0 %v473_v31 }
  0x20   :  { %308 = vmatpush1.bf16.msra.mxu1 %v474_v32 }
  0x22   :  { %160 = vmatmul.mubr.bf16.vlgmr.msra.gmra.mxu0 %v30_v33 }
  0x23   :  { %326 = vmatmul.mubr.bf16.vlgmr.msra.gmra.mxu1 %v196_v34 }
  0xe2   :  { %v161_v49 = vpop.f32.mrf.mxu0 }
  0xe3   :  { %v327_v50 = vpop.f32.mrf.mxu1  ;;  %v180_v52 = vmul.f32 %v173_v43, %v161_v49 }
  0xe4   :  { %v346_v53 = vmul.f32 %v339_v44, %v327_v50  ;;  %v163_v57 = vpop.f32.mrf.mxu0 }
  0xe5   :  { %v329_v58 = vpop.f32.mrf.mxu1  ;;  %v194_v59 = vadd.f32 %v187_v45, %v180_v52  ;;  %v181_v61 = vmul.f32 %v177_v47, %v163_v57 }
  0xe6   :  { %v360_v60 = vadd.f32 %v353_v46, %v346_v53  ;;  %v347_v62 = vmul.f32 %v343_v48, %v329_v58  ;;  %v165_v63 = vpop.f32.mrf.mxu0 }
  0xe7   :  { %v331_v0 = vpop.f32.mrf.mxu1  ;;  %v195_v2 = vadd.f32 %v191_v51, %v181_v61 }
  0xe8   :  { %v362_v1 = vadd.f32 %v360_v60, %v194_v59  ;;  %v361_v3 = vadd.f32 %v357_v54, %v347_v62  ;;  %v166_v5 = vpop.f32.mrf.mxu0 }
  0xe9   :  { %v332_v6 = vpop.f32.mrf.mxu1 }
  0xea   :  { %v363_v7 = vadd.f32 %v361_v3, %v195_v2  ;;  %v364_v8 = vmax.f32 %v362_v1, 0.0 }
  0xec   :  { %v365_v9 = vmax.f32 %v363_v7, 0.0 }
  0xee   :  { %v423_v11 = vpack.c.bf16 %v365_v9, %v364_v8 }
  0xf0   :  { %v377_v12 = vrot.slane %v423_v11, %v376_v10 }
  0xf2   :  { %424 = vst.sshfl [vmem:[%s647_s8] sm:$0x5 pattern:$0x73625140] %v377_v12 }

// kernel: _lambda_.43
= control target key start
LH: loop header
LB: loop body
LE: loop exit
PB: predicated region body
PF: predicated region fallthrough
CT: control target
= control target key end

     0   :  { %s1110_s15 = smov 0   ;;  %s1112_s16 = smov 0   ;;  %s1291_s0 = inlined_call_operand.vmem [shape: bf16[4,256], index: 0, kind: input, shape index: {}]   ;;  %s1292_s1 = inlined_call_operand.vmem [shape: bf16[256,512], index: 1, kind: input, shape index: {}]   ;;  %s1293_s2 = inlined_call_operand.vmem [shape: f32[1,512], index: 2, kind: input, shape index: {}]   ;;  %s1294_s3 = inlined_call_operand.vmem [shape: f32[1,512], index: 3, kind: input, shape index: {}]   ;;  %s1295_s4 = inlined_call_operand.vmem [shape: bf16[4,512], index: 4, kind: output, shape index: {}]  }
   0x1   :  { %s1114_s17 = smov 0   ;;  %s1116_s18 = smov 0  }
   0x2   :  { %s1118_s19 = smov 0  }
   0x3 LB: > { %s29_s20 = sadd.s32 1, %s1079_s18  ;;  %p77_p1 = scmp.ne.s32.totalorder %s1071_s16, %s1067_s15  ;;  %s1083_s19 = sphi %s1118_s19, %s14_s19   ;;  %s1079_s18 = sphi %s1116_s18, %s1299_s18   ;;  %s1075_s17 = sphi %s1114_s17, %s1298_s17   ;;  %s1071_s16 = sphi %s1112_s16, %s1297_s16   ;;  %s1067_s15 = sphi %s1110_s15, %s1296_s15  }
   0x4   : > { %p31_p0 = scmp.ge.s32.totalorder %s29_s20, 2  ;;  %p78_p2 = scmp.eq.s32.totalorder %s1083_s19, 0 }
   0x5   : > { %s70_s22 = sadd.s32 1, %s1071_s16  ;;  %p909_p5 = scmp.ge.s32.totalorder %s1083_s19, 2 }
   0x6   : > { %s1301_s20 = smov (%p31_p0, %s29_s20), 0  ;;  %p79_p3 = por %p78_p2, %p77_p1 }
   0x7   : > { %s66_s21 = ssub.s32 %s1079_s18, %s1301_s20  ;;  %196 = sbr.rel (%p909_p5) target bundleno = 32 (0x20), region = 20 }
   0x8   : > { %p68_p4 = scmp.eq.s32.totalorder %s66_s21, 0 }
   0xa   : > { %s1145_s23 = scalar_select %p68_p4, %s1071_s16, %s70_s22  }
   0xc   : > { %199 = sbr.rel (!%p79_p3) target bundleno = 32 (0x20), region = 24  ;;  %s201_s24 = sand.u32 (%p79_p3), 1, %s1071_s16  }
   0xd   : > { %s956_s25 = sshll.u32 (%p79_p3), %s1079_s18, 3  ;;  %s910_s26 = sshll.u32 (%p79_p3), %s201_s24, 8 }
   0xe   : > { %s1153_s29 = scalar_lea.vmem (%p79_p3), %s1292_s1, %s956_s25  ;;  %s1158_s30 = scalar_lea.vmem (%p79_p3), [#allocation3], %s910_s26 }
   0xf   : > { %v300_v0 = vld [vmem:[%s1153_s29] sm:$0xff] (%p79_p3)  ;;  %v302_v1 = vld [vmem:[%s1153_s29 + $0x10] sm:$0xff] (%p79_p3) }
  0x10   : > { %v304_v2 = vld [vmem:[%s1153_s29 + $0x20] sm:$0xff] (%p79_p3)  ;;  %301 = vst [vmem:[%s1158_s30] sm:$0xff] (%p79_p3), %v300_v0  ;;  %303 = vst [vmem:[%s1158_s30 + $0x8] sm:$0xff] (%p79_p3), %v302_v1  ;;  %v306_v3 = vld [vmem:[%s1153_s29 + $0x30] sm:$0xff] (%p79_p3) }
  0x11   : > { %305 = vst [vmem:[%s1158_s30 + $0x10] sm:$0xff] %v304_v2  ;;  %v308_v4 = vld [vmem:[%s1153_s29 + $0x40] sm:$0xff]  ;;  %v310_v5 = vld [vmem:[%s1153_s29 + $0x50] sm:$0xff]  ;;  %307 = vst [vmem:[%s1158_s30 + $0x18] sm:$0xff] %v306_v3 }
  0x12   : > { %309 = vst [vmem:[%s1158_s30 + $0x20] sm:$0xff] %v308_v4  ;;  %311 = vst [vmem:[%s1158_s30 + $0x28] sm:$0xff] %v310_v5  ;;  %v312_v6 = vld [vmem:[%s1153_s29 + $0x60] sm:$0xff]  ;;  %v314_v7 = vld [vmem:[%s1153_s29 + $0x70] sm:$0xff] }
  0x13   : > { %v316_v8 = vld [vmem:[%s1153_s29 + $0x80] sm:$0xff]  ;;  %313 = vst [vmem:[%s1158_s30 + $0x30] sm:$0xff] %v312_v6  ;;  %315 = vst [vmem:[%s1158_s30 + $0x38] sm:$0xff] %v314_v7  ;;  %v318_v9 = vld [vmem:[%s1153_s29 + $0x90] sm:$0xff] }
  0x14   : > { %317 = vst [vmem:[%s1158_s30 + $0x40] sm:$0xff] %v316_v8  ;;  %v320_v10 = vld [vmem:[%s1153_s29 + $0xa0] sm:$0xff]  ;;  %v322_v11 = vld [vmem:[%s1153_s29 + $0xb0] sm:$0xff]  ;;  %319 = vst [vmem:[%s1158_s30 + $0x48] sm:$0xff] %v318_v9 }
  0x15   : > { %321 = vst [vmem:[%s1158_s30 + $0x50] sm:$0xff] %v320_v10  ;;  %323 = vst [vmem:[%s1158_s30 + $0x58] sm:$0xff] %v322_v11  ;;  %v324_v12 = vld [vmem:[%s1153_s29 + $0xc0] sm:$0xff]  ;;  %v326_v13 = vld [vmem:[%s1153_s29 + $0xd0] sm:$0xff] }
  0x16   : > { %v328_v14 = vld [vmem:[%s1153_s29 + $0xe0] sm:$0xff]  ;;  %325 = vst [vmem:[%s1158_s30 + $0x60] sm:$0xff] %v324_v12  ;;  %327 = vst [vmem:[%s1158_s30 + $0x68] sm:$0xff] %v326_v13  ;;  %v330_v15 = vld [vmem:[%s1153_s29 + $0xf0] sm:$0xff] }
  0x17   : > { %329 = vst [vmem:[%s1158_s30 + $0x70] sm:$0xff] %v328_v14  ;;  %v332_v16 = vld [vmem:[%s1153_s29 + $0x100] sm:$0xff]  ;;  %v334_v17 = vld [vmem:[%s1153_s29 + $0x110] sm:$0xff]  ;;  %331 = vst [vmem:[%s1158_s30 + $0x78] sm:$0xff] %v330_v15 }
  0x18   : > { %333 = vst [vmem:[%s1158_s30 + $0x80] sm:$0xff] %v332_v16  ;;  %335 = vst [vmem:[%s1158_s30 + $0x88] sm:$0xff] %v334_v17  ;;  %v336_v18 = vld [vmem:[%s1153_s29 + $0x120] sm:$0xff]  ;;  %v338_v19 = vld [vmem:[%s1153_s29 + $0x130] sm:$0xff] }
  0x19   : > { %v340_v20 = vld [vmem:[%s1153_s29 + $0x140] sm:$0xff]  ;;  %337 = vst [vmem:[%s1158_s30 + $0x90] sm:$0xff] %v336_v18  ;;  %339 = vst [vmem:[%s1158_s30 + $0x98] sm:$0xff] %v338_v19  ;;  %v342_v21 = vld [vmem:[%s1153_s29 + $0x150] sm:$0xff] }
  0x1a   : > { %341 = vst [vmem:[%s1158_s30 + $0xa0] sm:$0xff] %v340_v20  ;;  %v344_v22 = vld [vmem:[%s1153_s29 + $0x160] sm:$0xff]  ;;  %v346_v23 = vld [vmem:[%s1153_s29 + $0x170] sm:$0xff]  ;;  %343 = vst [vmem:[%s1158_s30 + $0xa8] sm:$0xff] %v342_v21 }
  0x1b   : > { %345 = vst [vmem:[%s1158_s30 + $0xb0] sm:$0xff] %v344_v22  ;;  %347 = vst [vmem:[%s1158_s30 + $0xb8] sm:$0xff] %v346_v23  ;;  %v348_v24 = vld [vmem:[%s1153_s29 + $0x180] sm:$0xff]  ;;  %v350_v25 = vld [vmem:[%s1153_s29 + $0x190] sm:$0xff] }
  0x1c   : > { %v352_v26 = vld [vmem:[%s1153_s29 + $0x1a0] sm:$0xff]  ;;  %349 = vst [vmem:[%s1158_s30 + $0xc0] sm:$0xff] %v348_v24  ;;  %351 = vst [vmem:[%s1158_s30 + $0xc8] sm:$0xff] %v350_v25  ;;  %v354_v27 = vld [vmem:[%s1153_s29 + $0x1b0] sm:$0xff] }
  0x1d   : > { %353 = vst [vmem:[%s1158_s30 + $0xd0] sm:$0xff] %v352_v26  ;;  %v356_v28 = vld [vmem:[%s1153_s29 + $0x1c0] sm:$0xff]  ;;  %v358_v29 = vld [vmem:[%s1153_s29 + $0x1d0] sm:$0xff]  ;;  %355 = vst [vmem:[%s1158_s30 + $0xd8] sm:$0xff] %v354_v27 }
  0x1e   : > { %357 = vst [vmem:[%s1158_s30 + $0xe0] sm:$0xff] %v356_v28  ;;  %359 = vst [vmem:[%s1158_s30 + $0xe8] sm:$0xff] %v358_v29  ;;  %v360_v30 = vld [vmem:[%s1153_s29 + $0x1e0] sm:$0xff]  ;;  %v362_v31 = vld [vmem:[%s1153_s29 + $0x1f0] sm:$0xff] }
  0x1f   : > { %361 = vst [vmem:[%s1158_s30 + $0xf0] sm:$0xff] %v360_v30  ;;  %363 = vst [vmem:[%s1158_s30 + $0xf8] sm:$0xff] %v362_v31 }
  0x20 PF: > { %p913_p6 = scmp.ge.s32.totalorder %s1083_s19, 1  ;;  %p384_p7 = scmp.lt.s32.totalorder %s1083_s19, 3 }
  0x22   : > { %p385_p8 = pnand %p913_p6, %p384_p7 }
  0x23   : > { %s391_s5 = sand.u32 (!%p385_p8), 1, %s1067_s15   ;;  %s915_s10 = sshll.u32 (!%p385_p8), %s1075_s17, 1 }
  0x24   : > { %388 = sbr.rel (%p385_p8) target bundleno = 312 (0x138), region = 70  ;;  %s914_s8 = sshll.u32 (!%p385_p8), %s391_s5, 8 }
  0x25   : > { %s1231_s9 = scalar_lea.vmem (!%p385_p8), [#allocation3], %s914_s8  ;;  %p450_p9 = scmp.lt.s32.totalorder (!%p385_p8), %s915_s10, 3 }
  0x29   : > { %v1227_v32 = vld.sshfl [vmem:[%s1291_s0] sm:$0x33 pattern:$0x76325410]  ;;  %v997_v34 = vld [vmem:[%s1231_s9 + $0x74] ss:$8 sps:$4 sm:$0xff]   ;;  %v732_v2 = vlaneseq }
  0x2a   : > { %v516_v33 = vcombine.high %v1227_v32, %v1227_v32  ;;  %v999_v35 = vld [vmem:[%s1231_s9 + $0x70] ss:$8 sps:$4 sm:$0xff]   ;;  %679 = vmatprep.subr.bf16.mxu0 %v997_v34  ;;  %v1000_v36 = vld [vmem:[%s1231_s9 + $0x64] ss:$8 sps:$4 sm:$0xff]   ;;  %v1002_v37 = vld [vmem:[%s1231_s9 + $0x60] ss:$8 sps:$4 sm:$0xff]  }
  0x2b   : > { %680 = vmatpush1.bf16.msra.mxu0 %v999_v35  ;;  %v1003_v38 = vld [vmem:[%s1231_s9 + $0x54] ss:$8 sps:$4 sm:$0xff]   ;;  %v1005_v39 = vld [vmem:[%s1231_s9 + $0x50] ss:$8 sps:$4 sm:$0xff]   ;;  %v1006_v40 = vld [vmem:[%s1231_s9 + $0x44] ss:$8 sps:$4 sm:$0xff]  }
  0x2c   : > { %711 = vmatprep.mubr.bf16.mxu0 %v516_v33  ;;  %681 = vmatprep.subr.bf16.mxu0 %v1000_v36  ;;  %v1008_v41 = vld [vmem:[%s1231_s9 + $0x40] ss:$8 sps:$4 sm:$0xff]   ;;  %v1009_v42 = vld [vmem:[%s1231_s9 + $0x34] ss:$8 sps:$4 sm:$0xff]   ;;  %v1011_v43 = vld [vmem:[%s1231_s9 + $0x30] ss:$8 sps:$4 sm:$0xff]  }
  0x2d   : > { %v1012_v44 = vld [vmem:[%s1231_s9 + $0x24] ss:$8 sps:$4 sm:$0xff]   ;;  %v1014_v45 = vld [vmem:[%s1231_s9 + $0x20] ss:$8 sps:$4 sm:$0xff]   ;;  %v1015_v46 = vld [vmem:[%s1231_s9 + $0x14] ss:$8 sps:$4 sm:$0xff]  }
  0x2e   : > { %v1017_v47 = vld [vmem:[%s1231_s9 + $0x10] ss:$8 sps:$4 sm:$0xff]   ;;  %v1018_v48 = vld [vmem:[%s1231_s9 + $0x4] ss:$8 sps:$4 sm:$0xff]   ;;  %v1020_v49 = vld [vmem:[%s1231_s9] ss:$8 sps:$4 sm:$0xff]  }
  0x2f   : > { %682 = vmatpush1.bf16.msra.mxu0 %v1002_v37  ;;  %v1021_v50 = vld [vmem:[%s1231_s9 + $0xf4] ss:$8 sps:$4 sm:$0xff]   ;;  %v1023_v51 = vld [vmem:[%s1231_s9 + $0xf0] ss:$8 sps:$4 sm:$0xff]   ;;  %v1024_v52 = vld [vmem:[%s1231_s9 + $0xe4] ss:$8 sps:$4 sm:$0xff]  }
  0x30   : > { %683 = vmatprep.subr.bf16.mxu0 %v1003_v38  ;;  %v1026_v53 = vld [vmem:[%s1231_s9 + $0xe0] ss:$8 sps:$4 sm:$0xff]   ;;  %v1027_v54 = vld [vmem:[%s1231_s9 + $0xd4] ss:$8 sps:$4 sm:$0xff]   ;;  %v1029_v55 = vld [vmem:[%s1231_s9 + $0xd0] ss:$8 sps:$4 sm:$0xff]  }
  0x31   : > { %v1030_v56 = vld [vmem:[%s1231_s9 + $0xc4] ss:$8 sps:$4 sm:$0xff]   ;;  %v1032_v57 = vld [vmem:[%s1231_s9 + $0xc0] ss:$8 sps:$4 sm:$0xff]   ;;  %v1033_v58 = vld [vmem:[%s1231_s9 + $0xb4] ss:$8 sps:$4 sm:$0xff]  }
  0x32   : > { %v1035_v59 = vld [vmem:[%s1231_s9 + $0xb0] ss:$8 sps:$4 sm:$0xff]   ;;  %v1036_v60 = vld [vmem:[%s1231_s9 + $0xa4] ss:$8 sps:$4 sm:$0xff]   ;;  %v1038_v61 = vld [vmem:[%s1231_s9 + $0xa0] ss:$8 sps:$4 sm:$0xff]  }
  0x33   : > { %684 = vmatpush1.bf16.msra.mxu0 %v1005_v39  ;;  %v1039_v62 = vld [vmem:[%s1231_s9 + $0x94] ss:$8 sps:$4 sm:$0xff]   ;;  %v1041_v63 = vld [vmem:[%s1231_s9 + $0x90] ss:$8 sps:$4 sm:$0xff]   ;;  %v1042_v0 = vld [vmem:[%s1231_s9 + $0x84] ss:$8 sps:$4 sm:$0xff]  }
  0x34   : > { %685 = vmatprep.subr.bf16.mxu0 %v1006_v40  ;;  %v1044_v1 = vld [vmem:[%s1231_s9 + $0x80] ss:$8 sps:$4 sm:$0xff]   ;;  %s1303_s10 = smov (!%p450_p9, %s915_s10), 3  ;;  %v733_v3 = vshrl.u32 %v732_v2, 7 }
  0x35   : > { %s452_s13 = scalar_lea.vmem %s1293_s2, %s1303_s10  ;;  %s457_s21 = scalar_lea.vmem %s1294_s3, %s1303_s10 }
  0x36   : > { %v734_v4 = vsub.s32 0, %v733_v3  ;;  %v738_v5 = vsub.s32 1, %v733_v3  ;;  %v730_v6 = vld [vmem:[%s452_s13] sm:$0x3]  ;;  %s918_s17 = sshll.u32 %s1303_s10, 1 }
  0x37   : > { %686 = vmatpush1.bf16.msra.mxu0 %v1008_v41  ;;  %v743_v7 = vld [vmem:[%s457_s21] sm:$0x3]  ;;  %s467_s25 = scalar_lea.vmem %s1295_s4, %s918_s17 }
  0x38   : > { %687 = vmatprep.subr.bf16.mxu0 %v1009_v42  ;;  %v735_v8 = vrot.slane %v730_v6, %v734_v4  ;;  %v739_v9 = vrot.slane %v730_v6, %v738_v5  ;;  %v748_v10 = vrot.slane %v743_v7, %v734_v4  ;;  %v752_v11 = vrot.slane %v743_v7, %v738_v5 }
  0x3a   : > { %v740_v13 = vcombine.low %v735_v8, %v739_v9  ;;  %v753_v16 = vcombine.low %v748_v10, %v752_v11 }
  0x3b   : > { %688 = vmatpush1.bf16.msra.mxu0 %v1011_v43 }
  0x3c   : > { %689 = vmatprep.subr.bf16.mxu0 %v1012_v44 }
  0x3f   : > { %690 = vmatpush1.bf16.msra.mxu0 %v1014_v45 }
  0x40   : > { %691 = vmatprep.subr.bf16.mxu0 %v1015_v46 }
  0x43   : > { %692 = vmatpush1.bf16.msra.mxu0 %v1017_v47 }
  0x44   : > { %693 = vmatprep.subr.bf16.mxu0 %v1018_v48 }
  0x47   : > { %694 = vmatpush1.bf16.msra.mxu0 %v1020_v49 }
  0x48   : > { %695 = vmatprep.subr.bf16.mxu0 %v1021_v50 }
  0x4b   : > { %696 = vmatpush2.bf16.msra.mxu0 %v1023_v51 }
  0x4c   : > { %697 = vmatprep.subr.bf16.mxu0 %v1024_v52 }
  0x4f   : > { %698 = vmatpush2.bf16.msra.mxu0 %v1026_v53 }
  0x50   : > { %699 = vmatprep.subr.bf16.mxu0 %v1027_v54 }
  0x53   : > { %700 = vmatpush2.bf16.msra.mxu0 %v1029_v55 }
  0x54   : > { %701 = vmatprep.subr.bf16.mxu0 %v1030_v56 }
  0x57   : > { %702 = vmatpush2.bf16.msra.mxu0 %v1032_v57 }
  0x58   : > { %703 = vmatprep.subr.bf16.mxu0 %v1033_v58 }
  0x5b   : > { %704 = vmatpush2.bf16.msra.mxu0 %v1035_v59 }
  0x5c   : > { %705 = vmatprep.subr.bf16.mxu0 %v1036_v60 }
  0x5f   : > { %706 = vmatpush2.bf16.msra.mxu0 %v1038_v61 }
  0x60   : > { %707 = vmatprep.subr.bf16.mxu0 %v1039_v62 }
  0x63   : > { %708 = vmatpush2.bf16.msra.mxu0 %v1041_v63 }
  0x64   : > { %709 = vmatprep.subr.bf16.mxu0 %v1042_v0 }
  0x67   : > { %710 = vmatpush2.bf16.msra.mxu0 %v1044_v1 }
  0x6a   : > { %712 = vmatmul.mubr.bf16.vlgmr.msra.gmra.mxu0 %v1227_v32 }
 0x12a   : > { %v713_v12 = vpop.f32.mrf.mxu0 }
 0x12c   : > { %v715_v14 = vpop.f32.mrf.mxu0 }
 0x12d   : > { %v722_v15 = vcombine.low %v713_v12, %v715_v14 }
 0x12e   : > { %v717_v17 = vpop.f32.mrf.mxu0 }
 0x12f   : > { %v742_v18 = vmul.f32 %v740_v13, %v722_v15 }
 0x130   : > { %v718_v19 = vpop.f32.mrf.mxu0 }
 0x131   : > { %v755_v20 = vadd.f32 %v753_v16, %v742_v18 }
 0x133   : > { %v757_v21 = vcombine.high %v755_v20, %v755_v20 }
 0x135   : > { %v952_v22 = vpack.c.bf16 %v757_v21, %v755_v20 }
 0x137   : > { %953 = vst.sshfl [vmem:[%s467_s25] sm:$0x33 pattern:$0x76325410] %v952_v22 }
 0x138 PF: > { %s14_s19 = sadd.s32 1, %s1083_s19   ;;  %s1296_s15 = smov %s1071_s16 }
 0x139   : > { %p11_p10 = scmp.ge.s32.totalorder %s14_s19, 4   ;;  %s1297_s16 = smov %s1145_s23 }
 0x13a   : > { %s1298_s17 = smov %s1079_s18  ;;  %s1299_s18 = smov %s1301_s20 }
 0x13b   :  { %13 = sbr.rel (!%p11_p10) target bundleno = 3 (0x3), region = 126 }

// kernel: _lambda_.42
= control target key start
LH: loop header
LB: loop body
LE: loop exit
PB: predicated region body
PF: predicated region fallthrough
CT: control target
= control target key end

     0   :  { %v461_v9 = vmov 1966171168   ;;  %v68_v11 = vlaneseq  ;;  %v462_v42 = vmov 0.0   ;;  %v463_v43 = vmov 1983009808   ;;  %s608_s1 = inlined_call_operand.vmem [shape: bf16[256,256], index: 1, kind: input, shape index: {}]   ;;  %s609_s0 = inlined_call_operand.vmem [shape: bf16[2,256], index: 0, kind: input, shape index: {}]   ;;  %s610_s2 = inlined_call_operand.vmem [shape: f32[1,256], index: 2, kind: input, shape index: {}]   ;;  %s611_s3 = inlined_call_operand.vmem [shape: f32[1,256], index: 3, kind: input, shape index: {}]   ;;  %s612_s4 = inlined_call_operand.vmem [shape: bf16[2,256], index: 4, kind: output, shape index: {}]  }
   0x1   :  { %v413_v0 = vld [vmem:[%s608_s1 + $0x74] ss:$8 sps:$4 sm:$0xff]   ;;  %v415_v1 = vld [vmem:[%s608_s1 + $0x70] ss:$8 sps:$4 sm:$0xff]   ;;  %v416_v2 = vld [vmem:[%s608_s1 + $0x64] ss:$8 sps:$4 sm:$0xff]   ;;  %v66_v10 = vunpack.c.l.s4 %v461_v9  ;;  %v286_v44 = vunpack.c.l.s4 %v463_v43 }
   0x2   :  { %241 = vmatprep.subr.bf16.mxu0 %v413_v0  ;;  %v418_v3 = vld [vmem:[%s608_s1 + $0x60] ss:$8 sps:$4 sm:$0xff]   ;;  %v419_v4 = vld [vmem:[%s608_s1 + $0x54] ss:$8 sps:$4 sm:$0xff]   ;;  %v421_v5 = vld [vmem:[%s608_s1 + $0x50] ss:$8 sps:$4 sm:$0xff]  }
   0x3   :  { %242 = vmatpush1.bf16.msra.mxu0 %v415_v1  ;;  %v422_v6 = vld [vmem:[%s608_s1 + $0x44] ss:$8 sps:$4 sm:$0xff]   ;;  %v424_v7 = vld [vmem:[%s608_s1 + $0x40] ss:$8 sps:$4 sm:$0xff]   ;;  %v425_v8 = vld [vmem:[%s608_s1 + $0x34] ss:$8 sps:$4 sm:$0xff]   ;;  %v67_v14 = vunpack.c.0.s8 %v66_v10  ;;  %v287_v45 = vunpack.c.0.s8 %v286_v44 }
   0x4   :  { %243 = vmatprep.subr.bf16.mxu0 %v416_v2  ;;  %v427_v12 = vld [vmem:[%s608_s1 + $0x30] ss:$8 sps:$4 sm:$0xff]   ;;  %v428_v13 = vld [vmem:[%s608_s1 + $0x24] ss:$8 sps:$4 sm:$0xff]   ;;  %v522_v15 = vshrl.u32 %v68_v11, 7 }
   0x5   :  { %v430_v16 = vld [vmem:[%s608_s1 + $0x20] ss:$8 sps:$4 sm:$0xff]   ;;  %v431_v17 = vld [vmem:[%s608_s1 + $0x14] ss:$8 sps:$4 sm:$0xff]   ;;  %v433_v21 = vld [vmem:[%s608_s1 + $0x10] ss:$8 sps:$4 sm:$0xff]  }
   0x6   :  { %v531_v18 = vsub.s32 %v67_v14, %v522_v15  ;;  %v375_v19 = vld.sshfl [vmem:[%s609_s0] sm:$0x11 pattern:$0x75316420]  ;;  %v434_v22 = vld [vmem:[%s608_s1 + $0x4] ss:$8 sps:$4 sm:$0xff]   ;;  %v290_v49 = vsub.s32 %v287_v45, %v522_v15 }
   0x7   :  { %244 = vmatpush1.bf16.msra.mxu0 %v418_v3  ;;  %v64_v20 = vcombine.high %v375_v19, %v375_v19  ;;  %v436_v24 = vld [vmem:[%s608_s1] ss:$8 sps:$4 sm:$0xff]   ;;  %v437_v25 = vld [vmem:[%s608_s1 + $0xf4] ss:$8 sps:$4 sm:$0xff]   ;;  %v439_v26 = vld [vmem:[%s608_s1 + $0xf0] ss:$8 sps:$4 sm:$0xff]  }
   0x8   :  { %245 = vmatprep.subr.bf16.mxu0 %v419_v4  ;;  %v440_v27 = vld [vmem:[%s608_s1 + $0xe4] ss:$8 sps:$4 sm:$0xff]   ;;  %v442_v28 = vld [vmem:[%s608_s1 + $0xe0] ss:$8 sps:$4 sm:$0xff]   ;;  %v443_v29 = vld [vmem:[%s608_s1 + $0xd4] ss:$8 sps:$4 sm:$0xff]   ;;  %v71_v41 = vrot.slane %v375_v19, %v531_v18 }
   0x9   :  { %v78_v23 = vrot.slane %v64_v20, %v531_v18  ;;  %v445_v30 = vld [vmem:[%s608_s1 + $0xd0] ss:$8 sps:$4 sm:$0xff]   ;;  %v446_v31 = vld [vmem:[%s608_s1 + $0xc4] ss:$8 sps:$4 sm:$0xff]   ;;  %v448_v32 = vld [vmem:[%s608_s1 + $0xc0] ss:$8 sps:$4 sm:$0xff]  }
   0xa   :  { %v449_v33 = vld [vmem:[%s608_s1 + $0xb4] ss:$8 sps:$4 sm:$0xff]   ;;  %v451_v34 = vld [vmem:[%s608_s1 + $0xb0] ss:$8 sps:$4 sm:$0xff]   ;;  %v452_v35 = vld [vmem:[%s608_s1 + $0xa4] ss:$8 sps:$4 sm:$0xff]  }
   0xb   :  { %246 = vmatpush1.bf16.msra.mxu0 %v421_v5  ;;  %273 = vmatprep.mubr.bf16.mxu0 %v78_v23  ;;  %v454_v36 = vld [vmem:[%s608_s1 + $0xa0] ss:$8 sps:$4 sm:$0xff]   ;;  %v455_v37 = vld [vmem:[%s608_s1 + $0x94] ss:$8 sps:$4 sm:$0xff]   ;;  %v457_v38 = vld [vmem:[%s608_s1 + $0x90] ss:$8 sps:$4 sm:$0xff]  }
   0xc   :  { %247 = vmatprep.subr.bf16.mxu0 %v422_v6  ;;  %v458_v39 = vld [vmem:[%s608_s1 + $0x84] ss:$8 sps:$4 sm:$0xff]   ;;  %v460_v40 = vld [vmem:[%s608_s1 + $0x80] ss:$8 sps:$4 sm:$0xff]   ;;  %21 = vst [vmem:[#allocation2] sm:$0xf] %v462_v42 }
   0xd   :  { %v303_v47 = vsub.s32 0, %v522_v15  ;;  %v307_v48 = vsub.s32 1, %v522_v15  ;;  %v299_v51 = vld [vmem:[%s610_s2] sm:$0x3] }
   0xe   :  { %v319_v54 = vld [vmem:[%s611_s3] sm:$0x3] }
   0xf   :  { %248 = vmatpush1.bf16.msra.mxu0 %v424_v7  ;;  %v304_v57 = vrot.slane %v299_v51, %v303_v47  ;;  %v308_v58 = vrot.slane %v299_v51, %v307_v48  ;;  %v324_v61 = vrot.slane %v319_v54, %v303_v47  ;;  %v328_v62 = vrot.slane %v319_v54, %v307_v48 }
  0x10   :  { %249 = vmatprep.subr.bf16.mxu0 %v425_v8 }
  0x11   :  { %v309_v63 = vcombine.low %v304_v57, %v308_v58  ;;  %v329_v0 = vcombine.low %v324_v61, %v328_v62 }
  0x13   :  { %250 = vmatpush1.bf16.msra.mxu0 %v427_v12  ;;  %v22_v53 = vld [vmem:[#allocation2] sm:$0xf]  ;;  %v316_v1 = vrot.slane %v309_v63, %v290_v49  ;;  %v336_v2 = vrot.slane %v329_v0, %v290_v49 }
  0x14   :  { %251 = vmatprep.subr.bf16.mxu0 %v428_v13 }
  0x17   :  { %252 = vmatpush1.bf16.msra.mxu0 %v430_v16 }
  0x18   :  { %253 = vmatprep.subr.bf16.mxu0 %v431_v17 }
  0x1b   :  { %254 = vmatpush1.bf16.msra.mxu0 %v433_v21 }
  0x1c   :  { %255 = vmatprep.subr.bf16.mxu0 %v434_v22 }
  0x1f   :  { %256 = vmatpush1.bf16.msra.mxu0 %v436_v24 }
  0x20   :  { %257 = vmatprep.subr.bf16.mxu0 %v437_v25 }
  0x23   :  { %258 = vmatpush2.bf16.msra.mxu0 %v439_v26 }
  0x24   :  { %259 = vmatprep.subr.bf16.mxu0 %v440_v27 }
  0x27   :  { %260 = vmatpush2.bf16.msra.mxu0 %v442_v28 }
  0x28   :  { %261 = vmatprep.subr.bf16.mxu0 %v443_v29 }
  0x2b   :  { %262 = vmatpush2.bf16.msra.mxu0 %v445_v30 }
  0x2c   :  { %263 = vmatprep.subr.bf16.mxu0 %v446_v31 }
  0x2f   :  { %264 = vmatpush2.bf16.msra.mxu0 %v448_v32 }
  0x30   :  { %265 = vmatprep.subr.bf16.mxu0 %v449_v33 }
  0x33   :  { %266 = vmatpush2.bf16.msra.mxu0 %v451_v34 }
  0x34   :  { %267 = vmatprep.subr.bf16.mxu0 %v452_v35 }
  0x37   :  { %268 = vmatpush2.bf16.msra.mxu0 %v454_v36 }
  0x38   :  { %269 = vmatprep.subr.bf16.mxu0 %v455_v37 }
  0x3b   :  { %270 = vmatpush2.bf16.msra.mxu0 %v457_v38 }
  0x3c   :  { %271 = vmatprep.subr.bf16.mxu0 %v458_v39 }
  0x3f   :  { %272 = vmatpush2.bf16.msra.mxu0 %v460_v40 }
  0x42   :  { %274 = vmatmul.mubr.bf16.vlgmr.msra.gmra.mxu0 %v71_v41 }
 0x102   :  { %v275_v46 = vpop.f32.mrf.mxu0 }
 0x104   :  { %v277_v50 = vpop.f32.mrf.mxu0 }
 0x105   :  { %v284_v52 = vcombine.low %v275_v46, %v277_v50 }
 0x106   :  { %v279_v55 = vpop.f32.mrf.mxu0 }
 0x107   :  { %v291_v56 = vrot.slane %v284_v52, %v290_v49 }
 0x108   :  { %v280_v59 = vpop.f32.mrf.mxu0 }
 0x109   :  { %v293_v60 = vadd.f32 %v291_v56, %v22_v53 }
 0x10b   :  { %294 = vst [vmem:[#allocation2] sm:$0xf] %v293_v60 }
 0x112   :  { %v298_v3 = vld [vmem:[#allocation2] sm:$0xf] }
 0x113   :  { %v318_v4 = vmul.f32 %v316_v1, %v298_v3 }
 0x115   :  { %v338_v5 = vadd.f32 %v336_v2, %v318_v4 }
 0x117   :  { %v346_v6 = vrot.slane %v338_v5, %v290_v49 }
 0x119   :  { %v347_v7 = vcombine.high %v346_v6, %v346_v6 }
 0x11b   :  { %v408_v8 = vpack.c.bf16 %v347_v7, %v346_v6 }
 0x11d   :  { %v361_v9 = vrot.slane %v408_v8, %v531_v18 }
 0x11f   :  { %409 = vst.sshfl [vmem:[%s612_s4] sm:$0x5 pattern:$0x73625140] %v361_v9 }

// kernel: _lambda_.44
= control target key start
LH: loop header
LB: loop body
LE: loop exit
PB: predicated region body
PF: predicated region fallthrough
CT: control target
= control target key end

     0   :  { %v53_v0 = vlaneseq  ;;  %v619_v2 = vmov 1966171168   ;;  %vm146_vm0 = vcmask 517120   ;;  %vm213_vm1 = vcmask 1041409   ;;  %s808_s0 = inlined_call_operand.vmem [shape: bf16[8,64], index: 0, kind: input, shape index: {}]   ;;  %s809_s1 = inlined_call_operand.vmem [shape: bf16[8,2,64], index: 1, kind: input, shape index: {}]   ;;  %s810_s2 = inlined_call_operand.vmem [shape: bf16[8,2,64], index: 2, kind: input, shape index: {}]   ;;  %s811_s3 = inlined_call_operand.vmem [shape: bf16[8,64], index: 3, kind: output, shape index: {}]  }
   0x1   :  { %v14_v1 = vld [vmem:[%s808_s0] sm:$0xf]  ;;  %v51_v3 = vunpack.c.l.s4 %v619_v2  ;;  %v21_v16 = vld [vmem:[%s809_s1 + $0x5] sm:$0x1]  ;;  %v20_v22 = vld [vmem:[%s809_s1 + $0x4] sm:$0x1] }
   0x2   :  { %v15_v4 = vunpack.c.l.bf16 %v14_v1  ;;  %v644_v5 = vshrl.u32 %v53_v0, 7  ;;  %v180_v6 = vand.u32 127, %v53_v0  ;;  %v16_v10 = vld [vmem:[%s809_s1] sm:$0x1]  ;;  %v18_v12 = vld [vmem:[%s809_s1 + $0x2] sm:$0x1]  ;;  %v29_v26 = vunpack.c.l.bf16 %v21_v16 }
   0x3   :  { %v52_v7 = vunpack.c.0.s8 %v51_v3  ;;  %v17_v15 = vld [vmem:[%s809_s1 + $0x1] sm:$0x1]  ;;  %v24_v18 = vunpack.c.l.bf16 %v16_v10  ;;  %v26_v24 = vunpack.c.l.bf16 %v18_v12  ;;  %v19_v31 = vld [vmem:[%s809_s1 + $0x3] sm:$0x1]  ;;  %v28_v32 = vunpack.c.l.bf16 %v20_v22  ;;  %v22_v39 = vld [vmem:[%s809_s1 + $0x6] sm:$0x1] }
   0x4   :  { %v647_v8 = vsub.s32 %v180_v6, %v644_v5  ;;  %v49_v9 = vcombine.high %v15_v4, %v15_v4  ;;  %v657_v14 = vsub.s32 0, %v644_v5  ;;  %v25_v25 = vunpack.c.l.bf16 %v17_v15  ;;  %v23_v49 = vld [vmem:[%s809_s1 + $0x7] sm:$0x1] }
   0x5   :  { %v55_v11 = vsub.s32 %v52_v7, %v644_v5  ;;  %v27_v40 = vunpack.c.l.bf16 %v19_v31  ;;  %v30_v48 = vunpack.c.l.bf16 %v22_v39  ;;  %v31_v56 = vunpack.c.l.bf16 %v23_v49 }
   0x6   :  { %vm215_vm2 = vcmask 1042434   ;;  %vm217_vm3 = vcmask 1043459   ;;  %vm219_vm4 = vcmask 1044484   ;;  %vm221_vm5 = vcmask 1045509  }
   0x7   :  { %v56_v13 = vrot.slane %v15_v4, %v55_v11  ;;  %v63_v17 = vrot.slane %v49_v9, %v55_v11  ;;  %vm223_vm6 = vcmask 1046534   ;;  %vm225_vm7 = vcmask 1047559  }
   0x8   :  { %vm228_vm8 = vcmask 15360   ;;  %vm575_vm9 = vcmask 519168  }
   0x9   :  { %v72_v19 = vrot.slane %v56_v13, %v55_v11  ;;  %v64_v20 = vcombine.high %v56_v13, %v56_v13  ;;  %v65_v21 = vcombine.high %v63_v17, %v63_v17  ;;  %v79_v23 = vrot.slane %v63_v17, %v55_v11 }
   0xb   :  { %v101_v27 = vrot.slane %v72_v19, %v657_v14  ;;  %v94_v28 = vcombine.high %v72_v19, %v72_v19  ;;  %v86_v29 = vrot.slane %v64_v20, %v55_v11  ;;  %v93_v30 = vrot.slane %v65_v21, %v55_v11 }
   0xc   :  { %v117_v33 = vrot.slane %v79_v23, %v657_v14  ;;  %v95_v34 = vcombine.high %v79_v23, %v79_v23 }
   0xd   :  { %v138_v35 = vmul.f32 %v101_v27, %v24_v18  ;;  %v109_v36 = vrot.slane %v94_v28, %v657_v14  ;;  %v105_v37 = vrot.slane %v86_v29, %v657_v14  ;;  %v121_v38 = vrot.slane %v93_v30, %v657_v14 }
   0xe   :  { %v96_v41 = vcombine.high %v86_v29, %v86_v29  ;;  %v97_v42 = vcombine.high %v93_v30, %v93_v30  ;;  %v142_v52 = vmul.f32 %v117_v33, %v28_v32  ;;  %v125_v53 = vrot.slane %v95_v34, %v657_v14 }
   0xf   :  { %v147_v43 = vsel %vm146_vm0, %v138_v35, 0.0  ;;  %v140_v44 = vmul.f32 %v109_v36, %v26_v24  ;;  %v139_v45 = vmul.f32 %v105_v37, %v25_v25  ;;  %v143_v46 = vmul.f32 %v121_v38, %v29_v26 }
  0x10   :  { %148 = vadd.xlane.f32.xlu0 %v147_v43  ;;  %v113_v47 = vrot.slane %v96_v41, %v657_v14  ;;  %v129_v57 = vrot.slane %v97_v42, %v657_v14  ;;  %v159_v58 = vsel %vm146_vm0, %v142_v52, 0.0  ;;  %v144_v59 = vmul.f32 %v125_v53, %v30_v48 }
  0x11   :  { %v153_v50 = vsel %vm146_vm0, %v140_v44, 0.0  ;;  %v150_v51 = vsel %vm146_vm0, %v139_v45, 0.0  ;;  %v162_v54 = vsel %vm146_vm0, %v143_v46, 0.0  ;;  %v620_v27 = vmov 0  }
  0x12   :  { %154 = vadd.xlane.f32.xlu1 %v153_v50  ;;  %v141_v55 = vmul.f32 %v113_v47, %v27_v40  ;;  %v145_v61 = vmul.f32 %v129_v57, %v31_v56  ;;  %v165_v62 = vsel %vm146_vm0, %v144_v59, 0.0  ;;  %600 = vset.pattern.permute.xlu0 %v620_v27  ;;  %v239_v28 = vsub.s32 1, %v644_v5 }
  0x13   :  { %599 = vset.pattern.permute.xlu1 %v620_v27  ;;  %v243_v29 = vsub.s32 2, %v644_v5  ;;  %v247_v30 = vsub.s32 3, %v644_v5  ;;  %v251_v35 = vsub.s32 4, %v644_v5  ;;  %v255_v42 = vsub.s32 5, %v644_v5 }
  0x14   :  { %151 = vadd.xlane.f32.xlu0 %v150_v51  ;;  %v156_v60 = vsel %vm146_vm0, %v141_v55, 0.0  ;;  %v168_v63 = vsel %vm146_vm0, %v145_v61, 0.0  ;;  %v259_v46 = vsub.s32 6, %v644_v5  ;;  %v263_v50 = vsub.s32 7, %v644_v5 }
  0x16   :  { %163 = vadd.xlane.f32.xlu1 %v162_v54 }
  0x18   :  { %160 = vadd.xlane.f32.xlu0 %v159_v58 }
  0x1a   :  { %157 = vadd.xlane.f32.xlu1 %v156_v60 }
  0x1c   :  { %166 = vadd.xlane.f32.xlu0 %v165_v62 }
  0x1e   :  { %169 = vadd.xlane.f32.xlu1 %v168_v63 }
  0x99   :  { %v149_v0 = vpop.xlane.xlu0 %148 }
  0x9a   :  { %v184_v6 = vrot.slane %v149_v0, %v647_v8 }
  0x9b   :  { %v155_v1 = vpop.xlane.xlu1 %154 }
  0x9c   :  { %v192_v10 = vrot.slane %v155_v1, %v647_v8 }
  0x9d   :  { %v152_v2 = vpop.xlane.xlu0 %151 }
  0x9e   :  { %v188_v3 = vrot.slane %v152_v2, %v647_v8 }
  0x9f   :  { %v694_v4 = vpop.xlane.xlu1 %163 }
  0xa0   :  { %v214_v9 = vsel %vm213_vm1, %v188_v3, %v184_v6  ;;  %v204_v17 = vrot.slane %v694_v4, %v647_v8 }
  0xa1   :  { %v161_v7 = vpop.xlane.xlu0 %160  ;;  %v216_v15 = vsel %vm215_vm2, %v192_v10, %v214_v9 }
  0xa2   :  { %v200_v13 = vrot.slane %v161_v7, %v647_v8 }
  0xa3   :  { %v158_v11 = vpop.xlane.xlu1 %157 }
  0xa4   :  { %v196_v12 = vrot.slane %v158_v11, %v647_v8 }
  0xa5   :  { %v167_v16 = vpop.xlane.xlu0 %166 }
  0xa6   :  { %v218_v18 = vsel %vm217_vm3, %v196_v12, %v216_v15  ;;  %v208_v19 = vrot.slane %v167_v16, %v647_v8 }
  0xa7   :  { %v170_v20 = vpop.xlane.xlu1 %169  ;;  %v220_v21 = vsel %vm219_vm4, %v200_v13, %v218_v18 }
  0xa8   :  { %v212_v22 = vrot.slane %v170_v20, %v647_v8  ;;  %v222_v23 = vsel %vm221_vm5, %v204_v17, %v220_v21 }
  0xa9   :  { %v224_v24 = vsel %vm223_vm6, %v208_v19, %v222_v23 }
  0xaa   :  { %v226_v25 = vsel %vm225_vm7, %v212_v22, %v224_v24 }
  0xab   :  { %v229_v26 = vsel %vm228_vm8, %v226_v25, -inf }
  0xac   :  { %230 = vmax.xlane.f32.xlu0 %v229_v26 }
 0x135   :  { %v231_v31 = vpop.xlane.xlu0 %230 }
 0x136   :  { %v236_v32 = vrot.slane %v231_v31, %v657_v14  ;;  %v240_v33 = vrot.slane %v231_v31, %v239_v28  ;;  %v244_v34 = vrot.slane %v231_v31, %v243_v29  ;;  %v248_v36 = vrot.slane %v231_v31, %v247_v30 }
 0x137   :  { %v252_v43 = vrot.slane %v231_v31, %v251_v35  ;;  %v256_v47 = vrot.slane %v231_v31, %v255_v42  ;;  %v260_v51 = vrot.slane %v231_v31, %v259_v46  ;;  %v264_v54 = vrot.slane %v231_v31, %v263_v50 }
 0x138   :  { %v273_v37 = vsub.f32 %v149_v0, %v236_v32  ;;  %v274_v38 = vsub.f32 %v152_v2, %v240_v33  ;;  %v275_v39 = vsub.f32 %v155_v1, %v244_v34  ;;  %v276_v44 = vsub.f32 %v158_v11, %v248_v36 }
 0x139   :  { %v277_v48 = vsub.f32 %v161_v7, %v252_v43  ;;  %v278_v52 = vsub.f32 %v694_v4, %v256_v47  ;;  %v279_v55 = vsub.f32 %v167_v16, %v260_v51  ;;  %v280_v59 = vsub.f32 %v170_v20, %v264_v54 }
 0x13a   :  { %v281_v40 = vmul.f32 1.442695, %v273_v37  ;;  %v283_v41 = vmul.f32 1.442695, %v274_v38  ;;  %v285_v45 = vmul.f32 1.442695, %v275_v39 }
 0x13b   :  { %v287_v49 = vmul.f32 1.442695, %v276_v44  ;;  %v289_v53 = vmul.f32 1.442695, %v277_v48  ;;  %v291_v56 = vmul.f32 1.442695, %v278_v52 }
 0x13c   :  { %601 = vpow2.f32 %v281_v40  ;;  %v293_v60 = vmul.f32 1.442695, %v279_v55  ;;  %v295_v62 = vmul.f32 1.442695, %v280_v59 }
 0x13d   :  { %603 = vpow2.f32 %v283_v41 }
 0x13e   :  { %605 = vpow2.f32 %v285_v45 }
 0x13f   :  { %607 = vpow2.f32 %v287_v49 }
 0x140   :  { %609 = vpow2.f32 %v289_v53 }
 0x141   :  { %611 = vpow2.f32 %v291_v56  ;;  %v35_v56 = vld [vmem:[%s810_s2 + $0x3] sm:$0x1] }
 0x142   :  { %613 = vpow2.f32 %v293_v60 }
 0x143   :  { %615 = vpow2.f32 %v295_v62 }
 0x149   :  { %v602_v57 = vpop.eup %601 }
 0x14a   :  { %v604_v58 = vpop.eup %603  ;;  %306 = vperm.xlu1 %599, %v602_v57  }
 0x14b   :  { %309 = vperm.xlu0 %600, %v604_v58   ;;  %v606_v61 = vpop.eup %605 }
 0x14c   :  { %v608_v63 = vpop.eup %607 }
 0x14d   :  { %v610_v0 = vpop.eup %609 }
 0x14e   :  { %312 = vperm.xlu1 %599, %v606_v61   ;;  %v612_v1 = vpop.eup %611 }
 0x14f   :  { %v614_v2 = vpop.eup %613 }
 0x150   :  { %v616_v3 = vpop.eup %615 }
 0x152   :  { %315 = vperm.xlu1 %599, %v608_v63  }
 0x156   :  { %318 = vperm.xlu1 %599, %v610_v0  }
 0x15a   :  { %321 = vperm.xlu1 %599, %v612_v1  }
 0x15e   :  { %324 = vperm.xlu1 %599, %v614_v2  }
 0x162   :  { %327 = vperm.xlu1 %599, %v616_v3  }
 0x1c5   :  { %v307_v4 = vpop.permute.xlu1 %306 }
 0x1c6   :  { %v310_v10 = vpop.permute.xlu0 %309  ;;  %v332_v13 = vrot.slane %v307_v4, %v647_v8 }
 0x1c7   :  { %v336_v12 = vrot.slane %v310_v10, %v647_v8 }
 0x1c9   :  { %v313_v6 = vpop.permute.xlu1 %312  ;;  %v361_v19 = vsel %vm213_vm1, %v336_v12, %v332_v13 }
 0x1ca   :  { %v340_v15 = vrot.slane %v313_v6, %v647_v8 }
 0x1cc   :  { %v362_v21 = vsel %vm215_vm2, %v340_v15, %v361_v19 }
 0x1cd   :  { %v316_v7 = vpop.permute.xlu1 %315 }
 0x1ce   :  { %v344_v16 = vrot.slane %v316_v7, %v647_v8 }
 0x1d0   :  { %v363_v23 = vsel %vm217_vm3, %v344_v16, %v362_v21 }
 0x1d1   :  { %v319_v9 = vpop.permute.xlu1 %318 }
 0x1d2   :  { %v348_v17 = vrot.slane %v319_v9, %v647_v8  ;;  %v37_v9 = vld [vmem:[%s810_s2 + $0x5] sm:$0x1] }
 0x1d4   :  { %v364_v24 = vsel %vm219_vm4, %v348_v17, %v363_v23  ;;  %v45_v17 = vunpack.c.l.bf16 %v37_v9 }
 0x1d5   :  { %v322_v11 = vpop.permute.xlu1 %321 }
 0x1d6   :  { %v352_v20 = vrot.slane %v322_v11, %v647_v8 }
 0x1d8   :  { %v365_v26 = vsel %vm221_vm5, %v352_v20, %v364_v24  ;;  %v38_v20 = vld [vmem:[%s810_s2 + $0x6] sm:$0x1] }
 0x1d9   :  { %v325_v18 = vpop.permute.xlu1 %324 }
 0x1da   :  { %v356_v22 = vrot.slane %v325_v18, %v647_v8 }
 0x1dc   :  { %v366_v31 = vsel %vm223_vm6, %v356_v22, %v365_v26 }
 0x1dd   :  { %v328_v25 = vpop.permute.xlu1 %327 }
 0x1de   :  { %v360_v27 = vrot.slane %v328_v25, %v647_v8 }
 0x1e0   :  { %v367_v32 = vsel %vm225_vm7, %v360_v27, %v366_v31  ;;  %v46_v31 = vunpack.c.l.bf16 %v38_v20 }
 0x1e1   :  { %v369_v33 = vsel %vm228_vm8, %v367_v32, 0.0 }
 0x1e2   :  { %370 = vadd.xlane.f32.xlu1 %v369_v33 }
 0x26b   :  { %v371_v34 = vpop.xlane.xlu1 %370 }
 0x26c   :  { %617 = vrcp.f32 %v371_v34  ;;  %v39_v34 = vld [vmem:[%s810_s2 + $0x7] sm:$0x1] }
 0x279   :  { %v618_v36 = vpop.eup %617 }
 0x27a   :  { %v377_v37 = vrot.slane %v618_v36, %v657_v14  ;;  %v381_v39 = vrot.slane %v618_v36, %v239_v28  ;;  %v385_v8 = vrot.slane %v618_v36, %v243_v29  ;;  %v389_v43 = vrot.slane %v618_v36, %v247_v30 }
 0x27b   :  { %v393_v45 = vrot.slane %v618_v36, %v251_v35  ;;  %v397_v28 = vrot.slane %v618_v36, %v255_v42  ;;  %v401_v29 = vrot.slane %v618_v36, %v259_v46  ;;  %v405_v30 = vrot.slane %v618_v36, %v263_v50  ;;  %v32_v35 = vld [vmem:[%s810_s2] sm:$0x1]  ;;  %v33_v42 = vld [vmem:[%s810_s2 + $0x1] sm:$0x1]  ;;  %v34_v46 = vld [vmem:[%s810_s2 + $0x2] sm:$0x1] }
 0x27c   :  { %v414_v38 = vmul.f32 %v602_v57, %v377_v37  ;;  %v415_v40 = vmul.f32 %v604_v58, %v381_v39  ;;  %v416_v41 = vmul.f32 %v606_v61, %v385_v8  ;;  %v417_v44 = vmul.f32 %v608_v63, %v389_v43  ;;  %v36_v63 = vld [vmem:[%s810_s2 + $0x4] sm:$0x1] }
 0x27d   :  { %v418_v14 = vmul.f32 %v610_v0, %v393_v45  ;;  %v419_v47 = vmul.f32 %v612_v1, %v397_v28  ;;  %v420_v48 = vmul.f32 %v614_v2, %v401_v29  ;;  %v421_v49 = vmul.f32 %v616_v3, %v405_v30 }
 0x27e   :  { %424 = vperm.xlu0 %600, %v414_v38   ;;  %v40_v52 = vunpack.c.l.bf16 %v32_v35  ;;  %v41_v53 = vunpack.c.l.bf16 %v33_v42  ;;  %v42_v55 = vunpack.c.l.bf16 %v34_v46  ;;  %v43_v61 = vunpack.c.l.bf16 %v35_v56 }
 0x27f   :  { %v44_v6 = vunpack.c.l.bf16 %v36_v63 }
 0x282   :  { %429 = vperm.xlu0 %600, %v415_v40  }
 0x286   :  { %434 = vperm.xlu0 %600, %v416_v41  }
 0x28a   :  { %439 = vperm.xlu0 %600, %v417_v44   ;;  %v47_v44 = vunpack.c.l.bf16 %v39_v34 }
 0x28e   :  { %444 = vperm.xlu0 %600, %v418_v14  }
 0x292   :  { %449 = vperm.xlu0 %600, %v419_v47  }
 0x296   :  { %454 = vperm.xlu0 %600, %v420_v48  }
 0x29a   :  { %459 = vperm.xlu0 %600, %v421_v49  }
 0x2f9   :  { %v425_v51 = vpop.permute.xlu0 %424 }
 0x2fa   :  { %v462_v50 = vmul.f32 %v425_v51, %v40_v52 }
 0x2fc   :  { %v470_v59 = vsel %vm146_vm0, %v462_v50, 0.0 }
 0x2fd   :  { %v430_v5 = vpop.permute.xlu0 %429  ;;  %v471_v1 = vrot.slane %v470_v59, 4 }
 0x2fe   :  { %v463_v54 = vmul.f32 %v430_v5, %v41_v53 }
 0x2ff   :  { %v472_v12 = vadd.f32 %v471_v1, %v470_v59 }
 0x300   :  { %v477_v57 = vsel %vm146_vm0, %v463_v54, 0.0 }
 0x301   :  { %v435_v58 = vpop.permute.xlu0 %434  ;;  %v478_v62 = vrot.slane %v477_v57, 4  ;;  %v473_v23 = vrot.slane %v472_v12, 2 }
 0x302   :  { %v464_v60 = vmul.f32 %v435_v58, %v42_v55 }
 0x303   :  { %v479_v7 = vadd.f32 %v478_v62, %v477_v57  ;;  %v474_v38 = vadd.f32 %v473_v23, %v472_v12 }
 0x304   :  { %v484_v0 = vsel %vm146_vm0, %v464_v60, 0.0 }
 0x305   :  { %v485_v2 = vrot.slane %v484_v0, 4  ;;  %v440_v3 = vpop.permute.xlu0 %439  ;;  %v480_v18 = vrot.slane %v479_v7, 2  ;;  %v475_v48 = vrot.slane %v474_v38, 1 }
 0x306   :  { %v465_v4 = vmul.f32 %v440_v3, %v43_v61 }
 0x307   :  { %v486_v10 = vadd.f32 %v485_v2, %v484_v0  ;;  %v481_v32 = vadd.f32 %v480_v18, %v479_v7  ;;  %v476_v55 = vadd.f32 %v475_v48, %v474_v38 }
 0x308   :  { %v491_v11 = vsel %vm146_vm0, %v465_v4, 0.0 }
 0x309   :  { %v492_v13 = vrot.slane %v491_v11, 4  ;;  %v445_v15 = vpop.permute.xlu0 %444  ;;  %v487_v21 = vrot.slane %v486_v10, 2  ;;  %v482_v45 = vrot.slane %v481_v32, 1  ;;  %v589_v2 = vpack.c.bf16 %v476_v55, %v476_v55 }
 0x30a   :  { %v466_v16 = vmul.f32 %v445_v15, %v44_v6 }
 0x30b   :  { %v493_v19 = vadd.f32 %v492_v13, %v491_v11  ;;  %v488_v36 = vadd.f32 %v487_v21, %v486_v10  ;;  %v483_v53 = vadd.f32 %v482_v45, %v481_v32  ;;  %v558_v15 = vunpack.c.l.b16 %v589_v2 }
 0x30c   :  { %v498_v22 = vsel %vm146_vm0, %v466_v16, 0.0 }
 0x30d   :  { %v494_v24 = vrot.slane %v493_v19, 2  ;;  %v499_v25 = vrot.slane %v498_v22, 4  ;;  %v450_v26 = vpop.permute.xlu0 %449  ;;  %v489_v28 = vrot.slane %v488_v36, 1  ;;  %v590_v61 = vpack.c.bf16 %v483_v53, %v483_v53 }
 0x30e   :  { %v467_v27 = vmul.f32 %v450_v26, %v45_v17 }
 0x30f   :  { %v500_v33 = vadd.f32 %v499_v25, %v498_v22  ;;  %v495_v39 = vadd.f32 %v494_v24, %v493_v19  ;;  %v490_v5 = vadd.f32 %v489_v28, %v488_v36  ;;  %v559_v9 = vunpack.c.l.b16 %v590_v61 }
 0x310   :  { %v505_v37 = vsel %vm146_vm0, %v467_v27, 0.0 }
 0x311   :  { %v501_v40 = vrot.slane %v500_v33, 2  ;;  %v455_v8 = vpop.permute.xlu0 %454  ;;  %v506_v41 = vrot.slane %v505_v37, 4  ;;  %v496_v30 = vrot.slane %v495_v39, 1  ;;  %v591_v0 = vpack.c.bf16 %v490_v5, %v490_v5 }
 0x312   :  { %v468_v43 = vmul.f32 %v455_v8, %v46_v31  ;;  %v566_v20 = vsel %vm213_vm1, %v559_v9, %v558_v15 }
 0x313   :  { %v502_v14 = vadd.f32 %v501_v40, %v500_v33  ;;  %v507_v47 = vadd.f32 %v506_v41, %v505_v37  ;;  %v497_v56 = vadd.f32 %v496_v30, %v495_v39  ;;  %v560_v13 = vunpack.c.l.b16 %v591_v0 }
 0x314   :  { %v512_v29 = vsel %vm146_vm0, %v468_v43, 0.0 }
 0x315   :  { %v513_v49 = vrot.slane %v512_v29, 4  ;;  %v460_v35 = vpop.permute.xlu0 %459  ;;  %v503_v42 = vrot.slane %v502_v14, 1  ;;  %v508_v51 = vrot.slane %v507_v47, 2  ;;  %v592_v3 = vpack.c.bf16 %v497_v56, %v497_v56 }
 0x316   :  { %v469_v52 = vmul.f32 %v460_v35, %v47_v44  ;;  %v567_v23 = vsel %vm215_vm2, %v560_v13, %v566_v20 }
 0x317   :  { %v514_v46 = vadd.f32 %v513_v49, %v512_v29  ;;  %v509_v50 = vadd.f32 %v508_v51, %v507_v47  ;;  %v504_v59 = vadd.f32 %v503_v42, %v502_v14  ;;  %v561_v16 = vunpack.c.l.b16 %v592_v3 }
 0x318   :  { %v519_v54 = vsel %vm146_vm0, %v469_v52, 0.0 }
 0x319   :  { %v515_v57 = vrot.slane %v514_v46, 2  ;;  %v520_v58 = vrot.slane %v519_v54, 4  ;;  %v510_v60 = vrot.slane %v509_v50, 1  ;;  %v593_v7 = vpack.c.bf16 %v504_v59, %v504_v59 }
 0x31a   :  { %v568_v25 = vsel %vm217_vm3, %v561_v16, %v567_v23 }
 0x31b   :  { %v516_v62 = vadd.f32 %v515_v57, %v514_v46  ;;  %v521_v63 = vadd.f32 %v520_v58, %v519_v54  ;;  %v511_v1 = vadd.f32 %v510_v60, %v509_v50  ;;  %v562_v19 = vunpack.c.l.b16 %v593_v7 }
 0x31d   :  { %v517_v4 = vrot.slane %v516_v62, 1  ;;  %v522_v6 = vrot.slane %v521_v63, 2  ;;  %v594_v10 = vpack.c.bf16 %v511_v1, %v511_v1  ;;  %v569_v27 = vsel %vm219_vm4, %v562_v19, %v568_v25 }
 0x31f   :  { %v518_v11 = vadd.f32 %v517_v4, %v516_v62  ;;  %v523_v12 = vadd.f32 %v522_v6, %v521_v63  ;;  %v563_v21 = vunpack.c.l.b16 %v594_v10 }
 0x321   :  { %v595_v17 = vpack.c.bf16 %v518_v11, %v518_v11  ;;  %v524_v18 = vrot.slane %v523_v12, 1  ;;  %v570_v31 = vsel %vm221_vm5, %v563_v21, %v569_v27 }
 0x323   :  { %v525_v22 = vadd.f32 %v524_v18, %v523_v12  ;;  %v564_v24 = vunpack.c.l.b16 %v595_v17 }
 0x325   :  { %v596_v26 = vpack.c.bf16 %v525_v22, %v525_v22  ;;  %v571_v33 = vsel %vm223_vm6, %v564_v24, %v570_v31 }
 0x327   :  { %v565_v32 = vunpack.c.l.b16 %v596_v26 }
 0x329   :  { %v572_v34 = vsel %vm225_vm7, %v565_v32, %v571_v33 }
 0x32a   :  { %v573_v36 = vpack.c.b16 %v572_v34, %v572_v34 }
 0x32c   :  { %576 = vst.msk [vmem:[%s811_s3] sm:$0xf] %vm575_vm9, %v573_v36 }

// kernel: _lambda_.45
= control target key start
LH: loop header
LB: loop body
LE: loop exit
PB: predicated region body
PF: predicated region fallthrough
CT: control target
= control target key end

     0   :  { %v153_v35 = vlaneseq  ;;  %v2094_v36 = vmov 1966171168   ;;  %s2756_s0 = inlined_call_operand.vmem [shape: bf16[2,256], index: 0, kind: input, shape index: {}]   ;;  %s2757_s1 = inlined_call_operand.vmem [shape: bf16[256,1024], index: 1, kind: input, shape index: {}]   ;;  %s2758_s2 = inlined_call_operand.vmem [shape: f32[1,1024], index: 2, kind: input, shape index: {}]   ;;  %s2759_s3 = inlined_call_operand.vmem [shape: bf16[1024,128], index: 3, kind: input, shape index: {}]   ;;  %s2760_s4 = inlined_call_operand.vmem [shape: f32[1,128], index: 4, kind: input, shape index: {}]   ;;  %s2761_s5 = inlined_call_operand.hbm [shape: f32[2,128], index: 5, kind: output, shape index: {}]  }
   0x1   :  { %v79_v0 = vld [vmem:[%s2757_s1 + $0x1c0] sm:$0xff]  ;;  %v80_v2 = vld [vmem:[%s2757_s1 + $0x1c8] sm:$0xff]  ;;  %v203_v37 = vunpack.c.l.s4 %v2094_v36 }
   0x2   :  { %v83_v1 = vld [vmem:[%s2757_s1 + $0x1e0] sm:$0xff]  ;;  %v84_v4 = vld [vmem:[%s2757_s1 + $0x1e8] sm:$0xff]  ;;  %v2198_v46 = vshrl.u32 %v153_v35, 7 }
   0x3   :  { %v1782_v3 = vcombine.high %v79_v0, %v83_v1  ;;  %v1781_v5 = vcombine.low %v79_v0, %v83_v1  ;;  %v71_v6 = vld [vmem:[%s2757_s1 + $0x180] sm:$0xff]  ;;  %v1784_v8 = vcombine.high %v80_v2, %v84_v4  ;;  %v1783_v9 = vcombine.low %v80_v2, %v84_v4  ;;  %v72_v11 = vld [vmem:[%s2757_s1 + $0x188] sm:$0xff] }
   0x4   :  { %v75_v7 = vld [vmem:[%s2757_s1 + $0x1a0] sm:$0xff]  ;;  %v76_v12 = vld [vmem:[%s2757_s1 + $0x1a8] sm:$0xff]  ;;  %v204_v47 = vunpack.c.0.s8 %v203_v37 }
   0x5   :  { %v1774_v10 = vcombine.high %v71_v6, %v75_v7  ;;  %v63_v13 = vld [vmem:[%s2757_s1 + $0x140] sm:$0xff]  ;;  %858 = vmatprep.subr.bf16.mxu0 %v1782_v3  ;;  %v1776_v14 = vcombine.high %v72_v11, %v76_v12  ;;  %v64_v16 = vld [vmem:[%s2757_s1 + $0x148] sm:$0xff]  ;;  %899 = vmatprep.subr.bf16.mxu1 %v1784_v8  ;;  %v1773_v18 = vcombine.low %v71_v6, %v75_v7 }
   0x6   :  { %v67_v15 = vld [vmem:[%s2757_s1 + $0x160] sm:$0xff]  ;;  %v68_v17 = vld [vmem:[%s2757_s1 + $0x168] sm:$0xff]  ;;  %859 = vmatpush1.bf16.msra.mxu0 %v1781_v5  ;;  %900 = vmatpush1.bf16.msra.mxu1 %v1783_v9  ;;  %v1775_v19 = vcombine.low %v72_v11, %v76_v12  ;;  %v2213_v56 = vsub.s32 %v204_v47, %v2198_v46 }
   0x7   :  { %860 = vmatprep.subr.bf16.mxu0 %v1774_v10  ;;  %v1766_v20 = vcombine.high %v63_v13, %v67_v15  ;;  %901 = vmatprep.subr.bf16.mxu1 %v1776_v14  ;;  %v1768_v21 = vcombine.high %v64_v16, %v68_v17  ;;  %v55_v22 = vld [vmem:[%s2757_s1 + $0x100] sm:$0xff]  ;;  %v56_v24 = vld [vmem:[%s2757_s1 + $0x108] sm:$0xff]  ;;  %v1765_v26 = vcombine.low %v63_v13, %v67_v15 }
   0x8   :  { %v59_v23 = vld [vmem:[%s2757_s1 + $0x120] sm:$0xff]  ;;  %v60_v25 = vld [vmem:[%s2757_s1 + $0x128] sm:$0xff]  ;;  %v1767_v27 = vcombine.low %v64_v16, %v68_v17 }
   0x9   :  { %v1758_v28 = vcombine.high %v55_v22, %v59_v23  ;;  %v1760_v29 = vcombine.high %v56_v24, %v60_v25  ;;  %v47_v30 = vld [vmem:[%s2757_s1 + $0xc0] sm:$0xff]  ;;  %v48_v32 = vld [vmem:[%s2757_s1 + $0xc8] sm:$0xff]  ;;  %v1757_v34 = vcombine.low %v55_v22, %v59_v23  ;;  %v1759_v38 = vcombine.low %v56_v24, %v60_v25 }
   0xa   :  { %861 = vmatpush1.bf16.msra.mxu0 %v1773_v18  ;;  %902 = vmatpush1.bf16.msra.mxu1 %v1775_v19  ;;  %v51_v31 = vld [vmem:[%s2757_s1 + $0xe0] sm:$0xff]  ;;  %v52_v33 = vld [vmem:[%s2757_s1 + $0xe8] sm:$0xff] }
   0xb   :  { %862 = vmatprep.subr.bf16.mxu0 %v1766_v20  ;;  %903 = vmatprep.subr.bf16.mxu1 %v1768_v21  ;;  %v1750_v39 = vcombine.high %v47_v30, %v51_v31  ;;  %v1752_v40 = vcombine.high %v48_v32, %v52_v33  ;;  %v39_v41 = vld [vmem:[%s2757_s1 + $0x80] sm:$0xff]  ;;  %v40_v43 = vld [vmem:[%s2757_s1 + $0x88] sm:$0xff]  ;;  %v1749_v45 = vcombine.low %v47_v30, %v51_v31 }
   0xc   :  { %v43_v42 = vld [vmem:[%s2757_s1 + $0xa0] sm:$0xff]  ;;  %v44_v44 = vld [vmem:[%s2757_s1 + $0xa8] sm:$0xff]  ;;  %v1751_v48 = vcombine.low %v48_v32, %v52_v33 }
   0xd   :  { %v1742_v49 = vcombine.high %v39_v41, %v43_v42  ;;  %v1744_v50 = vcombine.high %v40_v43, %v44_v44  ;;  %v31_v51 = vld [vmem:[%s2757_s1 + $0x40] sm:$0xff]  ;;  %v32_v53 = vld [vmem:[%s2757_s1 + $0x48] sm:$0xff]  ;;  %v1741_v55 = vcombine.low %v39_v41, %v43_v42  ;;  %v1743_v57 = vcombine.low %v40_v43, %v44_v44 }
   0xe   :  { %863 = vmatpush1.bf16.msra.mxu0 %v1765_v26  ;;  %904 = vmatpush1.bf16.msra.mxu1 %v1767_v27  ;;  %v35_v52 = vld [vmem:[%s2757_s1 + $0x60] sm:$0xff]  ;;  %v36_v54 = vld [vmem:[%s2757_s1 + $0x68] sm:$0xff] }
   0xf   :  { %864 = vmatprep.subr.bf16.mxu0 %v1758_v28  ;;  %905 = vmatprep.subr.bf16.mxu1 %v1760_v29  ;;  %v1734_v58 = vcombine.high %v31_v51, %v35_v52  ;;  %v2218_v59 = vld.sshfl [vmem:[%s2756_s0] sm:$0x11 pattern:$0x75316420]  ;;  %v1736_v60 = vcombine.high %v32_v53, %v36_v54  ;;  %v24_v0 = vld [vmem:[%s2757_s1 + $0x8] sm:$0xff]  ;;  %v1733_v2 = vcombine.low %v31_v51, %v35_v52 }
  0x10   :  { %v23_v61 = vld [vmem:[%s2757_s1] sm:$0xff]  ;;  %v201_v63 = vcombine.high %v2218_v59, %v2218_v59  ;;  %v28_v1 = vld [vmem:[%s2757_s1 + $0x28] sm:$0xff]  ;;  %v1735_v4 = vcombine.low %v32_v53, %v36_v54 }
  0x11   :  { %v27_v62 = vld [vmem:[%s2757_s1 + $0x20] sm:$0xff]  ;;  %v1728_v6 = vcombine.high %v24_v0, %v28_v1  ;;  %v144_v9 = vld [vmem:[%s2757_s1 + $0x3c8] sm:$0xff]  ;;  %v1727_v12 = vcombine.low %v24_v0, %v28_v1 }
  0x12   :  { %865 = vmatpush1.bf16.msra.mxu0 %v1757_v34  ;;  %906 = vmatpush1.bf16.msra.mxu1 %v1759_v38  ;;  %v2235_v3 = vrot.slane %v201_v63, %v2213_v56  ;;  %v1726_v5 = vcombine.high %v23_v61, %v27_v62  ;;  %v143_v7 = vld [vmem:[%s2757_s1 + $0x3c0] sm:$0xff]  ;;  %v148_v10 = vld [vmem:[%s2757_s1 + $0x3e8] sm:$0xff]  ;;  %v1725_v11 = vcombine.low %v23_v61, %v27_v62 }
  0x13   :  { %866 = vmatprep.subr.bf16.mxu0 %v1750_v39  ;;  %907 = vmatprep.subr.bf16.mxu1 %v1752_v40  ;;  %v147_v8 = vld [vmem:[%s2757_s1 + $0x3e0] sm:$0xff]  ;;  %v1848_v14 = vcombine.high %v144_v9, %v148_v10  ;;  %v136_v17 = vld [vmem:[%s2757_s1 + $0x388] sm:$0xff]  ;;  %v1847_v20 = vcombine.low %v144_v9, %v148_v10 }
  0x14   :  { %890 = vmatprep.mubr.bf16.mxu0 %v2235_v3  ;;  %931 = vmatprep.mubr.bf16.mxu1 %v2235_v3  ;;  %v1846_v13 = vcombine.high %v143_v7, %v147_v8  ;;  %v135_v15 = vld [vmem:[%s2757_s1 + $0x380] sm:$0xff]  ;;  %v140_v18 = vld [vmem:[%s2757_s1 + $0x3a8] sm:$0xff]  ;;  %v1845_v19 = vcombine.low %v143_v7, %v147_v8  ;;  %v81_v8 = vld [vmem:[%s2757_s1 + $0x1d0] sm:$0xff] }
  0x15   :  { %v139_v16 = vld [vmem:[%s2757_s1 + $0x3a0] sm:$0xff]  ;;  %v1840_v22 = vcombine.high %v136_v17, %v140_v18  ;;  %v128_v25 = vld [vmem:[%s2757_s1 + $0x348] sm:$0xff]  ;;  %v1839_v28 = vcombine.low %v136_v17, %v140_v18 }
  0x16   :  { %867 = vmatpush1.bf16.msra.mxu0 %v1749_v45  ;;  %908 = vmatpush1.bf16.msra.mxu1 %v1751_v48  ;;  %v1838_v21 = vcombine.high %v135_v15, %v139_v16  ;;  %v127_v23 = vld [vmem:[%s2757_s1 + $0x340] sm:$0xff]  ;;  %v132_v26 = vld [vmem:[%s2757_s1 + $0x368] sm:$0xff]  ;;  %v1837_v27 = vcombine.low %v135_v15, %v139_v16  ;;  %v73_v16 = vld [vmem:[%s2757_s1 + $0x190] sm:$0xff] }
  0x17   :  { %868 = vmatprep.subr.bf16.mxu0 %v1742_v49  ;;  %909 = vmatprep.subr.bf16.mxu1 %v1744_v50  ;;  %v131_v24 = vld [vmem:[%s2757_s1 + $0x360] sm:$0xff]  ;;  %v1832_v30 = vcombine.high %v128_v25, %v132_v26  ;;  %v120_v33 = vld [vmem:[%s2757_s1 + $0x308] sm:$0xff]  ;;  %v1831_v36 = vcombine.low %v128_v25, %v132_v26  ;;  %v65_v25 = vld [vmem:[%s2757_s1 + $0x150] sm:$0xff] }
  0x18   :  { %v1830_v29 = vcombine.high %v127_v23, %v131_v24  ;;  %v119_v31 = vld [vmem:[%s2757_s1 + $0x300] sm:$0xff]  ;;  %v124_v34 = vld [vmem:[%s2757_s1 + $0x328] sm:$0xff]  ;;  %v1829_v35 = vcombine.low %v127_v23, %v131_v24  ;;  %v78_v23 = vld [vmem:[%s2757_s1 + $0x1b8] sm:$0xff] }
  0x19   :  { %v123_v32 = vld [vmem:[%s2757_s1 + $0x320] sm:$0xff]  ;;  %v1824_v38 = vcombine.high %v120_v33, %v124_v34  ;;  %v112_v41 = vld [vmem:[%s2757_s1 + $0x2c8] sm:$0xff]  ;;  %v1823_v45 = vcombine.low %v120_v33, %v124_v34 }
  0x1a   :  { %869 = vmatpush1.bf16.msra.mxu0 %v1741_v55  ;;  %910 = vmatpush1.bf16.msra.mxu1 %v1743_v57  ;;  %v1822_v37 = vcombine.high %v119_v31, %v123_v32  ;;  %v111_v39 = vld [vmem:[%s2757_s1 + $0x2c0] sm:$0xff]  ;;  %v116_v42 = vld [vmem:[%s2757_s1 + $0x2e8] sm:$0xff]  ;;  %v1821_v43 = vcombine.low %v119_v31, %v123_v32  ;;  %v57_v31 = vld [vmem:[%s2757_s1 + $0x110] sm:$0xff] }
  0x1b   :  { %870 = vmatprep.subr.bf16.mxu0 %v1734_v58  ;;  %911 = vmatprep.subr.bf16.mxu1 %v1736_v60  ;;  %v115_v40 = vld [vmem:[%s2757_s1 + $0x2e0] sm:$0xff]  ;;  %v1816_v49 = vcombine.high %v112_v41, %v116_v42  ;;  %v104_v50 = vld [vmem:[%s2757_s1 + $0x288] sm:$0xff]  ;;  %v1815_v54 = vcombine.low %v112_v41, %v116_v42  ;;  %v61_v32 = vld [vmem:[%s2757_s1 + $0x130] sm:$0xff] }
  0x1c   :  { %v103_v44 = vld [vmem:[%s2757_s1 + $0x280] sm:$0xff]  ;;  %v1814_v47 = vcombine.high %v111_v39, %v115_v40  ;;  %v108_v51 = vld [vmem:[%s2757_s1 + $0x2a8] sm:$0xff]  ;;  %v1813_v52 = vcombine.low %v111_v39, %v115_v40  ;;  %v49_v39 = vld [vmem:[%s2757_s1 + $0xd0] sm:$0xff]  ;;  %v1762_v42 = vcombine.high %v57_v31, %v61_v32 }
  0x1d   :  { %v107_v48 = vld [vmem:[%s2757_s1 + $0x2a0] sm:$0xff]  ;;  %v1808_v58 = vcombine.high %v104_v50, %v108_v51  ;;  %v96_v60 = vld [vmem:[%s2757_s1 + $0x248] sm:$0xff]  ;;  %v1807_v0 = vcombine.low %v104_v50, %v108_v51  ;;  %v53_v40 = vld [vmem:[%s2757_s1 + $0xf0] sm:$0xff] }
  0x1e   :  { %871 = vmatpush1.bf16.msra.mxu0 %v1733_v2  ;;  %912 = vmatpush1.bf16.msra.mxu1 %v1735_v4  ;;  %v95_v53 = vld [vmem:[%s2757_s1 + $0x240] sm:$0xff]  ;;  %v1806_v55 = vcombine.high %v103_v44, %v107_v48  ;;  %v100_v61 = vld [vmem:[%s2757_s1 + $0x268] sm:$0xff]  ;;  %v1805_v62 = vcombine.low %v103_v44, %v107_v48  ;;  %v45_v48 = vld [vmem:[%s2757_s1 + $0xb0] sm:$0xff]  ;;  %v1754_v50 = vcombine.high %v49_v39, %v53_v40 }
  0x1f   :  { %872 = vmatprep.subr.bf16.mxu0 %v1726_v5  ;;  %913 = vmatprep.subr.bf16.mxu1 %v1728_v6  ;;  %v99_v57 = vld [vmem:[%s2757_s1 + $0x260] sm:$0xff]  ;;  %v1800_v4 = vcombine.high %v96_v60, %v100_v61  ;;  %v88_v5 = vld [vmem:[%s2757_s1 + $0x208] sm:$0xff]  ;;  %v1799_v9 = vcombine.low %v96_v60, %v100_v61  ;;  %v42_v51 = vld [vmem:[%s2757_s1 + $0x98] sm:$0xff] }
  0x20   :  { %v87_v63 = vld [vmem:[%s2757_s1 + $0x200] sm:$0xff]  ;;  %v1798_v1 = vcombine.high %v95_v53, %v99_v57  ;;  %v92_v6 = vld [vmem:[%s2757_s1 + $0x228] sm:$0xff]  ;;  %v1797_v7 = vcombine.low %v95_v53, %v99_v57  ;;  %v37_v57 = vld [vmem:[%s2757_s1 + $0x70] sm:$0xff] }
  0x21   :  { %v91_v2 = vld [vmem:[%s2757_s1 + $0x220] sm:$0xff]  ;;  %v1791_v17 = vcombine.low %v88_v5, %v92_v6  ;;  %v34_v61 = vld [vmem:[%s2757_s1 + $0x58] sm:$0xff] }
  0x22   :  { %873 = vmatpush1.bf16.msra.mxu0 %v1725_v11  ;;  %914 = vmatpush1.bf16.msra.mxu1 %v1727_v12  ;;  %v1790_v10 = vcombine.high %v87_v63, %v91_v2  ;;  %v85_v11 = vld [vmem:[%s2757_s1 + $0x1f0] sm:$0xff]  ;;  %v1792_v12 = vcombine.high %v88_v5, %v92_v6  ;;  %v1789_v15 = vcombine.low %v87_v63, %v91_v2  ;;  %v26_v6 = vld [vmem:[%s2757_s1 + $0x18] sm:$0xff] }
  0x23   :  { %874 = vmatprep.subr.bf16.mxu0 %v1846_v13  ;;  %915 = vmatprep.subr.bf16.mxu1 %v1848_v14  ;;  %v82_v13 = vld [vmem:[%s2757_s1 + $0x1d8] sm:$0xff]  ;;  %v1786_v18 = vcombine.high %v81_v8, %v85_v11  ;;  %v1785_v24 = vcombine.low %v81_v8, %v85_v11  ;;  %v29_v2 = vld [vmem:[%s2757_s1 + $0x30] sm:$0xff] }
  0x24   :  { %v86_v14 = vld [vmem:[%s2757_s1 + $0x1f8] sm:$0xff]  ;;  %v149_v11 = vld [vmem:[%s2757_s1 + $0x3f0] sm:$0xff] }
  0x25   :  { %v1787_v26 = vcombine.low %v82_v13, %v86_v14 }
  0x26   :  { %875 = vmatpush2.bf16.msra.mxu0 %v1845_v19  ;;  %916 = vmatpush2.bf16.msra.mxu1 %v1847_v20  ;;  %v77_v19 = vld [vmem:[%s2757_s1 + $0x1b0] sm:$0xff]  ;;  %v1788_v20 = vcombine.high %v82_v13, %v86_v14  ;;  %v146_v14 = vld [vmem:[%s2757_s1 + $0x3d8] sm:$0xff] }
  0x27   :  { %876 = vmatprep.subr.bf16.mxu0 %v1838_v21  ;;  %917 = vmatprep.subr.bf16.mxu1 %v1840_v22  ;;  %v74_v21 = vld [vmem:[%s2757_s1 + $0x198] sm:$0xff]  ;;  %v2358_v22 = vrot.slane %v2218_v59, %v2213_v56 }
  0x28   :  { %v1780_v56 = vcombine.high %v74_v21, %v78_v23  ;;  %v66_v59 = vld [vmem:[%s2757_s1 + $0x158] sm:$0xff]  ;;  %v1779_v33 = vcombine.low %v74_v21, %v78_v23  ;;  %v137_v21 = vld [vmem:[%s2757_s1 + $0x390] sm:$0xff] }
  0x29   :  { %v141_v23 = vld [vmem:[%s2757_s1 + $0x3b0] sm:$0xff] }
  0x2a   :  { %877 = vmatpush2.bf16.msra.mxu0 %v1837_v27  ;;  %918 = vmatpush2.bf16.msra.mxu1 %v1839_v28  ;;  %v1778_v27 = vcombine.high %v73_v16, %v77_v19  ;;  %v69_v28 = vld [vmem:[%s2757_s1 + $0x170] sm:$0xff] }
  0x2b   :  { %878 = vmatprep.subr.bf16.mxu0 %v1830_v29  ;;  %919 = vmatprep.subr.bf16.mxu1 %v1832_v30  ;;  %v70_v29 = vld [vmem:[%s2757_s1 + $0x178] sm:$0xff]  ;;  %v1777_v30 = vcombine.low %v73_v16, %v77_v19  ;;  %v1770_v34 = vcombine.high %v65_v25, %v69_v28 }
  0x2c   :  { %v1771_v41 = vcombine.low %v66_v59, %v70_v29 }
  0x2e   :  { %879 = vmatpush2.bf16.msra.mxu0 %v1829_v35  ;;  %920 = vmatpush2.bf16.msra.mxu1 %v1831_v36  ;;  %v58_v35 = vld [vmem:[%s2757_s1 + $0x118] sm:$0xff] }
  0x2f   :  { %880 = vmatprep.subr.bf16.mxu0 %v1822_v37  ;;  %921 = vmatprep.subr.bf16.mxu1 %v1824_v38  ;;  %v62_v36 = vld [vmem:[%s2757_s1 + $0x138] sm:$0xff]  ;;  %v1772_v37 = vcombine.high %v66_v59, %v70_v29  ;;  %v1769_v38 = vcombine.low %v65_v25, %v69_v28 }
  0x30   :  { %v1764_v44 = vcombine.high %v58_v35, %v62_v36 }
  0x32   :  { %881 = vmatpush2.bf16.msra.mxu0 %v1821_v43  ;;  %922 = vmatpush2.bf16.msra.mxu1 %v1823_v45  ;;  %v50_v43 = vld [vmem:[%s2757_s1 + $0xd8] sm:$0xff]  ;;  %v1761_v45 = vcombine.low %v57_v31, %v61_v32 }
  0x33   :  { %882 = vmatprep.subr.bf16.mxu0 %v1814_v47  ;;  %923 = vmatprep.subr.bf16.mxu1 %v1816_v49  ;;  %v41_v47 = vld [vmem:[%s2757_s1 + $0x90] sm:$0xff]  ;;  %v1763_v49 = vcombine.low %v58_v35, %v62_v36 }
  0x34   :  { %v1746_v60 = vcombine.high %v41_v47, %v45_v48 }
  0x36   :  { %883 = vmatpush2.bf16.msra.mxu0 %v1813_v52  ;;  %924 = vmatpush2.bf16.msra.mxu1 %v1815_v54  ;;  %v46_v52 = vld [vmem:[%s2757_s1 + $0xb8] sm:$0xff]  ;;  %v1753_v54 = vcombine.low %v49_v39, %v53_v40 }
  0x37   :  { %884 = vmatprep.subr.bf16.mxu0 %v1806_v55  ;;  %925 = vmatprep.subr.bf16.mxu1 %v1808_v58  ;;  %v33_v55 = vld [vmem:[%s2757_s1 + $0x50] sm:$0xff]  ;;  %v1748_v63 = vcombine.high %v42_v51, %v46_v52 }
  0x38   :  { %v1738_v5 = vcombine.high %v33_v55, %v37_v57 }
  0x3a   :  { %885 = vmatpush2.bf16.msra.mxu0 %v1805_v62  ;;  %926 = vmatpush2.bf16.msra.mxu1 %v1807_v0  ;;  %v38_v62 = vld [vmem:[%s2757_s1 + $0x78] sm:$0xff]  ;;  %v1745_v0 = vcombine.low %v41_v47, %v45_v48 }
  0x3b   :  { %886 = vmatprep.subr.bf16.mxu0 %v1798_v1  ;;  %927 = vmatprep.subr.bf16.mxu1 %v1800_v4  ;;  %v25_v1 = vld [vmem:[%s2757_s1 + $0x10] sm:$0xff]  ;;  %v1747_v4 = vcombine.low %v42_v51, %v46_v52  ;;  %v1740_v8 = vcombine.high %v34_v61, %v38_v62 }
  0x3c   :  { %v1730_v13 = vcombine.high %v25_v1, %v29_v2 }
  0x3e   :  { %887 = vmatpush2.bf16.msra.mxu0 %v1797_v7  ;;  %928 = vmatpush2.bf16.msra.mxu1 %v1799_v9  ;;  %v30_v7 = vld [vmem:[%s2757_s1 + $0x38] sm:$0xff]  ;;  %v1737_v9 = vcombine.low %v33_v55, %v37_v57 }
  0x3f   :  { %888 = vmatprep.subr.bf16.mxu0 %v1790_v10  ;;  %929 = vmatprep.subr.bf16.mxu1 %v1792_v12  ;;  %v145_v10 = vld [vmem:[%s2757_s1 + $0x3d0] sm:$0xff]  ;;  %v1739_v12 = vcombine.low %v34_v61, %v38_v62  ;;  %v1732_v16 = vcombine.high %v26_v6, %v30_v7 }
  0x40   :  { %v1850_v19 = vcombine.high %v145_v10, %v149_v11 }
  0x42   :  { %889 = vmatpush2.bf16.msra.mxu0 %v1789_v15  ;;  %930 = vmatpush2.bf16.msra.mxu1 %v1791_v17  ;;  %v150_v15 = vld [vmem:[%s2757_s1 + $0x3f8] sm:$0xff]  ;;  %v1729_v17 = vcombine.low %v25_v1, %v29_v2 }
  0x43   :  { %940 = vmatprep.subr.bf16.mxu0 %v1786_v18  ;;  %981 = vmatprep.subr.bf16.mxu1 %v1788_v20  ;;  %v1731_v18 = vcombine.low %v26_v6, %v30_v7  ;;  %v1852_v20 = vcombine.high %v146_v14, %v150_v15 }
  0x45   :  { %891 = vmatmul.mubr.bf16.vlgmr.msra.gmra.mxu0 %v2358_v22  ;;  %932 = vmatmul.mubr.bf16.vlgmr.msra.gmra.mxu1 %v2358_v22 }
  0x46   :  { %941 = vmatpush1.bf16.msra.mxu0 %v1785_v24  ;;  %982 = vmatpush1.bf16.msra.mxu1 %v1787_v26 }
  0x47   :  { %942 = vmatprep.subr.bf16.mxu0 %v1778_v27  ;;  %983 = vmatprep.subr.bf16.mxu1 %v1780_v56 }
  0x48   :  { %972 = vmatprep.mubr.bf16.mxu0 %v2235_v3  ;;  %1013 = vmatprep.mubr.bf16.mxu1 %v2235_v3  ;;  %v54_v3 = vld [vmem:[%s2757_s1 + $0xf8] sm:$0xff] }
  0x49   :  { %v1756_v53 = vcombine.high %v50_v43, %v54_v3  ;;  %v1755_v58 = vcombine.low %v50_v43, %v54_v3 }
  0x4a   :  { %943 = vmatpush1.bf16.msra.mxu0 %v1777_v30  ;;  %984 = vmatpush1.bf16.msra.mxu1 %v1779_v33 }
  0x4b   :  { %944 = vmatprep.subr.bf16.mxu0 %v1770_v34  ;;  %985 = vmatprep.subr.bf16.mxu1 %v1772_v37 }
  0x4e   :  { %945 = vmatpush1.bf16.msra.mxu0 %v1769_v38  ;;  %986 = vmatpush1.bf16.msra.mxu1 %v1771_v41 }
  0x4f   :  { %946 = vmatprep.subr.bf16.mxu0 %v1762_v42  ;;  %987 = vmatprep.subr.bf16.mxu1 %v1764_v44 }
  0x52   :  { %947 = vmatpush1.bf16.msra.mxu0 %v1761_v45  ;;  %988 = vmatpush1.bf16.msra.mxu1 %v1763_v49 }
  0x53   :  { %948 = vmatprep.subr.bf16.mxu0 %v1754_v50  ;;  %989 = vmatprep.subr.bf16.mxu1 %v1756_v53 }
  0x56   :  { %949 = vmatpush1.bf16.msra.mxu0 %v1753_v54  ;;  %990 = vmatpush1.bf16.msra.mxu1 %v1755_v58 }
  0x57   :  { %950 = vmatprep.subr.bf16.mxu0 %v1746_v60  ;;  %991 = vmatprep.subr.bf16.mxu1 %v1748_v63 }
  0x5a   :  { %951 = vmatpush1.bf16.msra.mxu0 %v1745_v0  ;;  %992 = vmatpush1.bf16.msra.mxu1 %v1747_v4 }
  0x5b   :  { %952 = vmatprep.subr.bf16.mxu0 %v1738_v5  ;;  %993 = vmatprep.subr.bf16.mxu1 %v1740_v8 }
  0x5e   :  { %953 = vmatpush1.bf16.msra.mxu0 %v1737_v9  ;;  %994 = vmatpush1.bf16.msra.mxu1 %v1739_v12 }
  0x5f   :  { %954 = vmatprep.subr.bf16.mxu0 %v1730_v13  ;;  %995 = vmatprep.subr.bf16.mxu1 %v1732_v16 }
  0x60   :  { %10 = vsyncpa [#allocation3], 0  ;;  %v138_v24 = vld [vmem:[%s2757_s1 + $0x398] sm:$0xff]  ;;  %v1849_v26 = vcombine.low %v145_v10, %v149_v11  ;;  %v1851_v27 = vcombine.low %v146_v14, %v150_v15  ;;  %v1842_v28 = vcombine.high %v137_v21, %v141_v23  ;;  %v129_v59 = vld [vmem:[%s2757_s1 + $0x350] sm:$0xff]  ;;  %v1841_v32 = vcombine.low %v137_v21, %v141_v23  ;;  %s2095_s11 = smov [#allocation2]  }
  0x61   :  { %v142_v25 = vld [vmem:[%s2757_s1 + $0x3b8] sm:$0xff]  ;;  %v133_v29 = vld [vmem:[%s2757_s1 + $0x370] sm:$0xff]  ;;  %s1716_s12 = sshll.u32 %s2095_s11, 4  ;;  %s1717_s12 = int_to_ptr.vmem [resolvable:$true] %s1716_s12 }
  0x62   :  { %955 = vmatpush1.bf16.msra.mxu0 %v1729_v17  ;;  %996 = vmatpush1.bf16.msra.mxu1 %v1731_v18  ;;  %v1844_v56 = vcombine.high %v138_v24, %v142_v25  ;;  %v130_v30 = vld [vmem:[%s2757_s1 + $0x358] sm:$0xff]  ;;  %v1843_v33 = vcombine.low %v138_v24, %v142_v25  ;;  %v1834_v34 = vcombine.high %v129_v59, %v133_v29  ;;  %v121_v36 = vld [vmem:[%s2757_s1 + $0x310] sm:$0xff]  ;;  %p2077_p1 = scmp.lt.s32.totalorder %s1717_s12, %s1717_s12 }
  0x63   :  { %956 = vmatprep.subr.bf16.mxu0 %v1850_v19  ;;  %997 = vmatprep.subr.bf16.mxu1 %v1852_v20  ;;  %v134_v31 = vld [vmem:[%s2757_s1 + $0x378] sm:$0xff]  ;;  %v125_v37 = vld [vmem:[%s2757_s1 + $0x330] sm:$0xff]  ;;  %v1833_v40 = vcombine.low %v129_v59, %v133_v29  ;;  %v2021_v59 = vld [vmem:[%s2759_s3 + $0xe0] sm:$0xff]  }
  0x64   :  { %v1836_v35 = vcombine.high %v130_v30, %v134_v31  ;;  %v122_v38 = vld [vmem:[%s2757_s1 + $0x318] sm:$0xff]  ;;  %v1835_v41 = vcombine.low %v130_v30, %v134_v31  ;;  %v1826_v42 = vcombine.high %v121_v36, %v125_v37  ;;  %v113_v3 = vld [vmem:[%s2757_s1 + $0x2d0] sm:$0xff]  ;;  %v1825_v48 = vcombine.low %v121_v36, %v125_v37  ;;  %v2022_v29 = vld [vmem:[%s2759_s3 + $0x20] sm:$0xff]  }
  0x65   :  { %v126_v39 = vld [vmem:[%s2757_s1 + $0x338] sm:$0xff]  ;;  %v117_v44 = vld [vmem:[%s2757_s1 + $0x2f0] sm:$0xff]  ;;  %v2023_v30 = vld [vmem:[%s2759_s3 + $0xa0] sm:$0xff]  }
  0x66   :  { %957 = vmatpush2.bf16.msra.mxu0 %v1849_v26  ;;  %998 = vmatpush2.bf16.msra.mxu1 %v1851_v27  ;;  %v1828_v43 = vcombine.high %v122_v38, %v126_v39  ;;  %v114_v45 = vld [vmem:[%s2757_s1 + $0x2d8] sm:$0xff]  ;;  %v1827_v49 = vcombine.low %v122_v38, %v126_v39  ;;  %v1818_v50 = vcombine.high %v113_v3, %v117_v44  ;;  %v105_v52 = vld [vmem:[%s2757_s1 + $0x290] sm:$0xff]  ;;  %v2016_v26 = vld [vmem:[%s2759_s3 + $0x68] sm:$0xff]  }
  0x67   :  { %958 = vmatprep.subr.bf16.mxu0 %v1842_v28  ;;  %999 = vmatprep.subr.bf16.mxu1 %v1844_v56  ;;  %v118_v47 = vld [vmem:[%s2757_s1 + $0x2f8] sm:$0xff]  ;;  %v109_v53 = vld [vmem:[%s2757_s1 + $0x2b0] sm:$0xff]  ;;  %v1817_v57 = vcombine.low %v113_v3, %v117_v44  ;;  %v2018_v27 = vld [vmem:[%s2759_s3 + $0x28] sm:$0xff]  }
  0x68   :  { %v1820_v51 = vcombine.high %v114_v45, %v118_v47  ;;  %v106_v54 = vld [vmem:[%s2757_s1 + $0x298] sm:$0xff]  ;;  %v1819_v58 = vcombine.low %v114_v45, %v118_v47  ;;  %v1810_v60 = vcombine.high %v105_v52, %v109_v53  ;;  %v97_v62 = vld [vmem:[%s2757_s1 + $0x250] sm:$0xff]  ;;  %v1809_v2 = vcombine.low %v105_v52, %v109_v53  ;;  %v2019_v28 = vld [vmem:[%s2759_s3 + $0xa8] sm:$0xff]  }
  0x69   :  { %v110_v55 = vld [vmem:[%s2757_s1 + $0x2b8] sm:$0xff]  ;;  %v101_v63 = vld [vmem:[%s2757_s1 + $0x270] sm:$0xff]  ;;  %v2020_v56 = vld [vmem:[%s2759_s3 + $0x60] sm:$0xff]   ;;  %v159_v52 = vsub.s32 1, %v2198_v46  ;;  %v167_v53 = vsub.s32 3, %v2198_v46 }
  0x6a   :  { %959 = vmatpush2.bf16.msra.mxu0 %v1841_v32  ;;  %1000 = vmatpush2.bf16.msra.mxu1 %v1843_v33  ;;  %v1812_v61 = vcombine.high %v106_v54, %v110_v55  ;;  %v98_v0 = vld [vmem:[%s2757_s1 + $0x258] sm:$0xff]  ;;  %v1811_v4 = vcombine.low %v106_v54, %v110_v55  ;;  %v1802_v5 = vcombine.high %v97_v62, %v101_v63  ;;  %v89_v7 = vld [vmem:[%s2757_s1 + $0x210] sm:$0xff]  ;;  %v2032_v39 = vld [vmem:[%s2759_s3 + $0x48] sm:$0xff]  }
  0x6b   :  { %960 = vmatprep.subr.bf16.mxu0 %v1834_v34  ;;  %1001 = vmatprep.subr.bf16.mxu1 %v1836_v35  ;;  %v102_v1 = vld [vmem:[%s2757_s1 + $0x278] sm:$0xff]  ;;  %v93_v8 = vld [vmem:[%s2757_s1 + $0x230] sm:$0xff]  ;;  %v1801_v11 = vcombine.low %v97_v62, %v101_v63  ;;  %v2037_v3 = vld [vmem:[%s2759_s3 + $0xc0] sm:$0xff]  }
  0x6c   :  { %v1804_v6 = vcombine.high %v98_v0, %v102_v1  ;;  %v90_v9 = vld [vmem:[%s2757_s1 + $0x218] sm:$0xff]  ;;  %v1803_v12 = vcombine.low %v98_v0, %v102_v1  ;;  %v1794_v13 = vcombine.high %v89_v7, %v93_v8  ;;  %v1793_v15 = vcombine.low %v89_v7, %v93_v8  ;;  %v2012_v21 = vld [vmem:[%s2759_s3 + $0x70] sm:$0xff]   ;;  %v2038_v44 = vld [vmem:[%s2759_s3] sm:$0xff]  }
  0x6d   :  { %v94_v10 = vld [vmem:[%s2757_s1 + $0x238] sm:$0xff]  ;;  %v2013_v23 = vld [vmem:[%s2759_s3 + $0xf0] sm:$0xff]   ;;  %v2039_v45 = vld [vmem:[%s2759_s3 + $0x80] sm:$0xff]  }
  0x6e   :  { %961 = vmatpush2.bf16.msra.mxu0 %v1833_v40  ;;  %1002 = vmatpush2.bf16.msra.mxu1 %v1835_v41  ;;  %v1796_v14 = vcombine.high %v90_v9, %v94_v10  ;;  %v1795_v16 = vcombine.low %v90_v9, %v94_v10  ;;  %v2008_v17 = vld [vmem:[%s2759_s3 + $0x78] sm:$0xff]   ;;  %v2014_v24 = vld [vmem:[%s2759_s3 + $0x30] sm:$0xff]   ;;  %v2033_v40 = vld [vmem:[%s2759_s3 + $0xc8] sm:$0xff]  }
  0x6f   :  { %962 = vmatprep.subr.bf16.mxu0 %v1826_v42  ;;  %1003 = vmatprep.subr.bf16.mxu1 %v1828_v43  ;;  %v2009_v18 = vld [vmem:[%s2759_s3 + $0xf8] sm:$0xff]   ;;  %v2015_v25 = vld [vmem:[%s2759_s3 + $0xb0] sm:$0xff]   ;;  %v2034_v41 = vld [vmem:[%s2759_s3 + $0x8] sm:$0xff]  }
  0x70   :  { %v2010_v19 = vld [vmem:[%s2759_s3 + $0x38] sm:$0xff]   ;;  %v2028_v35 = vld [vmem:[%s2759_s3 + $0x50] sm:$0xff]   ;;  %v2035_v42 = vld [vmem:[%s2759_s3 + $0x88] sm:$0xff]  }
  0x71   :  { %v2011_v20 = vld [vmem:[%s2759_s3 + $0xb8] sm:$0xff]   ;;  %v2029_v36 = vld [vmem:[%s2759_s3 + $0xd0] sm:$0xff]   ;;  %v2036_v43 = vld [vmem:[%s2759_s3 + $0x40] sm:$0xff]  }
  0x72   :  { %963 = vmatpush2.bf16.msra.mxu0 %v1825_v48  ;;  %1004 = vmatpush2.bf16.msra.mxu1 %v1827_v49  ;;  %v2024_v31 = vld [vmem:[%s2759_s3 + $0x58] sm:$0xff]   ;;  %v2030_v37 = vld [vmem:[%s2759_s3 + $0x10] sm:$0xff]   ;;  %v155_v49 = vsub.s32 0, %v2198_v46 }
  0x73   :  { %964 = vmatprep.subr.bf16.mxu0 %v1818_v50  ;;  %1005 = vmatprep.subr.bf16.mxu1 %v1820_v51  ;;  %v2025_v32 = vld [vmem:[%s2759_s3 + $0xd8] sm:$0xff]   ;;  %v2031_v38 = vld [vmem:[%s2759_s3 + $0x90] sm:$0xff]   ;;  %v163_v50 = vsub.s32 2, %v2198_v46  ;;  %v2644_v51 = vld [vmem:[%s2758_s2] sm:$0xff] }
  0x74   :  { %v2026_v33 = vld [vmem:[%s2759_s3 + $0x18] sm:$0xff]   ;;  %v156_v54 = vrot.slane %v2644_v51, %v155_v49 }
  0x75   :  { %v2027_v34 = vld [vmem:[%s2759_s3 + $0x98] sm:$0xff]   ;;  %v164_v55 = vrot.slane %v2644_v51, %v163_v50 }
  0x76   :  { %965 = vmatpush2.bf16.msra.mxu0 %v1817_v57  ;;  %1006 = vmatpush2.bf16.msra.mxu1 %v1819_v58  ;;  %v2040_v47 = vld [vmem:[%s2759_s3 + $0x178] sm:$0xff]   ;;  %v160_v57 = vrot.slane %v2644_v51, %v159_v52 }
  0x77   :  { %966 = vmatprep.subr.bf16.mxu0 %v1810_v60  ;;  %1007 = vmatprep.subr.bf16.mxu1 %v1812_v61  ;;  %v2041_v48 = vld [vmem:[%s2759_s3 + $0x1f8] sm:$0xff]   ;;  %v168_v60 = vrot.slane %v2644_v51, %v167_v53 }
  0x78   :  { %v2042_v9 = vld [vmem:[%s2759_s3 + $0x138] sm:$0xff]  }
  0x7a   :  { %967 = vmatpush2.bf16.msra.mxu0 %v1809_v2  ;;  %1008 = vmatpush2.bf16.msra.mxu1 %v1811_v4 }
  0x7b   :  { %968 = vmatprep.subr.bf16.mxu0 %v1802_v5  ;;  %1009 = vmatprep.subr.bf16.mxu1 %v1804_v6 }
  0x7e   :  { %969 = vmatpush2.bf16.msra.mxu0 %v1801_v11  ;;  %1010 = vmatpush2.bf16.msra.mxu1 %v1803_v12 }
  0x7f   :  { %970 = vmatprep.subr.bf16.mxu0 %v1794_v13  ;;  %1011 = vmatprep.subr.bf16.mxu1 %v1796_v14  ;;  %v2043_v13 = vld [vmem:[%s2759_s3 + $0x1b8] sm:$0xff]   ;;  %v2044_v14 = vld [vmem:[%s2759_s3 + $0x170] sm:$0xff]  }
  0x82   :  { %971 = vmatpush2.bf16.msra.mxu0 %v1793_v15  ;;  %1012 = vmatpush2.bf16.msra.mxu1 %v1795_v16  ;;  %v2045_v16 = vld [vmem:[%s2759_s3 + $0x1f0] sm:$0xff]  }
  0x83   :  { %1918 = vmatprep.subr.bf16.mxu0 %v2008_v17  ;;  %1940 = vmatprep.subr.bf16.mxu1 %v2009_v18  ;;  %v2046_v17 = vld [vmem:[%s2759_s3 + $0x130] sm:$0xff]  }
  0x84   :  { %v2047_v18 = vld [vmem:[%s2759_s3 + $0x1b0] sm:$0xff]  }
  0x85   :  { %973 = vmatmul.mubr.bf16.vlgmr.msra.gmra.mxu0 %v2358_v22  ;;  %1014 = vmatmul.mubr.bf16.vlgmr.msra.gmra.mxu1 %v2358_v22  ;;  %v2017_v22 = vld [vmem:[%s2759_s3 + $0xe8] sm:$0xff]  }
  0x86   :  { %1919 = vmatpush3.bf16.msra.mxu0 %v2010_v19  ;;  %1941 = vmatpush3.bf16.msra.mxu1 %v2011_v20  ;;  %v2048_v19 = vld [vmem:[%s2759_s3 + $0x168] sm:$0xff]  }
  0x87   :  { %1920 = vmatprep.subr.bf16.mxu0 %v2012_v21  ;;  %1942 = vmatprep.subr.bf16.mxu1 %v2013_v23  ;;  %v2049_v20 = vld [vmem:[%s2759_s3 + $0x1e8] sm:$0xff]  }
  0x88   :  { %v2050_v21 = vld [vmem:[%s2759_s3 + $0x128] sm:$0xff]  }
  0x89   :  { %v2051_v23 = vld [vmem:[%s2759_s3 + $0x1a8] sm:$0xff]  }
  0x8a   :  { %1921 = vmatpush3.bf16.msra.mxu0 %v2014_v24  ;;  %1943 = vmatpush3.bf16.msra.mxu1 %v2015_v25  ;;  %v2052_v24 = vld [vmem:[%s2759_s3 + $0x160] sm:$0xff]  }
  0x8b   :  { %1922 = vmatprep.subr.bf16.mxu0 %v2016_v26  ;;  %1944 = vmatprep.subr.bf16.mxu1 %v2017_v22  ;;  %v2053_v25 = vld [vmem:[%s2759_s3 + $0x1e0] sm:$0xff]  }
  0x8c   :  { %v2054_v26 = vld [vmem:[%s2759_s3 + $0x120] sm:$0xff]  }
  0x8d   :  { %v2055_v22 = vld [vmem:[%s2759_s3 + $0x1a0] sm:$0xff]  }
  0x8e   :  { %1923 = vmatpush3.bf16.msra.mxu0 %v2018_v27  ;;  %1945 = vmatpush3.bf16.msra.mxu1 %v2019_v28  ;;  %v2056_v27 = vld [vmem:[%s2759_s3 + $0x158] sm:$0xff]  }
  0x8f   :  { %1924 = vmatprep.subr.bf16.mxu0 %v2020_v56  ;;  %1946 = vmatprep.subr.bf16.mxu1 %v2021_v59  ;;  %v2057_v28 = vld [vmem:[%s2759_s3 + $0x1d8] sm:$0xff]  }
  0x90   :  { %v2058_v56 = vld [vmem:[%s2759_s3 + $0x118] sm:$0xff]  }
  0x91   :  { %v2059_v59 = vld [vmem:[%s2759_s3 + $0x198] sm:$0xff]  }
  0x92   :  { %1925 = vmatpush3.bf16.msra.mxu0 %v2022_v29  ;;  %1947 = vmatpush3.bf16.msra.mxu1 %v2023_v30  ;;  %v2060_v29 = vld [vmem:[%s2759_s3 + $0x150] sm:$0xff]  }
  0x93   :  { %1926 = vmatprep.subr.bf16.mxu0 %v2024_v31  ;;  %1948 = vmatprep.subr.bf16.mxu1 %v2025_v32  ;;  %v2061_v30 = vld [vmem:[%s2759_s3 + $0x1d0] sm:$0xff]  }
  0x94   :  { %v2062_v31 = vld [vmem:[%s2759_s3 + $0x110] sm:$0xff]  }
  0x95   :  { %v2063_v32 = vld [vmem:[%s2759_s3 + $0x190] sm:$0xff]  }
  0x96   :  { %1927 = vmatpush3.bf16.msra.mxu0 %v2026_v33  ;;  %1949 = vmatpush3.bf16.msra.mxu1 %v2027_v34  ;;  %v2064_v33 = vld [vmem:[%s2759_s3 + $0x148] sm:$0xff]  }
  0x97   :  { %1928 = vmatprep.subr.bf16.mxu0 %v2028_v35  ;;  %1950 = vmatprep.subr.bf16.mxu1 %v2029_v36  ;;  %v2065_v34 = vld [vmem:[%s2759_s3 + $0x1c8] sm:$0xff]  }
  0x98   :  { %v2066_v35 = vld [vmem:[%s2759_s3 + $0x108] sm:$0xff]  }
  0x99   :  { %v2067_v36 = vld [vmem:[%s2759_s3 + $0x188] sm:$0xff]  }
  0x9a   :  { %1929 = vmatpush3.bf16.msra.mxu0 %v2030_v37  ;;  %1951 = vmatpush3.bf16.msra.mxu1 %v2031_v38  ;;  %v2068_v37 = vld [vmem:[%s2759_s3 + $0x140] sm:$0xff]  }
  0x9b   :  { %1930 = vmatprep.subr.bf16.mxu0 %v2032_v39  ;;  %1952 = vmatprep.subr.bf16.mxu1 %v2033_v40  ;;  %v2069_v38 = vld [vmem:[%s2759_s3 + $0x1c0] sm:$0xff]  }
  0x9c   :  { %v2070_v39 = vld [vmem:[%s2759_s3 + $0x100] sm:$0xff]  }
  0x9d   :  { %v2071_v40 = vld [vmem:[%s2759_s3 + $0x180] sm:$0xff]  }
  0x9e   :  { %1931 = vmatpush3.bf16.msra.mxu0 %v2034_v41  ;;  %1953 = vmatpush3.bf16.msra.mxu1 %v2035_v42  ;;  %v171_v41 = vsub.s32 4, %v2198_v46  ;;  %v179_v42 = vsub.s32 6, %v2198_v46 }
  0x9f   :  { %1932 = vmatprep.subr.bf16.mxu0 %v2036_v43  ;;  %1954 = vmatprep.subr.bf16.mxu1 %v2037_v3  ;;  %v175_v43 = vsub.s32 5, %v2198_v46  ;;  %v183_v3 = vsub.s32 7, %v2198_v46 }
  0xa1   :  { %v184_v49 = vrot.slane %v2644_v51, %v183_v3 }
  0xa2   :  { %1933 = vmatpush3.bf16.msra.mxu0 %v2038_v44  ;;  %1955 = vmatpush3.bf16.msra.mxu1 %v2039_v45  ;;  %v172_v44 = vrot.slane %v2644_v51, %v171_v41  ;;  %v180_v45 = vrot.slane %v2644_v51, %v179_v42 }
  0xa3   :  { %1962 = vmatprep.subr.bf16.mxu0 %v2040_v47  ;;  %1984 = vmatprep.subr.bf16.mxu1 %v2041_v48  ;;  %v176_v47 = vrot.slane %v2644_v51, %v175_v43 }
 0x105   :  { %v892_v58 = vpop.f32.mrf.mxu0  ;;  %v933_v61 = vpop.f32.mrf.mxu1 }
 0x106   :  { %v893_v62 = vadd.f32 %v892_v58, %v156_v54  ;;  %v934_v63 = vadd.f32 %v933_v61, %v164_v55 }
 0x107   :  { %v894_v0 = vpop.f32.mrf.mxu0  ;;  %v935_v2 = vpop.f32.mrf.mxu1 }
 0x108   :  { %v895_v1 = vadd.f32 %v894_v0, %v160_v57  ;;  %v936_v4 = vadd.f32 %v935_v2, %v168_v60  ;;  %v1024_v6 = vpack.c.bf16 %v934_v63, %v934_v63  ;;  %v1022_v10 = vpack.c.bf16 %v893_v62, %v893_v62 }
 0x109   :  { %v896_v5 = vpop.f32.mrf.mxu0  ;;  %v937_v8 = vpop.f32.mrf.mxu1 }
 0x10a   :  { %v1023_v7 = vpack.c.bf16 %v895_v1, %v895_v1  ;;  %v1025_v11 = vpack.c.bf16 %v936_v4, %v936_v4 }
 0x10b   :  { %v897_v12 = vpop.f32.mrf.mxu0  ;;  %v938_v15 = vpop.f32.mrf.mxu1 }
 0x10c   :  { %1581 = vmatprep.mubr.bf16.mxu0 %v1023_v7  ;;  %1621 = vmatprep.mubr.bf16.mxu1 %v1025_v11  ;;  %v1853_v12 = vld [vmem:[%s2760_s4] ss:$0 sm:$0xff]  ;;  %s2072_s4 = scalar_lea.vmem %s1717_s12, 32 }
 0x10d   :  { %1582 = vmatmul.mubr.bf16.vlgmr.msra.gmra.mxu0 %v1022_v10  ;;  %1622 = vmatmul.mubr.bf16.vlgmr.msra.gmra.mxu1 %v1024_v6  ;;  %p2073_p0 = scmp.ne.s32.totalorder %s1717_s12, %s2072_s4  ;;  %p2078_p2 = scmp.lt.s32.totalorder %s2072_s4, %s2072_s4 }
 0x10e   :  { %1963 = vmatpush3.bf16.msra.mxu0 %v2042_v9  ;;  %1985 = vmatpush3.bf16.msra.mxu1 %v2043_v13 }
 0x10f   :  { %1964 = vmatprep.subr.bf16.mxu0 %v2044_v14  ;;  %1986 = vmatprep.subr.bf16.mxu1 %v2045_v16  ;;  %p2079_p3 = por %p2078_p2, %p2077_p1 }
 0x111   :  { %p2080_p4 = pnand %p2079_p3, %p2073_p0 }
 0x112   :  { %1965 = vmatpush3.bf16.msra.mxu0 %v2046_v17  ;;  %1987 = vmatpush3.bf16.msra.mxu1 %v2047_v18 }
 0x113   :  { %1966 = vmatprep.subr.bf16.mxu0 %v2048_v19  ;;  %1988 = vmatprep.subr.bf16.mxu1 %v2049_v20 }
 0x116   :  { %1967 = vmatpush3.bf16.msra.mxu0 %v2050_v21  ;;  %1989 = vmatpush3.bf16.msra.mxu1 %v2051_v23 }
 0x117   :  { %1968 = vmatprep.subr.bf16.mxu0 %v2052_v24  ;;  %1990 = vmatprep.subr.bf16.mxu1 %v2053_v25 }
 0x11a   :  { %1969 = vmatpush3.bf16.msra.mxu0 %v2054_v26  ;;  %1991 = vmatpush3.bf16.msra.mxu1 %v2055_v22 }
 0x11b   :  { %1970 = vmatprep.subr.bf16.mxu0 %v2056_v27  ;;  %1992 = vmatprep.subr.bf16.mxu1 %v2057_v28 }
 0x11e   :  { %1971 = vmatpush3.bf16.msra.mxu0 %v2058_v56  ;;  %1993 = vmatpush3.bf16.msra.mxu1 %v2059_v59 }
 0x11f   :  { %1972 = vmatprep.subr.bf16.mxu0 %v2060_v29  ;;  %1994 = vmatprep.subr.bf16.mxu1 %v2061_v30 }
 0x122   :  { %1973 = vmatpush3.bf16.msra.mxu0 %v2062_v31  ;;  %1995 = vmatpush3.bf16.msra.mxu1 %v2063_v32 }
 0x123   :  { %1974 = vmatprep.subr.bf16.mxu0 %v2064_v33  ;;  %1996 = vmatprep.subr.bf16.mxu1 %v2065_v34 }
 0x126   :  { %1975 = vmatpush3.bf16.msra.mxu0 %v2066_v35  ;;  %1997 = vmatpush3.bf16.msra.mxu1 %v2067_v36 }
 0x127   :  { %1976 = vmatprep.subr.bf16.mxu0 %v2068_v37  ;;  %1998 = vmatprep.subr.bf16.mxu1 %v2069_v38 }
 0x12a   :  { %1977 = vmatpush3.bf16.msra.mxu0 %v2070_v39  ;;  %1999 = vmatpush3.bf16.msra.mxu1 %v2071_v40 }
 0x145   :  { %v974_v48 = vpop.f32.mrf.mxu0  ;;  %v1015_v50 = vpop.f32.mrf.mxu1 }
 0x146   :  { %v975_v52 = vadd.f32 %v974_v48, %v172_v44  ;;  %v1016_v53 = vadd.f32 %v1015_v50, %v180_v45 }
 0x147   :  { %v976_v54 = vpop.f32.mrf.mxu0  ;;  %v1017_v57 = vpop.f32.mrf.mxu1 }
 0x148   :  { %v977_v55 = vadd.f32 %v976_v54, %v176_v47  ;;  %v1018_v58 = vadd.f32 %v1017_v57, %v184_v49  ;;  %v1028_v61 = vpack.c.bf16 %v1016_v53, %v1016_v53  ;;  %v1026_v63 = vpack.c.bf16 %v975_v52, %v975_v52 }
 0x149   :  { %v978_v60 = vpop.f32.mrf.mxu0  ;;  %v1019_v46 = vpop.f32.mrf.mxu1 }
 0x14a   :  { %v1027_v62 = vpack.c.bf16 %v977_v55, %v977_v55  ;;  %v1029_v0 = vpack.c.bf16 %v1018_v58, %v1018_v58 }
 0x14b   :  { %v979_v1 = vpop.f32.mrf.mxu0  ;;  %v1020_v2 = vpop.f32.mrf.mxu1 }
 0x14c   :  { %1661 = vmatprep.mubr.bf16.mxu0 %v1027_v62  ;;  %1701 = vmatprep.mubr.bf16.mxu1 %v1029_v0 }
 0x14d   :  { %1662 = vmatmul.mubr.bf16.vlgmr.msra.gmra.mxu0 %v1026_v63  ;;  %1702 = vmatmul.mubr.bf16.vlgmr.msra.gmra.mxu1 %v1028_v61 }
 0x1cd   :  { %v1934_v51 = vpop.f32.mrf.mxu0  ;;  %v1956_v4 = vpop.f32.mrf.mxu1 }
 0x1cf   :  { %v1935_v5 = vpop.f32.mrf.mxu0  ;;  %v1957_v6 = vpop.f32.mrf.mxu1 }
 0x1d0   :  { %v1936_v11 = vadd.f32 %v1935_v5, %v1934_v51  ;;  %v1958_v15 = vadd.f32 %v1957_v6, %v1956_v4 }
 0x1d1   :  { %v1937_v7 = vpop.f32.mrf.mxu0  ;;  %v1959_v8 = vpop.f32.mrf.mxu1 }
 0x1d2   :  { %v1584_v13 = vadd.f32 %v1936_v11, %v1853_v12 }
 0x1d3   :  { %v1938_v9 = vpop.f32.mrf.mxu0  ;;  %v1960_v10 = vpop.f32.mrf.mxu1 }
 0x1d4   :  { %v1624_v18 = vadd.f32 %v1958_v15, %v1584_v13 }
 0x20d   :  { %v1978_v14 = vpop.f32.mrf.mxu0  ;;  %v2000_v16 = vpop.f32.mrf.mxu1 }
 0x20f   :  { %v1979_v17 = vpop.f32.mrf.mxu0  ;;  %v2001_v20 = vpop.f32.mrf.mxu1 }
 0x210   :  { %v1980_v19 = vadd.f32 %v1979_v17, %v1978_v14  ;;  %v2002_v24 = vadd.f32 %v2001_v20, %v2000_v16 }
 0x211   :  { %v1981_v21 = vpop.f32.mrf.mxu0  ;;  %v2003_v25 = vpop.f32.mrf.mxu1 }
 0x212   :  { %v1664_v23 = vadd.f32 %v1980_v19, %v1624_v18 }
 0x213   :  { %v1982_v26 = vpop.f32.mrf.mxu0  ;;  %v2004_v22 = vpop.f32.mrf.mxu1 }
 0x214   :  { %v1704_v27 = vadd.f32 %v2002_v24, %v1664_v23 }
 0x216   :  { %1709 = vst [vmem:[#allocation2] sm:$0x3] %v1704_v27 }
 0x217   :  { %2083 = shalt.err (!%p2080_p4)
}
 0x218   :  { %1719 = dma.vmem_to_hbm [thread:$0]  %s1717_s12, 32, %s2761_s5, [#allocation3]  }
 0x219   :  { %2092 = dma.done.wait [#allocation3], 32  }
 0x21a   :  { %2093 = vsyncadd [#allocation3], 4294967264 }
 0x21b   :  { %1723 = vsyncpa [#allocation3], 1 }

</bundles_post_ra>
